<compile_context>
chip_gen: v7x
topology: tpu7x:2x2x1
jax: 0.10.0
libtpu: 0.0.40
codegen_flags: <defaults>
</compile_context>

<pallas_src>
import functools

import jax
import jax.numpy as jnp
from jax.experimental import pallas as pl
from jax.experimental.pallas import tpu as pltpu

D_IN = 2048
D_H1 = 16384
D_H2 = 32
D_H3 = 4
D_OUT = 1


def _hidden_stream_kernel(x_ref, w1_ref, b1_ref, w2_ref, part_ref, acc_ref):
    """Streams one K-tile of the 16384-wide hidden layer.

    grid = (n_split, n_k):
      axis 0 ("parallel")  : splits the 16384 reduction across TensorCores
      axis 1 ("arbitrary") : K-tiles of that core's slice, accumulated in VMEM
    """
    k = pl.program_id(1)

    @pl.when(k == 0)
    def _():
        acc_ref[...] = jnp.zeros_like(acc_ref)

    # Layer 1 tile: (B, 2048)bf16 @ (2048, tn)bf16 -> f32 acc, + bias, ReLU.
    h1 = jnp.dot(x_ref[...], w1_ref[...], preferred_element_type=jnp.float32)
    h1 = jnp.maximum(h1 + b1_ref[...], 0.0)
    # nn.Dropout(0.25): identity at inference (eval mode).

    # Partial contraction of layer 2: (B, tn) @ (tn, 32), f32 accumulator.
    acc_ref[...] += jnp.dot(h1, w2_ref[...], preferred_element_type=jnp.float32)

    @pl.when(k == pl.num_programs(1) - 1)
    def _():
        part_ref[0] = acc_ref[...]                                    # (B, 32)


def _tail_kernel(part_ref, b2_ref, w3_ref, b3_ref, w4_ref, b4_ref, out_ref):
    """Combine per-core partials, then bias+ReLU and the tiny 32->4->1 tail."""
    h2 = jnp.maximum(jnp.sum(part_ref[...], axis=0) + b2_ref[...], 0.0)  # (B, 32)
    h3 = jnp.dot(h2, w3_ref[...], preferred_element_type=jnp.float32)
    h3 = jnp.maximum(h3 + b3_ref[...], 0.0)                              # (B, 4)
    h4 = jnp.dot(h3, w4_ref[...], preferred_element_type=jnp.float32)
    out_ref[...] = (h4 + b4_ref[...]).astype(out_ref.dtype)              # (B, 1)


def _vmem_limit_bytes(batch, tn, w1_itemsize):
    """Right-sized VMEM request (double-buffered tiles + headroom)."""
    w1_buf = D_IN * tn * w1_itemsize          # streamed W1 tile (bf16)
    x_buf = batch * D_IN * w1_itemsize        # resident activations
    b1_buf = 8 * tn * 4                       # sublane-padded bias tile
    w2_buf = tn * 128 * 4                     # lane-padded (32 -> 128) W2 tile
    need = 2 * (w1_buf + x_buf + b1_buf + w2_buf) + (8 << 20)
    return int(min(need, 48 << 20))           # stay well inside v7x's 64 MiB/TC


@functools.partial(jax.jit, static_argnames=("tn", "n_split"))
def basic_regressor_pallas(x, params, tn=2048, n_split=2):
    """x: (B, 2048) float32 -> (B, 1) float32."""
    w1, b1, w2, b2, w3, b3, w4, b4 = params
    B = x.shape[0]
    assert B % 8 == 0, "pad the batch to a multiple of 8 (f32 sublane)"
    assert D_H1 % (n_split * tn) == 0
    n_k = D_H1 // (n_split * tn)

    # bf16 streaming of the bandwidth-dominant operands; f32 accumulation.
    x_bf = x.astype(jnp.bfloat16)
    w1_bf = w1.astype(jnp.bfloat16)

    partials = pl.pallas_call(
        _hidden_stream_kernel,
        out_shape=jax.ShapeDtypeStruct((n_split, B, D_H2), jnp.float32),
        grid_spec=pltpu.PrefetchScalarGridSpec(
            num_scalar_prefetch=0,
            grid=(n_split, n_k),
            in_specs=[
                pl.BlockSpec((B, D_IN), lambda c, k: (0, 0)),           # x (resident)
                pl.BlockSpec((D_IN, tn), lambda c, k: (0, c * n_k + k)),  # W1 tile
                pl.BlockSpec((1, tn), lambda c, k: (0, c * n_k + k)),     # b1 tile
                pl.BlockSpec((tn, D_H2), lambda c, k: (c * n_k + k, 0)),  # W2 tile
            ],
            out_specs=pl.BlockSpec((1, B, D_H2), lambda c, k: (c, 0, 0)),
            scratch_shapes=[pltpu.VMEM((B, D_H2), jnp.float32)],
        ),
        compiler_params=pltpu.CompilerParams(
            dimension_semantics=("parallel", "arbitrary"),
            vmem_limit_bytes=_vmem_limit_bytes(B, tn, 2),
        ),
    )(x_bf, w1_bf, b1, w2)

    # Tiny epilogue: sum the per-core partials, bias+ReLU, 32->4->1.
    out = pl.pallas_call(
        _tail_kernel,
        out_shape=jax.ShapeDtypeStruct((B, D_OUT), jnp.float32),
    )(partials, b2, w3, b3, w4, b4)
    return out


def init_params(key):
    """Deterministic init mimicking PyTorch Linear default (U[-1/sqrt(fan_in), +])."""
    dims = [(D_IN, D_H1), (D_H1, D_H2), (D_H2, D_H3), (D_H3, D_OUT)]
    params = []
    for fan_in, fan_out in dims:
        kw, kb, key = jax.random.split(key, 3)
        bound = 1.0 / jnp.sqrt(jnp.float32(fan_in))
        w = jax.random.uniform(kw, (fan_in, fan_out), jnp.float32, -bound, bound)
        b = jax.random.uniform(kb, (1, fan_out), jnp.float32, -bound, bound)
        params += [w, b]
    return tuple(params)


def reference_forward_f32(x, params):
    """Pure-f32 reference (original module semantics; Dropout = identity)."""
    w1, b1, w2, b2, w3, b3, w4, b4 = params
    h = jnp.maximum(x @ w1 + b1, 0.0)
    h = jnp.maximum(h @ w2 + b2, 0.0)
    h = jnp.maximum(h @ w3 + b3, 0.0)
    return h @ w4 + b4


def reference_forward_matched(x, params):
    """Reference matching the kernel's bf16 streaming of x / W1 (f32 accumulate)."""
    w1, b1, w2, b2, w3, b3, w4, b4 = params
    h = jnp.dot(x.astype(jnp.bfloat16), w1.astype(jnp.bfloat16),
                preferred_element_type=jnp.float32) + b1
    h = jnp.maximum(h, 0.0)
    h = jnp.maximum(h @ w2 + b2, 0.0)
    h = jnp.maximum(h @ w3 + b3, 0.0)
    return h @ w4 + b4


if __name__ == "__main__":
    key = jax.random.PRNGKey(0)
    kx, kp = jax.random.split(key)

    B = 8
    x = jax.random.normal(kx, (B, D_IN), jnp.float32)
    params = init_params(kp)

    out = basic_regressor_pallas(x, params)
    out = jax.block_until_ready(out)
    assert out.shape == (B, D_OUT)

    ref_matched = reference_forward_matched(x, params)
    ref_f32 = reference_forward_f32(x, params)
    assert jnp.allclose(out, ref_matched, atol=2e-3, rtol=2e-3), (
        out, ref_matched, jnp.max(jnp.abs(out - ref_matched)))
    assert jnp.allclose(out, ref_f32, atol=2e-2, rtol=2e-2), (
        out, ref_f32, jnp.max(jnp.abs(out - ref_f32)))

    print("KERNEL_OK")
</pallas_src>

<mosaic_0001>
module attributes {stable_mosaic.version = 11 : i64} {
  func.func @_hidden_stream_kernel(%arg0: i32, %arg1: i32, %arg2: memref<8x2048xbf16, #tpu.memory_space<vmem>>, %arg3: memref<2048x2048xbf16, #tpu.memory_space<vmem>>, %arg4: memref<1x2048xf32, #tpu.memory_space<vmem>>, %arg5: memref<2048x32xf32, #tpu.memory_space<vmem>>, %arg6: memref<1x8x32xf32, #tpu.memory_space<vmem>>, %arg7: memref<8x32xf32, #tpu.memory_space<vmem>>) attributes {dimension_semantics = [#tpu.dimension_semantics<parallel>, #tpu.dimension_semantics<arbitrary>], iteration_bounds = array<i64: 2, 4>, scalar_prefetch = 0 : i64, scratch_operands = 1 : i64, tpu.core_type = #tpu.core_type<tc>, window_params = [{pipeline_mode = #tpu.pipeline_mode<synchronous>, transform_indices = @transform_0, window_bounds = array<i64: 8, 2048>}, {transform_indices = @transform_1, window_bounds = array<i64: 2048, 2048>}, {transform_indices = @transform_2, window_bounds = array<i64: 1, 2048>}, {transform_indices = @transform_3, window_bounds = array<i64: 2048, 32>}, {transform_indices = @transform_4, window_bounds = array<i64: 1, 8, 32>}]} {
    %c0_i32 = arith.constant 0 : i32
    %0 = arith.cmpi eq, %arg1, %c0_i32 : i32
    %1 = arith.extui %0 : i1 to i32
    %c0_i32_0 = arith.constant 0 : i32
    %2 = arith.cmpi ne, %1, %c0_i32_0 : i32
    scf.if %2 {
      %cst_15 = arith.constant 0.000000e+00 : f32
      %19 = vector.broadcast %cst_15 : f32 to vector<8x32xf32>
      %c0_16 = arith.constant 0 : index
      %c0_17 = arith.constant 0 : index
      %20 = vector.load %arg7[%c0_16, %c0_17] : memref<8x32xf32, #tpu.memory_space<vmem>>, vector<8x32xf32>
      tpu.vector_store %arg7[%c0_16, %c0_17], %19 {strides = array<i32>} : memref<8x32xf32, #tpu.memory_space<vmem>>, vector<8x32xf32>,
    } else {
    }
    %c0 = arith.constant 0 : index
    %c0_1 = arith.constant 0 : index
    %3 = vector.load %arg2[%c0, %c0_1] : memref<8x2048xbf16, #tpu.memory_space<vmem>>, vector<8x2048xbf16>
    %c0_2 = arith.constant 0 : index
    %c0_3 = arith.constant 0 : index
    %4 = vector.load %arg3[%c0_2, %c0_3] : memref<2048x2048xbf16, #tpu.memory_space<vmem>>, vector<2048x2048xbf16>
    %cst = arith.constant dense<0.000000e+00> : vector<8x2048xf32>
    %5 = tpu.matmul %3, %4, %cst {dimension_numbers = #tpu.dot_dimension_numbers<[1], [0], [0], [1], [0, 0, 1, 1], [], []>} : vector<8x2048xbf16>, vector<2048x2048xbf16>, vector<8x2048xf32> -> vector<8x2048xf32>
    %c0_4 = arith.constant 0 : index
    %c0_5 = arith.constant 0 : index
    %6 = vector.load %arg4[%c0_4, %c0_5] : memref<1x2048xf32, #tpu.memory_space<vmem>>, vector<1x2048xf32>
    %7 = vector.broadcast %6 : vector<1x2048xf32> to vector<8x2048xf32>
    %8 = arith.addf %5, %7 : vector<8x2048xf32>
    %cst_6 = arith.constant 0.000000e+00 : f32
    %9 = vector.broadcast %cst_6 : f32 to vector<8x2048xf32>
    %10 = arith.maximumf %8, %9 : vector<8x2048xf32>
    %c0_7 = arith.constant 0 : index
    %c0_8 = arith.constant 0 : index
    %11 = vector.load %arg7[%c0_7, %c0_8] : memref<8x32xf32, #tpu.memory_space<vmem>>, vector<8x32xf32>
    %c0_9 = arith.constant 0 : index
    %c0_10 = arith.constant 0 : index
    %12 = vector.load %arg5[%c0_9, %c0_10] : memref<2048x32xf32, #tpu.memory_space<vmem>>, vector<2048x32xf32>
    %cst_11 = arith.constant dense<0.000000e+00> : vector<8x32xf32>
    %13 = tpu.matmul %10, %12, %cst_11 {dimension_numbers = #tpu.dot_dimension_numbers<[1], [0], [0], [1], [0, 0, 1, 1], [], []>} : vector<8x2048xf32>, vector<2048x32xf32>, vector<8x32xf32> -> vector<8x32xf32>
    %14 = arith.addf %11, %13 : vector<8x32xf32>
    %c0_12 = arith.constant 0 : index
    %c0_13 = arith.constant 0 : index
    %15 = vector.load %arg7[%c0_12, %c0_13] : memref<8x32xf32, #tpu.memory_space<vmem>>, vector<8x32xf32>
    tpu.vector_store %arg7[%c0_12, %c0_13], %14 {strides = array<i32>} : memref<8x32xf32, #tpu.memory_space<vmem>>, vector<8x32xf32>,
    %c3_i32 = arith.constant 3 : i32
    %16 = arith.cmpi eq, %arg1, %c3_i32 : i32
    %17 = arith.extui %16 : i1 to i32
    %c0_i32_14 = arith.constant 0 : i32
    %18 = arith.cmpi ne, %17, %c0_i32_14 : i32
    scf.if %18 {
      %c0_15 = arith.constant 0 : index
      %c0_16 = arith.constant 0 : index
      %19 = vector.load %arg7[%c0_15, %c0_16] : memref<8x32xf32, #tpu.memory_space<vmem>>, vector<8x32xf32>
      %c0_17 = arith.constant 0 : index
      %c0_18 = arith.constant 0 : index
      %c0_19 = arith.constant 0 : index
      %20 = vector.load %arg6[%c0_17, %c0_18, %c0_19] : memref<1x8x32xf32, #tpu.memory_space<vmem>>, vector<1x8x32xf32>
      %21 = vector.shape_cast %20 : vector<1x8x32xf32> to vector<8x32xf32>
      %22 = vector.shape_cast %19 : vector<8x32xf32> to vector<1x8x32xf32>
      tpu.vector_store %arg6[%c0_17, %c0_18, %c0_19], %22 {strides = array<i32>} : memref<1x8x32xf32, #tpu.memory_space<vmem>>, vector<1x8x32xf32>,
    } else {
    }
    return
  }
  func.func @transform_0(%arg0: i32, %arg1: i32) -> (i32, i32) {
    %c0_i32 = arith.constant 0 : i32
    %c0_i32_0 = arith.constant 0 : i32
    %c0_i32_1 = arith.constant 0 : i32
    return %c0_i32, %c0_i32_0 : i32, i32
  }
  func.func @transform_1(%arg0: i32, %arg1: i32) -> (i32, i32) {
    %c4_i32 = arith.constant 4 : i32
    %0 = arith.muli %arg0, %c4_i32 : i32
    %1 = arith.addi %0, %arg1 : i32
    %c0_i32 = arith.constant 0 : i32
    %c0_i32_0 = arith.constant 0 : i32
    return %c0_i32, %1 : i32, i32
  }
  func.func @transform_2(%arg0: i32, %arg1: i32) -> (i32, i32) {
    %c4_i32 = arith.constant 4 : i32
    %0 = arith.muli %arg0, %c4_i32 : i32
    %1 = arith.addi %0, %arg1 : i32
    %c0_i32 = arith.constant 0 : i32
    %c0_i32_0 = arith.constant 0 : i32
    return %c0_i32, %1 : i32, i32
  }
  func.func @transform_3(%arg0: i32, %arg1: i32) -> (i32, i32) {
    %c4_i32 = arith.constant 4 : i32
    %0 = arith.muli %arg0, %c4_i32 : i32
    %1 = arith.addi %0, %arg1 : i32
    %c0_i32 = arith.constant 0 : i32
    %c0_i32_0 = arith.constant 0 : i32
    return %1, %c0_i32 : i32, i32
  }
  func.func @transform_4(%arg0: i32, %arg1: i32) -> (i32, i32, i32) {
    %c0_i32 = arith.constant 0 : i32
    %c0_i32_0 = arith.constant 0 : i32
    %c0_i32_1 = arith.constant 0 : i32
    return %arg0, %c0_i32, %c0_i32_0 : i32, i32, i32
  }
}

module attributes {stable_mosaic.version = 11 : i64} {
  func.func @_tail_kernel(%arg0: memref<2x8x32xf32, #tpu.memory_space<vmem>>, %arg1: memref<1x32xf32, #tpu.memory_space<vmem>>, %arg2: memref<32x4xf32, #tpu.memory_space<vmem>>, %arg3: memref<1x4xf32, #tpu.memory_space<vmem>>, %arg4: memref<4x1xf32, #tpu.memory_space<vmem>>, %arg5: memref<1x1xf32, #tpu.memory_space<vmem>>, %arg6: memref<8x1xf32, #tpu.memory_space<vmem>>) attributes {dimension_semantics = [], scalar_prefetch = 0 : i64, scratch_operands = 0 : i64, tpu.core_type = #tpu.core_type<tc>} {
    %c0 = arith.constant 0 : index
    %c0_0 = arith.constant 0 : index
    %c0_1 = arith.constant 0 : index
    %0 = vector.load %arg0[%c0, %c0_0, %c0_1] : memref<2x8x32xf32, #tpu.memory_space<vmem>>, vector<2x8x32xf32>
    %cst = arith.constant dense<0.000000e+00> : vector<8x32xf32>
    %1 = vector.multi_reduction <add>, %0, %cst [0] : vector<2x8x32xf32> to vector<8x32xf32>
    %c0_2 = arith.constant 0 : index
    %c0_3 = arith.constant 0 : index
    %2 = vector.load %arg1[%c0_2, %c0_3] : memref<1x32xf32, #tpu.memory_space<vmem>>, vector<1x32xf32>
    %3 = vector.broadcast %2 : vector<1x32xf32> to vector<8x32xf32>
    %4 = arith.addf %1, %3 : vector<8x32xf32>
    %cst_4 = arith.constant 0.000000e+00 : f32
    %5 = vector.broadcast %cst_4 : f32 to vector<8x32xf32>
    %6 = arith.maximumf %4, %5 : vector<8x32xf32>
    %c0_5 = arith.constant 0 : index
    %c0_6 = arith.constant 0 : index
    %7 = vector.load %arg2[%c0_5, %c0_6] : memref<32x4xf32, #tpu.memory_space<vmem>>, vector<32x4xf32>
    %cst_7 = arith.constant dense<0.000000e+00> : vector<8x4xf32>
    %8 = tpu.matmul %6, %7, %cst_7 {dimension_numbers = #tpu.dot_dimension_numbers<[1], [0], [0], [1], [0, 0, 1, 1], [], []>} : vector<8x32xf32>, vector<32x4xf32>, vector<8x4xf32> -> vector<8x4xf32>
    %c0_8 = arith.constant 0 : index
    %c0_9 = arith.constant 0 : index
    %9 = vector.load %arg3[%c0_8, %c0_9] : memref<1x4xf32, #tpu.memory_space<vmem>>, vector<1x4xf32>
    %10 = vector.broadcast %9 : vector<1x4xf32> to vector<8x4xf32>
    %11 = arith.addf %8, %10 : vector<8x4xf32>
    %cst_10 = arith.constant 0.000000e+00 : f32
    %12 = vector.broadcast %cst_10 : f32 to vector<8x4xf32>
    %13 = arith.maximumf %11, %12 : vector<8x4xf32>
    %c0_11 = arith.constant 0 : index
    %c0_12 = arith.constant 0 : index
    %14 = vector.load %arg4[%c0_11, %c0_12] : memref<4x1xf32, #tpu.memory_space<vmem>>, vector<4x1xf32>
    %cst_13 = arith.constant dense<0.000000e+00> : vector<8x1xf32>
    %15 = tpu.matmul %13, %14, %cst_13 {dimension_numbers = #tpu.dot_dimension_numbers<[1], [0], [0], [1], [0, 0, 1, 1], [], []>} : vector<8x4xf32>, vector<4x1xf32>, vector<8x1xf32> -> vector<8x1xf32>
    %c0_14 = arith.constant 0 : index
    %c0_15 = arith.constant 0 : index
    %16 = vector.load %arg5[%c0_14, %c0_15] : memref<1x1xf32, #tpu.memory_space<vmem>>, vector<1x1xf32>
    %17 = vector.broadcast %16 : vector<1x1xf32> to vector<8x1xf32>
    %18 = arith.addf %15, %17 : vector<8x1xf32>
    %c0_16 = arith.constant 0 : index
    %c0_17 = arith.constant 0 : index
    %19 = vector.load %arg6[%c0_16, %c0_17] : memref<8x1xf32, #tpu.memory_space<vmem>>, vector<8x1xf32>
    tpu.vector_store %arg6[%c0_16, %c0_17], %18 {strides = array<i32>} : memref<8x1xf32, #tpu.memory_space<vmem>>, vector<8x1xf32>,
    return
  }
}

</mosaic_0001>

<bundles_post_ra>
// kernel: basic_regressor_pallas.3
= control target key start
LH: loop header
LB: loop body
LE: loop exit
PB: predicated region body
PF: predicated region fallthrough
CT: control target
= control target key end

     0   :  { %vm27_vm0 = vcmask 261120   ;;  %v255_v0 = vmov 0.0|0.0   ;;  %vm256_vm1 = vmmov 0   ;;  %v257_v4 = vmov 0.0   ;;  %s329_s2 = inlined_call_operand.vmem [shape: f32[32,4], index: 2, kind: input, shape index: {}]   ;;  %s330_s0 = inlined_call_operand.vmem [shape: f32[2,8,32], index: 0, kind: input, shape index: {}]   ;;  %s331_s1 = inlined_call_operand.vmem [shape: f32[1,32], index: 1, kind: input, shape index: {}]   ;;  %s332_s4 = inlined_call_operand.vmem [shape: f32[4,1], index: 4, kind: input, shape index: {}]   ;;  %s333_s5 = inlined_call_operand.<no memory space> [shape: f32[1,1], index: 5, kind: input, shape index: {}]   ;;  %s334_s3 = inlined_call_operand.vmem [shape: f32[1,4], index: 3, kind: input, shape index: {}]   ;;  %s335_s6 = inlined_call_operand.vmem [shape: f32[8,1], index: 6, kind: output, shape index: {}]  }
   0x1   :  { %246 = vmatprep.subr.bf16.mxu0 %v255_v0  ;;  %v40_v1 = vld [vmem:[%s329_s2] sm:$0xff]  ;;  %v41_v2 = vld [vmem:[%s329_s2 + $0x8] sm:$0xff]  ;;  %v42_v3 = vld [vmem:[%s329_s2 + $0x10] sm:$0xff]  ;;  %238 = vmatprep.mubr.msk.f32.mxu0 %vm256_vm1, %v257_v4  ;;  %vm137_vm2 = vcmask 1043456   ;;  %v11_v17 = vstv %s333_s5  ;;  %vm133_vm3 = vcmask 31744   ;;  %vm211_vm4 = vcmask 7168  }
   0x2   :  { %v247_v5 = vpack.c.bf16 %v41_v2, %v40_v1  ;;  %v43_v6 = vld [vmem:[%s329_s2 + $0x18] sm:$0xff]  ;;  %v25_v7 = vld [vmem:[%s330_s0] sm:$0xff]  ;;  %v26_v8 = vld [vmem:[%s330_s0 + $0x8] sm:$0xff]  ;;  %241 = vmatprep.subr.mxu1 %v257_v4  ;;  %243 = vmatprep.mubr.msk.f32.mxu1 %vm256_vm1, %v257_v4  ;;  %12 = vst [vmem:[#allocation2] sm:$0x1] %v11_v17 }
   0x3   :  { %v28_v9 = vsel %vm27_vm0, %v25_v7, 0.0  ;;  %v29_v10 = vsel %vm27_vm0, %v26_v8, 0.0  ;;  %v217_v11 = vld [vmem:[%s331_s1] ss:$0 sm:$0xff]  ;;  %v250_v12 = vpack.c.bf16 %v43_v6, %v42_v3 }
   0x4   :  { %248 = vmatpush3.bf16.msra.mxu0 %v247_v5  ;;  %v30_v13 = vadd.f32 %v29_v10, %v28_v9  ;;  %v125_v16 = vld [vmem:[%s332_s4] sm:$0xf] }
   0x5   :  { %249 = vmatprep.subr.bf16.mxu0 %v255_v0  ;;  %242 = vmatpush3.msk.msra.mxu1 %vm137_vm2, %v125_v16  ;;  %v218_v18 = vld [vmem:[%s334_s3] ss:$0 sm:$0xff] }
   0x6   :  { %v38_v14 = vadd.f32 %v217_v11, %v30_v13 }
   0x8   :  { %251 = vmatpush3.bf16.msra.mxu0 %v250_v12  ;;  %v39_v15 = vmax.f32 %v38_v14, 0.0 }
   0x9   :  { %v220_v23 = vld [vmem:[#allocation2] ss:$0 sm:$0xff] }
   0xb   :  { %239 = vmatmul.mubr.msk.f32.vlgmr.msra.gmra.mrb[0].mxu0 %vm27_vm0, %v39_v15 }
  0xde   :  { %v120_v19 = vpop.f32.mrb[0].mxu0 }
  0xdf   :  { %v121_v20 = vadd.f32 %v218_v18, %v120_v19  ;;  %v240_v21 = vpop.f32.mrb[1].mxu0 }
  0xe1   :  { %v124_v22 = vmax.f32 %v121_v20, 0.0 }
  0xe3   :  { %244 = vmatmul.mubr.msk.f32.vlgmr.msra.gmra.mrb[0].mxu1 %vm133_vm3, %v124_v22 }
 0x1b6   :  { %v207_v24 = vpop.f32.mrb[0].mxu1 }
 0x1b7   :  { %v208_v25 = vadd.f32 %v220_v23, %v207_v24  ;;  %v245_v26 = vpop.f32.mrb[1].mxu1 }
 0x1b9   :  { %212 = vst.msk [vmem:[%s335_s6] sm:$0xff] %vm211_vm4, %v208_v25 }

// kernel: basic_regressor_pallas.2
= control target key start
LH: loop header
LB: loop body
LE: loop exit
PB: predicated region body
PF: predicated region fallthrough
CT: control target
= control target key end

     0   :  { %9 = vsyncpa [#allocation4], 0  ;;  %s22193_s0 = inlined_call_operand.vmem [shape: bf16[8,2048], index: 0, kind: input, shape index: {}]   ;;  %s22194_s1 = inlined_call_operand.hbm [shape: bf16[2048,16384], index: 1, kind: input, shape index: {}]   ;;  %s22195_s2 = inlined_call_operand.vmem [shape: f32[1,16384], index: 2, kind: input, shape index: {}]   ;;  %s22196_s3 = inlined_call_operand.vmem [shape: f32[16384,32], index: 3, kind: input, shape index: {}]   ;;  %s22197_s4 = inlined_call_operand.vmem [shape: f32[2,8,32], index: 4, kind: output, shape index: {}]  }
   0x1   :  { %11 = vsyncpa [#allocation4 + $0x1], 0  ;;  %s19400_s15 = smov 0   ;;  %s19402_s16 = smov 0  }
   0x2   :  { %s19404_s17 = smov 0   ;;  %s19406_s18 = smov 0  }
   0x3   :  { %s19408_s19 = smov 0   ;;  %s19410_s20 = smov 0  }
   0x4   :  { %s19412_s21 = smov 0   ;;  %s19414_s22 = smov 0  }
   0x5 LB: > { %s16313_s23 = sadd.s32 4294967295, %s19368_s22   ;;  %s26_s24 = sadd.s32 1, %s19360_s20  ;;  %s19368_s22 = sphi %s19414_s22, %s17_s22   ;;  %s19364_s21 = sphi %s19412_s21, %s22208_s21   ;;  %s19360_s20 = sphi %s19410_s20, %s22207_s20   ;;  %s19356_s19 = sphi %s19408_s19, %s22206_s19   ;;  %s19352_s18 = sphi %s19406_s18, %s22205_s18   ;;  %s19348_s17 = sphi %s19404_s17, %s22204_s17   ;;  %s19344_s16 = sphi %s19402_s16, %s22203_s16   ;;  %s19340_s15 = sphi %s19400_s15, %s22202_s15  }
   0x6   : > { %p27_p0 = scmp.ge.s32.totalorder %s26_s24, 4  ;;  %s29_s25 = sadd.s32 1, %s19364_s21 }
   0x7   : > { %s16315_s26 = sshll.u32 %s19364_s21, 2  ;;  %s61_s27 = sadd.s32 1, %s19348_s17 }
   0x8   : > { %s22210_s24 = smov (%p27_p0, %s26_s24), 0  ;;  %s22212_s25 = smov (!%p27_p0, %s29_s25), %s19364_s21 }
   0x9   : > { %s55_s28 = sadd.s32 %s19360_s20, %s16315_s26  ;;  %p68_p1 = scmp.ne.s32.totalorder %s19348_s17, %s19344_s16 }
   0xa   : > { %p31_p2 = scmp.ge.s32.totalorder %s22212_s25, 2  ;;  %p69_p3 = scmp.eq.s32.totalorder %s19368_s22, 0 }
   0xb   : > { %p74_p4 = scmp.ne.s32.totalorder %s19344_s16, %s19340_s15  ;;  %p75_p5 = scmp.eq.s32.totalorder %s16313_s23, 0 }
   0xc   : > { %s22214_s25 = smov (%p31_p2, %s22212_s25), 0  ;;  %p19453_p6 = por %p69_p3, %p68_p1 }
   0xd   : > { %p19457_p7 = por %p75_p5, %p74_p4  ;;  %s16316_s5 = sshll.u32 %s22214_s25, 2 }
   0xe   : > { %s57_s6 = sadd.s32 %s16316_s5, %s22210_s24  ;;  %p19186_p8 = scmp.lt.s32.totalorder %s19368_s22, 8 }
   0xf   : > { %s58_s7 = ssub.s32 %s55_s28, %s57_s6  ;;  %s187_s8 = sand.u32 1, %s19348_s17  }
  0x10   : > { %p59_p9 = scmp.eq.s32.totalorder %s58_s7, 0  ;;  %s16323_s9 = sshll.u32 %s187_s8, 14 }
  0x11   : > { %s18403_s10 = sshll.u32 %s55_s28, 10  ;;  %s191_s15 = scalar_lea.vmem [#allocation3], %s16323_s9 }
  0x12   : > { %s19466_s11 = scalar_select %p59_p9, %s19348_s17, %s61_s27  }
  0x13   : > { %s19471_s14 = scalar_lea.hbm %s22194_s1, %s18403_s10  ;;  %s200_s23 = sshll.u32 %s191_s15, 4  ;;  %s19479_s23 = int_to_ptr.vmem [resolvable:$true] %s200_s23 }
  0x14   : > { %p19475_p10 = pnand %p19186_p8, %p19453_p6  ;;  %s19482_s27 = scalar_lea.sflag [#allocation4], %s187_s8 }
  0x15   : > { %s19272_s28 = scalar_lea.hbm %s19471_s14, 262144  ;;  %s19277_s6 = scalar_lea.hbm %s22194_s1, 2097152 }
  0x16   : > { %p19273_p12 = scmp.ne.s32.totalorder %s19471_s14, %s19272_s28  ;;  %p19274_p13 = pneg %p19475_p10 }
  0x17   : > { %p19278_p2 = scmp.lt.u32.totalorder %s19471_s14, %s22194_s1  ;;  %p19279_p3 = scmp.lt.u32.totalorder %s19277_s6, %s19272_s28 }
  0x18   : > { %p19275_p0 = pnand %p19274_p13, %p19273_p12  ;;  %p19281_p5 = scmp.lt.u32.totalorder %s19272_s28, %s19471_s14 }
  0x19   : > { %p19280_p4 = por %p19279_p3, %p19278_p2 }
  0x1a   : > { %p19276_p1 = pneg %p19275_p0 }
  0x1b   : > { %p19282_p6 = por %p19281_p5, %p19280_p4 }
  0x1d   : > { %p19283_p8 = pnand %p19282_p6, %p19276_p1 }
  0x1f   : > { %19286 = shalt.err (!%p19283_p8)
}
  0x20   : > { %s19287_s8 = scalar_lea.vmem %s19479_s23, 262144  ;;  %s19370_s10 = smov [#allocation3]  }
  0x21   : > { %p19288_p9 = scmp.ne.s32.totalorder %s19479_s23, %s19287_s8  ;;  %s19292_s12 = sshll.u32 %s19370_s10, 4  ;;  %s19293_s12 = int_to_ptr.vmem [resolvable:$false] %s19292_s12 }
  0x22   : > { %s19294_s13 = scalar_lea.vmem %s19293_s12, 524288  ;;  %p19295_p11 = scmp.lt.s32.totalorder %s19479_s23, %s19293_s12 }
  0x23   : > { %p19290_p12 = pnand %p19288_p9, %p19274_p13  ;;  %p19296_p2 = scmp.lt.s32.totalorder %s19294_s13, %s19287_s8 }
  0x25   : > { %p19291_p0 = pneg %p19290_p12  ;;  %p19297_p3 = por %p19296_p2, %p19295_p11 }
  0x27   : > { %p19298_p4 = pnand %p19297_p3, %p19291_p0 }
  0x29   : > { %19301 = shalt.err (!%p19298_p4)
}
  0x2a   : > { %s19371_s15 = smov 8192   ;;  %s19372_s28 = smov 1024  }
  0x2b   : > { %s19373_s29 = smov 64   ;;  %p233_p13 = scmp.lt.s32.totalorder %s19368_s22, 9 }
  0x2c   : > { %19185 = dma.hbm_to_vmem [thread:$0]  (!%p19475_p10), %s19471_s14, 262144, %s19479_s23, %s19482_s27, %s19371_s15, %s19372_s28, %s19373_s29  }
  0x2d   : > { %p22201_p1 = scmp.ge.s32.totalorder %s19368_s22, 1 }
  0x2f   : > { %p234_p5 = pnand %p22201_p1, %p233_p13 }
  0x30   : > { %s239_s5 = sand.u32 (!%p234_p5), 1, %s19344_s16  }
  0x31   : > { %237 = sbr.rel (%p234_p5) target bundleno = 2568 (0xa08), region = 36  ;;  %s16328_s6 = sshll.u32 (!%p234_p5), %s239_s5, 14 }
  0x32   : > { %s240_s7 = scalar_lea.sflag (!%p234_p5), [#allocation4], %s239_s5  ;;  %s19514_s9 = scalar_lea.vmem (!%p234_p5), [#allocation3], %s16328_s6 }
  0x38   : > { %19335 = dma.done.wait (%p19457_p7), %s240_s7, 262144  }
  0x39   : > { %19337 = vsyncadd (%p19457_p7), %s240_s7, 4294705152  ;;  %s16329_s14 = sshll.u32 %s19356_s19, 2  ;;  %p302_p10 = scmp.lt.s32.totalorder %s19356_s19, 1 }
  0x3a   : > { %s284_s23 = sadd.s32 %s19352_s18, %s16329_s14  ;;  %p16335_p7 = scmp.ne.s32.totalorder %s19352_s18, 0 }
  0x3b   : > { %s16330_s26 = sshll.u32 %s284_s23, 4  ;;  %s16332_s27 = sshll.u32 %s284_s23, 8  ;;  %vm310_vm0 = vcmask (!%p16335_p7), 261120   ;;  %v19374_v0 = vmov (!%p16335_p7), 0.0  }
  0x3c   : > { %p286_p11 = scmp.lt.s32.totalorder %s16330_s26, 127  ;;  %p295_p6 = scmp.lt.s32.totalorder %s16332_s27, 2047  ;;  %311 = vst.msk [vmem:[#allocation2] sm:$0xff] (!%p16335_p7), %vm310_vm0, %v19374_v0 }
  0x3d   : > { %s22216_s19 = smov (!%p302_p10, %s19356_s19), 1  ;;  %309 = sbr.rel (%p16335_p7) target bundleno = 68 (0x44), region = 44 }
  0x3e   : > { %s22218_s26 = smov (!%p286_p11, %s16330_s26), 127  ;;  %s22220_s27 = smov (!%p295_p6, %s16332_s27), 2047 }
  0x3f   : > { %s19527_s12 = scalar_lea.vmem %s22195_s2, %s22218_s26  ;;  %s16334_s30 = sshll.u32 %s22216_s19, 3 }
  0x40   : > { %s16333_s13 = sshll.u32 %s22220_s27, 3  ;;  %s19532_s29 = scalar_lea.vmem %s22197_s4, %s16334_s30 }
  0x41   : > { %s19537_s7 = scalar_lea.vmem %s22196_s3, %s16333_s13 }
  0x44 PF: > { %v320_v1 = vld [vmem:[%s19514_s9] sm:$0xff]  ;;  %v321_v3 = vld [vmem:[%s19514_s9 + $0x8] sm:$0xff]  ;;  %v19571_v54 = vld [vmem:[%s22193_s0] sm:$0xff]  ;;  %vm16206_vm1 = vcmask 261120   ;;  %p18400_p8 = scmp.ne.s32.totalorder %s19352_s18, 3 }
  0x45   : > { %v328_v2 = vld [vmem:[%s19514_s9 + $0x40] sm:$0xff]  ;;  %v329_v5 = vld [vmem:[%s19514_s9 + $0x48] sm:$0xff]  ;;  %v19577_v58 = vcombine.high %v19571_v54, %v19571_v54 }
  0x46   : > { %v16353_v4 = vcombine.high %v320_v1, %v328_v2  ;;  %v16352_v6 = vcombine.low %v320_v1, %v328_v2  ;;  %v336_v7 = vld [vmem:[%s19514_s9 + $0x80] sm:$0xff]  ;;  %v16355_v9 = vcombine.high %v321_v3, %v329_v5  ;;  %v16354_v10 = vcombine.low %v321_v3, %v329_v5  ;;  %v337_v12 = vld [vmem:[%s19514_s9 + $0x88] sm:$0xff] }
  0x47   : > { %v344_v8 = vld [vmem:[%s19514_s9 + $0xc0] sm:$0xff]  ;;  %v345_v13 = vld [vmem:[%s19514_s9 + $0xc8] sm:$0xff]  ;;  %12780 = vmatprep.mubr.bf16.mxu0 %v19577_v58  ;;  %13108 = vmatprep.mubr.bf16.mxu1 %v19577_v58 }
  0x48   : > { %v16369_v11 = vcombine.high %v336_v7, %v344_v8  ;;  %v352_v14 = vld [vmem:[%s19514_s9 + $0x100] sm:$0xff]  ;;  %12748 = vmatprep.subr.bf16.mxu0 %v16353_v4  ;;  %v16371_v15 = vcombine.high %v337_v12, %v345_v13  ;;  %v353_v17 = vld [vmem:[%s19514_s9 + $0x108] sm:$0xff]  ;;  %13076 = vmatprep.subr.bf16.mxu1 %v16355_v9  ;;  %v16368_v19 = vcombine.low %v336_v7, %v344_v8 }
  0x49   : > { %v360_v16 = vld [vmem:[%s19514_s9 + $0x140] sm:$0xff]  ;;  %v361_v18 = vld [vmem:[%s19514_s9 + $0x148] sm:$0xff]  ;;  %12749 = vmatpush1.bf16.msra.mxu0 %v16352_v6  ;;  %13077 = vmatpush1.bf16.msra.mxu1 %v16354_v10  ;;  %v16370_v20 = vcombine.low %v337_v12, %v345_v13 }
  0x4a   : > { %12750 = vmatprep.subr.bf16.mxu0 %v16369_v11  ;;  %v16385_v21 = vcombine.high %v352_v14, %v360_v16  ;;  %13078 = vmatprep.subr.bf16.mxu1 %v16371_v15  ;;  %v16387_v22 = vcombine.high %v353_v17, %v361_v18  ;;  %v368_v23 = vld [vmem:[%s19514_s9 + $0x180] sm:$0xff]  ;;  %v369_v25 = vld [vmem:[%s19514_s9 + $0x188] sm:$0xff]  ;;  %v16384_v27 = vcombine.low %v352_v14, %v360_v16 }
  0x4b   : > { %v376_v24 = vld [vmem:[%s19514_s9 + $0x1c0] sm:$0xff]  ;;  %v377_v26 = vld [vmem:[%s19514_s9 + $0x1c8] sm:$0xff]  ;;  %v16386_v28 = vcombine.low %v353_v17, %v361_v18 }
  0x4c   : > { %v16401_v29 = vcombine.high %v368_v23, %v376_v24  ;;  %v16403_v30 = vcombine.high %v369_v25, %v377_v26  ;;  %v384_v31 = vld [vmem:[%s19514_s9 + $0x200] sm:$0xff]  ;;  %v385_v33 = vld [vmem:[%s19514_s9 + $0x208] sm:$0xff]  ;;  %v16400_v35 = vcombine.low %v368_v23, %v376_v24  ;;  %v16402_v36 = vcombine.low %v369_v25, %v377_v26 }
  0x4d   : > { %12751 = vmatpush1.bf16.msra.mxu0 %v16368_v19  ;;  %13079 = vmatpush1.bf16.msra.mxu1 %v16370_v20  ;;  %v392_v32 = vld [vmem:[%s19514_s9 + $0x240] sm:$0xff]  ;;  %v393_v34 = vld [vmem:[%s19514_s9 + $0x248] sm:$0xff] }
  0x4e   : > { %12752 = vmatprep.subr.bf16.mxu0 %v16385_v21  ;;  %13080 = vmatprep.subr.bf16.mxu1 %v16387_v22  ;;  %v16417_v37 = vcombine.high %v384_v31, %v392_v32  ;;  %v16419_v38 = vcombine.high %v385_v33, %v393_v34  ;;  %v400_v39 = vld [vmem:[%s19514_s9 + $0x280] sm:$0xff]  ;;  %v401_v41 = vld [vmem:[%s19514_s9 + $0x288] sm:$0xff]  ;;  %v16416_v43 = vcombine.low %v384_v31, %v392_v32 }
  0x4f   : > { %v408_v40 = vld [vmem:[%s19514_s9 + $0x2c0] sm:$0xff]  ;;  %v409_v42 = vld [vmem:[%s19514_s9 + $0x2c8] sm:$0xff]  ;;  %v16418_v44 = vcombine.low %v385_v33, %v393_v34 }
  0x50   : > { %v16433_v45 = vcombine.high %v400_v39, %v408_v40  ;;  %v16435_v46 = vcombine.high %v401_v41, %v409_v42  ;;  %v416_v47 = vld [vmem:[%s19514_s9 + $0x300] sm:$0xff]  ;;  %v417_v49 = vld [vmem:[%s19514_s9 + $0x308] sm:$0xff]  ;;  %v16432_v51 = vcombine.low %v400_v39, %v408_v40  ;;  %v16434_v52 = vcombine.low %v401_v41, %v409_v42 }
  0x51   : > { %12753 = vmatpush1.bf16.msra.mxu0 %v16384_v27  ;;  %13081 = vmatpush1.bf16.msra.mxu1 %v16386_v28  ;;  %v424_v48 = vld [vmem:[%s19514_s9 + $0x340] sm:$0xff]  ;;  %v425_v50 = vld [vmem:[%s19514_s9 + $0x348] sm:$0xff] }
  0x52   : > { %12754 = vmatprep.subr.bf16.mxu0 %v16401_v29  ;;  %13082 = vmatprep.subr.bf16.mxu1 %v16403_v30  ;;  %v16449_v53 = vcombine.high %v416_v47, %v424_v48  ;;  %v16451_v55 = vcombine.high %v417_v49, %v425_v50  ;;  %v432_v56 = vld [vmem:[%s19514_s9 + $0x380] sm:$0xff]  ;;  %v433_v59 = vld [vmem:[%s19514_s9 + $0x388] sm:$0xff]  ;;  %v16448_v61 = vcombine.low %v416_v47, %v424_v48 }
  0x53   : > { %v440_v57 = vld [vmem:[%s19514_s9 + $0x3c0] sm:$0xff]  ;;  %v441_v60 = vld [vmem:[%s19514_s9 + $0x3c8] sm:$0xff]  ;;  %v16450_v62 = vcombine.low %v417_v49, %v425_v50 }
  0x54   : > { %v16465_v63 = vcombine.high %v432_v56, %v440_v57  ;;  %v16467_v0 = vcombine.high %v433_v59, %v441_v60  ;;  %v448_v1 = vld [vmem:[%s19514_s9 + $0x400] sm:$0xff]  ;;  %v449_v3 = vld [vmem:[%s19514_s9 + $0x408] sm:$0xff]  ;;  %v16464_v5 = vcombine.low %v432_v56, %v440_v57  ;;  %v16466_v6 = vcombine.low %v433_v59, %v441_v60 }
  0x55   : > { %12755 = vmatpush1.bf16.msra.mxu0 %v16400_v35  ;;  %13083 = vmatpush1.bf16.msra.mxu1 %v16402_v36  ;;  %v456_v2 = vld [vmem:[%s19514_s9 + $0x440] sm:$0xff]  ;;  %v457_v4 = vld [vmem:[%s19514_s9 + $0x448] sm:$0xff] }
  0x56   : > { %12756 = vmatprep.subr.bf16.mxu0 %v16417_v37  ;;  %13084 = vmatprep.subr.bf16.mxu1 %v16419_v38  ;;  %v16481_v7 = vcombine.high %v448_v1, %v456_v2  ;;  %v16483_v8 = vcombine.high %v449_v3, %v457_v4  ;;  %v464_v9 = vld [vmem:[%s19514_s9 + $0x480] sm:$0xff]  ;;  %v465_v11 = vld [vmem:[%s19514_s9 + $0x488] sm:$0xff]  ;;  %v16480_v13 = vcombine.low %v448_v1, %v456_v2 }
  0x57   : > { %v472_v10 = vld [vmem:[%s19514_s9 + $0x4c0] sm:$0xff]  ;;  %v473_v12 = vld [vmem:[%s19514_s9 + $0x4c8] sm:$0xff]  ;;  %v16482_v14 = vcombine.low %v449_v3, %v457_v4 }
  0x58   : > { %v16497_v15 = vcombine.high %v464_v9, %v472_v10  ;;  %v16499_v16 = vcombine.high %v465_v11, %v473_v12  ;;  %v480_v17 = vld [vmem:[%s19514_s9 + $0x500] sm:$0xff]  ;;  %v481_v19 = vld [vmem:[%s19514_s9 + $0x508] sm:$0xff]  ;;  %v16496_v21 = vcombine.low %v464_v9, %v472_v10  ;;  %v16498_v22 = vcombine.low %v465_v11, %v473_v12 }
  0x59   : > { %12757 = vmatpush1.bf16.msra.mxu0 %v16416_v43  ;;  %13085 = vmatpush1.bf16.msra.mxu1 %v16418_v44  ;;  %v488_v18 = vld [vmem:[%s19514_s9 + $0x540] sm:$0xff]  ;;  %v489_v20 = vld [vmem:[%s19514_s9 + $0x548] sm:$0xff] }
  0x5a   : > { %12758 = vmatprep.subr.bf16.mxu0 %v16433_v45  ;;  %13086 = vmatprep.subr.bf16.mxu1 %v16435_v46  ;;  %v16513_v23 = vcombine.high %v480_v17, %v488_v18  ;;  %v16515_v24 = vcombine.high %v481_v19, %v489_v20  ;;  %v496_v25 = vld [vmem:[%s19514_s9 + $0x580] sm:$0xff]  ;;  %v497_v27 = vld [vmem:[%s19514_s9 + $0x588] sm:$0xff]  ;;  %v16512_v29 = vcombine.low %v480_v17, %v488_v18 }
  0x5b   : > { %v504_v26 = vld [vmem:[%s19514_s9 + $0x5c0] sm:$0xff]  ;;  %v505_v28 = vld [vmem:[%s19514_s9 + $0x5c8] sm:$0xff]  ;;  %v16514_v30 = vcombine.low %v481_v19, %v489_v20 }
  0x5c   : > { %v16529_v31 = vcombine.high %v496_v25, %v504_v26  ;;  %v16531_v32 = vcombine.high %v497_v27, %v505_v28  ;;  %v512_v33 = vld [vmem:[%s19514_s9 + $0x600] sm:$0xff]  ;;  %v513_v35 = vld [vmem:[%s19514_s9 + $0x608] sm:$0xff]  ;;  %v16528_v37 = vcombine.low %v496_v25, %v504_v26  ;;  %v16530_v38 = vcombine.low %v497_v27, %v505_v28 }
  0x5d   : > { %12759 = vmatpush1.bf16.msra.mxu0 %v16432_v51  ;;  %13087 = vmatpush1.bf16.msra.mxu1 %v16434_v52  ;;  %v520_v34 = vld [vmem:[%s19514_s9 + $0x640] sm:$0xff]  ;;  %v521_v36 = vld [vmem:[%s19514_s9 + $0x648] sm:$0xff] }
  0x5e   : > { %12760 = vmatprep.subr.bf16.mxu0 %v16449_v53  ;;  %13088 = vmatprep.subr.bf16.mxu1 %v16451_v55  ;;  %v16545_v39 = vcombine.high %v512_v33, %v520_v34  ;;  %v16547_v40 = vcombine.high %v513_v35, %v521_v36  ;;  %v528_v41 = vld [vmem:[%s19514_s9 + $0x680] sm:$0xff]  ;;  %v529_v43 = vld [vmem:[%s19514_s9 + $0x688] sm:$0xff]  ;;  %v16544_v45 = vcombine.low %v512_v33, %v520_v34 }
  0x5f   : > { %v536_v42 = vld [vmem:[%s19514_s9 + $0x6c0] sm:$0xff]  ;;  %v537_v44 = vld [vmem:[%s19514_s9 + $0x6c8] sm:$0xff]  ;;  %v16546_v46 = vcombine.low %v513_v35, %v521_v36 }
  0x60   : > { %v16561_v47 = vcombine.high %v528_v41, %v536_v42  ;;  %v16563_v48 = vcombine.high %v529_v43, %v537_v44  ;;  %v544_v49 = vld [vmem:[%s19514_s9 + $0x700] sm:$0xff]  ;;  %v545_v51 = vld [vmem:[%s19514_s9 + $0x708] sm:$0xff]  ;;  %v16560_v53 = vcombine.low %v528_v41, %v536_v42  ;;  %v16562_v55 = vcombine.low %v529_v43, %v537_v44 }
  0x61   : > { %12761 = vmatpush1.bf16.msra.mxu0 %v16448_v61  ;;  %13089 = vmatpush1.bf16.msra.mxu1 %v16450_v62  ;;  %v552_v50 = vld [vmem:[%s19514_s9 + $0x740] sm:$0xff]  ;;  %v553_v52 = vld [vmem:[%s19514_s9 + $0x748] sm:$0xff] }
  0x62   : > { %12762 = vmatprep.subr.bf16.mxu0 %v16465_v63  ;;  %13090 = vmatprep.subr.bf16.mxu1 %v16467_v0  ;;  %v16577_v56 = vcombine.high %v544_v49, %v552_v50  ;;  %v16579_v57 = vcombine.high %v545_v51, %v553_v52  ;;  %v560_v59 = vld [vmem:[%s19514_s9 + $0x780] sm:$0xff]  ;;  %v561_v61 = vld [vmem:[%s19514_s9 + $0x788] sm:$0xff]  ;;  %v16576_v63 = vcombine.low %v544_v49, %v552_v50 }
  0x63   : > { %v568_v60 = vld [vmem:[%s19514_s9 + $0x7c0] sm:$0xff]  ;;  %v569_v62 = vld [vmem:[%s19514_s9 + $0x7c8] sm:$0xff]  ;;  %v16578_v0 = vcombine.low %v545_v51, %v553_v52 }
  0x64   : > { %v16593_v1 = vcombine.high %v560_v59, %v568_v60  ;;  %v16595_v2 = vcombine.high %v561_v61, %v569_v62  ;;  %v576_v3 = vld [vmem:[%s19514_s9 + $0x800] sm:$0xff] }
  0x65   : > { %12763 = vmatpush1.bf16.msra.mxu0 %v16464_v5  ;;  %13091 = vmatpush1.bf16.msra.mxu1 %v16466_v6  ;;  %v584_v4 = vld [vmem:[%s19514_s9 + $0x840] sm:$0xff]  ;;  %v577_v5 = vld [vmem:[%s19514_s9 + $0x808] sm:$0xff] }
  0x66   : > { %12764 = vmatprep.subr.bf16.mxu0 %v16481_v7  ;;  %13092 = vmatprep.subr.bf16.mxu1 %v16483_v8  ;;  %v585_v6 = vld [vmem:[%s19514_s9 + $0x848] sm:$0xff]  ;;  %v16592_v7 = vcombine.low %v560_v59, %v568_v60  ;;  %v16594_v8 = vcombine.low %v561_v61, %v569_v62  ;;  %v16609_v9 = vcombine.high %v576_v3, %v584_v4  ;;  %v592_v11 = vld [vmem:[%s19514_s9 + $0x880] sm:$0xff] }
  0x67   : > { %v16611_v10 = vcombine.high %v577_v5, %v585_v6  ;;  %v600_v12 = vld [vmem:[%s19514_s9 + $0x8c0] sm:$0xff]  ;;  %v16608_v17 = vcombine.low %v576_v3, %v584_v4  ;;  %v16610_v18 = vcombine.low %v577_v5, %v585_v6 }
  0x68   : > { %v16625_v19 = vcombine.high %v592_v11, %v600_v12  ;;  %v16624_v25 = vcombine.low %v592_v11, %v600_v12 }
  0x69   : > { %12765 = vmatpush1.bf16.msra.mxu0 %v16480_v13  ;;  %13093 = vmatpush1.bf16.msra.mxu1 %v16482_v14  ;;  %v19623_v13 = vcombine.low %v19571_v54, %v19571_v54  ;;  %v593_v14 = vld [vmem:[%s19514_s9 + $0x888] sm:$0xff]  ;;  %v608_v54 = vld [vmem:[%s19514_s9 + $0x900] sm:$0xff] }
  0x6a   : > { %12766 = vmatprep.subr.bf16.mxu0 %v16497_v15  ;;  %13094 = vmatprep.subr.bf16.mxu1 %v16499_v16  ;;  %v601_v15 = vld [vmem:[%s19514_s9 + $0x8c8] sm:$0xff]  ;;  %v19630_v16 = vld [vmem:[%s22193_s0 + $0x8] sm:$0xff] }
  0x6b   : > { %v16627_v20 = vcombine.high %v593_v14, %v601_v15  ;;  %v16626_v26 = vcombine.low %v593_v14, %v601_v15 }
  0x6d   : > { %12767 = vmatpush1.bf16.msra.mxu0 %v16496_v21  ;;  %13095 = vmatpush1.bf16.msra.mxu1 %v16498_v22  ;;  %v616_v21 = vld [vmem:[%s19514_s9 + $0x940] sm:$0xff]  ;;  %v19636_v22 = vcombine.high %v19630_v16, %v19630_v16 }
  0x6e   : > { %12768 = vmatprep.subr.bf16.mxu0 %v16513_v23  ;;  %13096 = vmatprep.subr.bf16.mxu1 %v16515_v24  ;;  %v609_v23 = vld [vmem:[%s19514_s9 + $0x908] sm:$0xff]  ;;  %v16641_v27 = vcombine.high %v608_v54, %v616_v21  ;;  %v16640_v33 = vcombine.low %v608_v54, %v616_v21 }
  0x6f   : > { %v617_v24 = vld [vmem:[%s19514_s9 + $0x948] sm:$0xff] }
  0x70   : > { %v16643_v28 = vcombine.high %v609_v23, %v617_v24  ;;  %v16642_v34 = vcombine.low %v609_v23, %v617_v24 }
  0x71   : > { %12769 = vmatpush1.bf16.msra.mxu0 %v16512_v29  ;;  %13097 = vmatpush1.bf16.msra.mxu1 %v16514_v30  ;;  %v624_v29 = vld [vmem:[%s19514_s9 + $0x980] sm:$0xff] }
  0x72   : > { %12770 = vmatprep.subr.bf16.mxu0 %v16529_v31  ;;  %13098 = vmatprep.subr.bf16.mxu1 %v16531_v32  ;;  %v632_v30 = vld [vmem:[%s19514_s9 + $0x9c0] sm:$0xff]  ;;  %v625_v31 = vld [vmem:[%s19514_s9 + $0x988] sm:$0xff] }
  0x73   : > { %v633_v32 = vld [vmem:[%s19514_s9 + $0x9c8] sm:$0xff]  ;;  %v16657_v35 = vcombine.high %v624_v29, %v632_v30  ;;  %v16656_v41 = vcombine.low %v624_v29, %v632_v30 }
  0x74   : > { %v16659_v36 = vcombine.high %v625_v31, %v633_v32  ;;  %v16658_v42 = vcombine.low %v625_v31, %v633_v32 }
  0x75   : > { %12771 = vmatpush1.bf16.msra.mxu0 %v16528_v37  ;;  %13099 = vmatpush1.bf16.msra.mxu1 %v16530_v38  ;;  %v640_v37 = vld [vmem:[%s19514_s9 + $0xa00] sm:$0xff] }
  0x76   : > { %12772 = vmatprep.subr.bf16.mxu0 %v16545_v39  ;;  %13100 = vmatprep.subr.bf16.mxu1 %v16547_v40  ;;  %v648_v38 = vld [vmem:[%s19514_s9 + $0xa40] sm:$0xff]  ;;  %v641_v39 = vld [vmem:[%s19514_s9 + $0xa08] sm:$0xff] }
  0x77   : > { %v649_v40 = vld [vmem:[%s19514_s9 + $0xa48] sm:$0xff]  ;;  %v16673_v43 = vcombine.high %v640_v37, %v648_v38  ;;  %v16672_v49 = vcombine.low %v640_v37, %v648_v38 }
  0x78   : > { %v16675_v44 = vcombine.high %v641_v39, %v649_v40  ;;  %v16674_v50 = vcombine.low %v641_v39, %v649_v40 }
  0x79   : > { %12773 = vmatpush1.bf16.msra.mxu0 %v16544_v45  ;;  %13101 = vmatpush1.bf16.msra.mxu1 %v16546_v46  ;;  %v656_v45 = vld [vmem:[%s19514_s9 + $0xa80] sm:$0xff] }
  0x7a   : > { %12774 = vmatprep.subr.bf16.mxu0 %v16561_v47  ;;  %13102 = vmatprep.subr.bf16.mxu1 %v16563_v48  ;;  %v664_v46 = vld [vmem:[%s19514_s9 + $0xac0] sm:$0xff]  ;;  %v657_v47 = vld [vmem:[%s19514_s9 + $0xa88] sm:$0xff] }
  0x7b   : > { %v665_v48 = vld [vmem:[%s19514_s9 + $0xac8] sm:$0xff]  ;;  %v16689_v51 = vcombine.high %v656_v45, %v664_v46  ;;  %v16688_v59 = vcombine.low %v656_v45, %v664_v46 }
  0x7c   : > { %v16691_v52 = vcombine.high %v657_v47, %v665_v48  ;;  %v16690_v60 = vcombine.low %v657_v47, %v665_v48 }
  0x7d   : > { %12775 = vmatpush1.bf16.msra.mxu0 %v16560_v53  ;;  %13103 = vmatpush1.bf16.msra.mxu1 %v16562_v55  ;;  %v672_v53 = vld [vmem:[%s19514_s9 + $0xb00] sm:$0xff] }
  0x7e   : > { %12776 = vmatprep.subr.bf16.mxu0 %v16577_v56  ;;  %13104 = vmatprep.subr.bf16.mxu1 %v16579_v57  ;;  %v680_v55 = vld [vmem:[%s19514_s9 + $0xb40] sm:$0xff]  ;;  %v673_v56 = vld [vmem:[%s19514_s9 + $0xb08] sm:$0xff] }
  0x7f   : > { %v681_v57 = vld [vmem:[%s19514_s9 + $0xb48] sm:$0xff]  ;;  %v16705_v61 = vcombine.high %v672_v53, %v680_v55  ;;  %v16704_v3 = vcombine.low %v672_v53, %v680_v55 }
  0x80   : > { %v16707_v62 = vcombine.high %v673_v56, %v681_v57  ;;  %v16706_v4 = vcombine.low %v673_v56, %v681_v57 }
  0x81   : > { %12777 = vmatpush1.bf16.msra.mxu0 %v16576_v63  ;;  %13105 = vmatpush1.bf16.msra.mxu1 %v16578_v0  ;;  %v688_v63 = vld [vmem:[%s19514_s9 + $0xb80] sm:$0xff] }
  0x82   : > { %12778 = vmatprep.subr.bf16.mxu0 %v16593_v1  ;;  %13106 = vmatprep.subr.bf16.mxu1 %v16595_v2  ;;  %v696_v0 = vld [vmem:[%s19514_s9 + $0xbc0] sm:$0xff]  ;;  %v689_v1 = vld [vmem:[%s19514_s9 + $0xb88] sm:$0xff] }
  0x83   : > { %v697_v2 = vld [vmem:[%s19514_s9 + $0xbc8] sm:$0xff]  ;;  %v16721_v5 = vcombine.high %v688_v63, %v696_v0  ;;  %v16720_v11 = vcombine.low %v688_v63, %v696_v0 }
  0x84   : > { %v16723_v6 = vcombine.high %v689_v1, %v697_v2  ;;  %v16722_v12 = vcombine.low %v689_v1, %v697_v2 }
  0x85   : > { %12779 = vmatpush1.bf16.msra.mxu0 %v16592_v7  ;;  %13107 = vmatpush1.bf16.msra.mxu1 %v16594_v8  ;;  %v704_v7 = vld [vmem:[%s19514_s9 + $0xc00] sm:$0xff] }
  0x86   : > { %12789 = vmatprep.subr.bf16.mxu0 %v16609_v9  ;;  %13117 = vmatprep.subr.bf16.mxu1 %v16611_v10  ;;  %v712_v8 = vld [vmem:[%s19514_s9 + $0xc40] sm:$0xff]  ;;  %v705_v9 = vld [vmem:[%s19514_s9 + $0xc08] sm:$0xff] }
  0x87   : > { %v713_v10 = vld [vmem:[%s19514_s9 + $0xc48] sm:$0xff]  ;;  %v16737_v14 = vcombine.high %v704_v7, %v712_v8  ;;  %v16736_v54 = vcombine.low %v704_v7, %v712_v8 }
  0x88   : > { %12781 = vmatmul.mubr.bf16.vlgmr.msra.gmra.mrb[0].mxu0 %v19623_v13  ;;  %13109 = vmatmul.mubr.bf16.vlgmr.msra.gmra.mrb[0].mxu1 %v19623_v13  ;;  %v16739_v15 = vcombine.high %v705_v9, %v713_v10  ;;  %v16738_v21 = vcombine.low %v705_v9, %v713_v10 }
  0x89   : > { %12790 = vmatpush1.bf16.msra.mxu0 %v16608_v17  ;;  %13118 = vmatpush1.bf16.msra.mxu1 %v16610_v18  ;;  %v720_v17 = vld [vmem:[%s19514_s9 + $0xc80] sm:$0xff] }
  0x8a   : > { %12791 = vmatprep.subr.bf16.mxu0 %v16625_v19  ;;  %13119 = vmatprep.subr.bf16.mxu1 %v16627_v20  ;;  %v728_v18 = vld [vmem:[%s19514_s9 + $0xcc0] sm:$0xff]  ;;  %v721_v19 = vld [vmem:[%s19514_s9 + $0xc88] sm:$0xff] }
  0x8b   : > { %12821 = vmatprep.mubr.bf16.mxu0 %v19636_v22  ;;  %13149 = vmatprep.mubr.bf16.mxu1 %v19636_v22  ;;  %v729_v20 = vld [vmem:[%s19514_s9 + $0xcc8] sm:$0xff]  ;;  %v16753_v23 = vcombine.high %v720_v17, %v728_v18  ;;  %v16752_v29 = vcombine.low %v720_v17, %v728_v18 }
  0x8c   : > { %v16755_v24 = vcombine.high %v721_v19, %v729_v20  ;;  %v16754_v30 = vcombine.low %v721_v19, %v729_v20 }
  0x8d   : > { %12792 = vmatpush1.bf16.msra.mxu0 %v16624_v25  ;;  %13120 = vmatpush1.bf16.msra.mxu1 %v16626_v26  ;;  %v736_v25 = vld [vmem:[%s19514_s9 + $0xd00] sm:$0xff] }
  0x8e   : > { %12793 = vmatprep.subr.bf16.mxu0 %v16641_v27  ;;  %13121 = vmatprep.subr.bf16.mxu1 %v16643_v28  ;;  %v744_v26 = vld [vmem:[%s19514_s9 + $0xd40] sm:$0xff]  ;;  %v737_v27 = vld [vmem:[%s19514_s9 + $0xd08] sm:$0xff] }
  0x8f   : > { %v745_v28 = vld [vmem:[%s19514_s9 + $0xd48] sm:$0xff]  ;;  %v16769_v31 = vcombine.high %v736_v25, %v744_v26  ;;  %v16768_v37 = vcombine.low %v736_v25, %v744_v26 }
  0x90   : > { %v16771_v32 = vcombine.high %v737_v27, %v745_v28  ;;  %v16770_v38 = vcombine.low %v737_v27, %v745_v28  ;;  %v857_v25 = vld [vmem:[%s19514_s9 + $0x10c8] sm:$0xff] }
  0x91   : > { %12794 = vmatpush1.bf16.msra.mxu0 %v16640_v33  ;;  %13122 = vmatpush1.bf16.msra.mxu1 %v16642_v34  ;;  %v752_v33 = vld [vmem:[%s19514_s9 + $0xd80] sm:$0xff]  ;;  %v19711_v26 = vld [vmem:[%s22193_s0 + $0x10] sm:$0xff] }
  0x92   : > { %12795 = vmatprep.subr.bf16.mxu0 %v16657_v35  ;;  %13123 = vmatprep.subr.bf16.mxu1 %v16659_v36  ;;  %v760_v34 = vld [vmem:[%s19514_s9 + $0xdc0] sm:$0xff]  ;;  %v753_v35 = vld [vmem:[%s19514_s9 + $0xd88] sm:$0xff] }
  0x93   : > { %v761_v36 = vld [vmem:[%s19514_s9 + $0xdc8] sm:$0xff]  ;;  %v16785_v39 = vcombine.high %v752_v33, %v760_v34  ;;  %v16784_v45 = vcombine.low %v752_v33, %v760_v34 }
  0x94   : > { %v16787_v40 = vcombine.high %v753_v35, %v761_v36  ;;  %v16786_v46 = vcombine.low %v753_v35, %v761_v36  ;;  %v865_v33 = vld [vmem:[%s19514_s9 + $0x1108] sm:$0xff] }
  0x95   : > { %12796 = vmatpush1.bf16.msra.mxu0 %v16656_v41  ;;  %13124 = vmatpush1.bf16.msra.mxu1 %v16658_v42  ;;  %v768_v41 = vld [vmem:[%s19514_s9 + $0xe00] sm:$0xff]  ;;  %v873_v34 = vld [vmem:[%s19514_s9 + $0x1148] sm:$0xff] }
  0x96   : > { %12797 = vmatprep.subr.bf16.mxu0 %v16673_v43  ;;  %13125 = vmatprep.subr.bf16.mxu1 %v16675_v44  ;;  %v776_v42 = vld [vmem:[%s19514_s9 + $0xe40] sm:$0xff]  ;;  %v769_v43 = vld [vmem:[%s19514_s9 + $0xe08] sm:$0xff] }
  0x97   : > { %v777_v44 = vld [vmem:[%s19514_s9 + $0xe48] sm:$0xff]  ;;  %v16801_v47 = vcombine.high %v768_v41, %v776_v42  ;;  %v16800_v53 = vcombine.low %v768_v41, %v776_v42 }
  0x98   : > { %v16803_v48 = vcombine.high %v769_v43, %v777_v44  ;;  %v16802_v55 = vcombine.low %v769_v43, %v777_v44  ;;  %v881_v41 = vld [vmem:[%s19514_s9 + $0x1188] sm:$0xff]  ;;  %v16898_v44 = vcombine.low %v865_v33, %v873_v34 }
  0x99   : > { %12798 = vmatpush1.bf16.msra.mxu0 %v16672_v49  ;;  %13126 = vmatpush1.bf16.msra.mxu1 %v16674_v50  ;;  %v784_v49 = vld [vmem:[%s19514_s9 + $0xe80] sm:$0xff]  ;;  %v889_v42 = vld [vmem:[%s19514_s9 + $0x11c8] sm:$0xff] }
  0x9a   : > { %12799 = vmatprep.subr.bf16.mxu0 %v16689_v51  ;;  %13127 = vmatprep.subr.bf16.mxu1 %v16691_v52  ;;  %v792_v50 = vld [vmem:[%s19514_s9 + $0xec0] sm:$0xff]  ;;  %v785_v51 = vld [vmem:[%s19514_s9 + $0xe88] sm:$0xff] }
  0x9b   : > { %v793_v52 = vld [vmem:[%s19514_s9 + $0xec8] sm:$0xff]  ;;  %v16817_v56 = vcombine.high %v784_v49, %v792_v50  ;;  %v16816_v63 = vcombine.low %v784_v49, %v792_v50 }
  0x9c   : > { %v16819_v57 = vcombine.high %v785_v51, %v793_v52  ;;  %v16818_v0 = vcombine.low %v785_v51, %v793_v52  ;;  %v897_v49 = vld [vmem:[%s19514_s9 + $0x1208] sm:$0xff]  ;;  %v16914_v52 = vcombine.low %v881_v41, %v889_v42 }
  0x9d   : > { %12800 = vmatpush1.bf16.msra.mxu0 %v16688_v59  ;;  %13128 = vmatpush1.bf16.msra.mxu1 %v16690_v60  ;;  %v800_v59 = vld [vmem:[%s19514_s9 + $0xf00] sm:$0xff]  ;;  %v905_v50 = vld [vmem:[%s19514_s9 + $0x1248] sm:$0xff] }
  0x9e   : > { %12801 = vmatprep.subr.bf16.mxu0 %v16705_v61  ;;  %13129 = vmatprep.subr.bf16.mxu1 %v16707_v62  ;;  %v808_v60 = vld [vmem:[%s19514_s9 + $0xf40] sm:$0xff]  ;;  %v801_v61 = vld [vmem:[%s19514_s9 + $0xf08] sm:$0xff] }
  0x9f   : > { %v809_v62 = vld [vmem:[%s19514_s9 + $0xf48] sm:$0xff]  ;;  %v16833_v1 = vcombine.high %v800_v59, %v808_v60  ;;  %v16832_v7 = vcombine.low %v800_v59, %v808_v60 }
  0xa0   : > { %v16835_v2 = vcombine.high %v801_v61, %v809_v62  ;;  %v16834_v8 = vcombine.low %v801_v61, %v809_v62  ;;  %v913_v59 = vld [vmem:[%s19514_s9 + $0x1288] sm:$0xff]  ;;  %v16930_v62 = vcombine.low %v897_v49, %v905_v50 }
  0xa1   : > { %12802 = vmatpush1.bf16.msra.mxu0 %v16704_v3  ;;  %13130 = vmatpush1.bf16.msra.mxu1 %v16706_v4  ;;  %v816_v3 = vld [vmem:[%s19514_s9 + $0xf80] sm:$0xff]  ;;  %v921_v60 = vld [vmem:[%s19514_s9 + $0x12c8] sm:$0xff] }
  0xa2   : > { %12803 = vmatprep.subr.bf16.mxu0 %v16721_v5  ;;  %13131 = vmatprep.subr.bf16.mxu1 %v16723_v6  ;;  %v824_v4 = vld [vmem:[%s19514_s9 + $0xfc0] sm:$0xff]  ;;  %v817_v5 = vld [vmem:[%s19514_s9 + $0xf88] sm:$0xff] }
  0xa3   : > { %v825_v6 = vld [vmem:[%s19514_s9 + $0xfc8] sm:$0xff]  ;;  %v16849_v9 = vcombine.high %v816_v3, %v824_v4  ;;  %v16848_v17 = vcombine.low %v816_v3, %v824_v4 }
  0xa4   : > { %v16851_v10 = vcombine.high %v817_v5, %v825_v6  ;;  %v16850_v18 = vcombine.low %v817_v5, %v825_v6  ;;  %v929_v3 = vld [vmem:[%s19514_s9 + $0x1308] sm:$0xff]  ;;  %v16946_v6 = vcombine.low %v913_v59, %v921_v60 }
  0xa5   : > { %12804 = vmatpush1.bf16.msra.mxu0 %v16720_v11  ;;  %13132 = vmatpush1.bf16.msra.mxu1 %v16722_v12  ;;  %v832_v11 = vld [vmem:[%s19514_s9 + $0x1000] sm:$0xff]  ;;  %v937_v4 = vld [vmem:[%s19514_s9 + $0x1348] sm:$0xff] }
  0xa6   : > { %12805 = vmatprep.subr.bf16.mxu0 %v16737_v14  ;;  %13133 = vmatprep.subr.bf16.mxu1 %v16739_v15  ;;  %v840_v12 = vld [vmem:[%s19514_s9 + $0x1040] sm:$0xff]  ;;  %v833_v14 = vld [vmem:[%s19514_s9 + $0x1008] sm:$0xff] }
  0xa7   : > { %v841_v15 = vld [vmem:[%s19514_s9 + $0x1048] sm:$0xff]  ;;  %v16865_v19 = vcombine.high %v832_v11, %v840_v12  ;;  %v16864_v27 = vcombine.low %v832_v11, %v840_v12 }
  0xa8   : > { %v16867_v20 = vcombine.high %v833_v14, %v841_v15  ;;  %v16866_v28 = vcombine.low %v833_v14, %v841_v15  ;;  %v945_v11 = vld [vmem:[%s19514_s9 + $0x1388] sm:$0xff]  ;;  %v16962_v15 = vcombine.low %v929_v3, %v937_v4 }
  0xa9   : > { %12806 = vmatpush1.bf16.msra.mxu0 %v16736_v54  ;;  %13134 = vmatpush1.bf16.msra.mxu1 %v16738_v21  ;;  %v848_v54 = vld [vmem:[%s19514_s9 + $0x1080] sm:$0xff]  ;;  %v953_v12 = vld [vmem:[%s19514_s9 + $0x13c8] sm:$0xff] }
  0xaa   : > { %12807 = vmatprep.subr.bf16.mxu0 %v16753_v23  ;;  %13135 = vmatprep.subr.bf16.mxu1 %v16755_v24  ;;  %v856_v21 = vld [vmem:[%s19514_s9 + $0x10c0] sm:$0xff]  ;;  %v19704_v23 = vcombine.low %v19630_v16, %v19630_v16  ;;  %v849_v24 = vld [vmem:[%s19514_s9 + $0x1088] sm:$0xff] }
  0xab   : > { %v864_v16 = vld [vmem:[%s19514_s9 + $0x1100] sm:$0xff]  ;;  %v16880_v35 = vcombine.low %v848_v54, %v856_v21  ;;  %v16882_v36 = vcombine.low %v849_v24, %v857_v25 }
  0xad   : > { %12808 = vmatpush1.bf16.msra.mxu0 %v16752_v29  ;;  %13136 = vmatpush1.bf16.msra.mxu1 %v16754_v30  ;;  %v16881_v29 = vcombine.high %v848_v54, %v856_v21  ;;  %v16883_v30 = vcombine.high %v849_v24, %v857_v25  ;;  %v961_v54 = vld [vmem:[%s19514_s9 + $0x1408] sm:$0xff]  ;;  %v16978_v25 = vcombine.low %v945_v11, %v953_v12 }
  0xae   : > { %12809 = vmatprep.subr.bf16.mxu0 %v16769_v31  ;;  %13137 = vmatprep.subr.bf16.mxu1 %v16771_v32  ;;  %v872_v31 = vld [vmem:[%s19514_s9 + $0x1140] sm:$0xff]  ;;  %v19717_v32 = vcombine.high %v19711_v26, %v19711_v26  ;;  %v969_v21 = vld [vmem:[%s19514_s9 + $0x1448] sm:$0xff] }
  0xaf   : > { %v16896_v43 = vcombine.low %v864_v16, %v872_v31 }
  0xb1   : > { %12810 = vmatpush1.bf16.msra.mxu0 %v16768_v37  ;;  %13138 = vmatpush1.bf16.msra.mxu1 %v16770_v38  ;;  %v16897_v37 = vcombine.high %v864_v16, %v872_v31  ;;  %v16899_v38 = vcombine.high %v865_v33, %v873_v34  ;;  %v977_v16 = vld [vmem:[%s19514_s9 + $0x1488] sm:$0xff]  ;;  %v16994_v34 = vcombine.low %v961_v54, %v969_v21 }
  0xb2   : > { %12811 = vmatprep.subr.bf16.mxu0 %v16785_v39  ;;  %13139 = vmatprep.subr.bf16.mxu1 %v16787_v40  ;;  %v880_v39 = vld [vmem:[%s19514_s9 + $0x1180] sm:$0xff]  ;;  %v985_v31 = vld [vmem:[%s19514_s9 + $0x14c8] sm:$0xff] }
  0xb3   : > { %v888_v40 = vld [vmem:[%s19514_s9 + $0x11c0] sm:$0xff] }
  0xb4   : > { %v16912_v51 = vcombine.low %v880_v39, %v888_v40 }
  0xb5   : > { %12812 = vmatpush1.bf16.msra.mxu0 %v16784_v45  ;;  %13140 = vmatpush1.bf16.msra.mxu1 %v16786_v46  ;;  %v16913_v45 = vcombine.high %v880_v39, %v888_v40  ;;  %v16915_v46 = vcombine.high %v881_v41, %v889_v42  ;;  %v993_v39 = vld [vmem:[%s19514_s9 + $0x1508] sm:$0xff]  ;;  %v17010_v42 = vcombine.low %v977_v16, %v985_v31 }
  0xb6   : > { %12813 = vmatprep.subr.bf16.mxu0 %v16801_v47  ;;  %13141 = vmatprep.subr.bf16.mxu1 %v16803_v48  ;;  %v896_v47 = vld [vmem:[%s19514_s9 + $0x1200] sm:$0xff]  ;;  %v1001_v40 = vld [vmem:[%s19514_s9 + $0x1548] sm:$0xff] }
  0xb7   : > { %v904_v48 = vld [vmem:[%s19514_s9 + $0x1240] sm:$0xff] }
  0xb8   : > { %v16928_v61 = vcombine.low %v896_v47, %v904_v48 }
  0xb9   : > { %12814 = vmatpush1.bf16.msra.mxu0 %v16800_v53  ;;  %13142 = vmatpush1.bf16.msra.mxu1 %v16802_v55  ;;  %v16929_v53 = vcombine.high %v896_v47, %v904_v48  ;;  %v16931_v55 = vcombine.high %v897_v49, %v905_v50  ;;  %v1009_v47 = vld [vmem:[%s19514_s9 + $0x1588] sm:$0xff]  ;;  %v17026_v50 = vcombine.low %v993_v39, %v1001_v40 }
  0xba   : > { %12815 = vmatprep.subr.bf16.mxu0 %v16817_v56  ;;  %13143 = vmatprep.subr.bf16.mxu1 %v16819_v57  ;;  %v912_v56 = vld [vmem:[%s19514_s9 + $0x1280] sm:$0xff]  ;;  %v1017_v48 = vld [vmem:[%s19514_s9 + $0x15c8] sm:$0xff] }
  0xbb   : > { %v920_v57 = vld [vmem:[%s19514_s9 + $0x12c0] sm:$0xff] }
  0xbc   : > { %v16944_v5 = vcombine.low %v912_v56, %v920_v57 }
  0xbd   : > { %12816 = vmatpush1.bf16.msra.mxu0 %v16816_v63  ;;  %13144 = vmatpush1.bf16.msra.mxu1 %v16818_v0  ;;  %v16945_v63 = vcombine.high %v912_v56, %v920_v57  ;;  %v16947_v0 = vcombine.high %v913_v59, %v921_v60  ;;  %v1025_v56 = vld [vmem:[%s19514_s9 + $0x1608] sm:$0xff]  ;;  %v17042_v60 = vcombine.low %v1009_v47, %v1017_v48 }
  0xbe   : > { %12817 = vmatprep.subr.bf16.mxu0 %v16833_v1  ;;  %13145 = vmatprep.subr.bf16.mxu1 %v16835_v2  ;;  %v928_v1 = vld [vmem:[%s19514_s9 + $0x1300] sm:$0xff]  ;;  %v1033_v57 = vld [vmem:[%s19514_s9 + $0x1648] sm:$0xff] }
  0xbf   : > { %v936_v2 = vld [vmem:[%s19514_s9 + $0x1340] sm:$0xff] }
  0xc0   : > { %v16960_v14 = vcombine.low %v928_v1, %v936_v2 }
  0xc1   : > { %12818 = vmatpush1.bf16.msra.mxu0 %v16832_v7  ;;  %13146 = vmatpush1.bf16.msra.mxu1 %v16834_v8  ;;  %v16961_v7 = vcombine.high %v928_v1, %v936_v2  ;;  %v16963_v8 = vcombine.high %v929_v3, %v937_v4  ;;  %v1041_v1 = vld [vmem:[%s19514_s9 + $0x1688] sm:$0xff]  ;;  %v17058_v4 = vcombine.low %v1025_v56, %v1033_v57 }
  0xc2   : > { %12819 = vmatprep.subr.bf16.mxu0 %v16849_v9  ;;  %13147 = vmatprep.subr.bf16.mxu1 %v16851_v10  ;;  %v944_v9 = vld [vmem:[%s19514_s9 + $0x1380] sm:$0xff]  ;;  %v1049_v2 = vld [vmem:[%s19514_s9 + $0x16c8] sm:$0xff] }
  0xc3   : > { %v952_v10 = vld [vmem:[%s19514_s9 + $0x13c0] sm:$0xff] }
  0xc4   : > { %v16976_v24 = vcombine.low %v944_v9, %v952_v10 }
  0xc5   : > { %12820 = vmatpush1.bf16.msra.mxu0 %v16848_v17  ;;  %13148 = vmatpush1.bf16.msra.mxu1 %v16850_v18  ;;  %v16977_v17 = vcombine.high %v944_v9, %v952_v10  ;;  %v16979_v18 = vcombine.high %v945_v11, %v953_v12  ;;  %v1057_v9 = vld [vmem:[%s19514_s9 + $0x1708] sm:$0xff]  ;;  %v17074_v12 = vcombine.low %v1041_v1, %v1049_v2 }
  0xc6   : > { %12830 = vmatprep.subr.bf16.mxu0 %v16865_v19  ;;  %13158 = vmatprep.subr.bf16.mxu1 %v16867_v20  ;;  %v960_v19 = vld [vmem:[%s19514_s9 + $0x1400] sm:$0xff]  ;;  %v1065_v10 = vld [vmem:[%s19514_s9 + $0x1748] sm:$0xff] }
  0xc7   : > { %v968_v20 = vld [vmem:[%s19514_s9 + $0x1440] sm:$0xff] }
  0xc8   : > { %12822 = vmatmul.mubr.bf16.vlgmr.msra.gmra.mrb[0].mxu0 %v19704_v23  ;;  %13150 = vmatmul.mubr.bf16.vlgmr.msra.gmra.mrb[0].mxu1 %v19704_v23  ;;  %v16992_v33 = vcombine.low %v960_v19, %v968_v20 }
  0xc9   : > { %12831 = vmatpush1.bf16.msra.mxu0 %v16864_v27  ;;  %13159 = vmatpush1.bf16.msra.mxu1 %v16866_v28  ;;  %v16993_v27 = vcombine.high %v960_v19, %v968_v20  ;;  %v16995_v28 = vcombine.high %v961_v54, %v969_v21  ;;  %v1073_v19 = vld [vmem:[%s19514_s9 + $0x1788] sm:$0xff]  ;;  %v17090_v21 = vcombine.low %v1057_v9, %v1065_v10 }
  0xca   : > { %12832 = vmatprep.subr.bf16.mxu0 %v16881_v29  ;;  %13160 = vmatprep.subr.bf16.mxu1 %v16883_v30  ;;  %v976_v29 = vld [vmem:[%s19514_s9 + $0x1480] sm:$0xff]  ;;  %v1081_v20 = vld [vmem:[%s19514_s9 + $0x17c8] sm:$0xff] }
  0xcb   : > { %12862 = vmatprep.mubr.bf16.mxu0 %v19717_v32  ;;  %13190 = vmatprep.mubr.bf16.mxu1 %v19717_v32  ;;  %v984_v30 = vld [vmem:[%s19514_s9 + $0x14c0] sm:$0xff] }
  0xcc   : > { %v17008_v41 = vcombine.low %v976_v29, %v984_v30 }
  0xcd   : > { %12833 = vmatpush1.bf16.msra.mxu0 %v16880_v35  ;;  %13161 = vmatpush1.bf16.msra.mxu1 %v16882_v36  ;;  %v17009_v35 = vcombine.high %v976_v29, %v984_v30  ;;  %v17011_v36 = vcombine.high %v977_v16, %v985_v31  ;;  %v1089_v29 = vld [vmem:[%s19514_s9 + $0x1808] sm:$0xff]  ;;  %v17106_v31 = vcombine.low %v1073_v19, %v1081_v20 }
  0xce   : > { %12834 = vmatprep.subr.bf16.mxu0 %v16897_v37  ;;  %13162 = vmatprep.subr.bf16.mxu1 %v16899_v38  ;;  %v992_v37 = vld [vmem:[%s19514_s9 + $0x1500] sm:$0xff]  ;;  %v1097_v30 = vld [vmem:[%s19514_s9 + $0x1848] sm:$0xff] }
  0xcf   : > { %v1000_v38 = vld [vmem:[%s19514_s9 + $0x1540] sm:$0xff] }
  0xd0   : > { %v17024_v49 = vcombine.low %v992_v37, %v1000_v38 }
  0xd1   : > { %12835 = vmatpush1.bf16.msra.mxu0 %v16896_v43  ;;  %13163 = vmatpush1.bf16.msra.mxu1 %v16898_v44  ;;  %v17025_v43 = vcombine.high %v992_v37, %v1000_v38  ;;  %v17027_v44 = vcombine.high %v993_v39, %v1001_v40  ;;  %v19785_v37 = vcombine.low %v19711_v26, %v19711_v26  ;;  %v1105_v38 = vld [vmem:[%s19514_s9 + $0x1888] sm:$0xff]  ;;  %v19792_v40 = vld [vmem:[%s22193_s0 + $0x18] sm:$0xff]  ;;  %v1120_v26 = vld [vmem:[%s19514_s9 + $0x1900] sm:$0xff] }
  0xd2   : > { %12836 = vmatprep.subr.bf16.mxu0 %v16913_v45  ;;  %13164 = vmatprep.subr.bf16.mxu1 %v16915_v46  ;;  %v1008_v45 = vld [vmem:[%s19514_s9 + $0x1580] sm:$0xff]  ;;  %v1113_v39 = vld [vmem:[%s19514_s9 + $0x18c8] sm:$0xff] }
  0xd3   : > { %v1016_v46 = vld [vmem:[%s19514_s9 + $0x15c0] sm:$0xff] }
  0xd4   : > { %v17040_v59 = vcombine.low %v1008_v45, %v1016_v46 }
  0xd5   : > { %12837 = vmatpush1.bf16.msra.mxu0 %v16912_v51  ;;  %13165 = vmatpush1.bf16.msra.mxu1 %v16914_v52  ;;  %v17041_v51 = vcombine.high %v1008_v45, %v1016_v46  ;;  %v17043_v52 = vcombine.high %v1009_v47, %v1017_v48  ;;  %v1128_v45 = vld [vmem:[%s19514_s9 + $0x1940] sm:$0xff]  ;;  %v19798_v46 = vcombine.high %v19792_v40, %v19792_v40  ;;  %v1121_v47 = vld [vmem:[%s19514_s9 + $0x1908] sm:$0xff] }
  0xd6   : > { %12838 = vmatprep.subr.bf16.mxu0 %v16929_v53  ;;  %13166 = vmatprep.subr.bf16.mxu1 %v16931_v55  ;;  %v1024_v53 = vld [vmem:[%s19514_s9 + $0x1600] sm:$0xff]  ;;  %v1129_v48 = vld [vmem:[%s19514_s9 + $0x1948] sm:$0xff] }
  0xd7   : > { %v1032_v55 = vld [vmem:[%s19514_s9 + $0x1640] sm:$0xff] }
  0xd8   : > { %v17056_v3 = vcombine.low %v1024_v53, %v1032_v55 }
  0xd9   : > { %12839 = vmatpush1.bf16.msra.mxu0 %v16928_v61  ;;  %13167 = vmatpush1.bf16.msra.mxu1 %v16930_v62  ;;  %v17057_v61 = vcombine.high %v1024_v53, %v1032_v55  ;;  %v17059_v62 = vcombine.high %v1025_v56, %v1033_v57  ;;  %v1136_v53 = vld [vmem:[%s19514_s9 + $0x1980] sm:$0xff]  ;;  %v1137_v56 = vld [vmem:[%s19514_s9 + $0x1988] sm:$0xff] }
  0xda   : > { %12840 = vmatprep.subr.bf16.mxu0 %v16945_v63  ;;  %13168 = vmatprep.subr.bf16.mxu1 %v16947_v0  ;;  %v1040_v63 = vld [vmem:[%s19514_s9 + $0x1680] sm:$0xff]  ;;  %v1145_v57 = vld [vmem:[%s19514_s9 + $0x19c8] sm:$0xff] }
  0xdb   : > { %v1048_v0 = vld [vmem:[%s19514_s9 + $0x16c0] sm:$0xff] }
  0xdc   : > { %v17072_v11 = vcombine.low %v1040_v63, %v1048_v0  ;;  %v1144_v55 = vld [vmem:[%s19514_s9 + $0x19c0] sm:$0xff] }
  0xdd   : > { %12841 = vmatpush1.bf16.msra.mxu0 %v16944_v5  ;;  %13169 = vmatpush1.bf16.msra.mxu1 %v16946_v6  ;;  %v17073_v5 = vcombine.high %v1040_v63, %v1048_v0  ;;  %v17075_v6 = vcombine.high %v1041_v1, %v1049_v2  ;;  %v1152_v63 = vld [vmem:[%s19514_s9 + $0x1a00] sm:$0xff]  ;;  %v1153_v1 = vld [vmem:[%s19514_s9 + $0x1a08] sm:$0xff] }
  0xde   : > { %12842 = vmatprep.subr.bf16.mxu0 %v16961_v7  ;;  %13170 = vmatprep.subr.bf16.mxu1 %v16963_v8  ;;  %v1056_v7 = vld [vmem:[%s19514_s9 + $0x1700] sm:$0xff]  ;;  %v1161_v2 = vld [vmem:[%s19514_s9 + $0x1a48] sm:$0xff] }
  0xdf   : > { %v1064_v8 = vld [vmem:[%s19514_s9 + $0x1740] sm:$0xff] }
  0xe0   : > { %v17088_v54 = vcombine.low %v1056_v7, %v1064_v8  ;;  %v1160_v0 = vld [vmem:[%s19514_s9 + $0x1a40] sm:$0xff] }
  0xe1   : > { %12843 = vmatpush1.bf16.msra.mxu0 %v16960_v14  ;;  %13171 = vmatpush1.bf16.msra.mxu1 %v16962_v15  ;;  %v17089_v14 = vcombine.high %v1056_v7, %v1064_v8  ;;  %v17091_v15 = vcombine.high %v1057_v9, %v1065_v10  ;;  %v1168_v7 = vld [vmem:[%s19514_s9 + $0x1a80] sm:$0xff]  ;;  %v1169_v9 = vld [vmem:[%s19514_s9 + $0x1a88] sm:$0xff] }
  0xe2   : > { %12844 = vmatprep.subr.bf16.mxu0 %v16977_v17  ;;  %13172 = vmatprep.subr.bf16.mxu1 %v16979_v18  ;;  %v1072_v17 = vld [vmem:[%s19514_s9 + $0x1780] sm:$0xff]  ;;  %v1177_v10 = vld [vmem:[%s19514_s9 + $0x1ac8] sm:$0xff] }
  0xe3   : > { %v1080_v18 = vld [vmem:[%s19514_s9 + $0x17c0] sm:$0xff] }
  0xe4   : > { %v17104_v16 = vcombine.low %v1072_v17, %v1080_v18  ;;  %v1176_v8 = vld [vmem:[%s19514_s9 + $0x1ac0] sm:$0xff] }
  0xe5   : > { %12845 = vmatpush1.bf16.msra.mxu0 %v16976_v24  ;;  %13173 = vmatpush1.bf16.msra.mxu1 %v16978_v25  ;;  %v17105_v24 = vcombine.high %v1072_v17, %v1080_v18  ;;  %v17107_v25 = vcombine.high %v1073_v19, %v1081_v20  ;;  %v1184_v17 = vld [vmem:[%s19514_s9 + $0x1b00] sm:$0xff]  ;;  %v1185_v19 = vld [vmem:[%s19514_s9 + $0x1b08] sm:$0xff] }
  0xe6   : > { %12846 = vmatprep.subr.bf16.mxu0 %v16993_v27  ;;  %13174 = vmatprep.subr.bf16.mxu1 %v16995_v28  ;;  %v1088_v27 = vld [vmem:[%s19514_s9 + $0x1800] sm:$0xff]  ;;  %v1193_v20 = vld [vmem:[%s19514_s9 + $0x1b48] sm:$0xff] }
  0xe7   : > { %v1096_v28 = vld [vmem:[%s19514_s9 + $0x1840] sm:$0xff] }
  0xe8   : > { %v1192_v18 = vld [vmem:[%s19514_s9 + $0x1b40] sm:$0xff] }
  0xe9   : > { %12847 = vmatpush1.bf16.msra.mxu0 %v16992_v33  ;;  %13175 = vmatpush1.bf16.msra.mxu1 %v16994_v34  ;;  %v17121_v33 = vcombine.high %v1088_v27, %v1096_v28  ;;  %v17123_v34 = vcombine.high %v1089_v29, %v1097_v30 }
  0xea   : > { %12848 = vmatprep.subr.bf16.mxu0 %v17009_v35  ;;  %13176 = vmatprep.subr.bf16.mxu1 %v17011_v36  ;;  %v1104_v35 = vld [vmem:[%s19514_s9 + $0x1880] sm:$0xff] }
  0xeb   : > { %v1112_v36 = vld [vmem:[%s19514_s9 + $0x18c0] sm:$0xff] }
  0xed   : > { %12849 = vmatpush1.bf16.msra.mxu0 %v17008_v41  ;;  %13177 = vmatpush1.bf16.msra.mxu1 %v17010_v42  ;;  %v17120_v41 = vcombine.low %v1088_v27, %v1096_v28  ;;  %v17122_v42 = vcombine.low %v1089_v29, %v1097_v30  ;;  %v1200_v27 = vld [vmem:[%s19514_s9 + $0x1b80] sm:$0xff]  ;;  %v1201_v29 = vld [vmem:[%s19514_s9 + $0x1b88] sm:$0xff] }
  0xee   : > { %12850 = vmatprep.subr.bf16.mxu0 %v17025_v43  ;;  %13178 = vmatprep.subr.bf16.mxu1 %v17027_v44  ;;  %v17137_v43 = vcombine.high %v1104_v35, %v1112_v36  ;;  %v17139_v44 = vcombine.high %v1105_v38, %v1113_v39  ;;  %v1208_v28 = vld [vmem:[%s19514_s9 + $0x1bc0] sm:$0xff]  ;;  %v1209_v30 = vld [vmem:[%s19514_s9 + $0x1bc8] sm:$0xff] }
  0xf1   : > { %12851 = vmatpush1.bf16.msra.mxu0 %v17024_v49  ;;  %13179 = vmatpush1.bf16.msra.mxu1 %v17026_v50  ;;  %v17136_v49 = vcombine.low %v1104_v35, %v1112_v36  ;;  %v17138_v50 = vcombine.low %v1105_v38, %v1113_v39  ;;  %v1216_v35 = vld [vmem:[%s19514_s9 + $0x1c00] sm:$0xff]  ;;  %v1217_v38 = vld [vmem:[%s19514_s9 + $0x1c08] sm:$0xff] }
  0xf2   : > { %12852 = vmatprep.subr.bf16.mxu0 %v17041_v51  ;;  %13180 = vmatprep.subr.bf16.mxu1 %v17043_v52  ;;  %v17153_v51 = vcombine.high %v1120_v26, %v1128_v45  ;;  %v17155_v52 = vcombine.high %v1121_v47, %v1129_v48  ;;  %v1224_v36 = vld [vmem:[%s19514_s9 + $0x1c40] sm:$0xff]  ;;  %v1225_v39 = vld [vmem:[%s19514_s9 + $0x1c48] sm:$0xff] }
  0xf5   : > { %12853 = vmatpush1.bf16.msra.mxu0 %v17040_v59  ;;  %13181 = vmatpush1.bf16.msra.mxu1 %v17042_v60  ;;  %v17152_v59 = vcombine.low %v1120_v26, %v1128_v45  ;;  %v17154_v60 = vcombine.low %v1121_v47, %v1129_v48  ;;  %v1232_v26 = vld [vmem:[%s19514_s9 + $0x1c80] sm:$0xff]  ;;  %v1233_v47 = vld [vmem:[%s19514_s9 + $0x1c88] sm:$0xff] }
  0xf6   : > { %12854 = vmatprep.subr.bf16.mxu0 %v17057_v61  ;;  %13182 = vmatprep.subr.bf16.mxu1 %v17059_v62  ;;  %v17169_v61 = vcombine.high %v1136_v53, %v1144_v55  ;;  %v17171_v62 = vcombine.high %v1137_v56, %v1145_v57  ;;  %v1240_v45 = vld [vmem:[%s19514_s9 + $0x1cc0] sm:$0xff]  ;;  %v1241_v48 = vld [vmem:[%s19514_s9 + $0x1cc8] sm:$0xff] }
  0xf9   : > { %12855 = vmatpush1.bf16.msra.mxu0 %v17056_v3  ;;  %13183 = vmatpush1.bf16.msra.mxu1 %v17058_v4  ;;  %v17168_v3 = vcombine.low %v1136_v53, %v1144_v55  ;;  %v17170_v4 = vcombine.low %v1137_v56, %v1145_v57  ;;  %v1248_v53 = vld [vmem:[%s19514_s9 + $0x1d00] sm:$0xff]  ;;  %v1249_v56 = vld [vmem:[%s19514_s9 + $0x1d08] sm:$0xff] }
  0xfa   : > { %12856 = vmatprep.subr.bf16.mxu0 %v17073_v5  ;;  %13184 = vmatprep.subr.bf16.mxu1 %v17075_v6  ;;  %v17185_v5 = vcombine.high %v1152_v63, %v1160_v0  ;;  %v17187_v6 = vcombine.high %v1153_v1, %v1161_v2  ;;  %v1256_v55 = vld [vmem:[%s19514_s9 + $0x1d40] sm:$0xff]  ;;  %v1257_v57 = vld [vmem:[%s19514_s9 + $0x1d48] sm:$0xff] }
  0xfd   : > { %12857 = vmatpush1.bf16.msra.mxu0 %v17072_v11  ;;  %13185 = vmatpush1.bf16.msra.mxu1 %v17074_v12  ;;  %v17184_v11 = vcombine.low %v1152_v63, %v1160_v0  ;;  %v17186_v12 = vcombine.low %v1153_v1, %v1161_v2  ;;  %v1264_v63 = vld [vmem:[%s19514_s9 + $0x1d80] sm:$0xff]  ;;  %v1265_v1 = vld [vmem:[%s19514_s9 + $0x1d88] sm:$0xff] }
  0xfe   : > { %12858 = vmatprep.subr.bf16.mxu0 %v17089_v14  ;;  %13186 = vmatprep.subr.bf16.mxu1 %v17091_v15  ;;  %v17201_v14 = vcombine.high %v1168_v7, %v1176_v8  ;;  %v17203_v15 = vcombine.high %v1169_v9, %v1177_v10  ;;  %v1272_v0 = vld [vmem:[%s19514_s9 + $0x1dc0] sm:$0xff]  ;;  %v1273_v2 = vld [vmem:[%s19514_s9 + $0x1dc8] sm:$0xff] }
 0x101   : > { %12859 = vmatpush1.bf16.msra.mxu0 %v17088_v54  ;;  %13187 = vmatpush1.bf16.msra.mxu1 %v17090_v21  ;;  %v17200_v54 = vcombine.low %v1168_v7, %v1176_v8  ;;  %v17202_v21 = vcombine.low %v1169_v9, %v1177_v10  ;;  %v1280_v7 = vld [vmem:[%s19514_s9 + $0x1e00] sm:$0xff]  ;;  %v1281_v9 = vld [vmem:[%s19514_s9 + $0x1e08] sm:$0xff] }
 0x102   : > { %12860 = vmatprep.subr.bf16.mxu0 %v17105_v24  ;;  %13188 = vmatprep.subr.bf16.mxu1 %v17107_v25  ;;  %v17217_v24 = vcombine.high %v1184_v17, %v1192_v18  ;;  %v17219_v25 = vcombine.high %v1185_v19, %v1193_v20  ;;  %v1288_v8 = vld [vmem:[%s19514_s9 + $0x1e40] sm:$0xff]  ;;  %v1289_v10 = vld [vmem:[%s19514_s9 + $0x1e48] sm:$0xff] }
 0x105   : > { %12861 = vmatpush1.bf16.msra.mxu0 %v17104_v16  ;;  %13189 = vmatpush1.bf16.msra.mxu1 %v17106_v31  ;;  %v17216_v16 = vcombine.low %v1184_v17, %v1192_v18  ;;  %v17218_v31 = vcombine.low %v1185_v19, %v1193_v20  ;;  %v1296_v17 = vld [vmem:[%s19514_s9 + $0x1e80] sm:$0xff]  ;;  %v1297_v19 = vld [vmem:[%s19514_s9 + $0x1e88] sm:$0xff] }
 0x106   : > { %12871 = vmatprep.subr.bf16.mxu0 %v17121_v33  ;;  %13199 = vmatprep.subr.bf16.mxu1 %v17123_v34  ;;  %v17233_v33 = vcombine.high %v1200_v27, %v1208_v28  ;;  %v17235_v34 = vcombine.high %v1201_v29, %v1209_v30  ;;  %v1304_v18 = vld [vmem:[%s19514_s9 + $0x1ec0] sm:$0xff]  ;;  %v1305_v20 = vld [vmem:[%s19514_s9 + $0x1ec8] sm:$0xff] }
 0x108   : > { %12863 = vmatmul.mubr.bf16.vlgmr.msra.gmra.mrb[0].mxu0 %v19785_v37  ;;  %13191 = vmatmul.mubr.bf16.vlgmr.msra.gmra.mrb[0].mxu1 %v19785_v37 }
 0x109   : > { %12872 = vmatpush1.bf16.msra.mxu0 %v17120_v41  ;;  %13200 = vmatpush1.bf16.msra.mxu1 %v17122_v42  ;;  %v17232_v41 = vcombine.low %v1200_v27, %v1208_v28  ;;  %v17234_v42 = vcombine.low %v1201_v29, %v1209_v30  ;;  %v1312_v27 = vld [vmem:[%s19514_s9 + $0x1f00] sm:$0xff]  ;;  %v1313_v29 = vld [vmem:[%s19514_s9 + $0x1f08] sm:$0xff] }
 0x10a   : > { %12873 = vmatprep.subr.bf16.mxu0 %v17137_v43  ;;  %13201 = vmatprep.subr.bf16.mxu1 %v17139_v44  ;;  %v17249_v43 = vcombine.high %v1216_v35, %v1224_v36  ;;  %v17251_v44 = vcombine.high %v1217_v38, %v1225_v39  ;;  %v1320_v28 = vld [vmem:[%s19514_s9 + $0x1f40] sm:$0xff]  ;;  %v1321_v30 = vld [vmem:[%s19514_s9 + $0x1f48] sm:$0xff] }
 0x10b   : > { %12903 = vmatprep.mubr.bf16.mxu0 %v19798_v46  ;;  %13231 = vmatprep.mubr.bf16.mxu1 %v19798_v46 }
 0x10d   : > { %12874 = vmatpush1.bf16.msra.mxu0 %v17136_v49  ;;  %13202 = vmatpush1.bf16.msra.mxu1 %v17138_v50  ;;  %v17248_v49 = vcombine.low %v1216_v35, %v1224_v36  ;;  %v17250_v50 = vcombine.low %v1217_v38, %v1225_v39  ;;  %v1328_v35 = vld [vmem:[%s19514_s9 + $0x1f80] sm:$0xff]  ;;  %v1329_v38 = vld [vmem:[%s19514_s9 + $0x1f88] sm:$0xff] }
 0x10e   : > { %12875 = vmatprep.subr.bf16.mxu0 %v17153_v51  ;;  %13203 = vmatprep.subr.bf16.mxu1 %v17155_v52  ;;  %v17265_v51 = vcombine.high %v1232_v26, %v1240_v45  ;;  %v17267_v52 = vcombine.high %v1233_v47, %v1241_v48  ;;  %v1336_v36 = vld [vmem:[%s19514_s9 + $0x1fc0] sm:$0xff]  ;;  %v1337_v39 = vld [vmem:[%s19514_s9 + $0x1fc8] sm:$0xff] }
 0x111   : > { %12876 = vmatpush1.bf16.msra.mxu0 %v17152_v59  ;;  %13204 = vmatpush1.bf16.msra.mxu1 %v17154_v60  ;;  %v17264_v59 = vcombine.low %v1232_v26, %v1240_v45  ;;  %v17266_v60 = vcombine.low %v1233_v47, %v1241_v48  ;;  %v1344_v26 = vld [vmem:[%s19514_s9 + $0x2000] sm:$0xff]  ;;  %v1345_v47 = vld [vmem:[%s19514_s9 + $0x2008] sm:$0xff] }
 0x112   : > { %12877 = vmatprep.subr.bf16.mxu0 %v17169_v61  ;;  %13205 = vmatprep.subr.bf16.mxu1 %v17171_v62  ;;  %v17281_v61 = vcombine.high %v1248_v53, %v1256_v55  ;;  %v17283_v62 = vcombine.high %v1249_v56, %v1257_v57  ;;  %v1352_v45 = vld [vmem:[%s19514_s9 + $0x2040] sm:$0xff]  ;;  %v1353_v48 = vld [vmem:[%s19514_s9 + $0x2048] sm:$0xff] }
 0x115   : > { %12878 = vmatpush1.bf16.msra.mxu0 %v17168_v3  ;;  %13206 = vmatpush1.bf16.msra.mxu1 %v17170_v4  ;;  %v17280_v3 = vcombine.low %v1248_v53, %v1256_v55  ;;  %v17282_v4 = vcombine.low %v1249_v56, %v1257_v57  ;;  %v1360_v53 = vld [vmem:[%s19514_s9 + $0x2080] sm:$0xff]  ;;  %v19866_v56 = vcombine.low %v19792_v40, %v19792_v40  ;;  %v1361_v57 = vld [vmem:[%s19514_s9 + $0x2088] sm:$0xff] }
 0x116   : > { %12879 = vmatprep.subr.bf16.mxu0 %v17185_v5  ;;  %13207 = vmatprep.subr.bf16.mxu1 %v17187_v6  ;;  %v17297_v5 = vcombine.high %v1264_v63, %v1272_v0  ;;  %v17299_v6 = vcombine.high %v1265_v1, %v1273_v2  ;;  %v1368_v55 = vld [vmem:[%s19514_s9 + $0x20c0] sm:$0xff] }
 0x117   : > { %v1376_v40 = vld [vmem:[%s19514_s9 + $0x2100] sm:$0xff] }
 0x119   : > { %12880 = vmatpush1.bf16.msra.mxu0 %v17184_v11  ;;  %13208 = vmatpush1.bf16.msra.mxu1 %v17186_v12  ;;  %v17296_v11 = vcombine.low %v1264_v63, %v1272_v0  ;;  %v17298_v12 = vcombine.low %v1265_v1, %v1273_v2  ;;  %v17393_v63 = vcombine.high %v1360_v53, %v1368_v55  ;;  %v1384_v1 = vld [vmem:[%s19514_s9 + $0x2140] sm:$0xff] }
 0x11a   : > { %12881 = vmatprep.subr.bf16.mxu0 %v17201_v14  ;;  %13209 = vmatprep.subr.bf16.mxu1 %v17203_v15  ;;  %v17313_v14 = vcombine.high %v1280_v7, %v1288_v8  ;;  %v17315_v15 = vcombine.high %v1281_v9, %v1289_v10 }
 0x11d   : > { %12882 = vmatpush1.bf16.msra.mxu0 %v17200_v54  ;;  %13210 = vmatpush1.bf16.msra.mxu1 %v17202_v21  ;;  %v17312_v54 = vcombine.low %v1280_v7, %v1288_v8  ;;  %v17314_v21 = vcombine.low %v1281_v9, %v1289_v10  ;;  %v17409_v7 = vcombine.high %v1376_v40, %v1384_v1  ;;  %v1392_v9 = vld [vmem:[%s19514_s9 + $0x2180] sm:$0xff] }
 0x11e   : > { %12883 = vmatprep.subr.bf16.mxu0 %v17217_v24  ;;  %13211 = vmatprep.subr.bf16.mxu1 %v17219_v25  ;;  %v17329_v24 = vcombine.high %v1296_v17, %v1304_v18  ;;  %v17331_v25 = vcombine.high %v1297_v19, %v1305_v20  ;;  %v1400_v10 = vld [vmem:[%s19514_s9 + $0x21c0] sm:$0xff] }
 0x121   : > { %12884 = vmatpush1.bf16.msra.mxu0 %v17216_v16  ;;  %13212 = vmatpush1.bf16.msra.mxu1 %v17218_v31  ;;  %v17328_v16 = vcombine.low %v1296_v17, %v1304_v18  ;;  %v17330_v31 = vcombine.low %v1297_v19, %v1305_v20  ;;  %v17425_v17 = vcombine.high %v1392_v9, %v1400_v10  ;;  %v1408_v19 = vld [vmem:[%s19514_s9 + $0x2200] sm:$0xff] }
 0x122   : > { %12885 = vmatprep.subr.bf16.mxu0 %v17233_v33  ;;  %13213 = vmatprep.subr.bf16.mxu1 %v17235_v34  ;;  %v17345_v33 = vcombine.high %v1312_v27, %v1320_v28  ;;  %v17347_v34 = vcombine.high %v1313_v29, %v1321_v30  ;;  %v1416_v20 = vld [vmem:[%s19514_s9 + $0x2240] sm:$0xff] }
 0x125   : > { %12886 = vmatpush1.bf16.msra.mxu0 %v17232_v41  ;;  %13214 = vmatpush1.bf16.msra.mxu1 %v17234_v42  ;;  %v17344_v41 = vcombine.low %v1312_v27, %v1320_v28  ;;  %v17346_v42 = vcombine.low %v1313_v29, %v1321_v30  ;;  %v17441_v27 = vcombine.high %v1408_v19, %v1416_v20  ;;  %v1424_v29 = vld [vmem:[%s19514_s9 + $0x2280] sm:$0xff] }
 0x126   : > { %12887 = vmatprep.subr.bf16.mxu0 %v17249_v43  ;;  %13215 = vmatprep.subr.bf16.mxu1 %v17251_v44  ;;  %v17361_v43 = vcombine.high %v1328_v35, %v1336_v36  ;;  %v17363_v44 = vcombine.high %v1329_v38, %v1337_v39  ;;  %v1432_v30 = vld [vmem:[%s19514_s9 + $0x22c0] sm:$0xff] }
 0x129   : > { %12888 = vmatpush1.bf16.msra.mxu0 %v17248_v49  ;;  %13216 = vmatpush1.bf16.msra.mxu1 %v17250_v50  ;;  %v17360_v49 = vcombine.low %v1328_v35, %v1336_v36  ;;  %v17362_v50 = vcombine.low %v1329_v38, %v1337_v39  ;;  %v17457_v35 = vcombine.high %v1424_v29, %v1432_v30  ;;  %v1440_v38 = vld [vmem:[%s19514_s9 + $0x2300] sm:$0xff] }
 0x12a   : > { %12889 = vmatprep.subr.bf16.mxu0 %v17265_v51  ;;  %13217 = vmatprep.subr.bf16.mxu1 %v17267_v52  ;;  %v17377_v51 = vcombine.high %v1344_v26, %v1352_v45  ;;  %v17379_v52 = vcombine.high %v1345_v47, %v1353_v48  ;;  %v1448_v39 = vld [vmem:[%s19514_s9 + $0x2340] sm:$0xff] }
 0x12d   : > { %12890 = vmatpush1.bf16.msra.mxu0 %v17264_v59  ;;  %13218 = vmatpush1.bf16.msra.mxu1 %v17266_v60  ;;  %v1369_v59 = vld [vmem:[%s19514_s9 + $0x20c8] sm:$0xff]  ;;  %v19873_v60 = vld [vmem:[%s22193_s0 + $0x20] sm:$0xff] }
 0x12e   : > { %12891 = vmatprep.subr.bf16.mxu0 %v17281_v61  ;;  %13219 = vmatprep.subr.bf16.mxu1 %v17283_v62  ;;  %v17376_v61 = vcombine.low %v1344_v26, %v1352_v45  ;;  %v17378_v62 = vcombine.low %v1345_v47, %v1353_v48  ;;  %v17395_v0 = vcombine.high %v1361_v57, %v1369_v59  ;;  %v1456_v47 = vld [vmem:[%s19514_s9 + $0x2380] sm:$0xff] }
 0x12f   : > { %v19879_v2 = vcombine.high %v19873_v60, %v19873_v60  ;;  %v17473_v26 = vcombine.high %v1440_v38, %v1448_v39  ;;  %v1464_v48 = vld [vmem:[%s19514_s9 + $0x23c0] sm:$0xff] }
 0x131   : > { %12892 = vmatpush1.bf16.msra.mxu0 %v17280_v3  ;;  %13220 = vmatpush1.bf16.msra.mxu1 %v17282_v4  ;;  %v1377_v3 = vld [vmem:[%s19514_s9 + $0x2108] sm:$0xff] }
 0x132   : > { %12893 = vmatprep.subr.bf16.mxu0 %v17297_v5  ;;  %13221 = vmatprep.subr.bf16.mxu1 %v17299_v6  ;;  %v1385_v4 = vld [vmem:[%s19514_s9 + $0x2148] sm:$0xff]  ;;  %v17392_v5 = vcombine.low %v1360_v53, %v1368_v55  ;;  %v17394_v6 = vcombine.low %v1361_v57, %v1369_v59  ;;  %v17489_v53 = vcombine.high %v1456_v47, %v1464_v48  ;;  %v1472_v57 = vld [vmem:[%s19514_s9 + $0x2400] sm:$0xff] }
 0x133   : > { %v17411_v8 = vcombine.high %v1377_v3, %v1385_v4  ;;  %v1480_v59 = vld [vmem:[%s19514_s9 + $0x2440] sm:$0xff] }
 0x135   : > { %12894 = vmatpush1.bf16.msra.mxu0 %v17296_v11  ;;  %13222 = vmatpush1.bf16.msra.mxu1 %v17298_v12  ;;  %v1393_v11 = vld [vmem:[%s19514_s9 + $0x2188] sm:$0xff] }
 0x136   : > { %12895 = vmatprep.subr.bf16.mxu0 %v17313_v14  ;;  %13223 = vmatprep.subr.bf16.mxu1 %v17315_v15  ;;  %v1401_v12 = vld [vmem:[%s19514_s9 + $0x21c8] sm:$0xff]  ;;  %v17408_v14 = vcombine.low %v1376_v40, %v1384_v1  ;;  %v17410_v15 = vcombine.low %v1377_v3, %v1385_v4  ;;  %v17505_v40 = vcombine.high %v1472_v57, %v1480_v59  ;;  %v1488_v3 = vld [vmem:[%s19514_s9 + $0x2480] sm:$0xff] }
 0x137   : > { %v17427_v18 = vcombine.high %v1393_v11, %v1401_v12  ;;  %v1496_v4 = vld [vmem:[%s19514_s9 + $0x24c0] sm:$0xff] }
 0x139   : > { %12896 = vmatpush1.bf16.msra.mxu0 %v17312_v54  ;;  %13224 = vmatpush1.bf16.msra.mxu1 %v17314_v21  ;;  %v1409_v54 = vld [vmem:[%s19514_s9 + $0x2208] sm:$0xff] }
 0x13a   : > { %12897 = vmatprep.subr.bf16.mxu0 %v17329_v24  ;;  %13225 = vmatprep.subr.bf16.mxu1 %v17331_v25  ;;  %v1417_v21 = vld [vmem:[%s19514_s9 + $0x2248] sm:$0xff]  ;;  %v17424_v24 = vcombine.low %v1392_v9, %v1400_v10  ;;  %v17426_v25 = vcombine.low %v1393_v11, %v1401_v12  ;;  %v17521_v9 = vcombine.high %v1488_v3, %v1496_v4  ;;  %v1504_v11 = vld [vmem:[%s19514_s9 + $0x2500] sm:$0xff] }
 0x13b   : > { %v17443_v28 = vcombine.high %v1409_v54, %v1417_v21  ;;  %v1512_v12 = vld [vmem:[%s19514_s9 + $0x2540] sm:$0xff] }
 0x13d   : > { %12898 = vmatpush1.bf16.msra.mxu0 %v17328_v16  ;;  %13226 = vmatpush1.bf16.msra.mxu1 %v17330_v31  ;;  %v1425_v16 = vld [vmem:[%s19514_s9 + $0x2288] sm:$0xff] }
 0x13e   : > { %12899 = vmatprep.subr.bf16.mxu0 %v17345_v33  ;;  %13227 = vmatprep.subr.bf16.mxu1 %v17347_v34  ;;  %v1433_v31 = vld [vmem:[%s19514_s9 + $0x22c8] sm:$0xff]  ;;  %v17440_v33 = vcombine.low %v1408_v19, %v1416_v20  ;;  %v17442_v34 = vcombine.low %v1409_v54, %v1417_v21  ;;  %v17537_v19 = vcombine.high %v1504_v11, %v1512_v12  ;;  %v1520_v54 = vld [vmem:[%s19514_s9 + $0x2580] sm:$0xff] }
 0x13f   : > { %v17459_v36 = vcombine.high %v1425_v16, %v1433_v31  ;;  %v1528_v21 = vld [vmem:[%s19514_s9 + $0x25c0] sm:$0xff] }
 0x141   : > { %12900 = vmatpush1.bf16.msra.mxu0 %v17344_v41  ;;  %13228 = vmatpush1.bf16.msra.mxu1 %v17346_v42  ;;  %v1441_v41 = vld [vmem:[%s19514_s9 + $0x2308] sm:$0xff] }
 0x142   : > { %12901 = vmatprep.subr.bf16.mxu0 %v17361_v43  ;;  %13229 = vmatprep.subr.bf16.mxu1 %v17363_v44  ;;  %v1449_v42 = vld [vmem:[%s19514_s9 + $0x2348] sm:$0xff]  ;;  %v17456_v43 = vcombine.low %v1424_v29, %v1432_v30  ;;  %v17458_v44 = vcombine.low %v1425_v16, %v1433_v31  ;;  %v17553_v29 = vcombine.high %v1520_v54, %v1528_v21  ;;  %v1536_v16 = vld [vmem:[%s19514_s9 + $0x2600] sm:$0xff] }
 0x143   : > { %v17475_v45 = vcombine.high %v1441_v41, %v1449_v42  ;;  %v1544_v31 = vld [vmem:[%s19514_s9 + $0x2640] sm:$0xff] }
 0x145   : > { %12902 = vmatpush1.bf16.msra.mxu0 %v17360_v49  ;;  %13230 = vmatpush1.bf16.msra.mxu1 %v17362_v50  ;;  %v1457_v49 = vld [vmem:[%s19514_s9 + $0x2388] sm:$0xff] }
 0x146   : > { %12912 = vmatprep.subr.bf16.mxu0 %v17377_v51  ;;  %13240 = vmatprep.subr.bf16.mxu1 %v17379_v52  ;;  %v1465_v50 = vld [vmem:[%s19514_s9 + $0x23c8] sm:$0xff]  ;;  %v17472_v51 = vcombine.low %v1440_v38, %v1448_v39  ;;  %v17474_v52 = vcombine.low %v1441_v41, %v1449_v42  ;;  %v17569_v38 = vcombine.high %v1536_v16, %v1544_v31  ;;  %v1552_v41 = vld [vmem:[%s19514_s9 + $0x2680] sm:$0xff] }
 0x147   : > { %v17491_v55 = vcombine.high %v1457_v49, %v1465_v50  ;;  %v1560_v42 = vld [vmem:[%s19514_s9 + $0x26c0] sm:$0xff] }
 0x148   : > { %12904 = vmatmul.mubr.bf16.vlgmr.msra.gmra.mrb[0].mxu0 %v19866_v56  ;;  %13232 = vmatmul.mubr.bf16.vlgmr.msra.gmra.mrb[0].mxu1 %v19866_v56 }
 0x149   : > { %12913 = vmatpush1.bf16.msra.mxu0 %v17376_v61  ;;  %13241 = vmatpush1.bf16.msra.mxu1 %v17378_v62  ;;  %v1473_v61 = vld [vmem:[%s19514_s9 + $0x2408] sm:$0xff] }
 0x14a   : > { %12914 = vmatprep.subr.bf16.mxu0 %v17393_v63  ;;  %13242 = vmatprep.subr.bf16.mxu1 %v17395_v0  ;;  %v1481_v62 = vld [vmem:[%s19514_s9 + $0x2448] sm:$0xff]  ;;  %v17488_v63 = vcombine.low %v1456_v47, %v1464_v48  ;;  %v17490_v0 = vcombine.low %v1457_v49, %v1465_v50  ;;  %v17585_v47 = vcombine.high %v1552_v41, %v1560_v42  ;;  %v1568_v49 = vld [vmem:[%s19514_s9 + $0x2700] sm:$0xff] }
 0x14b   : > { %12944 = vmatprep.mubr.bf16.mxu0 %v19879_v2  ;;  %13272 = vmatprep.mubr.bf16.mxu1 %v19879_v2  ;;  %v17507_v1 = vcombine.high %v1473_v61, %v1481_v62  ;;  %v1576_v50 = vld [vmem:[%s19514_s9 + $0x2740] sm:$0xff] }
 0x14d   : > { %12915 = vmatpush1.bf16.msra.mxu0 %v17392_v5  ;;  %13243 = vmatpush1.bf16.msra.mxu1 %v17394_v6  ;;  %v1489_v5 = vld [vmem:[%s19514_s9 + $0x2488] sm:$0xff] }
 0x14e   : > { %12916 = vmatprep.subr.bf16.mxu0 %v17409_v7  ;;  %13244 = vmatprep.subr.bf16.mxu1 %v17411_v8  ;;  %v1497_v6 = vld [vmem:[%s19514_s9 + $0x24c8] sm:$0xff]  ;;  %v17504_v7 = vcombine.low %v1472_v57, %v1480_v59  ;;  %v17506_v8 = vcombine.low %v1473_v61, %v1481_v62  ;;  %v17601_v57 = vcombine.high %v1568_v49, %v1576_v50  ;;  %v1584_v61 = vld [vmem:[%s19514_s9 + $0x2780] sm:$0xff] }
 0x14f   : > { %v17523_v10 = vcombine.high %v1489_v5, %v1497_v6  ;;  %v1592_v62 = vld [vmem:[%s19514_s9 + $0x27c0] sm:$0xff] }
 0x151   : > { %12917 = vmatpush1.bf16.msra.mxu0 %v17408_v14  ;;  %13245 = vmatpush1.bf16.msra.mxu1 %v17410_v15  ;;  %v1505_v14 = vld [vmem:[%s19514_s9 + $0x2508] sm:$0xff] }
 0x152   : > { %12918 = vmatprep.subr.bf16.mxu0 %v17425_v17  ;;  %13246 = vmatprep.subr.bf16.mxu1 %v17427_v18  ;;  %v1513_v15 = vld [vmem:[%s19514_s9 + $0x2548] sm:$0xff]  ;;  %v17520_v17 = vcombine.low %v1488_v3, %v1496_v4  ;;  %v17522_v18 = vcombine.low %v1489_v5, %v1497_v6  ;;  %v17617_v3 = vcombine.high %v1584_v61, %v1592_v62  ;;  %v1600_v5 = vld [vmem:[%s19514_s9 + $0x2800] sm:$0xff] }
 0x153   : > { %v17539_v20 = vcombine.high %v1505_v14, %v1513_v15  ;;  %v1608_v6 = vld [vmem:[%s19514_s9 + $0x2840] sm:$0xff] }
 0x155   : > { %12919 = vmatpush1.bf16.msra.mxu0 %v17424_v24  ;;  %13247 = vmatpush1.bf16.msra.mxu1 %v17426_v25  ;;  %v1521_v24 = vld [vmem:[%s19514_s9 + $0x2588] sm:$0xff] }
 0x156   : > { %12920 = vmatprep.subr.bf16.mxu0 %v17441_v27  ;;  %13248 = vmatprep.subr.bf16.mxu1 %v17443_v28  ;;  %v1529_v25 = vld [vmem:[%s19514_s9 + $0x25c8] sm:$0xff]  ;;  %v17536_v27 = vcombine.low %v1504_v11, %v1512_v12  ;;  %v17538_v28 = vcombine.low %v1505_v14, %v1513_v15  ;;  %v17633_v11 = vcombine.high %v1600_v5, %v1608_v6  ;;  %v1616_v14 = vld [vmem:[%s19514_s9 + $0x2880] sm:$0xff] }
 0x157   : > { %v17555_v30 = vcombine.high %v1521_v24, %v1529_v25  ;;  %v1624_v15 = vld [vmem:[%s19514_s9 + $0x28c0] sm:$0xff] }
 0x159   : > { %12921 = vmatpush1.bf16.msra.mxu0 %v17440_v33  ;;  %13249 = vmatpush1.bf16.msra.mxu1 %v17442_v34  ;;  %v1537_v33 = vld [vmem:[%s19514_s9 + $0x2608] sm:$0xff] }
 0x15a   : > { %12922 = vmatprep.subr.bf16.mxu0 %v17457_v35  ;;  %13250 = vmatprep.subr.bf16.mxu1 %v17459_v36  ;;  %v1545_v34 = vld [vmem:[%s19514_s9 + $0x2648] sm:$0xff]  ;;  %v17552_v35 = vcombine.low %v1520_v54, %v1528_v21  ;;  %v17554_v36 = vcombine.low %v1521_v24, %v1529_v25  ;;  %v17632_v54 = vcombine.low %v1600_v5, %v1608_v6 }
 0x15b   : > { %v17571_v39 = vcombine.high %v1537_v33, %v1545_v34  ;;  %v17649_v24 = vcombine.high %v1616_v14, %v1624_v15 }
 0x15d   : > { %12923 = vmatpush1.bf16.msra.mxu0 %v17456_v43  ;;  %13251 = vmatpush1.bf16.msra.mxu1 %v17458_v44  ;;  %v1553_v43 = vld [vmem:[%s19514_s9 + $0x2688] sm:$0xff] }
 0x15e   : > { %12924 = vmatprep.subr.bf16.mxu0 %v17473_v26  ;;  %13252 = vmatprep.subr.bf16.mxu1 %v17475_v45  ;;  %v1561_v44 = vld [vmem:[%s19514_s9 + $0x26c8] sm:$0xff]  ;;  %v17568_v26 = vcombine.low %v1536_v16, %v1544_v31  ;;  %v17570_v45 = vcombine.low %v1537_v33, %v1545_v34  ;;  %v17648_v16 = vcombine.low %v1616_v14, %v1624_v15 }
 0x15f   : > { %v17587_v48 = vcombine.high %v1553_v43, %v1561_v44 }
 0x161   : > { %12925 = vmatpush1.bf16.msra.mxu0 %v17472_v51  ;;  %13253 = vmatpush1.bf16.msra.mxu1 %v17474_v52  ;;  %v1569_v51 = vld [vmem:[%s19514_s9 + $0x2708] sm:$0xff] }
 0x162   : > { %12926 = vmatprep.subr.bf16.mxu0 %v17489_v53  ;;  %13254 = vmatprep.subr.bf16.mxu1 %v17491_v55  ;;  %v1577_v52 = vld [vmem:[%s19514_s9 + $0x2748] sm:$0xff]  ;;  %v17584_v53 = vcombine.low %v1552_v41, %v1560_v42  ;;  %v17586_v55 = vcombine.low %v1553_v43, %v1561_v44 }
 0x163   : > { %v17603_v59 = vcombine.high %v1569_v51, %v1577_v52 }
 0x165   : > { %12927 = vmatpush1.bf16.msra.mxu0 %v17488_v63  ;;  %13255 = vmatpush1.bf16.msra.mxu1 %v17490_v0  ;;  %v1585_v63 = vld [vmem:[%s19514_s9 + $0x2788] sm:$0xff] }
 0x166   : > { %12928 = vmatprep.subr.bf16.mxu0 %v17505_v40  ;;  %13256 = vmatprep.subr.bf16.mxu1 %v17507_v1  ;;  %v1593_v0 = vld [vmem:[%s19514_s9 + $0x27c8] sm:$0xff]  ;;  %v17600_v40 = vcombine.low %v1568_v49, %v1576_v50  ;;  %v17602_v1 = vcombine.low %v1569_v51, %v1577_v52 }
 0x167   : > { %v17619_v4 = vcombine.high %v1585_v63, %v1593_v0 }
 0x169   : > { %12929 = vmatpush1.bf16.msra.mxu0 %v17504_v7  ;;  %13257 = vmatpush1.bf16.msra.mxu1 %v17506_v8  ;;  %v1601_v7 = vld [vmem:[%s19514_s9 + $0x2808] sm:$0xff] }
 0x16a   : > { %12930 = vmatprep.subr.bf16.mxu0 %v17521_v9  ;;  %13258 = vmatprep.subr.bf16.mxu1 %v17523_v10  ;;  %v1609_v8 = vld [vmem:[%s19514_s9 + $0x2848] sm:$0xff]  ;;  %v17616_v9 = vcombine.low %v1584_v61, %v1592_v62  ;;  %v17618_v10 = vcombine.low %v1585_v63, %v1593_v0 }
 0x16b   : > { %v17635_v12 = vcombine.high %v1601_v7, %v1609_v8  ;;  %v17634_v21 = vcombine.low %v1601_v7, %v1609_v8 }
 0x16d   : > { %12931 = vmatpush1.bf16.msra.mxu0 %v17520_v17  ;;  %13259 = vmatpush1.bf16.msra.mxu1 %v17522_v18  ;;  %v19947_v17 = vcombine.low %v19873_v60, %v19873_v60  ;;  %v1617_v18 = vld [vmem:[%s19514_s9 + $0x2888] sm:$0xff]  ;;  %v1632_v60 = vld [vmem:[%s19514_s9 + $0x2900] sm:$0xff] }
 0x16e   : > { %12932 = vmatprep.subr.bf16.mxu0 %v17537_v19  ;;  %13260 = vmatprep.subr.bf16.mxu1 %v17539_v20  ;;  %v1625_v19 = vld [vmem:[%s19514_s9 + $0x28c8] sm:$0xff]  ;;  %v19954_v20 = vld [vmem:[%s22193_s0 + $0x28] sm:$0xff] }
 0x16f   : > { %v17651_v25 = vcombine.high %v1617_v18, %v1625_v19  ;;  %v17650_v31 = vcombine.low %v1617_v18, %v1625_v19 }
 0x171   : > { %12933 = vmatpush1.bf16.msra.mxu0 %v17536_v27  ;;  %13261 = vmatpush1.bf16.msra.mxu1 %v17538_v28  ;;  %v1640_v27 = vld [vmem:[%s19514_s9 + $0x2940] sm:$0xff]  ;;  %v19960_v28 = vcombine.high %v19954_v20, %v19954_v20 }
 0x172   : > { %12934 = vmatprep.subr.bf16.mxu0 %v17553_v29  ;;  %13262 = vmatprep.subr.bf16.mxu1 %v17555_v30  ;;  %v1633_v29 = vld [vmem:[%s19514_s9 + $0x2908] sm:$0xff]  ;;  %v17665_v33 = vcombine.high %v1632_v60, %v1640_v27  ;;  %v17664_v41 = vcombine.low %v1632_v60, %v1640_v27 }
 0x173   : > { %v1641_v30 = vld [vmem:[%s19514_s9 + $0x2948] sm:$0xff] }
 0x174   : > { %v17667_v34 = vcombine.high %v1633_v29, %v1641_v30  ;;  %v17666_v42 = vcombine.low %v1633_v29, %v1641_v30 }
 0x175   : > { %12935 = vmatpush1.bf16.msra.mxu0 %v17552_v35  ;;  %13263 = vmatpush1.bf16.msra.mxu1 %v17554_v36  ;;  %v1648_v35 = vld [vmem:[%s19514_s9 + $0x2980] sm:$0xff] }
 0x176   : > { %12936 = vmatprep.subr.bf16.mxu0 %v17569_v38  ;;  %13264 = vmatprep.subr.bf16.mxu1 %v17571_v39  ;;  %v1656_v36 = vld [vmem:[%s19514_s9 + $0x29c0] sm:$0xff]  ;;  %v1649_v38 = vld [vmem:[%s19514_s9 + $0x2988] sm:$0xff] }
 0x177   : > { %v1657_v39 = vld [vmem:[%s19514_s9 + $0x29c8] sm:$0xff]  ;;  %v17681_v43 = vcombine.high %v1648_v35, %v1656_v36  ;;  %v17680_v49 = vcombine.low %v1648_v35, %v1656_v36 }
 0x178   : > { %v17683_v44 = vcombine.high %v1649_v38, %v1657_v39  ;;  %v17682_v50 = vcombine.low %v1649_v38, %v1657_v39 }
 0x179   : > { %12937 = vmatpush1.bf16.msra.mxu0 %v17568_v26  ;;  %13265 = vmatpush1.bf16.msra.mxu1 %v17570_v45  ;;  %v1664_v26 = vld [vmem:[%s19514_s9 + $0x2a00] sm:$0xff] }
 0x17a   : > { %12938 = vmatprep.subr.bf16.mxu0 %v17585_v47  ;;  %13266 = vmatprep.subr.bf16.mxu1 %v17587_v48  ;;  %v1672_v45 = vld [vmem:[%s19514_s9 + $0x2a40] sm:$0xff]  ;;  %v1665_v47 = vld [vmem:[%s19514_s9 + $0x2a08] sm:$0xff] }
 0x17b   : > { %v1673_v48 = vld [vmem:[%s19514_s9 + $0x2a48] sm:$0xff]  ;;  %v17697_v51 = vcombine.high %v1664_v26, %v1672_v45  ;;  %v17696_v61 = vcombine.low %v1664_v26, %v1672_v45 }
 0x17c   : > { %v17699_v52 = vcombine.high %v1665_v47, %v1673_v48  ;;  %v17698_v62 = vcombine.low %v1665_v47, %v1673_v48 }
 0x17d   : > { %12939 = vmatpush1.bf16.msra.mxu0 %v17584_v53  ;;  %13267 = vmatpush1.bf16.msra.mxu1 %v17586_v55  ;;  %v1680_v53 = vld [vmem:[%s19514_s9 + $0x2a80] sm:$0xff] }
 0x17e   : > { %12940 = vmatprep.subr.bf16.mxu0 %v17601_v57  ;;  %13268 = vmatprep.subr.bf16.mxu1 %v17603_v59  ;;  %v1688_v55 = vld [vmem:[%s19514_s9 + $0x2ac0] sm:$0xff]  ;;  %v1681_v57 = vld [vmem:[%s19514_s9 + $0x2a88] sm:$0xff] }
 0x17f   : > { %v1689_v59 = vld [vmem:[%s19514_s9 + $0x2ac8] sm:$0xff]  ;;  %v17713_v63 = vcombine.high %v1680_v53, %v1688_v55  ;;  %v17712_v5 = vcombine.low %v1680_v53, %v1688_v55 }
 0x180   : > { %v17715_v0 = vcombine.high %v1681_v57, %v1689_v59  ;;  %v17714_v6 = vcombine.low %v1681_v57, %v1689_v59 }
 0x181   : > { %12941 = vmatpush1.bf16.msra.mxu0 %v17600_v40  ;;  %13269 = vmatpush1.bf16.msra.mxu1 %v17602_v1  ;;  %v1696_v40 = vld [vmem:[%s19514_s9 + $0x2b00] sm:$0xff] }
 0x182   : > { %12942 = vmatprep.subr.bf16.mxu0 %v17617_v3  ;;  %13270 = vmatprep.subr.bf16.mxu1 %v17619_v4  ;;  %v1704_v1 = vld [vmem:[%s19514_s9 + $0x2b40] sm:$0xff]  ;;  %v1697_v3 = vld [vmem:[%s19514_s9 + $0x2b08] sm:$0xff] }
 0x183   : > { %v1705_v4 = vld [vmem:[%s19514_s9 + $0x2b48] sm:$0xff]  ;;  %v17729_v7 = vcombine.high %v1696_v40, %v1704_v1  ;;  %v17728_v14 = vcombine.low %v1696_v40, %v1704_v1 }
 0x184   : > { %v17731_v8 = vcombine.high %v1697_v3, %v1705_v4  ;;  %v17730_v15 = vcombine.low %v1697_v3, %v1705_v4 }
 0x185   : > { %12943 = vmatpush1.bf16.msra.mxu0 %v17616_v9  ;;  %13271 = vmatpush1.bf16.msra.mxu1 %v17618_v10  ;;  %v1712_v9 = vld [vmem:[%s19514_s9 + $0x2b80] sm:$0xff] }
 0x186   : > { %12953 = vmatprep.subr.bf16.mxu0 %v17633_v11  ;;  %13281 = vmatprep.subr.bf16.mxu1 %v17635_v12  ;;  %v1720_v10 = vld [vmem:[%s19514_s9 + $0x2bc0] sm:$0xff]  ;;  %v1713_v11 = vld [vmem:[%s19514_s9 + $0x2b88] sm:$0xff] }
 0x187   : > { %v1721_v12 = vld [vmem:[%s19514_s9 + $0x2bc8] sm:$0xff]  ;;  %v17745_v18 = vcombine.high %v1712_v9, %v1720_v10  ;;  %v17744_v60 = vcombine.low %v1712_v9, %v1720_v10 }
 0x188   : > { %12945 = vmatmul.mubr.bf16.vlgmr.msra.gmra.mrb[0].mxu0 %v19947_v17  ;;  %13273 = vmatmul.mubr.bf16.vlgmr.msra.gmra.mrb[0].mxu1 %v19947_v17  ;;  %v17747_v19 = vcombine.high %v1713_v11, %v1721_v12  ;;  %v17746_v27 = vcombine.low %v1713_v11, %v1721_v12 }
 0x189   : > { %12954 = vmatpush1.bf16.msra.mxu0 %v17632_v54  ;;  %13282 = vmatpush1.bf16.msra.mxu1 %v17634_v21  ;;  %v1728_v54 = vld [vmem:[%s19514_s9 + $0x2c00] sm:$0xff] }
 0x18a   : > { %12955 = vmatprep.subr.bf16.mxu0 %v17649_v24  ;;  %13283 = vmatprep.subr.bf16.mxu1 %v17651_v25  ;;  %v1736_v21 = vld [vmem:[%s19514_s9 + $0x2c40] sm:$0xff]  ;;  %v1729_v24 = vld [vmem:[%s19514_s9 + $0x2c08] sm:$0xff] }
 0x18b   : > { %12985 = vmatprep.mubr.bf16.mxu0 %v19960_v28  ;;  %13313 = vmatprep.mubr.bf16.mxu1 %v19960_v28  ;;  %v1737_v25 = vld [vmem:[%s19514_s9 + $0x2c48] sm:$0xff]  ;;  %v17761_v29 = vcombine.high %v1728_v54, %v1736_v21  ;;  %v17760_v35 = vcombine.low %v1728_v54, %v1736_v21 }
 0x18c   : > { %v17763_v30 = vcombine.high %v1729_v24, %v1737_v25  ;;  %v17762_v36 = vcombine.low %v1729_v24, %v1737_v25 }
 0x18d   : > { %12956 = vmatpush1.bf16.msra.mxu0 %v17648_v16  ;;  %13284 = vmatpush1.bf16.msra.mxu1 %v17650_v31  ;;  %v1744_v16 = vld [vmem:[%s19514_s9 + $0x2c80] sm:$0xff] }
 0x18e   : > { %12957 = vmatprep.subr.bf16.mxu0 %v17665_v33  ;;  %13285 = vmatprep.subr.bf16.mxu1 %v17667_v34  ;;  %v1752_v31 = vld [vmem:[%s19514_s9 + $0x2cc0] sm:$0xff]  ;;  %v1745_v33 = vld [vmem:[%s19514_s9 + $0x2c88] sm:$0xff] }
 0x18f   : > { %v1753_v34 = vld [vmem:[%s19514_s9 + $0x2cc8] sm:$0xff]  ;;  %v17777_v38 = vcombine.high %v1744_v16, %v1752_v31  ;;  %v17776_v26 = vcombine.low %v1744_v16, %v1752_v31 }
 0x190   : > { %v17779_v39 = vcombine.high %v1745_v33, %v1753_v34  ;;  %v17778_v45 = vcombine.low %v1745_v33, %v1753_v34 }
 0x191   : > { %12958 = vmatpush1.bf16.msra.mxu0 %v17664_v41  ;;  %13286 = vmatpush1.bf16.msra.mxu1 %v17666_v42  ;;  %v1760_v41 = vld [vmem:[%s19514_s9 + $0x2d00] sm:$0xff] }
 0x192   : > { %12959 = vmatprep.subr.bf16.mxu0 %v17681_v43  ;;  %13287 = vmatprep.subr.bf16.mxu1 %v17683_v44  ;;  %v1768_v42 = vld [vmem:[%s19514_s9 + $0x2d40] sm:$0xff]  ;;  %v1761_v43 = vld [vmem:[%s19514_s9 + $0x2d08] sm:$0xff] }
 0x193   : > { %v1769_v44 = vld [vmem:[%s19514_s9 + $0x2d48] sm:$0xff]  ;;  %v17793_v47 = vcombine.high %v1760_v41, %v1768_v42  ;;  %v17792_v53 = vcombine.low %v1760_v41, %v1768_v42 }
 0x194   : > { %v17795_v48 = vcombine.high %v1761_v43, %v1769_v44  ;;  %v17794_v55 = vcombine.low %v1761_v43, %v1769_v44 }
 0x195   : > { %12960 = vmatpush1.bf16.msra.mxu0 %v17680_v49  ;;  %13288 = vmatpush1.bf16.msra.mxu1 %v17682_v50  ;;  %v1776_v49 = vld [vmem:[%s19514_s9 + $0x2d80] sm:$0xff] }
 0x196   : > { %12961 = vmatprep.subr.bf16.mxu0 %v17697_v51  ;;  %13289 = vmatprep.subr.bf16.mxu1 %v17699_v52  ;;  %v1784_v50 = vld [vmem:[%s19514_s9 + $0x2dc0] sm:$0xff]  ;;  %v1777_v51 = vld [vmem:[%s19514_s9 + $0x2d88] sm:$0xff] }
 0x197   : > { %v1785_v52 = vld [vmem:[%s19514_s9 + $0x2dc8] sm:$0xff]  ;;  %v17809_v57 = vcombine.high %v1776_v49, %v1784_v50  ;;  %v17808_v40 = vcombine.low %v1776_v49, %v1784_v50 }
 0x198   : > { %v17811_v59 = vcombine.high %v1777_v51, %v1785_v52  ;;  %v17810_v1 = vcombine.low %v1777_v51, %v1785_v52  ;;  %v1881_v49 = vld [vmem:[%s19514_s9 + $0x30c8] sm:$0xff] }
 0x199   : > { %12962 = vmatpush1.bf16.msra.mxu0 %v17696_v61  ;;  %13290 = vmatpush1.bf16.msra.mxu1 %v17698_v62  ;;  %v1792_v61 = vld [vmem:[%s19514_s9 + $0x2e00] sm:$0xff]  ;;  %v20035_v50 = vld [vmem:[%s22193_s0 + $0x30] sm:$0xff] }
 0x19a   : > { %12963 = vmatprep.subr.bf16.mxu0 %v17713_v63  ;;  %13291 = vmatprep.subr.bf16.mxu1 %v17715_v0  ;;  %v1800_v62 = vld [vmem:[%s19514_s9 + $0x2e40] sm:$0xff]  ;;  %v1793_v63 = vld [vmem:[%s19514_s9 + $0x2e08] sm:$0xff] }
 0x19b   : > { %v1801_v0 = vld [vmem:[%s19514_s9 + $0x2e48] sm:$0xff]  ;;  %v17825_v3 = vcombine.high %v1792_v61, %v1800_v62  ;;  %v17824_v9 = vcombine.low %v1792_v61, %v1800_v62 }
 0x19c   : > { %v17827_v4 = vcombine.high %v1793_v63, %v1801_v0  ;;  %v17826_v10 = vcombine.low %v1793_v63, %v1801_v0  ;;  %v1889_v61 = vld [vmem:[%s19514_s9 + $0x3108] sm:$0xff] }
 0x19d   : > { %12964 = vmatpush1.bf16.msra.mxu0 %v17712_v5  ;;  %13292 = vmatpush1.bf16.msra.mxu1 %v17714_v6  ;;  %v1808_v5 = vld [vmem:[%s19514_s9 + $0x2e80] sm:$0xff]  ;;  %v1897_v62 = vld [vmem:[%s19514_s9 + $0x3148] sm:$0xff] }
 0x19e   : > { %12965 = vmatprep.subr.bf16.mxu0 %v17729_v7  ;;  %13293 = vmatprep.subr.bf16.mxu1 %v17731_v8  ;;  %v1816_v6 = vld [vmem:[%s19514_s9 + $0x2ec0] sm:$0xff]  ;;  %v1809_v7 = vld [vmem:[%s19514_s9 + $0x2e88] sm:$0xff] }
 0x19f   : > { %v1817_v8 = vld [vmem:[%s19514_s9 + $0x2ec8] sm:$0xff]  ;;  %v17841_v11 = vcombine.high %v1808_v5, %v1816_v6  ;;  %v17840_v54 = vcombine.low %v1808_v5, %v1816_v6 }
 0x1a0   : > { %v17843_v12 = vcombine.high %v1809_v7, %v1817_v8  ;;  %v17842_v21 = vcombine.low %v1809_v7, %v1817_v8  ;;  %v1905_v5 = vld [vmem:[%s19514_s9 + $0x3188] sm:$0xff]  ;;  %v17922_v8 = vcombine.low %v1889_v61, %v1897_v62 }
 0x1a1   : > { %12966 = vmatpush1.bf16.msra.mxu0 %v17728_v14  ;;  %13294 = vmatpush1.bf16.msra.mxu1 %v17730_v15  ;;  %v1824_v14 = vld [vmem:[%s19514_s9 + $0x2f00] sm:$0xff]  ;;  %v1913_v6 = vld [vmem:[%s19514_s9 + $0x31c8] sm:$0xff] }
 0x1a2   : > { %12967 = vmatprep.subr.bf16.mxu0 %v17745_v18  ;;  %13295 = vmatprep.subr.bf16.mxu1 %v17747_v19  ;;  %v1832_v15 = vld [vmem:[%s19514_s9 + $0x2f40] sm:$0xff]  ;;  %v1825_v18 = vld [vmem:[%s19514_s9 + $0x2f08] sm:$0xff] }
 0x1a3   : > { %v1833_v19 = vld [vmem:[%s19514_s9 + $0x2f48] sm:$0xff]  ;;  %v17857_v24 = vcombine.high %v1824_v14, %v1832_v15  ;;  %v17856_v16 = vcombine.low %v1824_v14, %v1832_v15 }
 0x1a4   : > { %v17859_v25 = vcombine.high %v1825_v18, %v1833_v19  ;;  %v17858_v31 = vcombine.low %v1825_v18, %v1833_v19  ;;  %v1921_v14 = vld [vmem:[%s19514_s9 + $0x3208] sm:$0xff]  ;;  %v17938_v19 = vcombine.low %v1905_v5, %v1913_v6 }
 0x1a5   : > { %12968 = vmatpush1.bf16.msra.mxu0 %v17744_v60  ;;  %13296 = vmatpush1.bf16.msra.mxu1 %v17746_v27  ;;  %v1840_v60 = vld [vmem:[%s19514_s9 + $0x2f80] sm:$0xff]  ;;  %v1929_v15 = vld [vmem:[%s19514_s9 + $0x3248] sm:$0xff] }
 0x1a6   : > { %12969 = vmatprep.subr.bf16.mxu0 %v17761_v29  ;;  %13297 = vmatprep.subr.bf16.mxu1 %v17763_v30  ;;  %v1848_v27 = vld [vmem:[%s19514_s9 + $0x2fc0] sm:$0xff]  ;;  %v1841_v29 = vld [vmem:[%s19514_s9 + $0x2f88] sm:$0xff] }
 0x1a7   : > { %v1849_v30 = vld [vmem:[%s19514_s9 + $0x2fc8] sm:$0xff]  ;;  %v17873_v33 = vcombine.high %v1840_v60, %v1848_v27  ;;  %v17872_v41 = vcombine.low %v1840_v60, %v1848_v27 }
 0x1a8   : > { %v17875_v34 = vcombine.high %v1841_v29, %v1849_v30  ;;  %v17874_v42 = vcombine.low %v1841_v29, %v1849_v30  ;;  %v1937_v60 = vld [vmem:[%s19514_s9 + $0x3288] sm:$0xff]  ;;  %v17954_v30 = vcombine.low %v1921_v14, %v1929_v15 }
 0x1a9   : > { %12970 = vmatpush1.bf16.msra.mxu0 %v17760_v35  ;;  %13298 = vmatpush1.bf16.msra.mxu1 %v17762_v36  ;;  %v1856_v35 = vld [vmem:[%s19514_s9 + $0x3000] sm:$0xff]  ;;  %v1945_v27 = vld [vmem:[%s19514_s9 + $0x32c8] sm:$0xff] }
 0x1aa   : > { %12971 = vmatprep.subr.bf16.mxu0 %v17777_v38  ;;  %13299 = vmatprep.subr.bf16.mxu1 %v17779_v39  ;;  %v1864_v36 = vld [vmem:[%s19514_s9 + $0x3040] sm:$0xff]  ;;  %v1857_v38 = vld [vmem:[%s19514_s9 + $0x3008] sm:$0xff] }
 0x1ab   : > { %v1865_v39 = vld [vmem:[%s19514_s9 + $0x3048] sm:$0xff]  ;;  %v17889_v43 = vcombine.high %v1856_v35, %v1864_v36  ;;  %v17888_v51 = vcombine.low %v1856_v35, %v1864_v36 }
 0x1ac   : > { %v17891_v44 = vcombine.high %v1857_v38, %v1865_v39  ;;  %v17890_v52 = vcombine.low %v1857_v38, %v1865_v39  ;;  %v1953_v35 = vld [vmem:[%s19514_s9 + $0x3308] sm:$0xff]  ;;  %v17970_v39 = vcombine.low %v1937_v60, %v1945_v27 }
 0x1ad   : > { %12972 = vmatpush1.bf16.msra.mxu0 %v17776_v26  ;;  %13300 = vmatpush1.bf16.msra.mxu1 %v17778_v45  ;;  %v1872_v26 = vld [vmem:[%s19514_s9 + $0x3080] sm:$0xff]  ;;  %v1961_v36 = vld [vmem:[%s19514_s9 + $0x3348] sm:$0xff] }
 0x1ae   : > { %12973 = vmatprep.subr.bf16.mxu0 %v17793_v47  ;;  %13301 = vmatprep.subr.bf16.mxu1 %v17795_v48  ;;  %v1880_v45 = vld [vmem:[%s19514_s9 + $0x30c0] sm:$0xff]  ;;  %v20028_v47 = vcombine.low %v19954_v20, %v19954_v20  ;;  %v1873_v48 = vld [vmem:[%s19514_s9 + $0x3088] sm:$0xff] }
 0x1af   : > { %v1888_v20 = vld [vmem:[%s19514_s9 + $0x3100] sm:$0xff]  ;;  %v17904_v63 = vcombine.low %v1872_v26, %v1880_v45  ;;  %v17906_v0 = vcombine.low %v1873_v48, %v1881_v49 }
 0x1b1   : > { %12974 = vmatpush1.bf16.msra.mxu0 %v17792_v53  ;;  %13302 = vmatpush1.bf16.msra.mxu1 %v17794_v55  ;;  %v17905_v53 = vcombine.high %v1872_v26, %v1880_v45  ;;  %v17907_v55 = vcombine.high %v1873_v48, %v1881_v49  ;;  %v1969_v26 = vld [vmem:[%s19514_s9 + $0x3388] sm:$0xff]  ;;  %v17986_v49 = vcombine.low %v1953_v35, %v1961_v36 }
 0x1b2   : > { %12975 = vmatprep.subr.bf16.mxu0 %v17809_v57  ;;  %13303 = vmatprep.subr.bf16.mxu1 %v17811_v59  ;;  %v1896_v57 = vld [vmem:[%s19514_s9 + $0x3140] sm:$0xff]  ;;  %v20041_v59 = vcombine.high %v20035_v50, %v20035_v50  ;;  %v1977_v45 = vld [vmem:[%s19514_s9 + $0x33c8] sm:$0xff] }
 0x1b3   : > { %v17920_v7 = vcombine.low %v1888_v20, %v1896_v57 }
 0x1b5   : > { %12976 = vmatpush1.bf16.msra.mxu0 %v17808_v40  ;;  %13304 = vmatpush1.bf16.msra.mxu1 %v17810_v1  ;;  %v17921_v40 = vcombine.high %v1888_v20, %v1896_v57  ;;  %v17923_v1 = vcombine.high %v1889_v61, %v1897_v62  ;;  %v1985_v20 = vld [vmem:[%s19514_s9 + $0x3408] sm:$0xff]  ;;  %v18002_v62 = vcombine.low %v1969_v26, %v1977_v45 }
 0x1b6   : > { %12977 = vmatprep.subr.bf16.mxu0 %v17825_v3  ;;  %13305 = vmatprep.subr.bf16.mxu1 %v17827_v4  ;;  %v1904_v3 = vld [vmem:[%s19514_s9 + $0x3180] sm:$0xff]  ;;  %v1993_v57 = vld [vmem:[%s19514_s9 + $0x3448] sm:$0xff] }
 0x1b7   : > { %v1912_v4 = vld [vmem:[%s19514_s9 + $0x31c0] sm:$0xff] }
 0x1b8   : > { %v17936_v18 = vcombine.low %v1904_v3, %v1912_v4 }
 0x1b9   : > { %12978 = vmatpush1.bf16.msra.mxu0 %v17824_v9  ;;  %13306 = vmatpush1.bf16.msra.mxu1 %v17826_v10  ;;  %v17937_v9 = vcombine.high %v1904_v3, %v1912_v4  ;;  %v17939_v10 = vcombine.high %v1905_v5, %v1913_v6  ;;  %v2001_v3 = vld [vmem:[%s19514_s9 + $0x3488] sm:$0xff]  ;;  %v18018_v6 = vcombine.low %v1985_v20, %v1993_v57 }
 0x1ba   : > { %12979 = vmatprep.subr.bf16.mxu0 %v17841_v11  ;;  %13307 = vmatprep.subr.bf16.mxu1 %v17843_v12  ;;  %v1920_v11 = vld [vmem:[%s19514_s9 + $0x3200] sm:$0xff]  ;;  %v2009_v4 = vld [vmem:[%s19514_s9 + $0x34c8] sm:$0xff] }
 0x1bb   : > { %v1928_v12 = vld [vmem:[%s19514_s9 + $0x3240] sm:$0xff] }
 0x1bc   : > { %v17952_v29 = vcombine.low %v1920_v11, %v1928_v12 }
 0x1bd   : > { %12980 = vmatpush1.bf16.msra.mxu0 %v17840_v54  ;;  %13308 = vmatpush1.bf16.msra.mxu1 %v17842_v21  ;;  %v17953_v54 = vcombine.high %v1920_v11, %v1928_v12  ;;  %v17955_v21 = vcombine.high %v1921_v14, %v1929_v15  ;;  %v2017_v11 = vld [vmem:[%s19514_s9 + $0x3508] sm:$0xff]  ;;  %v18034_v15 = vcombine.low %v2001_v3, %v2009_v4 }
 0x1be   : > { %12981 = vmatprep.subr.bf16.mxu0 %v17857_v24  ;;  %13309 = vmatprep.subr.bf16.mxu1 %v17859_v25  ;;  %v1936_v24 = vld [vmem:[%s19514_s9 + $0x3280] sm:$0xff]  ;;  %v2025_v12 = vld [vmem:[%s19514_s9 + $0x3548] sm:$0xff] }
 0x1bf   : > { %v1944_v25 = vld [vmem:[%s19514_s9 + $0x32c0] sm:$0xff] }
 0x1c0   : > { %v17968_v38 = vcombine.low %v1936_v24, %v1944_v25 }
 0x1c1   : > { %12982 = vmatpush1.bf16.msra.mxu0 %v17856_v16  ;;  %13310 = vmatpush1.bf16.msra.mxu1 %v17858_v31  ;;  %v17969_v16 = vcombine.high %v1936_v24, %v1944_v25  ;;  %v17971_v31 = vcombine.high %v1937_v60, %v1945_v27  ;;  %v2033_v24 = vld [vmem:[%s19514_s9 + $0x3588] sm:$0xff]  ;;  %v18050_v27 = vcombine.low %v2017_v11, %v2025_v12 }
 0x1c2   : > { %12983 = vmatprep.subr.bf16.mxu0 %v17873_v33  ;;  %13311 = vmatprep.subr.bf16.mxu1 %v17875_v34  ;;  %v1952_v33 = vld [vmem:[%s19514_s9 + $0x3300] sm:$0xff]  ;;  %v2041_v25 = vld [vmem:[%s19514_s9 + $0x35c8] sm:$0xff] }
 0x1c3   : > { %v1960_v34 = vld [vmem:[%s19514_s9 + $0x3340] sm:$0xff] }
 0x1c4   : > { %v17984_v48 = vcombine.low %v1952_v33, %v1960_v34 }
 0x1c5   : > { %12984 = vmatpush1.bf16.msra.mxu0 %v17872_v41  ;;  %13312 = vmatpush1.bf16.msra.mxu1 %v17874_v42  ;;  %v17985_v41 = vcombine.high %v1952_v33, %v1960_v34  ;;  %v17987_v42 = vcombine.high %v1953_v35, %v1961_v36  ;;  %v2049_v33 = vld [vmem:[%s19514_s9 + $0x3608] sm:$0xff]  ;;  %v18066_v36 = vcombine.low %v2033_v24, %v2041_v25 }
 0x1c6   : > { %12994 = vmatprep.subr.bf16.mxu0 %v17889_v43  ;;  %13322 = vmatprep.subr.bf16.mxu1 %v17891_v44  ;;  %v1968_v43 = vld [vmem:[%s19514_s9 + $0x3380] sm:$0xff]  ;;  %v2057_v34 = vld [vmem:[%s19514_s9 + $0x3648] sm:$0xff] }
 0x1c7   : > { %v1976_v44 = vld [vmem:[%s19514_s9 + $0x33c0] sm:$0xff] }
 0x1c8   : > { %12986 = vmatmul.mubr.bf16.vlgmr.msra.gmra.mrb[0].mxu0 %v20028_v47  ;;  %13314 = vmatmul.mubr.bf16.vlgmr.msra.gmra.mrb[0].mxu1 %v20028_v47  ;;  %v18000_v61 = vcombine.low %v1968_v43, %v1976_v44 }
 0x1c9   : > { %12995 = vmatpush1.bf16.msra.mxu0 %v17888_v51  ;;  %13323 = vmatpush1.bf16.msra.mxu1 %v17890_v52  ;;  %v18001_v51 = vcombine.high %v1968_v43, %v1976_v44  ;;  %v18003_v52 = vcombine.high %v1969_v26, %v1977_v45  ;;  %v2065_v43 = vld [vmem:[%s19514_s9 + $0x3688] sm:$0xff]  ;;  %v18082_v45 = vcombine.low %v2049_v33, %v2057_v34 }
 0x1ca   : > { %12996 = vmatprep.subr.bf16.mxu0 %v17905_v53  ;;  %13324 = vmatprep.subr.bf16.mxu1 %v17907_v55  ;;  %v1984_v53 = vld [vmem:[%s19514_s9 + $0x3400] sm:$0xff]  ;;  %v2073_v44 = vld [vmem:[%s19514_s9 + $0x36c8] sm:$0xff] }
 0x1cb   : > { %13026 = vmatprep.mubr.bf16.mxu0 %v20041_v59  ;;  %13354 = vmatprep.mubr.bf16.mxu1 %v20041_v59  ;;  %v1992_v55 = vld [vmem:[%s19514_s9 + $0x3440] sm:$0xff] }
 0x1cc   : > { %v18016_v5 = vcombine.low %v1984_v53, %v1992_v55 }
 0x1cd   : > { %12997 = vmatpush1.bf16.msra.mxu0 %v17904_v63  ;;  %13325 = vmatpush1.bf16.msra.mxu1 %v17906_v0  ;;  %v18017_v63 = vcombine.high %v1984_v53, %v1992_v55  ;;  %v18019_v0 = vcombine.high %v1985_v20, %v1993_v57  ;;  %v2081_v53 = vld [vmem:[%s19514_s9 + $0x3708] sm:$0xff]  ;;  %v18098_v57 = vcombine.low %v2065_v43, %v2073_v44 }
 0x1ce   : > { %12998 = vmatprep.subr.bf16.mxu0 %v17921_v40  ;;  %13326 = vmatprep.subr.bf16.mxu1 %v17923_v1  ;;  %v2000_v40 = vld [vmem:[%s19514_s9 + $0x3480] sm:$0xff]  ;;  %v2089_v55 = vld [vmem:[%s19514_s9 + $0x3748] sm:$0xff] }
 0x1cf   : > { %v2008_v1 = vld [vmem:[%s19514_s9 + $0x34c0] sm:$0xff] }
 0x1d0   : > { %v18032_v14 = vcombine.low %v2000_v40, %v2008_v1 }
 0x1d1   : > { %12999 = vmatpush1.bf16.msra.mxu0 %v17920_v7  ;;  %13327 = vmatpush1.bf16.msra.mxu1 %v17922_v8  ;;  %v18033_v7 = vcombine.high %v2000_v40, %v2008_v1  ;;  %v18035_v8 = vcombine.high %v2001_v3, %v2009_v4  ;;  %v2097_v40 = vld [vmem:[%s19514_s9 + $0x3788] sm:$0xff]  ;;  %v18114_v4 = vcombine.low %v2081_v53, %v2089_v55 }
 0x1d2   : > { %13000 = vmatprep.subr.bf16.mxu0 %v17937_v9  ;;  %13328 = vmatprep.subr.bf16.mxu1 %v17939_v10  ;;  %v2016_v9 = vld [vmem:[%s19514_s9 + $0x3500] sm:$0xff]  ;;  %v2105_v1 = vld [vmem:[%s19514_s9 + $0x37c8] sm:$0xff] }
 0x1d3   : > { %v2024_v10 = vld [vmem:[%s19514_s9 + $0x3540] sm:$0xff] }
 0x1d4   : > { %v18048_v60 = vcombine.low %v2016_v9, %v2024_v10 }
 0x1d5   : > { %13001 = vmatpush1.bf16.msra.mxu0 %v17936_v18  ;;  %13329 = vmatpush1.bf16.msra.mxu1 %v17938_v19  ;;  %v18049_v18 = vcombine.high %v2016_v9, %v2024_v10  ;;  %v18051_v19 = vcombine.high %v2017_v11, %v2025_v12  ;;  %v2113_v9 = vld [vmem:[%s19514_s9 + $0x3808] sm:$0xff]  ;;  %v18130_v12 = vcombine.low %v2097_v40, %v2105_v1 }
 0x1d6   : > { %13002 = vmatprep.subr.bf16.mxu0 %v17953_v54  ;;  %13330 = vmatprep.subr.bf16.mxu1 %v17955_v21  ;;  %v2032_v54 = vld [vmem:[%s19514_s9 + $0x3580] sm:$0xff]  ;;  %v2121_v10 = vld [vmem:[%s19514_s9 + $0x3848] sm:$0xff] }
 0x1d7   : > { %v2040_v21 = vld [vmem:[%s19514_s9 + $0x35c0] sm:$0xff] }
 0x1d8   : > { %v18064_v35 = vcombine.low %v2032_v54, %v2040_v21 }
 0x1d9   : > { %13003 = vmatpush1.bf16.msra.mxu0 %v17952_v29  ;;  %13331 = vmatpush1.bf16.msra.mxu1 %v17954_v30  ;;  %v18065_v29 = vcombine.high %v2032_v54, %v2040_v21  ;;  %v18067_v30 = vcombine.high %v2033_v24, %v2041_v25  ;;  %v20109_v54 = vcombine.low %v20035_v50, %v20035_v50  ;;  %v2129_v21 = vld [vmem:[%s19514_s9 + $0x3888] sm:$0xff]  ;;  %v20116_v25 = vld [vmem:[%s22193_s0 + $0x38] sm:$0xff]  ;;  %v2144_v50 = vld [vmem:[%s19514_s9 + $0x3900] sm:$0xff] }
 0x1da   : > { %13004 = vmatprep.subr.bf16.mxu0 %v17969_v16  ;;  %13332 = vmatprep.subr.bf16.mxu1 %v17971_v31  ;;  %v2048_v16 = vld [vmem:[%s19514_s9 + $0x3600] sm:$0xff]  ;;  %v2137_v24 = vld [vmem:[%s19514_s9 + $0x38c8] sm:$0xff] }
 0x1db   : > { %v2056_v31 = vld [vmem:[%s19514_s9 + $0x3640] sm:$0xff] }
 0x1dc   : > { %v18080_v26 = vcombine.low %v2048_v16, %v2056_v31 }
 0x1dd   : > { %13005 = vmatpush1.bf16.msra.mxu0 %v17968_v38  ;;  %13333 = vmatpush1.bf16.msra.mxu1 %v17970_v39  ;;  %v18081_v38 = vcombine.high %v2048_v16, %v2056_v31  ;;  %v18083_v39 = vcombine.high %v2049_v33, %v2057_v34  ;;  %v2152_v16 = vld [vmem:[%s19514_s9 + $0x3940] sm:$0xff]  ;;  %v20122_v31 = vcombine.high %v20116_v25, %v20116_v25  ;;  %v2145_v33 = vld [vmem:[%s19514_s9 + $0x3908] sm:$0xff] }
 0x1de   : > { %13006 = vmatprep.subr.bf16.mxu0 %v17985_v41  ;;  %13334 = vmatprep.subr.bf16.mxu1 %v17987_v42  ;;  %v2064_v41 = vld [vmem:[%s19514_s9 + $0x3680] sm:$0xff]  ;;  %v2153_v34 = vld [vmem:[%s19514_s9 + $0x3948] sm:$0xff] }
 0x1df   : > { %v2072_v42 = vld [vmem:[%s19514_s9 + $0x36c0] sm:$0xff] }
 0x1e0   : > { %v18096_v20 = vcombine.low %v2064_v41, %v2072_v42 }
 0x1e1   : > { %13007 = vmatpush1.bf16.msra.mxu0 %v17984_v48  ;;  %13335 = vmatpush1.bf16.msra.mxu1 %v17986_v49  ;;  %v18097_v48 = vcombine.high %v2064_v41, %v2072_v42  ;;  %v18099_v49 = vcombine.high %v2065_v43, %v2073_v44  ;;  %v2160_v41 = vld [vmem:[%s19514_s9 + $0x3980] sm:$0xff]  ;;  %v2161_v43 = vld [vmem:[%s19514_s9 + $0x3988] sm:$0xff] }
 0x1e2   : > { %13008 = vmatprep.subr.bf16.mxu0 %v18001_v51  ;;  %13336 = vmatprep.subr.bf16.mxu1 %v18003_v52  ;;  %v2080_v51 = vld [vmem:[%s19514_s9 + $0x3700] sm:$0xff]  ;;  %v2169_v44 = vld [vmem:[%s19514_s9 + $0x39c8] sm:$0xff] }
 0x1e3   : > { %v2088_v52 = vld [vmem:[%s19514_s9 + $0x3740] sm:$0xff] }
 0x1e4   : > { %v18112_v3 = vcombine.low %v2080_v51, %v2088_v52  ;;  %v2168_v42 = vld [vmem:[%s19514_s9 + $0x39c0] sm:$0xff] }
 0x1e5   : > { %13009 = vmatpush1.bf16.msra.mxu0 %v18000_v61  ;;  %13337 = vmatpush1.bf16.msra.mxu1 %v18002_v62  ;;  %v18113_v61 = vcombine.high %v2080_v51, %v2088_v52  ;;  %v18115_v62 = vcombine.high %v2081_v53, %v2089_v55  ;;  %v2176_v51 = vld [vmem:[%s19514_s9 + $0x3a00] sm:$0xff]  ;;  %v2177_v53 = vld [vmem:[%s19514_s9 + $0x3a08] sm:$0xff] }
 0x1e6   : > { %13010 = vmatprep.subr.bf16.mxu0 %v18017_v63  ;;  %13338 = vmatprep.subr.bf16.mxu1 %v18019_v0  ;;  %v2096_v63 = vld [vmem:[%s19514_s9 + $0x3780] sm:$0xff]  ;;  %v2185_v55 = vld [vmem:[%s19514_s9 + $0x3a48] sm:$0xff] }
 0x1e7   : > { %v2104_v0 = vld [vmem:[%s19514_s9 + $0x37c0] sm:$0xff] }
 0x1e8   : > { %v18128_v11 = vcombine.low %v2096_v63, %v2104_v0  ;;  %v2184_v52 = vld [vmem:[%s19514_s9 + $0x3a40] sm:$0xff] }
 0x1e9   : > { %13011 = vmatpush1.bf16.msra.mxu0 %v18016_v5  ;;  %13339 = vmatpush1.bf16.msra.mxu1 %v18018_v6  ;;  %v18129_v5 = vcombine.high %v2096_v63, %v2104_v0  ;;  %v18131_v6 = vcombine.high %v2097_v40, %v2105_v1  ;;  %v2192_v63 = vld [vmem:[%s19514_s9 + $0x3a80] sm:$0xff]  ;;  %v2193_v40 = vld [vmem:[%s19514_s9 + $0x3a88] sm:$0xff] }
 0x1ea   : > { %13012 = vmatprep.subr.bf16.mxu0 %v18033_v7  ;;  %13340 = vmatprep.subr.bf16.mxu1 %v18035_v8  ;;  %v2112_v7 = vld [vmem:[%s19514_s9 + $0x3800] sm:$0xff]  ;;  %v2201_v1 = vld [vmem:[%s19514_s9 + $0x3ac8] sm:$0xff] }
 0x1eb   : > { %v2120_v8 = vld [vmem:[%s19514_s9 + $0x3840] sm:$0xff] }
 0x1ec   : > { %v2200_v0 = vld [vmem:[%s19514_s9 + $0x3ac0] sm:$0xff] }
 0x1ed   : > { %13013 = vmatpush1.bf16.msra.mxu0 %v18032_v14  ;;  %13341 = vmatpush1.bf16.msra.mxu1 %v18034_v15  ;;  %v18145_v14 = vcombine.high %v2112_v7, %v2120_v8  ;;  %v18147_v15 = vcombine.high %v2113_v9, %v2121_v10 }
 0x1ee   : > { %13014 = vmatprep.subr.bf16.mxu0 %v18049_v18  ;;  %13342 = vmatprep.subr.bf16.mxu1 %v18051_v19  ;;  %v2128_v18 = vld [vmem:[%s19514_s9 + $0x3880] sm:$0xff] }
 0x1ef   : > { %v2136_v19 = vld [vmem:[%s19514_s9 + $0x38c0] sm:$0xff] }
 0x1f1   : > { %13015 = vmatpush1.bf16.msra.mxu0 %v18048_v60  ;;  %13343 = vmatpush1.bf16.msra.mxu1 %v18050_v27  ;;  %v18144_v60 = vcombine.low %v2112_v7, %v2120_v8  ;;  %v18146_v27 = vcombine.low %v2113_v9, %v2121_v10  ;;  %v2208_v7 = vld [vmem:[%s19514_s9 + $0x3b00] sm:$0xff]  ;;  %v2209_v9 = vld [vmem:[%s19514_s9 + $0x3b08] sm:$0xff] }
 0x1f2   : > { %13016 = vmatprep.subr.bf16.mxu0 %v18065_v29  ;;  %13344 = vmatprep.subr.bf16.mxu1 %v18067_v30  ;;  %v18161_v29 = vcombine.high %v2128_v18, %v2136_v19  ;;  %v18163_v30 = vcombine.high %v2129_v21, %v2137_v24  ;;  %v2216_v8 = vld [vmem:[%s19514_s9 + $0x3b40] sm:$0xff]  ;;  %v2217_v10 = vld [vmem:[%s19514_s9 + $0x3b48] sm:$0xff] }
 0x1f5   : > { %13017 = vmatpush1.bf16.msra.mxu0 %v18064_v35  ;;  %13345 = vmatpush1.bf16.msra.mxu1 %v18066_v36  ;;  %v18160_v35 = vcombine.low %v2128_v18, %v2136_v19  ;;  %v18162_v36 = vcombine.low %v2129_v21, %v2137_v24  ;;  %v2224_v18 = vld [vmem:[%s19514_s9 + $0x3b80] sm:$0xff]  ;;  %v2225_v21 = vld [vmem:[%s19514_s9 + $0x3b88] sm:$0xff] }
 0x1f6   : > { %13018 = vmatprep.subr.bf16.mxu0 %v18081_v38  ;;  %13346 = vmatprep.subr.bf16.mxu1 %v18083_v39  ;;  %v18177_v38 = vcombine.high %v2144_v50, %v2152_v16  ;;  %v18179_v39 = vcombine.high %v2145_v33, %v2153_v34  ;;  %v2232_v19 = vld [vmem:[%s19514_s9 + $0x3bc0] sm:$0xff]  ;;  %v2233_v24 = vld [vmem:[%s19514_s9 + $0x3bc8] sm:$0xff] }
 0x1f9   : > { %13019 = vmatpush1.bf16.msra.mxu0 %v18080_v26  ;;  %13347 = vmatpush1.bf16.msra.mxu1 %v18082_v45  ;;  %v18176_v26 = vcombine.low %v2144_v50, %v2152_v16  ;;  %v18178_v45 = vcombine.low %v2145_v33, %v2153_v34  ;;  %v2240_v50 = vld [vmem:[%s19514_s9 + $0x3c00] sm:$0xff]  ;;  %v2241_v33 = vld [vmem:[%s19514_s9 + $0x3c08] sm:$0xff] }
 0x1fa   : > { %13020 = vmatprep.subr.bf16.mxu0 %v18097_v48  ;;  %13348 = vmatprep.subr.bf16.mxu1 %v18099_v49  ;;  %v18193_v48 = vcombine.high %v2160_v41, %v2168_v42  ;;  %v18195_v49 = vcombine.high %v2161_v43, %v2169_v44  ;;  %v2248_v16 = vld [vmem:[%s19514_s9 + $0x3c40] sm:$0xff]  ;;  %v2249_v34 = vld [vmem:[%s19514_s9 + $0x3c48] sm:$0xff] }
 0x1fd   : > { %13021 = vmatpush1.bf16.msra.mxu0 %v18096_v20  ;;  %13349 = vmatpush1.bf16.msra.mxu1 %v18098_v57  ;;  %v18192_v20 = vcombine.low %v2160_v41, %v2168_v42  ;;  %v18194_v57 = vcombine.low %v2161_v43, %v2169_v44  ;;  %v2256_v41 = vld [vmem:[%s19514_s9 + $0x3c80] sm:$0xff]  ;;  %v2257_v43 = vld [vmem:[%s19514_s9 + $0x3c88] sm:$0xff] }
 0x1fe   : > { %13022 = vmatprep.subr.bf16.mxu0 %v18113_v61  ;;  %13350 = vmatprep.subr.bf16.mxu1 %v18115_v62  ;;  %v18209_v61 = vcombine.high %v2176_v51, %v2184_v52  ;;  %v18211_v62 = vcombine.high %v2177_v53, %v2185_v55  ;;  %v2264_v42 = vld [vmem:[%s19514_s9 + $0x3cc0] sm:$0xff]  ;;  %v2265_v44 = vld [vmem:[%s19514_s9 + $0x3cc8] sm:$0xff] }
 0x201   : > { %13023 = vmatpush1.bf16.msra.mxu0 %v18112_v3  ;;  %13351 = vmatpush1.bf16.msra.mxu1 %v18114_v4  ;;  %v18208_v3 = vcombine.low %v2176_v51, %v2184_v52  ;;  %v18210_v4 = vcombine.low %v2177_v53, %v2185_v55  ;;  %v2272_v51 = vld [vmem:[%s19514_s9 + $0x3d00] sm:$0xff]  ;;  %v2273_v53 = vld [vmem:[%s19514_s9 + $0x3d08] sm:$0xff] }
 0x202   : > { %13024 = vmatprep.subr.bf16.mxu0 %v18129_v5  ;;  %13352 = vmatprep.subr.bf16.mxu1 %v18131_v6  ;;  %v18225_v5 = vcombine.high %v2192_v63, %v2200_v0  ;;  %v18227_v6 = vcombine.high %v2193_v40, %v2201_v1  ;;  %v2280_v52 = vld [vmem:[%s19514_s9 + $0x3d40] sm:$0xff]  ;;  %v2281_v55 = vld [vmem:[%s19514_s9 + $0x3d48] sm:$0xff] }
 0x205   : > { %13025 = vmatpush1.bf16.msra.mxu0 %v18128_v11  ;;  %13353 = vmatpush1.bf16.msra.mxu1 %v18130_v12  ;;  %v18224_v11 = vcombine.low %v2192_v63, %v2200_v0  ;;  %v18226_v12 = vcombine.low %v2193_v40, %v2201_v1  ;;  %v2288_v63 = vld [vmem:[%s19514_s9 + $0x3d80] sm:$0xff]  ;;  %v2289_v40 = vld [vmem:[%s19514_s9 + $0x3d88] sm:$0xff] }
 0x206   : > { %13035 = vmatprep.subr.bf16.mxu0 %v18145_v14  ;;  %13363 = vmatprep.subr.bf16.mxu1 %v18147_v15  ;;  %v18241_v14 = vcombine.high %v2208_v7, %v2216_v8  ;;  %v18243_v15 = vcombine.high %v2209_v9, %v2217_v10  ;;  %v2296_v0 = vld [vmem:[%s19514_s9 + $0x3dc0] sm:$0xff]  ;;  %v2297_v1 = vld [vmem:[%s19514_s9 + $0x3dc8] sm:$0xff] }
 0x208   : > { %13027 = vmatmul.mubr.bf16.vlgmr.msra.gmra.mrb[0].mxu0 %v20109_v54  ;;  %13355 = vmatmul.mubr.bf16.vlgmr.msra.gmra.mrb[0].mxu1 %v20109_v54 }
 0x209   : > { %13036 = vmatpush1.bf16.msra.mxu0 %v18144_v60  ;;  %13364 = vmatpush1.bf16.msra.mxu1 %v18146_v27  ;;  %v18240_v60 = vcombine.low %v2208_v7, %v2216_v8  ;;  %v18242_v27 = vcombine.low %v2209_v9, %v2217_v10  ;;  %v2304_v7 = vld [vmem:[%s19514_s9 + $0x3e00] sm:$0xff]  ;;  %v2305_v9 = vld [vmem:[%s19514_s9 + $0x3e08] sm:$0xff] }
 0x20a   : > { %13037 = vmatprep.subr.bf16.mxu0 %v18161_v29  ;;  %13365 = vmatprep.subr.bf16.mxu1 %v18163_v30  ;;  %v18257_v29 = vcombine.high %v2224_v18, %v2232_v19  ;;  %v18259_v30 = vcombine.high %v2225_v21, %v2233_v24  ;;  %v2312_v8 = vld [vmem:[%s19514_s9 + $0x3e40] sm:$0xff]  ;;  %v2313_v10 = vld [vmem:[%s19514_s9 + $0x3e48] sm:$0xff] }
 0x20b   : > { %13067 = vmatprep.mubr.bf16.mxu0 %v20122_v31  ;;  %13395 = vmatprep.mubr.bf16.mxu1 %v20122_v31 }
 0x20d   : > { %13038 = vmatpush1.bf16.msra.mxu0 %v18160_v35  ;;  %13366 = vmatpush1.bf16.msra.mxu1 %v18162_v36  ;;  %v18256_v35 = vcombine.low %v2224_v18, %v2232_v19  ;;  %v18258_v36 = vcombine.low %v2225_v21, %v2233_v24  ;;  %v2320_v18 = vld [vmem:[%s19514_s9 + $0x3e80] sm:$0xff]  ;;  %v2321_v21 = vld [vmem:[%s19514_s9 + $0x3e88] sm:$0xff] }
 0x20e   : > { %13039 = vmatprep.subr.bf16.mxu0 %v18177_v38  ;;  %13367 = vmatprep.subr.bf16.mxu1 %v18179_v39  ;;  %v18273_v38 = vcombine.high %v2240_v50, %v2248_v16  ;;  %v18275_v39 = vcombine.high %v2241_v33, %v2249_v34  ;;  %v2328_v19 = vld [vmem:[%s19514_s9 + $0x3ec0] sm:$0xff]  ;;  %v2329_v24 = vld [vmem:[%s19514_s9 + $0x3ec8] sm:$0xff] }
 0x211   : > { %13040 = vmatpush1.bf16.msra.mxu0 %v18176_v26  ;;  %13368 = vmatpush1.bf16.msra.mxu1 %v18178_v45  ;;  %v18272_v26 = vcombine.low %v2240_v50, %v2248_v16  ;;  %v18274_v45 = vcombine.low %v2241_v33, %v2249_v34  ;;  %v2336_v50 = vld [vmem:[%s19514_s9 + $0x3f00] sm:$0xff]  ;;  %v2337_v33 = vld [vmem:[%s19514_s9 + $0x3f08] sm:$0xff] }
 0x212   : > { %13041 = vmatprep.subr.bf16.mxu0 %v18193_v48  ;;  %13369 = vmatprep.subr.bf16.mxu1 %v18195_v49  ;;  %v18289_v48 = vcombine.high %v2256_v41, %v2264_v42  ;;  %v18291_v49 = vcombine.high %v2257_v43, %v2265_v44  ;;  %v2344_v16 = vld [vmem:[%s19514_s9 + $0x3f40] sm:$0xff]  ;;  %v2345_v34 = vld [vmem:[%s19514_s9 + $0x3f48] sm:$0xff] }
 0x215   : > { %13042 = vmatpush1.bf16.msra.mxu0 %v18192_v20  ;;  %13370 = vmatpush1.bf16.msra.mxu1 %v18194_v57  ;;  %v18288_v20 = vcombine.low %v2256_v41, %v2264_v42  ;;  %v18290_v57 = vcombine.low %v2257_v43, %v2265_v44  ;;  %v2352_v41 = vld [vmem:[%s19514_s9 + $0x3f80] sm:$0xff]  ;;  %v2353_v43 = vld [vmem:[%s19514_s9 + $0x3f88] sm:$0xff] }
 0x216   : > { %13043 = vmatprep.subr.bf16.mxu0 %v18209_v61  ;;  %13371 = vmatprep.subr.bf16.mxu1 %v18211_v62  ;;  %v18305_v61 = vcombine.high %v2272_v51, %v2280_v52  ;;  %v18307_v62 = vcombine.high %v2273_v53, %v2281_v55  ;;  %v2360_v42 = vld [vmem:[%s19514_s9 + $0x3fc0] sm:$0xff]  ;;  %v2361_v44 = vld [vmem:[%s19514_s9 + $0x3fc8] sm:$0xff] }
 0x219   : > { %13044 = vmatpush1.bf16.msra.mxu0 %v18208_v3  ;;  %13372 = vmatpush1.bf16.msra.mxu1 %v18210_v4  ;;  %v18304_v3 = vcombine.low %v2272_v51, %v2280_v52  ;;  %v18306_v4 = vcombine.low %v2273_v53, %v2281_v55  ;;  %v322_v51 = vld [vmem:[%s19514_s9 + $0x10] sm:$0xff]  ;;  %v323_v53 = vld [vmem:[%s19514_s9 + $0x18] sm:$0xff] }
 0x21a   : > { %13045 = vmatprep.subr.bf16.mxu0 %v18225_v5  ;;  %13373 = vmatprep.subr.bf16.mxu1 %v18227_v6  ;;  %v18321_v5 = vcombine.high %v2288_v63, %v2296_v0  ;;  %v18323_v6 = vcombine.high %v2289_v40, %v2297_v1  ;;  %v330_v52 = vld [vmem:[%s19514_s9 + $0x50] sm:$0xff]  ;;  %v331_v55 = vld [vmem:[%s19514_s9 + $0x58] sm:$0xff] }
 0x21d   : > { %13046 = vmatpush1.bf16.msra.mxu0 %v18224_v11  ;;  %13374 = vmatpush1.bf16.msra.mxu1 %v18226_v12  ;;  %v18320_v11 = vcombine.low %v2288_v63, %v2296_v0  ;;  %v18322_v12 = vcombine.low %v2289_v40, %v2297_v1  ;;  %v338_v63 = vld [vmem:[%s19514_s9 + $0x90] sm:$0xff]  ;;  %v20190_v40 = vcombine.low %v20116_v25, %v20116_v25  ;;  %v339_v1 = vld [vmem:[%s19514_s9 + $0x98] sm:$0xff] }
 0x21e   : > { %13047 = vmatprep.subr.bf16.mxu0 %v18241_v14  ;;  %13375 = vmatprep.subr.bf16.mxu1 %v18243_v15  ;;  %v18337_v14 = vcombine.high %v2304_v7, %v2312_v8  ;;  %v18339_v15 = vcombine.high %v2305_v9, %v2313_v10  ;;  %v346_v0 = vld [vmem:[%s19514_s9 + $0xd0] sm:$0xff]  ;;  %v355_v25 = vld [vmem:[%s19514_s9 + $0x118] sm:$0xff] }
 0x221   : > { %13048 = vmatpush1.bf16.msra.mxu0 %v18240_v60  ;;  %13376 = vmatpush1.bf16.msra.mxu1 %v18242_v27  ;;  %v18336_v60 = vcombine.low %v2304_v7, %v2312_v8  ;;  %v18338_v27 = vcombine.low %v2305_v9, %v2313_v10  ;;  %v354_v8 = vld [vmem:[%s19514_s9 + $0x110] sm:$0xff]  ;;  %v363_v10 = vld [vmem:[%s19514_s9 + $0x158] sm:$0xff] }
 0x222   : > { %13049 = vmatprep.subr.bf16.mxu0 %v18257_v29  ;;  %13377 = vmatprep.subr.bf16.mxu1 %v18259_v30  ;;  %v18353_v29 = vcombine.high %v2320_v18, %v2328_v19  ;;  %v18355_v30 = vcombine.high %v2321_v21, %v2329_v24  ;;  %v362_v9 = vld [vmem:[%s19514_s9 + $0x150] sm:$0xff] }
 0x225   : > { %13050 = vmatpush1.bf16.msra.mxu0 %v18256_v35  ;;  %13378 = vmatpush1.bf16.msra.mxu1 %v18258_v36  ;;  %v18352_v35 = vcombine.low %v2320_v18, %v2328_v19  ;;  %v18354_v36 = vcombine.low %v2321_v21, %v2329_v24  ;;  %v370_v18 = vld [vmem:[%s19514_s9 + $0x190] sm:$0xff]  ;;  %v371_v21 = vld [vmem:[%s19514_s9 + $0x198] sm:$0xff] }
 0x226   : > { %13051 = vmatprep.subr.bf16.mxu0 %v18273_v38  ;;  %13379 = vmatprep.subr.bf16.mxu1 %v18275_v39  ;;  %v18369_v38 = vcombine.high %v2336_v50, %v2344_v16  ;;  %v18371_v39 = vcombine.high %v2337_v33, %v2345_v34  ;;  %v378_v19 = vld [vmem:[%s19514_s9 + $0x1d0] sm:$0xff]  ;;  %v379_v24 = vld [vmem:[%s19514_s9 + $0x1d8] sm:$0xff] }
 0x229   : > { %13052 = vmatpush1.bf16.msra.mxu0 %v18272_v26  ;;  %13380 = vmatpush1.bf16.msra.mxu1 %v18274_v45  ;;  %v18368_v26 = vcombine.low %v2336_v50, %v2344_v16  ;;  %v18370_v45 = vcombine.low %v2337_v33, %v2345_v34  ;;  %v386_v50 = vld [vmem:[%s19514_s9 + $0x210] sm:$0xff]  ;;  %v387_v33 = vld [vmem:[%s19514_s9 + $0x218] sm:$0xff] }
 0x22a   : > { %13053 = vmatprep.subr.bf16.mxu0 %v18289_v48  ;;  %13381 = vmatprep.subr.bf16.mxu1 %v18291_v49  ;;  %v18385_v48 = vcombine.high %v2352_v41, %v2360_v42  ;;  %v18387_v49 = vcombine.high %v2353_v43, %v2361_v44  ;;  %v394_v16 = vld [vmem:[%s19514_s9 + $0x250] sm:$0xff]  ;;  %v395_v34 = vld [vmem:[%s19514_s9 + $0x258] sm:$0xff] }
 0x22d   : > { %13054 = vmatpush1.bf16.msra.mxu0 %v18288_v20  ;;  %13382 = vmatpush1.bf16.msra.mxu1 %v18290_v57  ;;  %v18384_v20 = vcombine.low %v2352_v41, %v2360_v42  ;;  %v18386_v57 = vcombine.low %v2353_v43, %v2361_v44  ;;  %v402_v41 = vld [vmem:[%s19514_s9 + $0x290] sm:$0xff]  ;;  %v403_v43 = vld [vmem:[%s19514_s9 + $0x298] sm:$0xff] }
 0x22e   : > { %13055 = vmatprep.subr.bf16.mxu0 %v18305_v61  ;;  %13383 = vmatprep.subr.bf16.mxu1 %v18307_v62  ;;  %v16357_v61 = vcombine.high %v322_v51, %v330_v52  ;;  %v16359_v62 = vcombine.high %v323_v53, %v331_v55  ;;  %v410_v42 = vld [vmem:[%s19514_s9 + $0x2d0] sm:$0xff]  ;;  %v411_v44 = vld [vmem:[%s19514_s9 + $0x2d8] sm:$0xff] }
 0x231   : > { %13056 = vmatpush1.bf16.msra.mxu0 %v18304_v3  ;;  %13384 = vmatpush1.bf16.msra.mxu1 %v18306_v4  ;;  %v347_v3 = vld [vmem:[%s19514_s9 + $0xd8] sm:$0xff]  ;;  %v16356_v4 = vcombine.low %v322_v51, %v330_v52  ;;  %v418_v51 = vld [vmem:[%s19514_s9 + $0x310] sm:$0xff] }
 0x232   : > { %13057 = vmatprep.subr.bf16.mxu0 %v18321_v5  ;;  %13385 = vmatprep.subr.bf16.mxu1 %v18323_v6  ;;  %v16358_v5 = vcombine.low %v323_v53, %v331_v55  ;;  %v16373_v6 = vcombine.high %v338_v63, %v346_v0  ;;  %v16375_v7 = vcombine.high %v339_v1, %v347_v3  ;;  %v426_v52 = vld [vmem:[%s19514_s9 + $0x350] sm:$0xff]  ;;  %v419_v53 = vld [vmem:[%s19514_s9 + $0x318] sm:$0xff] }
 0x233   : > { %v427_v55 = vld [vmem:[%s19514_s9 + $0x358] sm:$0xff] }
 0x235   : > { %13058 = vmatpush1.bf16.msra.mxu0 %v18320_v11  ;;  %13386 = vmatpush1.bf16.msra.mxu1 %v18322_v12  ;;  %v16372_v11 = vcombine.low %v338_v63, %v346_v0  ;;  %v16374_v12 = vcombine.low %v339_v1, %v347_v3  ;;  %v434_v63 = vld [vmem:[%s19514_s9 + $0x390] sm:$0xff]  ;;  %v435_v1 = vld [vmem:[%s19514_s9 + $0x398] sm:$0xff] }
 0x236   : > { %13059 = vmatprep.subr.bf16.mxu0 %v18337_v14  ;;  %13387 = vmatprep.subr.bf16.mxu1 %v18339_v15  ;;  %v16389_v14 = vcombine.high %v354_v8, %v362_v9  ;;  %v16391_v15 = vcombine.high %v355_v25, %v363_v10  ;;  %v442_v0 = vld [vmem:[%s19514_s9 + $0x3d0] sm:$0xff]  ;;  %v443_v3 = vld [vmem:[%s19514_s9 + $0x3d8] sm:$0xff] }
 0x239   : > { %13060 = vmatpush1.bf16.msra.mxu0 %v18336_v60  ;;  %13388 = vmatpush1.bf16.msra.mxu1 %v18338_v27  ;;  %v16388_v60 = vcombine.low %v354_v8, %v362_v9  ;;  %v16390_v27 = vcombine.low %v355_v25, %v363_v10  ;;  %v450_v8 = vld [vmem:[%s19514_s9 + $0x410] sm:$0xff]  ;;  %v451_v25 = vld [vmem:[%s19514_s9 + $0x418] sm:$0xff] }
 0x23a   : > { %13061 = vmatprep.subr.bf16.mxu0 %v18353_v29  ;;  %13389 = vmatprep.subr.bf16.mxu1 %v18355_v30  ;;  %v16405_v29 = vcombine.high %v370_v18, %v378_v19  ;;  %v16407_v30 = vcombine.high %v371_v21, %v379_v24  ;;  %v458_v9 = vld [vmem:[%s19514_s9 + $0x450] sm:$0xff]  ;;  %v459_v10 = vld [vmem:[%s19514_s9 + $0x458] sm:$0xff] }
 0x23d   : > { %13062 = vmatpush1.bf16.msra.mxu0 %v18352_v35  ;;  %13390 = vmatpush1.bf16.msra.mxu1 %v18354_v36  ;;  %v16404_v35 = vcombine.low %v370_v18, %v378_v19  ;;  %v16406_v36 = vcombine.low %v371_v21, %v379_v24  ;;  %v466_v18 = vld [vmem:[%s19514_s9 + $0x490] sm:$0xff]  ;;  %v467_v21 = vld [vmem:[%s19514_s9 + $0x498] sm:$0xff] }
 0x23e   : > { %13063 = vmatprep.subr.bf16.mxu0 %v18369_v38  ;;  %13391 = vmatprep.subr.bf16.mxu1 %v18371_v39  ;;  %v16421_v38 = vcombine.high %v386_v50, %v394_v16  ;;  %v16423_v39 = vcombine.high %v387_v33, %v395_v34  ;;  %v474_v19 = vld [vmem:[%s19514_s9 + $0x4d0] sm:$0xff]  ;;  %v475_v24 = vld [vmem:[%s19514_s9 + $0x4d8] sm:$0xff] }
 0x241   : > { %13064 = vmatpush1.bf16.msra.mxu0 %v18368_v26  ;;  %13392 = vmatpush1.bf16.msra.mxu1 %v18370_v45  ;;  %v16420_v26 = vcombine.low %v386_v50, %v394_v16  ;;  %v16422_v45 = vcombine.low %v387_v33, %v395_v34  ;;  %v482_v50 = vld [vmem:[%s19514_s9 + $0x510] sm:$0xff]  ;;  %v483_v33 = vld [vmem:[%s19514_s9 + $0x518] sm:$0xff] }
 0x242   : > { %13065 = vmatprep.subr.bf16.mxu0 %v18385_v48  ;;  %13393 = vmatprep.subr.bf16.mxu1 %v18387_v49  ;;  %v16437_v48 = vcombine.high %v402_v41, %v410_v42  ;;  %v16439_v49 = vcombine.high %v403_v43, %v411_v44  ;;  %v490_v16 = vld [vmem:[%s19514_s9 + $0x550] sm:$0xff]  ;;  %v491_v34 = vld [vmem:[%s19514_s9 + $0x558] sm:$0xff] }
 0x245   : > { %13066 = vmatpush1.bf16.msra.mxu0 %v18384_v20  ;;  %13394 = vmatpush1.bf16.msra.mxu1 %v18386_v57  ;;  %v16436_v20 = vcombine.low %v402_v41, %v410_v42  ;;  %v16438_v57 = vcombine.low %v403_v43, %v411_v44  ;;  %v498_v41 = vld [vmem:[%s19514_s9 + $0x590] sm:$0xff]  ;;  %v499_v43 = vld [vmem:[%s19514_s9 + $0x598] sm:$0xff] }
 0x246   : > { %13404 = vmatprep.subr.bf16.mxu0 %v16357_v61  ;;  %13732 = vmatprep.subr.bf16.mxu1 %v16359_v62  ;;  %v16453_v61 = vcombine.high %v418_v51, %v426_v52  ;;  %v16455_v62 = vcombine.high %v419_v53, %v427_v55  ;;  %v506_v42 = vld [vmem:[%s19514_s9 + $0x5d0] sm:$0xff]  ;;  %v507_v44 = vld [vmem:[%s19514_s9 + $0x5d8] sm:$0xff] }
 0x248   : > { %13068 = vmatmul.mubr.bf16.vlgmr.msra.gmra.mrb[0].mxu0 %v20190_v40  ;;  %13396 = vmatmul.mubr.bf16.vlgmr.msra.gmra.mrb[0].mxu1 %v20190_v40 }
 0x249   : > { %13405 = vmatpush1.bf16.msra.mxu0 %v16356_v4  ;;  %13733 = vmatpush1.bf16.msra.mxu1 %v16358_v5  ;;  %v16452_v4 = vcombine.low %v418_v51, %v426_v52  ;;  %v16454_v5 = vcombine.low %v419_v53, %v427_v55  ;;  %v514_v51 = vld [vmem:[%s19514_s9 + $0x610] sm:$0xff]  ;;  %v515_v53 = vld [vmem:[%s19514_s9 + $0x618] sm:$0xff] }
 0x24a   : > { %13406 = vmatprep.subr.bf16.mxu0 %v16373_v6  ;;  %13734 = vmatprep.subr.bf16.mxu1 %v16375_v7  ;;  %v16469_v6 = vcombine.high %v434_v63, %v442_v0  ;;  %v16471_v7 = vcombine.high %v435_v1, %v443_v3  ;;  %v522_v52 = vld [vmem:[%s19514_s9 + $0x650] sm:$0xff]  ;;  %v523_v55 = vld [vmem:[%s19514_s9 + $0x658] sm:$0xff] }
 0x24b   : > { %13436 = vmatprep.mubr.bf16.mxu0 %v19577_v58  ;;  %13764 = vmatprep.mubr.bf16.mxu1 %v19577_v58 }
 0x24d   : > { %13407 = vmatpush1.bf16.msra.mxu0 %v16372_v11  ;;  %13735 = vmatpush1.bf16.msra.mxu1 %v16374_v12  ;;  %v16468_v11 = vcombine.low %v434_v63, %v442_v0  ;;  %v16470_v12 = vcombine.low %v435_v1, %v443_v3  ;;  %v530_v63 = vld [vmem:[%s19514_s9 + $0x690] sm:$0xff]  ;;  %v531_v1 = vld [vmem:[%s19514_s9 + $0x698] sm:$0xff] }
 0x24e   : > { %13408 = vmatprep.subr.bf16.mxu0 %v16389_v14  ;;  %13736 = vmatprep.subr.bf16.mxu1 %v16391_v15  ;;  %v16485_v14 = vcombine.high %v450_v8, %v458_v9  ;;  %v16487_v15 = vcombine.high %v451_v25, %v459_v10  ;;  %v538_v0 = vld [vmem:[%s19514_s9 + $0x6d0] sm:$0xff]  ;;  %v539_v3 = vld [vmem:[%s19514_s9 + $0x6d8] sm:$0xff] }
 0x251   : > { %13409 = vmatpush1.bf16.msra.mxu0 %v16388_v60  ;;  %13737 = vmatpush1.bf16.msra.mxu1 %v16390_v27  ;;  %v16484_v60 = vcombine.low %v450_v8, %v458_v9  ;;  %v16486_v27 = vcombine.low %v451_v25, %v459_v10  ;;  %v546_v8 = vld [vmem:[%s19514_s9 + $0x710] sm:$0xff]  ;;  %v547_v25 = vld [vmem:[%s19514_s9 + $0x718] sm:$0xff] }
 0x252   : > { %13410 = vmatprep.subr.bf16.mxu0 %v16405_v29  ;;  %13738 = vmatprep.subr.bf16.mxu1 %v16407_v30  ;;  %v16501_v29 = vcombine.high %v466_v18, %v474_v19  ;;  %v16503_v30 = vcombine.high %v467_v21, %v475_v24  ;;  %v554_v9 = vld [vmem:[%s19514_s9 + $0x750] sm:$0xff]  ;;  %v555_v10 = vld [vmem:[%s19514_s9 + $0x758] sm:$0xff] }
 0x255   : > { %13411 = vmatpush1.bf16.msra.mxu0 %v16404_v35  ;;  %13739 = vmatpush1.bf16.msra.mxu1 %v16406_v36  ;;  %v16500_v35 = vcombine.low %v466_v18, %v474_v19  ;;  %v16502_v36 = vcombine.low %v467_v21, %v475_v24  ;;  %v562_v18 = vld [vmem:[%s19514_s9 + $0x790] sm:$0xff]  ;;  %v563_v21 = vld [vmem:[%s19514_s9 + $0x798] sm:$0xff] }
 0x256   : > { %13412 = vmatprep.subr.bf16.mxu0 %v16421_v38  ;;  %13740 = vmatprep.subr.bf16.mxu1 %v16423_v39  ;;  %v16517_v38 = vcombine.high %v482_v50, %v490_v16  ;;  %v16519_v39 = vcombine.high %v483_v33, %v491_v34  ;;  %v570_v19 = vld [vmem:[%s19514_s9 + $0x7d0] sm:$0xff]  ;;  %v571_v24 = vld [vmem:[%s19514_s9 + $0x7d8] sm:$0xff] }
 0x259   : > { %13413 = vmatpush1.bf16.msra.mxu0 %v16420_v26  ;;  %13741 = vmatpush1.bf16.msra.mxu1 %v16422_v45  ;;  %v16516_v26 = vcombine.low %v482_v50, %v490_v16  ;;  %v16518_v45 = vcombine.low %v483_v33, %v491_v34  ;;  %v578_v50 = vld [vmem:[%s19514_s9 + $0x810] sm:$0xff]  ;;  %v579_v33 = vld [vmem:[%s19514_s9 + $0x818] sm:$0xff] }
 0x25a   : > { %13414 = vmatprep.subr.bf16.mxu0 %v16437_v48  ;;  %13742 = vmatprep.subr.bf16.mxu1 %v16439_v49  ;;  %v16533_v48 = vcombine.high %v498_v41, %v506_v42  ;;  %v16535_v49 = vcombine.high %v499_v43, %v507_v44  ;;  %v586_v16 = vld [vmem:[%s19514_s9 + $0x850] sm:$0xff]  ;;  %v587_v34 = vld [vmem:[%s19514_s9 + $0x858] sm:$0xff] }
 0x25d   : > { %13415 = vmatpush1.bf16.msra.mxu0 %v16436_v20  ;;  %13743 = vmatpush1.bf16.msra.mxu1 %v16438_v57  ;;  %v16532_v20 = vcombine.low %v498_v41, %v506_v42  ;;  %v16534_v57 = vcombine.low %v499_v43, %v507_v44  ;;  %v594_v41 = vld [vmem:[%s19514_s9 + $0x890] sm:$0xff]  ;;  %v595_v43 = vld [vmem:[%s19514_s9 + $0x898] sm:$0xff] }
 0x25e   : > { %13416 = vmatprep.subr.bf16.mxu0 %v16453_v61  ;;  %13744 = vmatprep.subr.bf16.mxu1 %v16455_v62  ;;  %v16549_v61 = vcombine.high %v514_v51, %v522_v52  ;;  %v16551_v62 = vcombine.high %v515_v53, %v523_v55  ;;  %v602_v42 = vld [vmem:[%s19514_s9 + $0x8d0] sm:$0xff]  ;;  %v603_v44 = vld [vmem:[%s19514_s9 + $0x8d8] sm:$0xff] }
 0x261   : > { %13417 = vmatpush1.bf16.msra.mxu0 %v16452_v4  ;;  %13745 = vmatpush1.bf16.msra.mxu1 %v16454_v5  ;;  %v16548_v4 = vcombine.low %v514_v51, %v522_v52  ;;  %v16550_v5 = vcombine.low %v515_v53, %v523_v55  ;;  %v610_v51 = vld [vmem:[%s19514_s9 + $0x910] sm:$0xff]  ;;  %v611_v53 = vld [vmem:[%s19514_s9 + $0x918] sm:$0xff] }
 0x262   : > { %13418 = vmatprep.subr.bf16.mxu0 %v16469_v6  ;;  %13746 = vmatprep.subr.bf16.mxu1 %v16471_v7  ;;  %v16565_v6 = vcombine.high %v530_v63, %v538_v0  ;;  %v16567_v7 = vcombine.high %v531_v1, %v539_v3  ;;  %v618_v52 = vld [vmem:[%s19514_s9 + $0x950] sm:$0xff]  ;;  %v619_v55 = vld [vmem:[%s19514_s9 + $0x958] sm:$0xff] }
 0x265   : > { %13419 = vmatpush1.bf16.msra.mxu0 %v16468_v11  ;;  %13747 = vmatpush1.bf16.msra.mxu1 %v16470_v12  ;;  %v16564_v11 = vcombine.low %v530_v63, %v538_v0  ;;  %v16566_v12 = vcombine.low %v531_v1, %v539_v3  ;;  %v626_v63 = vld [vmem:[%s19514_s9 + $0x990] sm:$0xff]  ;;  %v627_v1 = vld [vmem:[%s19514_s9 + $0x998] sm:$0xff] }
 0x266   : > { %13420 = vmatprep.subr.bf16.mxu0 %v16485_v14  ;;  %13748 = vmatprep.subr.bf16.mxu1 %v16487_v15  ;;  %v16581_v14 = vcombine.high %v546_v8, %v554_v9  ;;  %v16583_v15 = vcombine.high %v547_v25, %v555_v10  ;;  %v634_v0 = vld [vmem:[%s19514_s9 + $0x9d0] sm:$0xff]  ;;  %v635_v3 = vld [vmem:[%s19514_s9 + $0x9d8] sm:$0xff] }
 0x269   : > { %13421 = vmatpush1.bf16.msra.mxu0 %v16484_v60  ;;  %13749 = vmatpush1.bf16.msra.mxu1 %v16486_v27  ;;  %v16580_v60 = vcombine.low %v546_v8, %v554_v9  ;;  %v16582_v27 = vcombine.low %v547_v25, %v555_v10  ;;  %v642_v8 = vld [vmem:[%s19514_s9 + $0xa10] sm:$0xff]  ;;  %v643_v25 = vld [vmem:[%s19514_s9 + $0xa18] sm:$0xff] }
 0x26a   : > { %13422 = vmatprep.subr.bf16.mxu0 %v16501_v29  ;;  %13750 = vmatprep.subr.bf16.mxu1 %v16503_v30  ;;  %v16597_v29 = vcombine.high %v562_v18, %v570_v19  ;;  %v16599_v30 = vcombine.high %v563_v21, %v571_v24  ;;  %v650_v9 = vld [vmem:[%s19514_s9 + $0xa50] sm:$0xff]  ;;  %v651_v10 = vld [vmem:[%s19514_s9 + $0xa58] sm:$0xff] }
 0x26d   : > { %13423 = vmatpush1.bf16.msra.mxu0 %v16500_v35  ;;  %13751 = vmatpush1.bf16.msra.mxu1 %v16502_v36  ;;  %v16596_v35 = vcombine.low %v562_v18, %v570_v19  ;;  %v16598_v36 = vcombine.low %v563_v21, %v571_v24  ;;  %v658_v18 = vld [vmem:[%s19514_s9 + $0xa90] sm:$0xff]  ;;  %v659_v21 = vld [vmem:[%s19514_s9 + $0xa98] sm:$0xff] }
 0x26e   : > { %13424 = vmatprep.subr.bf16.mxu0 %v16517_v38  ;;  %13752 = vmatprep.subr.bf16.mxu1 %v16519_v39  ;;  %v16613_v38 = vcombine.high %v578_v50, %v586_v16  ;;  %v16615_v39 = vcombine.high %v579_v33, %v587_v34  ;;  %v666_v19 = vld [vmem:[%s19514_s9 + $0xad0] sm:$0xff]  ;;  %v667_v24 = vld [vmem:[%s19514_s9 + $0xad8] sm:$0xff] }
 0x271   : > { %13425 = vmatpush1.bf16.msra.mxu0 %v16516_v26  ;;  %13753 = vmatpush1.bf16.msra.mxu1 %v16518_v45  ;;  %v16612_v26 = vcombine.low %v578_v50, %v586_v16  ;;  %v16614_v45 = vcombine.low %v579_v33, %v587_v34  ;;  %v674_v50 = vld [vmem:[%s19514_s9 + $0xb10] sm:$0xff]  ;;  %v675_v33 = vld [vmem:[%s19514_s9 + $0xb18] sm:$0xff] }
 0x272   : > { %13426 = vmatprep.subr.bf16.mxu0 %v16533_v48  ;;  %13754 = vmatprep.subr.bf16.mxu1 %v16535_v49  ;;  %v16629_v48 = vcombine.high %v594_v41, %v602_v42  ;;  %v16631_v49 = vcombine.high %v595_v43, %v603_v44  ;;  %v682_v16 = vld [vmem:[%s19514_s9 + $0xb50] sm:$0xff]  ;;  %v683_v34 = vld [vmem:[%s19514_s9 + $0xb58] sm:$0xff] }
 0x275   : > { %13427 = vmatpush1.bf16.msra.mxu0 %v16532_v20  ;;  %13755 = vmatpush1.bf16.msra.mxu1 %v16534_v57  ;;  %v16628_v20 = vcombine.low %v594_v41, %v602_v42  ;;  %v16630_v57 = vcombine.low %v595_v43, %v603_v44  ;;  %v690_v41 = vld [vmem:[%s19514_s9 + $0xb90] sm:$0xff]  ;;  %v691_v43 = vld [vmem:[%s19514_s9 + $0xb98] sm:$0xff] }
 0x276   : > { %13428 = vmatprep.subr.bf16.mxu0 %v16549_v61  ;;  %13756 = vmatprep.subr.bf16.mxu1 %v16551_v62  ;;  %v16645_v61 = vcombine.high %v610_v51, %v618_v52  ;;  %v16647_v62 = vcombine.high %v611_v53, %v619_v55  ;;  %v698_v42 = vld [vmem:[%s19514_s9 + $0xbd0] sm:$0xff]  ;;  %v699_v44 = vld [vmem:[%s19514_s9 + $0xbd8] sm:$0xff] }
 0x279   : > { %13429 = vmatpush1.bf16.msra.mxu0 %v16548_v4  ;;  %13757 = vmatpush1.bf16.msra.mxu1 %v16550_v5  ;;  %v16644_v4 = vcombine.low %v610_v51, %v618_v52  ;;  %v16646_v5 = vcombine.low %v611_v53, %v619_v55  ;;  %v706_v51 = vld [vmem:[%s19514_s9 + $0xc10] sm:$0xff]  ;;  %v707_v53 = vld [vmem:[%s19514_s9 + $0xc18] sm:$0xff] }
 0x27a   : > { %13430 = vmatprep.subr.bf16.mxu0 %v16565_v6  ;;  %13758 = vmatprep.subr.bf16.mxu1 %v16567_v7  ;;  %v16661_v6 = vcombine.high %v626_v63, %v634_v0  ;;  %v16663_v7 = vcombine.high %v627_v1, %v635_v3  ;;  %v714_v52 = vld [vmem:[%s19514_s9 + $0xc50] sm:$0xff]  ;;  %v715_v55 = vld [vmem:[%s19514_s9 + $0xc58] sm:$0xff] }
 0x27d   : > { %13431 = vmatpush1.bf16.msra.mxu0 %v16564_v11  ;;  %13759 = vmatpush1.bf16.msra.mxu1 %v16566_v12  ;;  %v16660_v11 = vcombine.low %v626_v63, %v634_v0  ;;  %v16662_v12 = vcombine.low %v627_v1, %v635_v3  ;;  %v722_v63 = vld [vmem:[%s19514_s9 + $0xc90] sm:$0xff]  ;;  %v723_v1 = vld [vmem:[%s19514_s9 + $0xc98] sm:$0xff] }
 0x27e   : > { %13432 = vmatprep.subr.bf16.mxu0 %v16581_v14  ;;  %13760 = vmatprep.subr.bf16.mxu1 %v16583_v15  ;;  %v16677_v14 = vcombine.high %v642_v8, %v650_v9  ;;  %v16679_v15 = vcombine.high %v643_v25, %v651_v10  ;;  %v730_v0 = vld [vmem:[%s19514_s9 + $0xcd0] sm:$0xff]  ;;  %v731_v3 = vld [vmem:[%s19514_s9 + $0xcd8] sm:$0xff] }
 0x281   : > { %13433 = vmatpush1.bf16.msra.mxu0 %v16580_v60  ;;  %13761 = vmatpush1.bf16.msra.mxu1 %v16582_v27  ;;  %v16676_v60 = vcombine.low %v642_v8, %v650_v9  ;;  %v16678_v27 = vcombine.low %v643_v25, %v651_v10  ;;  %v738_v8 = vld [vmem:[%s19514_s9 + $0xd10] sm:$0xff]  ;;  %v739_v25 = vld [vmem:[%s19514_s9 + $0xd18] sm:$0xff] }
 0x282   : > { %13434 = vmatprep.subr.bf16.mxu0 %v16597_v29  ;;  %13762 = vmatprep.subr.bf16.mxu1 %v16599_v30  ;;  %v16693_v29 = vcombine.high %v658_v18, %v666_v19  ;;  %v16695_v30 = vcombine.high %v659_v21, %v667_v24  ;;  %v746_v9 = vld [vmem:[%s19514_s9 + $0xd50] sm:$0xff]  ;;  %v747_v10 = vld [vmem:[%s19514_s9 + $0xd58] sm:$0xff] }
 0x285   : > { %13435 = vmatpush1.bf16.msra.mxu0 %v16596_v35  ;;  %13763 = vmatpush1.bf16.msra.mxu1 %v16598_v36  ;;  %v16692_v35 = vcombine.low %v658_v18, %v666_v19  ;;  %v16694_v36 = vcombine.low %v659_v21, %v667_v24  ;;  %v754_v18 = vld [vmem:[%s19514_s9 + $0xd90] sm:$0xff]  ;;  %v755_v21 = vld [vmem:[%s19514_s9 + $0xd98] sm:$0xff] }
 0x286   : > { %13445 = vmatprep.subr.bf16.mxu0 %v16613_v38  ;;  %13773 = vmatprep.subr.bf16.mxu1 %v16615_v39  ;;  %v16709_v38 = vcombine.high %v674_v50, %v682_v16  ;;  %v16711_v39 = vcombine.high %v675_v33, %v683_v34  ;;  %v762_v19 = vld [vmem:[%s19514_s9 + $0xdd0] sm:$0xff]  ;;  %v763_v24 = vld [vmem:[%s19514_s9 + $0xdd8] sm:$0xff] }
 0x288   : > { %13437 = vmatmul.mubr.bf16.vlgmr.msra.gmra.mrb[4].mxu0 %v19623_v13  ;;  %13765 = vmatmul.mubr.bf16.vlgmr.msra.gmra.mrb[4].mxu1 %v19623_v13 }
 0x289   : > { %13446 = vmatpush1.bf16.msra.mxu0 %v16612_v26  ;;  %13774 = vmatpush1.bf16.msra.mxu1 %v16614_v45  ;;  %v16708_v26 = vcombine.low %v674_v50, %v682_v16  ;;  %v16710_v45 = vcombine.low %v675_v33, %v683_v34  ;;  %v770_v50 = vld [vmem:[%s19514_s9 + $0xe10] sm:$0xff]  ;;  %v771_v33 = vld [vmem:[%s19514_s9 + $0xe18] sm:$0xff] }
 0x28a   : > { %13447 = vmatprep.subr.bf16.mxu0 %v16629_v48  ;;  %13775 = vmatprep.subr.bf16.mxu1 %v16631_v49  ;;  %v16725_v48 = vcombine.high %v690_v41, %v698_v42  ;;  %v16727_v49 = vcombine.high %v691_v43, %v699_v44  ;;  %v778_v16 = vld [vmem:[%s19514_s9 + $0xe50] sm:$0xff]  ;;  %v779_v34 = vld [vmem:[%s19514_s9 + $0xe58] sm:$0xff] }
 0x28b   : > { %13477 = vmatprep.mubr.bf16.mxu0 %v19636_v22  ;;  %13805 = vmatprep.mubr.bf16.mxu1 %v19636_v22 }
 0x28d   : > { %13448 = vmatpush1.bf16.msra.mxu0 %v16628_v20  ;;  %13776 = vmatpush1.bf16.msra.mxu1 %v16630_v57  ;;  %v16724_v20 = vcombine.low %v690_v41, %v698_v42  ;;  %v16726_v57 = vcombine.low %v691_v43, %v699_v44  ;;  %v786_v41 = vld [vmem:[%s19514_s9 + $0xe90] sm:$0xff]  ;;  %v787_v43 = vld [vmem:[%s19514_s9 + $0xe98] sm:$0xff] }
 0x28e   : > { %13449 = vmatprep.subr.bf16.mxu0 %v16645_v61  ;;  %13777 = vmatprep.subr.bf16.mxu1 %v16647_v62  ;;  %v16741_v61 = vcombine.high %v706_v51, %v714_v52  ;;  %v16743_v62 = vcombine.high %v707_v53, %v715_v55  ;;  %v794_v42 = vld [vmem:[%s19514_s9 + $0xed0] sm:$0xff]  ;;  %v795_v44 = vld [vmem:[%s19514_s9 + $0xed8] sm:$0xff] }
 0x291   : > { %13450 = vmatpush1.bf16.msra.mxu0 %v16644_v4  ;;  %13778 = vmatpush1.bf16.msra.mxu1 %v16646_v5  ;;  %v16740_v4 = vcombine.low %v706_v51, %v714_v52  ;;  %v16742_v5 = vcombine.low %v707_v53, %v715_v55  ;;  %v802_v51 = vld [vmem:[%s19514_s9 + $0xf10] sm:$0xff]  ;;  %v803_v53 = vld [vmem:[%s19514_s9 + $0xf18] sm:$0xff] }
 0x292   : > { %13451 = vmatprep.subr.bf16.mxu0 %v16661_v6  ;;  %13779 = vmatprep.subr.bf16.mxu1 %v16663_v7  ;;  %v16757_v6 = vcombine.high %v722_v63, %v730_v0  ;;  %v16759_v7 = vcombine.high %v723_v1, %v731_v3  ;;  %v810_v52 = vld [vmem:[%s19514_s9 + $0xf50] sm:$0xff]  ;;  %v811_v55 = vld [vmem:[%s19514_s9 + $0xf58] sm:$0xff] }
 0x295   : > { %13452 = vmatpush1.bf16.msra.mxu0 %v16660_v11  ;;  %13780 = vmatpush1.bf16.msra.mxu1 %v16662_v12  ;;  %v16756_v11 = vcombine.low %v722_v63, %v730_v0  ;;  %v16758_v12 = vcombine.low %v723_v1, %v731_v3  ;;  %v818_v63 = vld [vmem:[%s19514_s9 + $0xf90] sm:$0xff]  ;;  %v819_v1 = vld [vmem:[%s19514_s9 + $0xf98] sm:$0xff] }
 0x296   : > { %13453 = vmatprep.subr.bf16.mxu0 %v16677_v14  ;;  %13781 = vmatprep.subr.bf16.mxu1 %v16679_v15  ;;  %v16773_v14 = vcombine.high %v738_v8, %v746_v9  ;;  %v16775_v15 = vcombine.high %v739_v25, %v747_v10  ;;  %v826_v0 = vld [vmem:[%s19514_s9 + $0xfd0] sm:$0xff]  ;;  %v827_v3 = vld [vmem:[%s19514_s9 + $0xfd8] sm:$0xff] }
 0x299   : > { %13454 = vmatpush1.bf16.msra.mxu0 %v16676_v60  ;;  %13782 = vmatpush1.bf16.msra.mxu1 %v16678_v27  ;;  %v16772_v60 = vcombine.low %v738_v8, %v746_v9  ;;  %v16774_v27 = vcombine.low %v739_v25, %v747_v10  ;;  %v834_v8 = vld [vmem:[%s19514_s9 + $0x1010] sm:$0xff]  ;;  %v835_v25 = vld [vmem:[%s19514_s9 + $0x1018] sm:$0xff] }
 0x29a   : > { %13455 = vmatprep.subr.bf16.mxu0 %v16693_v29  ;;  %13783 = vmatprep.subr.bf16.mxu1 %v16695_v30  ;;  %v16789_v29 = vcombine.high %v754_v18, %v762_v19  ;;  %v16791_v30 = vcombine.high %v755_v21, %v763_v24  ;;  %v842_v9 = vld [vmem:[%s19514_s9 + $0x1050] sm:$0xff]  ;;  %v843_v10 = vld [vmem:[%s19514_s9 + $0x1058] sm:$0xff] }
 0x29d   : > { %13456 = vmatpush1.bf16.msra.mxu0 %v16692_v35  ;;  %13784 = vmatpush1.bf16.msra.mxu1 %v16694_v36  ;;  %v16788_v35 = vcombine.low %v754_v18, %v762_v19  ;;  %v16790_v36 = vcombine.low %v755_v21, %v763_v24  ;;  %v850_v18 = vld [vmem:[%s19514_s9 + $0x1090] sm:$0xff]  ;;  %v851_v21 = vld [vmem:[%s19514_s9 + $0x1098] sm:$0xff] }
 0x29e   : > { %13457 = vmatprep.subr.bf16.mxu0 %v16709_v38  ;;  %13785 = vmatprep.subr.bf16.mxu1 %v16711_v39  ;;  %v16805_v38 = vcombine.high %v770_v50, %v778_v16  ;;  %v16807_v39 = vcombine.high %v771_v33, %v779_v34  ;;  %v858_v19 = vld [vmem:[%s19514_s9 + $0x10d0] sm:$0xff]  ;;  %v859_v24 = vld [vmem:[%s19514_s9 + $0x10d8] sm:$0xff] }
 0x2a1   : > { %13458 = vmatpush1.bf16.msra.mxu0 %v16708_v26  ;;  %13786 = vmatpush1.bf16.msra.mxu1 %v16710_v45  ;;  %v16804_v26 = vcombine.low %v770_v50, %v778_v16  ;;  %v16806_v45 = vcombine.low %v771_v33, %v779_v34  ;;  %v866_v50 = vld [vmem:[%s19514_s9 + $0x1110] sm:$0xff]  ;;  %v867_v33 = vld [vmem:[%s19514_s9 + $0x1118] sm:$0xff] }
 0x2a2   : > { %13459 = vmatprep.subr.bf16.mxu0 %v16725_v48  ;;  %13787 = vmatprep.subr.bf16.mxu1 %v16727_v49  ;;  %v16821_v48 = vcombine.high %v786_v41, %v794_v42  ;;  %v16823_v49 = vcombine.high %v787_v43, %v795_v44  ;;  %v874_v16 = vld [vmem:[%s19514_s9 + $0x1150] sm:$0xff]  ;;  %v875_v34 = vld [vmem:[%s19514_s9 + $0x1158] sm:$0xff] }
 0x2a5   : > { %13460 = vmatpush1.bf16.msra.mxu0 %v16724_v20  ;;  %13788 = vmatpush1.bf16.msra.mxu1 %v16726_v57  ;;  %v16820_v20 = vcombine.low %v786_v41, %v794_v42  ;;  %v16822_v57 = vcombine.low %v787_v43, %v795_v44  ;;  %v882_v41 = vld [vmem:[%s19514_s9 + $0x1190] sm:$0xff]  ;;  %v883_v43 = vld [vmem:[%s19514_s9 + $0x1198] sm:$0xff] }
 0x2a6   : > { %13461 = vmatprep.subr.bf16.mxu0 %v16741_v61  ;;  %13789 = vmatprep.subr.bf16.mxu1 %v16743_v62  ;;  %v16837_v61 = vcombine.high %v802_v51, %v810_v52  ;;  %v16839_v62 = vcombine.high %v803_v53, %v811_v55  ;;  %v890_v42 = vld [vmem:[%s19514_s9 + $0x11d0] sm:$0xff]  ;;  %v891_v44 = vld [vmem:[%s19514_s9 + $0x11d8] sm:$0xff] }
 0x2a9   : > { %13462 = vmatpush1.bf16.msra.mxu0 %v16740_v4  ;;  %13790 = vmatpush1.bf16.msra.mxu1 %v16742_v5  ;;  %v16836_v4 = vcombine.low %v802_v51, %v810_v52  ;;  %v16838_v5 = vcombine.low %v803_v53, %v811_v55  ;;  %v898_v51 = vld [vmem:[%s19514_s9 + $0x1210] sm:$0xff]  ;;  %v899_v53 = vld [vmem:[%s19514_s9 + $0x1218] sm:$0xff] }
 0x2aa   : > { %13463 = vmatprep.subr.bf16.mxu0 %v16757_v6  ;;  %13791 = vmatprep.subr.bf16.mxu1 %v16759_v7  ;;  %v16853_v6 = vcombine.high %v818_v63, %v826_v0  ;;  %v16855_v7 = vcombine.high %v819_v1, %v827_v3  ;;  %v906_v52 = vld [vmem:[%s19514_s9 + $0x1250] sm:$0xff]  ;;  %v907_v55 = vld [vmem:[%s19514_s9 + $0x1258] sm:$0xff] }
 0x2ad   : > { %13464 = vmatpush1.bf16.msra.mxu0 %v16756_v11  ;;  %13792 = vmatpush1.bf16.msra.mxu1 %v16758_v12  ;;  %v16852_v11 = vcombine.low %v818_v63, %v826_v0  ;;  %v16854_v12 = vcombine.low %v819_v1, %v827_v3  ;;  %v914_v63 = vld [vmem:[%s19514_s9 + $0x1290] sm:$0xff]  ;;  %v915_v1 = vld [vmem:[%s19514_s9 + $0x1298] sm:$0xff] }
 0x2ae   : > { %13465 = vmatprep.subr.bf16.mxu0 %v16773_v14  ;;  %13793 = vmatprep.subr.bf16.mxu1 %v16775_v15  ;;  %v16869_v14 = vcombine.high %v834_v8, %v842_v9  ;;  %v16871_v15 = vcombine.high %v835_v25, %v843_v10  ;;  %v922_v0 = vld [vmem:[%s19514_s9 + $0x12d0] sm:$0xff]  ;;  %v923_v3 = vld [vmem:[%s19514_s9 + $0x12d8] sm:$0xff] }
 0x2b1   : > { %13466 = vmatpush1.bf16.msra.mxu0 %v16772_v60  ;;  %13794 = vmatpush1.bf16.msra.mxu1 %v16774_v27  ;;  %v16868_v60 = vcombine.low %v834_v8, %v842_v9  ;;  %v16870_v27 = vcombine.low %v835_v25, %v843_v10  ;;  %v930_v8 = vld [vmem:[%s19514_s9 + $0x1310] sm:$0xff]  ;;  %v931_v25 = vld [vmem:[%s19514_s9 + $0x1318] sm:$0xff] }
 0x2b2   : > { %13467 = vmatprep.subr.bf16.mxu0 %v16789_v29  ;;  %13795 = vmatprep.subr.bf16.mxu1 %v16791_v30  ;;  %v16885_v29 = vcombine.high %v850_v18, %v858_v19  ;;  %v16887_v30 = vcombine.high %v851_v21, %v859_v24  ;;  %v938_v9 = vld [vmem:[%s19514_s9 + $0x1350] sm:$0xff]  ;;  %v939_v10 = vld [vmem:[%s19514_s9 + $0x1358] sm:$0xff] }
 0x2b5   : > { %13468 = vmatpush1.bf16.msra.mxu0 %v16788_v35  ;;  %13796 = vmatpush1.bf16.msra.mxu1 %v16790_v36  ;;  %v16884_v35 = vcombine.low %v850_v18, %v858_v19  ;;  %v16886_v36 = vcombine.low %v851_v21, %v859_v24  ;;  %v946_v18 = vld [vmem:[%s19514_s9 + $0x1390] sm:$0xff]  ;;  %v947_v21 = vld [vmem:[%s19514_s9 + $0x1398] sm:$0xff] }
 0x2b6   : > { %13469 = vmatprep.subr.bf16.mxu0 %v16805_v38  ;;  %13797 = vmatprep.subr.bf16.mxu1 %v16807_v39  ;;  %v16901_v38 = vcombine.high %v866_v50, %v874_v16  ;;  %v16903_v39 = vcombine.high %v867_v33, %v875_v34  ;;  %v954_v19 = vld [vmem:[%s19514_s9 + $0x13d0] sm:$0xff]  ;;  %v955_v24 = vld [vmem:[%s19514_s9 + $0x13d8] sm:$0xff] }
 0x2b9   : > { %13470 = vmatpush1.bf16.msra.mxu0 %v16804_v26  ;;  %13798 = vmatpush1.bf16.msra.mxu1 %v16806_v45  ;;  %v16900_v26 = vcombine.low %v866_v50, %v874_v16  ;;  %v16902_v45 = vcombine.low %v867_v33, %v875_v34  ;;  %v962_v50 = vld [vmem:[%s19514_s9 + $0x1410] sm:$0xff]  ;;  %v963_v33 = vld [vmem:[%s19514_s9 + $0x1418] sm:$0xff] }
 0x2ba   : > { %13471 = vmatprep.subr.bf16.mxu0 %v16821_v48  ;;  %13799 = vmatprep.subr.bf16.mxu1 %v16823_v49  ;;  %v16917_v48 = vcombine.high %v882_v41, %v890_v42  ;;  %v16919_v49 = vcombine.high %v883_v43, %v891_v44  ;;  %v970_v16 = vld [vmem:[%s19514_s9 + $0x1450] sm:$0xff]  ;;  %v971_v34 = vld [vmem:[%s19514_s9 + $0x1458] sm:$0xff] }
 0x2bd   : > { %13472 = vmatpush1.bf16.msra.mxu0 %v16820_v20  ;;  %13800 = vmatpush1.bf16.msra.mxu1 %v16822_v57  ;;  %v16916_v20 = vcombine.low %v882_v41, %v890_v42  ;;  %v16918_v57 = vcombine.low %v883_v43, %v891_v44  ;;  %v978_v41 = vld [vmem:[%s19514_s9 + $0x1490] sm:$0xff]  ;;  %v979_v43 = vld [vmem:[%s19514_s9 + $0x1498] sm:$0xff] }
 0x2be   : > { %13473 = vmatprep.subr.bf16.mxu0 %v16837_v61  ;;  %13801 = vmatprep.subr.bf16.mxu1 %v16839_v62  ;;  %v16933_v61 = vcombine.high %v898_v51, %v906_v52  ;;  %v16935_v62 = vcombine.high %v899_v53, %v907_v55  ;;  %v986_v42 = vld [vmem:[%s19514_s9 + $0x14d0] sm:$0xff]  ;;  %v987_v44 = vld [vmem:[%s19514_s9 + $0x14d8] sm:$0xff] }
 0x2c1   : > { %13474 = vmatpush1.bf16.msra.mxu0 %v16836_v4  ;;  %13802 = vmatpush1.bf16.msra.mxu1 %v16838_v5  ;;  %v16932_v4 = vcombine.low %v898_v51, %v906_v52  ;;  %v16934_v5 = vcombine.low %v899_v53, %v907_v55  ;;  %v994_v51 = vld [vmem:[%s19514_s9 + $0x1510] sm:$0xff]  ;;  %v995_v53 = vld [vmem:[%s19514_s9 + $0x1518] sm:$0xff] }
 0x2c2   : > { %13475 = vmatprep.subr.bf16.mxu0 %v16853_v6  ;;  %13803 = vmatprep.subr.bf16.mxu1 %v16855_v7  ;;  %v16949_v6 = vcombine.high %v914_v63, %v922_v0  ;;  %v16951_v7 = vcombine.high %v915_v1, %v923_v3  ;;  %v1002_v52 = vld [vmem:[%s19514_s9 + $0x1550] sm:$0xff]  ;;  %v1003_v55 = vld [vmem:[%s19514_s9 + $0x1558] sm:$0xff] }
 0x2c5   : > { %13476 = vmatpush1.bf16.msra.mxu0 %v16852_v11  ;;  %13804 = vmatpush1.bf16.msra.mxu1 %v16854_v12  ;;  %v16948_v11 = vcombine.low %v914_v63, %v922_v0  ;;  %v16950_v12 = vcombine.low %v915_v1, %v923_v3  ;;  %v1010_v63 = vld [vmem:[%s19514_s9 + $0x1590] sm:$0xff]  ;;  %v1011_v1 = vld [vmem:[%s19514_s9 + $0x1598] sm:$0xff] }
 0x2c6   : > { %13486 = vmatprep.subr.bf16.mxu0 %v16869_v14  ;;  %13814 = vmatprep.subr.bf16.mxu1 %v16871_v15  ;;  %v16965_v14 = vcombine.high %v930_v8, %v938_v9  ;;  %v16967_v15 = vcombine.high %v931_v25, %v939_v10  ;;  %v1018_v0 = vld [vmem:[%s19514_s9 + $0x15d0] sm:$0xff]  ;;  %v1019_v3 = vld [vmem:[%s19514_s9 + $0x15d8] sm:$0xff] }
 0x2c8   : > { %13478 = vmatmul.mubr.bf16.vlgmr.msra.gmra.mrb[4].mxu0 %v19704_v23  ;;  %13806 = vmatmul.mubr.bf16.vlgmr.msra.gmra.mrb[4].mxu1 %v19704_v23 }
 0x2c9   : > { %13487 = vmatpush1.bf16.msra.mxu0 %v16868_v60  ;;  %13815 = vmatpush1.bf16.msra.mxu1 %v16870_v27  ;;  %v16964_v60 = vcombine.low %v930_v8, %v938_v9  ;;  %v16966_v27 = vcombine.low %v931_v25, %v939_v10  ;;  %v1026_v8 = vld [vmem:[%s19514_s9 + $0x1610] sm:$0xff]  ;;  %v1027_v25 = vld [vmem:[%s19514_s9 + $0x1618] sm:$0xff] }
 0x2ca   : > { %13488 = vmatprep.subr.bf16.mxu0 %v16885_v29  ;;  %13816 = vmatprep.subr.bf16.mxu1 %v16887_v30  ;;  %v16981_v29 = vcombine.high %v946_v18, %v954_v19  ;;  %v16983_v30 = vcombine.high %v947_v21, %v955_v24  ;;  %v1034_v9 = vld [vmem:[%s19514_s9 + $0x1650] sm:$0xff]  ;;  %v1035_v10 = vld [vmem:[%s19514_s9 + $0x1658] sm:$0xff] }
 0x2cb   : > { %13518 = vmatprep.mubr.bf16.mxu0 %v19717_v32  ;;  %13846 = vmatprep.mubr.bf16.mxu1 %v19717_v32 }
 0x2cd   : > { %13489 = vmatpush1.bf16.msra.mxu0 %v16884_v35  ;;  %13817 = vmatpush1.bf16.msra.mxu1 %v16886_v36  ;;  %v16980_v35 = vcombine.low %v946_v18, %v954_v19  ;;  %v16982_v36 = vcombine.low %v947_v21, %v955_v24  ;;  %v1042_v18 = vld [vmem:[%s19514_s9 + $0x1690] sm:$0xff]  ;;  %v1043_v21 = vld [vmem:[%s19514_s9 + $0x1698] sm:$0xff] }
 0x2ce   : > { %13490 = vmatprep.subr.bf16.mxu0 %v16901_v38  ;;  %13818 = vmatprep.subr.bf16.mxu1 %v16903_v39  ;;  %v16997_v38 = vcombine.high %v962_v50, %v970_v16  ;;  %v16999_v39 = vcombine.high %v963_v33, %v971_v34  ;;  %v1050_v19 = vld [vmem:[%s19514_s9 + $0x16d0] sm:$0xff]  ;;  %v1051_v24 = vld [vmem:[%s19514_s9 + $0x16d8] sm:$0xff] }
 0x2d1   : > { %13491 = vmatpush1.bf16.msra.mxu0 %v16900_v26  ;;  %13819 = vmatpush1.bf16.msra.mxu1 %v16902_v45  ;;  %v16996_v26 = vcombine.low %v962_v50, %v970_v16  ;;  %v16998_v45 = vcombine.low %v963_v33, %v971_v34  ;;  %v1058_v50 = vld [vmem:[%s19514_s9 + $0x1710] sm:$0xff]  ;;  %v1059_v33 = vld [vmem:[%s19514_s9 + $0x1718] sm:$0xff] }
 0x2d2   : > { %13492 = vmatprep.subr.bf16.mxu0 %v16917_v48  ;;  %13820 = vmatprep.subr.bf16.mxu1 %v16919_v49  ;;  %v17013_v48 = vcombine.high %v978_v41, %v986_v42  ;;  %v17015_v49 = vcombine.high %v979_v43, %v987_v44  ;;  %v1066_v16 = vld [vmem:[%s19514_s9 + $0x1750] sm:$0xff]  ;;  %v1067_v34 = vld [vmem:[%s19514_s9 + $0x1758] sm:$0xff] }
 0x2d5   : > { %13493 = vmatpush1.bf16.msra.mxu0 %v16916_v20  ;;  %13821 = vmatpush1.bf16.msra.mxu1 %v16918_v57  ;;  %v17012_v20 = vcombine.low %v978_v41, %v986_v42  ;;  %v17014_v57 = vcombine.low %v979_v43, %v987_v44  ;;  %v1074_v41 = vld [vmem:[%s19514_s9 + $0x1790] sm:$0xff]  ;;  %v1075_v43 = vld [vmem:[%s19514_s9 + $0x1798] sm:$0xff] }
 0x2d6   : > { %13494 = vmatprep.subr.bf16.mxu0 %v16933_v61  ;;  %13822 = vmatprep.subr.bf16.mxu1 %v16935_v62  ;;  %v17029_v61 = vcombine.high %v994_v51, %v1002_v52  ;;  %v17031_v62 = vcombine.high %v995_v53, %v1003_v55  ;;  %v1082_v42 = vld [vmem:[%s19514_s9 + $0x17d0] sm:$0xff]  ;;  %v1083_v44 = vld [vmem:[%s19514_s9 + $0x17d8] sm:$0xff] }
 0x2d9   : > { %13495 = vmatpush1.bf16.msra.mxu0 %v16932_v4  ;;  %13823 = vmatpush1.bf16.msra.mxu1 %v16934_v5  ;;  %v17028_v4 = vcombine.low %v994_v51, %v1002_v52  ;;  %v17030_v5 = vcombine.low %v995_v53, %v1003_v55  ;;  %v1090_v51 = vld [vmem:[%s19514_s9 + $0x1810] sm:$0xff]  ;;  %v1091_v53 = vld [vmem:[%s19514_s9 + $0x1818] sm:$0xff] }
 0x2da   : > { %13496 = vmatprep.subr.bf16.mxu0 %v16949_v6  ;;  %13824 = vmatprep.subr.bf16.mxu1 %v16951_v7  ;;  %v17045_v6 = vcombine.high %v1010_v63, %v1018_v0  ;;  %v17047_v7 = vcombine.high %v1011_v1, %v1019_v3  ;;  %v1098_v52 = vld [vmem:[%s19514_s9 + $0x1850] sm:$0xff]  ;;  %v1099_v55 = vld [vmem:[%s19514_s9 + $0x1858] sm:$0xff] }
 0x2dd   : > { %13497 = vmatpush1.bf16.msra.mxu0 %v16948_v11  ;;  %13825 = vmatpush1.bf16.msra.mxu1 %v16950_v12  ;;  %v17044_v11 = vcombine.low %v1010_v63, %v1018_v0  ;;  %v17046_v12 = vcombine.low %v1011_v1, %v1019_v3  ;;  %v1106_v63 = vld [vmem:[%s19514_s9 + $0x1890] sm:$0xff]  ;;  %v1107_v1 = vld [vmem:[%s19514_s9 + $0x1898] sm:$0xff] }
 0x2de   : > { %13498 = vmatprep.subr.bf16.mxu0 %v16965_v14  ;;  %13826 = vmatprep.subr.bf16.mxu1 %v16967_v15  ;;  %v17061_v14 = vcombine.high %v1026_v8, %v1034_v9  ;;  %v17063_v15 = vcombine.high %v1027_v25, %v1035_v10  ;;  %v1114_v0 = vld [vmem:[%s19514_s9 + $0x18d0] sm:$0xff]  ;;  %v1115_v3 = vld [vmem:[%s19514_s9 + $0x18d8] sm:$0xff] }
 0x2e1   : > { %13499 = vmatpush1.bf16.msra.mxu0 %v16964_v60  ;;  %13827 = vmatpush1.bf16.msra.mxu1 %v16966_v27  ;;  %v17060_v60 = vcombine.low %v1026_v8, %v1034_v9  ;;  %v17062_v27 = vcombine.low %v1027_v25, %v1035_v10  ;;  %v1122_v8 = vld [vmem:[%s19514_s9 + $0x1910] sm:$0xff]  ;;  %v1123_v25 = vld [vmem:[%s19514_s9 + $0x1918] sm:$0xff] }
 0x2e2   : > { %13500 = vmatprep.subr.bf16.mxu0 %v16981_v29  ;;  %13828 = vmatprep.subr.bf16.mxu1 %v16983_v30  ;;  %v17077_v29 = vcombine.high %v1042_v18, %v1050_v19  ;;  %v17079_v30 = vcombine.high %v1043_v21, %v1051_v24  ;;  %v1130_v9 = vld [vmem:[%s19514_s9 + $0x1950] sm:$0xff]  ;;  %v1131_v10 = vld [vmem:[%s19514_s9 + $0x1958] sm:$0xff] }
 0x2e5   : > { %13501 = vmatpush1.bf16.msra.mxu0 %v16980_v35  ;;  %13829 = vmatpush1.bf16.msra.mxu1 %v16982_v36  ;;  %v17076_v35 = vcombine.low %v1042_v18, %v1050_v19  ;;  %v17078_v36 = vcombine.low %v1043_v21, %v1051_v24  ;;  %v1138_v18 = vld [vmem:[%s19514_s9 + $0x1990] sm:$0xff]  ;;  %v1139_v21 = vld [vmem:[%s19514_s9 + $0x1998] sm:$0xff] }
 0x2e6   : > { %13502 = vmatprep.subr.bf16.mxu0 %v16997_v38  ;;  %13830 = vmatprep.subr.bf16.mxu1 %v16999_v39  ;;  %v17093_v38 = vcombine.high %v1058_v50, %v1066_v16  ;;  %v17095_v39 = vcombine.high %v1059_v33, %v1067_v34  ;;  %v1146_v19 = vld [vmem:[%s19514_s9 + $0x19d0] sm:$0xff]  ;;  %v1147_v24 = vld [vmem:[%s19514_s9 + $0x19d8] sm:$0xff] }
 0x2e9   : > { %13503 = vmatpush1.bf16.msra.mxu0 %v16996_v26  ;;  %13831 = vmatpush1.bf16.msra.mxu1 %v16998_v45  ;;  %v17092_v26 = vcombine.low %v1058_v50, %v1066_v16  ;;  %v17094_v45 = vcombine.low %v1059_v33, %v1067_v34  ;;  %v1154_v50 = vld [vmem:[%s19514_s9 + $0x1a10] sm:$0xff]  ;;  %v1155_v33 = vld [vmem:[%s19514_s9 + $0x1a18] sm:$0xff] }
 0x2ea   : > { %13504 = vmatprep.subr.bf16.mxu0 %v17013_v48  ;;  %13832 = vmatprep.subr.bf16.mxu1 %v17015_v49  ;;  %v17109_v48 = vcombine.high %v1074_v41, %v1082_v42  ;;  %v17111_v49 = vcombine.high %v1075_v43, %v1083_v44  ;;  %v1162_v16 = vld [vmem:[%s19514_s9 + $0x1a50] sm:$0xff]  ;;  %v1163_v34 = vld [vmem:[%s19514_s9 + $0x1a58] sm:$0xff] }
 0x2ed   : > { %13505 = vmatpush1.bf16.msra.mxu0 %v17012_v20  ;;  %13833 = vmatpush1.bf16.msra.mxu1 %v17014_v57  ;;  %v17108_v20 = vcombine.low %v1074_v41, %v1082_v42  ;;  %v17110_v57 = vcombine.low %v1075_v43, %v1083_v44  ;;  %v1170_v41 = vld [vmem:[%s19514_s9 + $0x1a90] sm:$0xff]  ;;  %v1171_v43 = vld [vmem:[%s19514_s9 + $0x1a98] sm:$0xff] }
 0x2ee   : > { %13506 = vmatprep.subr.bf16.mxu0 %v17029_v61  ;;  %13834 = vmatprep.subr.bf16.mxu1 %v17031_v62  ;;  %v17125_v61 = vcombine.high %v1090_v51, %v1098_v52  ;;  %v17127_v62 = vcombine.high %v1091_v53, %v1099_v55  ;;  %v1178_v42 = vld [vmem:[%s19514_s9 + $0x1ad0] sm:$0xff]  ;;  %v1179_v44 = vld [vmem:[%s19514_s9 + $0x1ad8] sm:$0xff] }
 0x2f1   : > { %13507 = vmatpush1.bf16.msra.mxu0 %v17028_v4  ;;  %13835 = vmatpush1.bf16.msra.mxu1 %v17030_v5  ;;  %v17124_v4 = vcombine.low %v1090_v51, %v1098_v52  ;;  %v17126_v5 = vcombine.low %v1091_v53, %v1099_v55  ;;  %v1186_v51 = vld [vmem:[%s19514_s9 + $0x1b10] sm:$0xff]  ;;  %v1187_v53 = vld [vmem:[%s19514_s9 + $0x1b18] sm:$0xff] }
 0x2f2   : > { %13508 = vmatprep.subr.bf16.mxu0 %v17045_v6  ;;  %13836 = vmatprep.subr.bf16.mxu1 %v17047_v7  ;;  %v17141_v6 = vcombine.high %v1106_v63, %v1114_v0  ;;  %v17143_v7 = vcombine.high %v1107_v1, %v1115_v3  ;;  %v1194_v52 = vld [vmem:[%s19514_s9 + $0x1b50] sm:$0xff]  ;;  %v1195_v55 = vld [vmem:[%s19514_s9 + $0x1b58] sm:$0xff] }
 0x2f5   : > { %13509 = vmatpush1.bf16.msra.mxu0 %v17044_v11  ;;  %13837 = vmatpush1.bf16.msra.mxu1 %v17046_v12  ;;  %v17140_v11 = vcombine.low %v1106_v63, %v1114_v0  ;;  %v17142_v12 = vcombine.low %v1107_v1, %v1115_v3  ;;  %v17223_v63 = vcombine.high %v1187_v53, %v1195_v55  ;;  %v1202_v0 = vld [vmem:[%s19514_s9 + $0x1b90] sm:$0xff] }
 0x2f6   : > { %13510 = vmatprep.subr.bf16.mxu0 %v17061_v14  ;;  %13838 = vmatprep.subr.bf16.mxu1 %v17063_v15  ;;  %v17157_v14 = vcombine.high %v1122_v8, %v1130_v9  ;;  %v17159_v15 = vcombine.high %v1123_v25, %v1131_v10  ;;  %v1210_v1 = vld [vmem:[%s19514_s9 + $0x1bd0] sm:$0xff] }
 0x2f9   : > { %13511 = vmatpush1.bf16.msra.mxu0 %v17060_v60  ;;  %13839 = vmatpush1.bf16.msra.mxu1 %v17062_v27  ;;  %v17156_v60 = vcombine.low %v1122_v8, %v1130_v9  ;;  %v17158_v27 = vcombine.low %v1123_v25, %v1131_v10  ;;  %v17220_v9 = vcombine.low %v1186_v51, %v1194_v52 }
 0x2fa   : > { %13512 = vmatprep.subr.bf16.mxu0 %v17077_v29  ;;  %13840 = vmatprep.subr.bf16.mxu1 %v17079_v30  ;;  %v17173_v29 = vcombine.high %v1138_v18, %v1146_v19  ;;  %v17175_v30 = vcombine.high %v1139_v21, %v1147_v24 }
 0x2fd   : > { %13513 = vmatpush1.bf16.msra.mxu0 %v17076_v35  ;;  %13841 = vmatpush1.bf16.msra.mxu1 %v17078_v36  ;;  %v17172_v35 = vcombine.low %v1138_v18, %v1146_v19  ;;  %v17174_v36 = vcombine.low %v1139_v21, %v1147_v24  ;;  %v1218_v18 = vld [vmem:[%s19514_s9 + $0x1c10] sm:$0xff]  ;;  %v1219_v21 = vld [vmem:[%s19514_s9 + $0x1c18] sm:$0xff] }
 0x2fe   : > { %13514 = vmatprep.subr.bf16.mxu0 %v17093_v38  ;;  %13842 = vmatprep.subr.bf16.mxu1 %v17095_v39  ;;  %v17189_v38 = vcombine.high %v1154_v50, %v1162_v16  ;;  %v17191_v39 = vcombine.high %v1155_v33, %v1163_v34  ;;  %v1226_v19 = vld [vmem:[%s19514_s9 + $0x1c50] sm:$0xff]  ;;  %v1227_v24 = vld [vmem:[%s19514_s9 + $0x1c58] sm:$0xff] }
 0x301   : > { %13515 = vmatpush1.bf16.msra.mxu0 %v17092_v26  ;;  %13843 = vmatpush1.bf16.msra.mxu1 %v17094_v45  ;;  %v17188_v26 = vcombine.low %v1154_v50, %v1162_v16  ;;  %v17190_v45 = vcombine.low %v1155_v33, %v1163_v34  ;;  %v1234_v50 = vld [vmem:[%s19514_s9 + $0x1c90] sm:$0xff]  ;;  %v1235_v33 = vld [vmem:[%s19514_s9 + $0x1c98] sm:$0xff] }
 0x302   : > { %13516 = vmatprep.subr.bf16.mxu0 %v17109_v48  ;;  %13844 = vmatprep.subr.bf16.mxu1 %v17111_v49  ;;  %v17205_v48 = vcombine.high %v1170_v41, %v1178_v42  ;;  %v17207_v49 = vcombine.high %v1171_v43, %v1179_v44  ;;  %v1242_v16 = vld [vmem:[%s19514_s9 + $0x1cd0] sm:$0xff]  ;;  %v1243_v34 = vld [vmem:[%s19514_s9 + $0x1cd8] sm:$0xff] }
 0x305   : > { %13517 = vmatpush1.bf16.msra.mxu0 %v17108_v20  ;;  %13845 = vmatpush1.bf16.msra.mxu1 %v17110_v57  ;;  %v17204_v20 = vcombine.low %v1170_v41, %v1178_v42  ;;  %v17206_v57 = vcombine.low %v1171_v43, %v1179_v44  ;;  %v1250_v41 = vld [vmem:[%s19514_s9 + $0x1d10] sm:$0xff]  ;;  %v1251_v43 = vld [vmem:[%s19514_s9 + $0x1d18] sm:$0xff] }
 0x306   : > { %13527 = vmatprep.subr.bf16.mxu0 %v17125_v61  ;;  %13855 = vmatprep.subr.bf16.mxu1 %v17127_v62  ;;  %v17221_v61 = vcombine.high %v1186_v51, %v1194_v52  ;;  %v1258_v42 = vld [vmem:[%s19514_s9 + $0x1d50] sm:$0xff]  ;;  %v1259_v44 = vld [vmem:[%s19514_s9 + $0x1d58] sm:$0xff] }
 0x307   : > { %v1266_v51 = vld [vmem:[%s19514_s9 + $0x1d90] sm:$0xff] }
 0x308   : > { %13519 = vmatmul.mubr.bf16.vlgmr.msra.gmra.mrb[4].mxu0 %v19785_v37  ;;  %13847 = vmatmul.mubr.bf16.vlgmr.msra.gmra.mrb[4].mxu1 %v19785_v37  ;;  %v1274_v52 = vld [vmem:[%s19514_s9 + $0x1dd0] sm:$0xff] }
 0x309   : > { %13528 = vmatpush1.bf16.msra.mxu0 %v17124_v4  ;;  %13856 = vmatpush1.bf16.msra.mxu1 %v17126_v5  ;;  %v1203_v5 = vld [vmem:[%s19514_s9 + $0x1b98] sm:$0xff] }
 0x30a   : > { %13529 = vmatprep.subr.bf16.mxu0 %v17141_v6  ;;  %13857 = vmatprep.subr.bf16.mxu1 %v17143_v7  ;;  %v1211_v6 = vld [vmem:[%s19514_s9 + $0x1bd8] sm:$0xff] }
 0x30b   : > { %13559 = vmatprep.mubr.bf16.mxu0 %v19798_v46  ;;  %13887 = vmatprep.mubr.bf16.mxu1 %v19798_v46 }
 0x30d   : > { %13530 = vmatpush1.bf16.msra.mxu0 %v17140_v11  ;;  %13858 = vmatpush1.bf16.msra.mxu1 %v17142_v12  ;;  %v17222_v11 = vcombine.low %v1187_v53, %v1195_v55  ;;  %v17237_v12 = vcombine.high %v1202_v0, %v1210_v1  ;;  %v1267_v53 = vld [vmem:[%s19514_s9 + $0x1d98] sm:$0xff] }
 0x30e   : > { %13531 = vmatprep.subr.bf16.mxu0 %v17157_v14  ;;  %13859 = vmatprep.subr.bf16.mxu1 %v17159_v15  ;;  %v17239_v15 = vcombine.high %v1203_v5, %v1211_v6  ;;  %v1275_v55 = vld [vmem:[%s19514_s9 + $0x1dd8] sm:$0xff] }
 0x311   : > { %13532 = vmatpush1.bf16.msra.mxu0 %v17156_v60  ;;  %13860 = vmatpush1.bf16.msra.mxu1 %v17158_v27  ;;  %v17236_v60 = vcombine.low %v1202_v0, %v1210_v1  ;;  %v17238_v27 = vcombine.low %v1203_v5, %v1211_v6  ;;  %v1282_v0 = vld [vmem:[%s19514_s9 + $0x1e10] sm:$0xff]  ;;  %v1283_v5 = vld [vmem:[%s19514_s9 + $0x1e18] sm:$0xff] }
 0x312   : > { %13533 = vmatprep.subr.bf16.mxu0 %v17173_v29  ;;  %13861 = vmatprep.subr.bf16.mxu1 %v17175_v30  ;;  %v17253_v29 = vcombine.high %v1218_v18, %v1226_v19  ;;  %v17255_v30 = vcombine.high %v1219_v21, %v1227_v24  ;;  %v1290_v1 = vld [vmem:[%s19514_s9 + $0x1e50] sm:$0xff]  ;;  %v1291_v6 = vld [vmem:[%s19514_s9 + $0x1e58] sm:$0xff] }
 0x315   : > { %13534 = vmatpush1.bf16.msra.mxu0 %v17172_v35  ;;  %13862 = vmatpush1.bf16.msra.mxu1 %v17174_v36  ;;  %v17252_v35 = vcombine.low %v1218_v18, %v1226_v19  ;;  %v17254_v36 = vcombine.low %v1219_v21, %v1227_v24  ;;  %v17316_v18 = vcombine.low %v1282_v0, %v1290_v1 }
 0x316   : > { %13535 = vmatprep.subr.bf16.mxu0 %v17189_v38  ;;  %13863 = vmatprep.subr.bf16.mxu1 %v17191_v39  ;;  %v17269_v38 = vcombine.high %v1234_v50, %v1242_v16  ;;  %v17271_v39 = vcombine.high %v1235_v33, %v1243_v34  ;;  %v17318_v19 = vcombine.low %v1283_v5, %v1291_v6 }
 0x319   : > { %13536 = vmatpush1.bf16.msra.mxu0 %v17188_v26  ;;  %13864 = vmatpush1.bf16.msra.mxu1 %v17190_v45  ;;  %v17268_v26 = vcombine.low %v1234_v50, %v1242_v16  ;;  %v17270_v45 = vcombine.low %v1235_v33, %v1243_v34 }
 0x31a   : > { %13537 = vmatprep.subr.bf16.mxu0 %v17205_v48  ;;  %13865 = vmatprep.subr.bf16.mxu1 %v17207_v49  ;;  %v17285_v48 = vcombine.high %v1250_v41, %v1258_v42  ;;  %v17287_v49 = vcombine.high %v1251_v43, %v1259_v44 }
 0x31b   : > { %v20422_v62 = vpop.f32.mrb[0].mxu0  ;;  %v20426_v3 = vpop.f32.mrb[0].mxu1 }
 0x31c   : > { %v20428_v4 = vpop.f32.mrb[1].mxu0  ;;  %v20432_v7 = vpop.f32.mrb[1].mxu1 }
 0x31d   : > { %v13073_v8 = vpop.f32.mrb[2].mxu0  ;;  %13538 = vmatpush1.bf16.msra.mxu0 %v17204_v20  ;;  %v13401_v25 = vpop.f32.mrb[2].mxu1  ;;  %13866 = vmatpush1.bf16.msra.mxu1 %v17206_v57  ;;  %v17284_v20 = vcombine.low %v1250_v41, %v1258_v42  ;;  %v17286_v57 = vcombine.low %v1251_v43, %v1259_v44 }
 0x31e   : > { %v13074_v10 = vpop.f32.mrb[3].mxu0  ;;  %13539 = vmatprep.subr.bf16.mxu0 %v17221_v61  ;;  %v13402_v14 = vpop.f32.mrb[3].mxu1  ;;  %13867 = vmatprep.subr.bf16.mxu1 %v17223_v63  ;;  %v17301_v61 = vcombine.high %v1266_v51, %v1274_v52  ;;  %v17303_v63 = vcombine.high %v1267_v53, %v1275_v55  ;;  %v17300_v8 = vcombine.low %v1266_v51, %v1274_v52 }
 0x31f   : > { %v17317_v25 = vcombine.high %v1282_v0, %v1290_v1  ;;  %v17319_v10 = vcombine.high %v1283_v5, %v1291_v6  ;;  %v1299_v14 = vld [vmem:[%s19514_s9 + $0x1e98] sm:$0xff] }
 0x321   : > { %13540 = vmatpush1.bf16.msra.mxu0 %v17220_v9  ;;  %13868 = vmatpush1.bf16.msra.mxu1 %v17222_v11  ;;  %v17302_v9 = vcombine.low %v1267_v53, %v1275_v55  ;;  %v1298_v11 = vld [vmem:[%s19514_s9 + $0x1e90] sm:$0xff] }
 0x322   : > { %13541 = vmatprep.subr.bf16.mxu0 %v17237_v12  ;;  %13869 = vmatprep.subr.bf16.mxu1 %v17239_v15  ;;  %v1306_v12 = vld [vmem:[%s19514_s9 + $0x1ed0] sm:$0xff]  ;;  %v1307_v15 = vld [vmem:[%s19514_s9 + $0x1ed8] sm:$0xff] }
 0x323   : > { %v17333_v21 = vcombine.high %v1298_v11, %v1306_v12  ;;  %v17335_v24 = vcombine.high %v1299_v14, %v1307_v15  ;;  %v17332_v50 = vcombine.low %v1298_v11, %v1306_v12  ;;  %v17334_v16 = vcombine.low %v1299_v14, %v1307_v15 }
 0x325   : > { %13542 = vmatpush1.bf16.msra.mxu0 %v17236_v60  ;;  %13870 = vmatpush1.bf16.msra.mxu1 %v17238_v27  ;;  %v1314_v60 = vld [vmem:[%s19514_s9 + $0x1f10] sm:$0xff] }
 0x326   : > { %13543 = vmatprep.subr.bf16.mxu0 %v17253_v29  ;;  %13871 = vmatprep.subr.bf16.mxu1 %v17255_v30  ;;  %v1322_v27 = vld [vmem:[%s19514_s9 + $0x1f50] sm:$0xff]  ;;  %v1315_v29 = vld [vmem:[%s19514_s9 + $0x1f18] sm:$0xff] }
 0x327   : > { %v1323_v30 = vld [vmem:[%s19514_s9 + $0x1f58] sm:$0xff]  ;;  %v17349_v33 = vcombine.high %v1314_v60, %v1322_v27  ;;  %v17348_v41 = vcombine.low %v1314_v60, %v1322_v27 }
 0x328   : > { %v17351_v34 = vcombine.high %v1315_v29, %v1323_v30  ;;  %v17350_v42 = vcombine.low %v1315_v29, %v1323_v30 }
 0x329   : > { %13544 = vmatpush1.bf16.msra.mxu0 %v17252_v35  ;;  %13872 = vmatpush1.bf16.msra.mxu1 %v17254_v36  ;;  %v1330_v35 = vld [vmem:[%s19514_s9 + $0x1f90] sm:$0xff] }
 0x32a   : > { %13545 = vmatprep.subr.bf16.mxu0 %v17269_v38  ;;  %13873 = vmatprep.subr.bf16.mxu1 %v17271_v39  ;;  %v1338_v36 = vld [vmem:[%s19514_s9 + $0x1fd0] sm:$0xff]  ;;  %v1331_v38 = vld [vmem:[%s19514_s9 + $0x1f98] sm:$0xff] }
 0x32b   : > { %v1339_v39 = vld [vmem:[%s19514_s9 + $0x1fd8] sm:$0xff]  ;;  %v17365_v43 = vcombine.high %v1330_v35, %v1338_v36  ;;  %v17364_v51 = vcombine.low %v1330_v35, %v1338_v36 }
 0x32c   : > { %v17367_v44 = vcombine.high %v1331_v38, %v1339_v39  ;;  %v17366_v52 = vcombine.low %v1331_v38, %v1339_v39 }
 0x32d   : > { %13546 = vmatpush1.bf16.msra.mxu0 %v17268_v26  ;;  %13874 = vmatpush1.bf16.msra.mxu1 %v17270_v45  ;;  %v1346_v26 = vld [vmem:[%s19514_s9 + $0x2010] sm:$0xff] }
 0x32e   : > { %13547 = vmatprep.subr.bf16.mxu0 %v17285_v48  ;;  %13875 = vmatprep.subr.bf16.mxu1 %v17287_v49  ;;  %v1354_v45 = vld [vmem:[%s19514_s9 + $0x2050] sm:$0xff]  ;;  %v1347_v48 = vld [vmem:[%s19514_s9 + $0x2018] sm:$0xff] }
 0x32f   : > { %v1355_v49 = vld [vmem:[%s19514_s9 + $0x2058] sm:$0xff]  ;;  %v17381_v53 = vcombine.high %v1346_v26, %v1354_v45  ;;  %v17380_v0 = vcombine.low %v1346_v26, %v1354_v45 }
 0x330   : > { %v17383_v55 = vcombine.high %v1347_v48, %v1355_v49  ;;  %v17382_v1 = vcombine.low %v1347_v48, %v1355_v49 }
 0x331   : > { %13548 = vmatpush1.bf16.msra.mxu0 %v17284_v20  ;;  %13876 = vmatpush1.bf16.msra.mxu1 %v17286_v57  ;;  %v1362_v20 = vld [vmem:[%s19514_s9 + $0x2090] sm:$0xff] }
 0x332   : > { %13549 = vmatprep.subr.bf16.mxu0 %v17301_v61  ;;  %13877 = vmatprep.subr.bf16.mxu1 %v17303_v63  ;;  %v1370_v57 = vld [vmem:[%s19514_s9 + $0x20d0] sm:$0xff]  ;;  %v1363_v61 = vld [vmem:[%s19514_s9 + $0x2098] sm:$0xff] }
 0x333   : > { %v1371_v63 = vld [vmem:[%s19514_s9 + $0x20d8] sm:$0xff]  ;;  %v17397_v5 = vcombine.high %v1362_v20, %v1370_v57  ;;  %v17396_v11 = vcombine.low %v1362_v20, %v1370_v57 }
 0x334   : > { %v17399_v6 = vcombine.high %v1363_v61, %v1371_v63  ;;  %v17398_v12 = vcombine.low %v1363_v61, %v1371_v63 }
 0x335   : > { %13550 = vmatpush1.bf16.msra.mxu0 %v17300_v8  ;;  %13878 = vmatpush1.bf16.msra.mxu1 %v17302_v9  ;;  %v1378_v8 = vld [vmem:[%s19514_s9 + $0x2110] sm:$0xff] }
 0x336   : > { %13551 = vmatprep.subr.bf16.mxu0 %v17317_v25  ;;  %13879 = vmatprep.subr.bf16.mxu1 %v17319_v10  ;;  %v1386_v9 = vld [vmem:[%s19514_s9 + $0x2150] sm:$0xff]  ;;  %v1379_v25 = vld [vmem:[%s19514_s9 + $0x2118] sm:$0xff] }
 0x337   : > { %v1387_v10 = vld [vmem:[%s19514_s9 + $0x2158] sm:$0xff]  ;;  %v17413_v14 = vcombine.high %v1378_v8, %v1386_v9  ;;  %v17412_v60 = vcombine.low %v1378_v8, %v1386_v9 }
 0x338   : > { %v17415_v15 = vcombine.high %v1379_v25, %v1387_v10  ;;  %v17414_v27 = vcombine.low %v1379_v25, %v1387_v10 }
 0x339   : > { %13552 = vmatpush1.bf16.msra.mxu0 %v17316_v18  ;;  %13880 = vmatpush1.bf16.msra.mxu1 %v17318_v19  ;;  %v1394_v18 = vld [vmem:[%s19514_s9 + $0x2190] sm:$0xff] }
 0x33a   : > { %13553 = vmatprep.subr.bf16.mxu0 %v17333_v21  ;;  %13881 = vmatprep.subr.bf16.mxu1 %v17335_v24  ;;  %v1402_v19 = vld [vmem:[%s19514_s9 + $0x21d0] sm:$0xff]  ;;  %v1395_v21 = vld [vmem:[%s19514_s9 + $0x2198] sm:$0xff] }
 0x33b   : > { %v1403_v24 = vld [vmem:[%s19514_s9 + $0x21d8] sm:$0xff]  ;;  %v17429_v29 = vcombine.high %v1394_v18, %v1402_v19  ;;  %v17428_v35 = vcombine.low %v1394_v18, %v1402_v19 }
 0x33c   : > { %v17431_v30 = vcombine.high %v1395_v21, %v1403_v24  ;;  %v17430_v36 = vcombine.low %v1395_v21, %v1403_v24 }
 0x33d   : > { %13554 = vmatpush1.bf16.msra.mxu0 %v17332_v50  ;;  %13882 = vmatpush1.bf16.msra.mxu1 %v17334_v16  ;;  %v1410_v50 = vld [vmem:[%s19514_s9 + $0x2210] sm:$0xff] }
 0x33e   : > { %13555 = vmatprep.subr.bf16.mxu0 %v17349_v33  ;;  %13883 = vmatprep.subr.bf16.mxu1 %v17351_v34  ;;  %v1418_v16 = vld [vmem:[%s19514_s9 + $0x2250] sm:$0xff]  ;;  %v1411_v33 = vld [vmem:[%s19514_s9 + $0x2218] sm:$0xff] }
 0x33f   : > { %v1419_v34 = vld [vmem:[%s19514_s9 + $0x2258] sm:$0xff]  ;;  %v17445_v38 = vcombine.high %v1410_v50, %v1418_v16  ;;  %v17444_v26 = vcombine.low %v1410_v50, %v1418_v16 }
 0x340   : > { %v17447_v39 = vcombine.high %v1411_v33, %v1419_v34  ;;  %v17446_v45 = vcombine.low %v1411_v33, %v1419_v34 }
 0x341   : > { %13556 = vmatpush1.bf16.msra.mxu0 %v17348_v41  ;;  %13884 = vmatpush1.bf16.msra.mxu1 %v17350_v42  ;;  %v1426_v41 = vld [vmem:[%s19514_s9 + $0x2290] sm:$0xff] }
 0x342   : > { %13557 = vmatprep.subr.bf16.mxu0 %v17365_v43  ;;  %13885 = vmatprep.subr.bf16.mxu1 %v17367_v44  ;;  %v1434_v42 = vld [vmem:[%s19514_s9 + $0x22d0] sm:$0xff]  ;;  %v1427_v43 = vld [vmem:[%s19514_s9 + $0x2298] sm:$0xff] }
 0x343   : > { %v1435_v44 = vld [vmem:[%s19514_s9 + $0x22d8] sm:$0xff]  ;;  %v17461_v48 = vcombine.high %v1426_v41, %v1434_v42  ;;  %v17460_v20 = vcombine.low %v1426_v41, %v1434_v42 }
 0x344   : > { %v17463_v49 = vcombine.high %v1427_v43, %v1435_v44  ;;  %v17462_v57 = vcombine.low %v1427_v43, %v1435_v44 }
 0x345   : > { %13558 = vmatpush1.bf16.msra.mxu0 %v17364_v51  ;;  %13886 = vmatpush1.bf16.msra.mxu1 %v17366_v52  ;;  %v1442_v51 = vld [vmem:[%s19514_s9 + $0x2310] sm:$0xff] }
 0x346   : > { %13568 = vmatprep.subr.bf16.mxu0 %v17381_v53  ;;  %13896 = vmatprep.subr.bf16.mxu1 %v17383_v55  ;;  %v1450_v52 = vld [vmem:[%s19514_s9 + $0x2350] sm:$0xff]  ;;  %v1443_v53 = vld [vmem:[%s19514_s9 + $0x2318] sm:$0xff] }
 0x347   : > { %v1451_v55 = vld [vmem:[%s19514_s9 + $0x2358] sm:$0xff]  ;;  %v17477_v61 = vcombine.high %v1442_v51, %v1450_v52  ;;  %v17476_v8 = vcombine.low %v1442_v51, %v1450_v52 }
 0x348   : > { %13560 = vmatmul.mubr.bf16.vlgmr.msra.gmra.mrb[4].mxu0 %v19866_v56  ;;  %13888 = vmatmul.mubr.bf16.vlgmr.msra.gmra.mrb[4].mxu1 %v19866_v56  ;;  %v17479_v63 = vcombine.high %v1443_v53, %v1451_v55  ;;  %v17478_v9 = vcombine.low %v1443_v53, %v1451_v55 }
 0x349   : > { %13569 = vmatpush1.bf16.msra.mxu0 %v17380_v0  ;;  %13897 = vmatpush1.bf16.msra.mxu1 %v17382_v1  ;;  %v1458_v0 = vld [vmem:[%s19514_s9 + $0x2390] sm:$0xff] }
 0x34a   : > { %13570 = vmatprep.subr.bf16.mxu0 %v17397_v5  ;;  %13898 = vmatprep.subr.bf16.mxu1 %v17399_v6  ;;  %v1466_v1 = vld [vmem:[%s19514_s9 + $0x23d0] sm:$0xff]  ;;  %v1459_v5 = vld [vmem:[%s19514_s9 + $0x2398] sm:$0xff] }
 0x34b   : > { %13600 = vmatprep.mubr.bf16.mxu0 %v19879_v2  ;;  %13928 = vmatprep.mubr.bf16.mxu1 %v19879_v2  ;;  %v1467_v6 = vld [vmem:[%s19514_s9 + $0x23d8] sm:$0xff]  ;;  %v17493_v25 = vcombine.high %v1458_v0, %v1466_v1  ;;  %v17492_v18 = vcombine.low %v1458_v0, %v1466_v1 }
 0x34c   : > { %v17495_v10 = vcombine.high %v1459_v5, %v1467_v6  ;;  %v17494_v19 = vcombine.low %v1459_v5, %v1467_v6 }
 0x34d   : > { %13571 = vmatpush1.bf16.msra.mxu0 %v17396_v11  ;;  %13899 = vmatpush1.bf16.msra.mxu1 %v17398_v12  ;;  %v1474_v11 = vld [vmem:[%s19514_s9 + $0x2410] sm:$0xff] }
 0x34e   : > { %13572 = vmatprep.subr.bf16.mxu0 %v17413_v14  ;;  %13900 = vmatprep.subr.bf16.mxu1 %v17415_v15  ;;  %v1482_v12 = vld [vmem:[%s19514_s9 + $0x2450] sm:$0xff]  ;;  %v1475_v14 = vld [vmem:[%s19514_s9 + $0x2418] sm:$0xff] }
 0x34f   : > { %v1483_v15 = vld [vmem:[%s19514_s9 + $0x2458] sm:$0xff]  ;;  %v17509_v21 = vcombine.high %v1474_v11, %v1482_v12  ;;  %v17508_v50 = vcombine.low %v1474_v11, %v1482_v12 }
 0x350   : > { %v17511_v24 = vcombine.high %v1475_v14, %v1483_v15  ;;  %v17510_v16 = vcombine.low %v1475_v14, %v1483_v15 }
 0x351   : > { %13573 = vmatpush1.bf16.msra.mxu0 %v17412_v60  ;;  %13901 = vmatpush1.bf16.msra.mxu1 %v17414_v27  ;;  %v1490_v60 = vld [vmem:[%s19514_s9 + $0x2490] sm:$0xff] }
 0x352   : > { %13574 = vmatprep.subr.bf16.mxu0 %v17429_v29  ;;  %13902 = vmatprep.subr.bf16.mxu1 %v17431_v30  ;;  %v1498_v27 = vld [vmem:[%s19514_s9 + $0x24d0] sm:$0xff]  ;;  %v1491_v29 = vld [vmem:[%s19514_s9 + $0x2498] sm:$0xff] }
 0x353   : > { %v1499_v30 = vld [vmem:[%s19514_s9 + $0x24d8] sm:$0xff]  ;;  %v17525_v33 = vcombine.high %v1490_v60, %v1498_v27  ;;  %v17524_v41 = vcombine.low %v1490_v60, %v1498_v27 }
 0x354   : > { %v17527_v34 = vcombine.high %v1491_v29, %v1499_v30  ;;  %v17526_v42 = vcombine.low %v1491_v29, %v1499_v30 }
 0x355   : > { %13575 = vmatpush1.bf16.msra.mxu0 %v17428_v35  ;;  %13903 = vmatpush1.bf16.msra.mxu1 %v17430_v36  ;;  %v1506_v35 = vld [vmem:[%s19514_s9 + $0x2510] sm:$0xff] }
 0x356   : > { %13576 = vmatprep.subr.bf16.mxu0 %v17445_v38  ;;  %13904 = vmatprep.subr.bf16.mxu1 %v17447_v39  ;;  %v1514_v36 = vld [vmem:[%s19514_s9 + $0x2550] sm:$0xff]  ;;  %v1507_v38 = vld [vmem:[%s19514_s9 + $0x2518] sm:$0xff] }
 0x357   : > { %v1515_v39 = vld [vmem:[%s19514_s9 + $0x2558] sm:$0xff]  ;;  %v17541_v43 = vcombine.high %v1506_v35, %v1514_v36  ;;  %v17540_v51 = vcombine.low %v1506_v35, %v1514_v36 }
 0x358   : > { %v17543_v44 = vcombine.high %v1507_v38, %v1515_v39  ;;  %v17542_v52 = vcombine.low %v1507_v38, %v1515_v39 }
 0x359   : > { %13577 = vmatpush1.bf16.msra.mxu0 %v17444_v26  ;;  %13905 = vmatpush1.bf16.msra.mxu1 %v17446_v45  ;;  %v1522_v26 = vld [vmem:[%s19514_s9 + $0x2590] sm:$0xff] }
 0x35a   : > { %13578 = vmatprep.subr.bf16.mxu0 %v17461_v48  ;;  %13906 = vmatprep.subr.bf16.mxu1 %v17463_v49  ;;  %v1530_v45 = vld [vmem:[%s19514_s9 + $0x25d0] sm:$0xff]  ;;  %v1523_v48 = vld [vmem:[%s19514_s9 + $0x2598] sm:$0xff] }
 0x35b   : > { %v1531_v49 = vld [vmem:[%s19514_s9 + $0x25d8] sm:$0xff]  ;;  %v17557_v53 = vcombine.high %v1522_v26, %v1530_v45  ;;  %v17556_v0 = vcombine.low %v1522_v26, %v1530_v45 }
 0x35c   : > { %v17559_v55 = vcombine.high %v1523_v48, %v1531_v49  ;;  %v17558_v1 = vcombine.low %v1523_v48, %v1531_v49 }
 0x35d   : > { %13579 = vmatpush1.bf16.msra.mxu0 %v17460_v20  ;;  %13907 = vmatpush1.bf16.msra.mxu1 %v17462_v57  ;;  %v1538_v20 = vld [vmem:[%s19514_s9 + $0x2610] sm:$0xff] }
 0x35e   : > { %13580 = vmatprep.subr.bf16.mxu0 %v17477_v61  ;;  %13908 = vmatprep.subr.bf16.mxu1 %v17479_v63  ;;  %v1546_v57 = vld [vmem:[%s19514_s9 + $0x2650] sm:$0xff]  ;;  %v1539_v61 = vld [vmem:[%s19514_s9 + $0x2618] sm:$0xff] }
 0x35f   : > { %v1547_v63 = vld [vmem:[%s19514_s9 + $0x2658] sm:$0xff]  ;;  %v17573_v5 = vcombine.high %v1538_v20, %v1546_v57  ;;  %v17572_v11 = vcombine.low %v1538_v20, %v1546_v57 }
 0x360   : > { %v17575_v6 = vcombine.high %v1539_v61, %v1547_v63  ;;  %v17574_v12 = vcombine.low %v1539_v61, %v1547_v63 }
 0x361   : > { %13581 = vmatpush1.bf16.msra.mxu0 %v17476_v8  ;;  %13909 = vmatpush1.bf16.msra.mxu1 %v17478_v9  ;;  %v1554_v8 = vld [vmem:[%s19514_s9 + $0x2690] sm:$0xff] }
 0x362   : > { %13582 = vmatprep.subr.bf16.mxu0 %v17493_v25  ;;  %13910 = vmatprep.subr.bf16.mxu1 %v17495_v10  ;;  %v1562_v9 = vld [vmem:[%s19514_s9 + $0x26d0] sm:$0xff]  ;;  %v1555_v25 = vld [vmem:[%s19514_s9 + $0x2698] sm:$0xff] }
 0x363   : > { %v1563_v10 = vld [vmem:[%s19514_s9 + $0x26d8] sm:$0xff]  ;;  %v17589_v14 = vcombine.high %v1554_v8, %v1562_v9  ;;  %v17588_v60 = vcombine.low %v1554_v8, %v1562_v9 }
 0x364   : > { %v17591_v15 = vcombine.high %v1555_v25, %v1563_v10  ;;  %v17590_v27 = vcombine.low %v1555_v25, %v1563_v10 }
 0x365   : > { %13583 = vmatpush1.bf16.msra.mxu0 %v17492_v18  ;;  %13911 = vmatpush1.bf16.msra.mxu1 %v17494_v19  ;;  %v1570_v18 = vld [vmem:[%s19514_s9 + $0x2710] sm:$0xff] }
 0x366   : > { %13584 = vmatprep.subr.bf16.mxu0 %v17509_v21  ;;  %13912 = vmatprep.subr.bf16.mxu1 %v17511_v24  ;;  %v1578_v19 = vld [vmem:[%s19514_s9 + $0x2750] sm:$0xff]  ;;  %v1571_v21 = vld [vmem:[%s19514_s9 + $0x2718] sm:$0xff] }
 0x367   : > { %v1579_v24 = vld [vmem:[%s19514_s9 + $0x2758] sm:$0xff]  ;;  %v17605_v29 = vcombine.high %v1570_v18, %v1578_v19  ;;  %v17604_v35 = vcombine.low %v1570_v18, %v1578_v19 }
 0x368   : > { %v17607_v30 = vcombine.high %v1571_v21, %v1579_v24  ;;  %v17606_v36 = vcombine.low %v1571_v21, %v1579_v24 }
 0x369   : > { %13585 = vmatpush1.bf16.msra.mxu0 %v17508_v50  ;;  %13913 = vmatpush1.bf16.msra.mxu1 %v17510_v16  ;;  %v1586_v50 = vld [vmem:[%s19514_s9 + $0x2790] sm:$0xff] }
 0x36a   : > { %13586 = vmatprep.subr.bf16.mxu0 %v17525_v33  ;;  %13914 = vmatprep.subr.bf16.mxu1 %v17527_v34  ;;  %v1594_v16 = vld [vmem:[%s19514_s9 + $0x27d0] sm:$0xff]  ;;  %v1587_v33 = vld [vmem:[%s19514_s9 + $0x2798] sm:$0xff] }
 0x36b   : > { %v1595_v34 = vld [vmem:[%s19514_s9 + $0x27d8] sm:$0xff]  ;;  %v17621_v38 = vcombine.high %v1586_v50, %v1594_v16  ;;  %v17620_v26 = vcombine.low %v1586_v50, %v1594_v16 }
 0x36c   : > { %v17623_v39 = vcombine.high %v1587_v33, %v1595_v34  ;;  %v17622_v45 = vcombine.low %v1587_v33, %v1595_v34 }
 0x36d   : > { %13587 = vmatpush1.bf16.msra.mxu0 %v17524_v41  ;;  %13915 = vmatpush1.bf16.msra.mxu1 %v17526_v42  ;;  %v1602_v41 = vld [vmem:[%s19514_s9 + $0x2810] sm:$0xff] }
 0x36e   : > { %13588 = vmatprep.subr.bf16.mxu0 %v17541_v43  ;;  %13916 = vmatprep.subr.bf16.mxu1 %v17543_v44  ;;  %v1610_v42 = vld [vmem:[%s19514_s9 + $0x2850] sm:$0xff]  ;;  %v1603_v43 = vld [vmem:[%s19514_s9 + $0x2818] sm:$0xff] }
 0x36f   : > { %v1611_v44 = vld [vmem:[%s19514_s9 + $0x2858] sm:$0xff]  ;;  %v17637_v48 = vcombine.high %v1602_v41, %v1610_v42  ;;  %v17636_v20 = vcombine.low %v1602_v41, %v1610_v42 }
 0x370   : > { %v17639_v49 = vcombine.high %v1603_v43, %v1611_v44  ;;  %v17638_v57 = vcombine.low %v1603_v43, %v1611_v44 }
 0x371   : > { %13589 = vmatpush1.bf16.msra.mxu0 %v17540_v51  ;;  %13917 = vmatpush1.bf16.msra.mxu1 %v17542_v52  ;;  %v1618_v51 = vld [vmem:[%s19514_s9 + $0x2890] sm:$0xff] }
 0x372   : > { %13590 = vmatprep.subr.bf16.mxu0 %v17557_v53  ;;  %13918 = vmatprep.subr.bf16.mxu1 %v17559_v55  ;;  %v1626_v52 = vld [vmem:[%s19514_s9 + $0x28d0] sm:$0xff]  ;;  %v1619_v53 = vld [vmem:[%s19514_s9 + $0x2898] sm:$0xff] }
 0x373   : > { %v1627_v55 = vld [vmem:[%s19514_s9 + $0x28d8] sm:$0xff]  ;;  %v17653_v61 = vcombine.high %v1618_v51, %v1626_v52  ;;  %v17652_v8 = vcombine.low %v1618_v51, %v1626_v52 }
 0x374   : > { %v17655_v63 = vcombine.high %v1619_v53, %v1627_v55  ;;  %v17654_v9 = vcombine.low %v1619_v53, %v1627_v55 }
 0x375   : > { %13591 = vmatpush1.bf16.msra.mxu0 %v17556_v0  ;;  %13919 = vmatpush1.bf16.msra.mxu1 %v17558_v1  ;;  %v1634_v0 = vld [vmem:[%s19514_s9 + $0x2910] sm:$0xff] }
 0x376   : > { %13592 = vmatprep.subr.bf16.mxu0 %v17573_v5  ;;  %13920 = vmatprep.subr.bf16.mxu1 %v17575_v6  ;;  %v1642_v1 = vld [vmem:[%s19514_s9 + $0x2950] sm:$0xff]  ;;  %v1635_v5 = vld [vmem:[%s19514_s9 + $0x2918] sm:$0xff] }
 0x377   : > { %v1643_v6 = vld [vmem:[%s19514_s9 + $0x2958] sm:$0xff]  ;;  %v17669_v25 = vcombine.high %v1634_v0, %v1642_v1  ;;  %v17668_v18 = vcombine.low %v1634_v0, %v1642_v1 }
 0x378   : > { %v17671_v10 = vcombine.high %v1635_v5, %v1643_v6  ;;  %v17670_v19 = vcombine.low %v1635_v5, %v1643_v6 }
 0x379   : > { %13593 = vmatpush1.bf16.msra.mxu0 %v17572_v11  ;;  %13921 = vmatpush1.bf16.msra.mxu1 %v17574_v12  ;;  %v1650_v11 = vld [vmem:[%s19514_s9 + $0x2990] sm:$0xff] }
 0x37a   : > { %13594 = vmatprep.subr.bf16.mxu0 %v17589_v14  ;;  %13922 = vmatprep.subr.bf16.mxu1 %v17591_v15  ;;  %v1658_v12 = vld [vmem:[%s19514_s9 + $0x29d0] sm:$0xff]  ;;  %v1651_v14 = vld [vmem:[%s19514_s9 + $0x2998] sm:$0xff] }
 0x37b   : > { %v1659_v15 = vld [vmem:[%s19514_s9 + $0x29d8] sm:$0xff]  ;;  %v17685_v21 = vcombine.high %v1650_v11, %v1658_v12  ;;  %v17684_v50 = vcombine.low %v1650_v11, %v1658_v12 }
 0x37c   : > { %v17687_v24 = vcombine.high %v1651_v14, %v1659_v15  ;;  %v17686_v16 = vcombine.low %v1651_v14, %v1659_v15 }
 0x37d   : > { %13595 = vmatpush1.bf16.msra.mxu0 %v17588_v60  ;;  %13923 = vmatpush1.bf16.msra.mxu1 %v17590_v27  ;;  %v1666_v60 = vld [vmem:[%s19514_s9 + $0x2a10] sm:$0xff] }
 0x37e   : > { %13596 = vmatprep.subr.bf16.mxu0 %v17605_v29  ;;  %13924 = vmatprep.subr.bf16.mxu1 %v17607_v30  ;;  %v1674_v27 = vld [vmem:[%s19514_s9 + $0x2a50] sm:$0xff]  ;;  %v1667_v29 = vld [vmem:[%s19514_s9 + $0x2a18] sm:$0xff] }
 0x37f   : > { %v1675_v30 = vld [vmem:[%s19514_s9 + $0x2a58] sm:$0xff]  ;;  %v17701_v33 = vcombine.high %v1666_v60, %v1674_v27  ;;  %v17700_v41 = vcombine.low %v1666_v60, %v1674_v27 }
 0x380   : > { %v17703_v34 = vcombine.high %v1667_v29, %v1675_v30  ;;  %v17702_v42 = vcombine.low %v1667_v29, %v1675_v30 }
 0x381   : > { %13597 = vmatpush1.bf16.msra.mxu0 %v17604_v35  ;;  %13925 = vmatpush1.bf16.msra.mxu1 %v17606_v36  ;;  %v1682_v35 = vld [vmem:[%s19514_s9 + $0x2a90] sm:$0xff] }
 0x382   : > { %13598 = vmatprep.subr.bf16.mxu0 %v17621_v38  ;;  %13926 = vmatprep.subr.bf16.mxu1 %v17623_v39  ;;  %v1690_v36 = vld [vmem:[%s19514_s9 + $0x2ad0] sm:$0xff]  ;;  %v1683_v38 = vld [vmem:[%s19514_s9 + $0x2a98] sm:$0xff] }
 0x383   : > { %v1691_v39 = vld [vmem:[%s19514_s9 + $0x2ad8] sm:$0xff]  ;;  %v17717_v43 = vcombine.high %v1682_v35, %v1690_v36  ;;  %v17716_v51 = vcombine.low %v1682_v35, %v1690_v36 }
 0x384   : > { %v17719_v44 = vcombine.high %v1683_v38, %v1691_v39  ;;  %v17718_v52 = vcombine.low %v1683_v38, %v1691_v39 }
 0x385   : > { %13599 = vmatpush1.bf16.msra.mxu0 %v17620_v26  ;;  %13927 = vmatpush1.bf16.msra.mxu1 %v17622_v45  ;;  %v1698_v26 = vld [vmem:[%s19514_s9 + $0x2b10] sm:$0xff] }
 0x386   : > { %13609 = vmatprep.subr.bf16.mxu0 %v17637_v48  ;;  %13937 = vmatprep.subr.bf16.mxu1 %v17639_v49  ;;  %v1706_v45 = vld [vmem:[%s19514_s9 + $0x2b50] sm:$0xff]  ;;  %v1699_v48 = vld [vmem:[%s19514_s9 + $0x2b18] sm:$0xff] }
 0x387   : > { %v1707_v49 = vld [vmem:[%s19514_s9 + $0x2b58] sm:$0xff]  ;;  %v17733_v53 = vcombine.high %v1698_v26, %v1706_v45  ;;  %v17732_v0 = vcombine.low %v1698_v26, %v1706_v45 }
 0x388   : > { %13601 = vmatmul.mubr.bf16.vlgmr.msra.gmra.mrb[4].mxu0 %v19947_v17  ;;  %13929 = vmatmul.mubr.bf16.vlgmr.msra.gmra.mrb[4].mxu1 %v19947_v17  ;;  %v17735_v55 = vcombine.high %v1699_v48, %v1707_v49  ;;  %v17734_v1 = vcombine.low %v1699_v48, %v1707_v49 }
 0x389   : > { %13610 = vmatpush1.bf16.msra.mxu0 %v17636_v20  ;;  %13938 = vmatpush1.bf16.msra.mxu1 %v17638_v57  ;;  %v1714_v20 = vld [vmem:[%s19514_s9 + $0x2b90] sm:$0xff] }
 0x38a   : > { %13611 = vmatprep.subr.bf16.mxu0 %v17653_v61  ;;  %13939 = vmatprep.subr.bf16.mxu1 %v17655_v63  ;;  %v1722_v57 = vld [vmem:[%s19514_s9 + $0x2bd0] sm:$0xff]  ;;  %v1715_v61 = vld [vmem:[%s19514_s9 + $0x2b98] sm:$0xff] }
 0x38b   : > { %13641 = vmatprep.mubr.bf16.mxu0 %v19960_v28  ;;  %13969 = vmatprep.mubr.bf16.mxu1 %v19960_v28  ;;  %v1723_v63 = vld [vmem:[%s19514_s9 + $0x2bd8] sm:$0xff]  ;;  %v17749_v5 = vcombine.high %v1714_v20, %v1722_v57  ;;  %v17748_v11 = vcombine.low %v1714_v20, %v1722_v57 }
 0x38c   : > { %v17751_v6 = vcombine.high %v1715_v61, %v1723_v63  ;;  %v17750_v12 = vcombine.low %v1715_v61, %v1723_v63 }
 0x38d   : > { %13612 = vmatpush1.bf16.msra.mxu0 %v17652_v8  ;;  %13940 = vmatpush1.bf16.msra.mxu1 %v17654_v9  ;;  %v1730_v8 = vld [vmem:[%s19514_s9 + $0x2c10] sm:$0xff] }
 0x38e   : > { %13613 = vmatprep.subr.bf16.mxu0 %v17669_v25  ;;  %13941 = vmatprep.subr.bf16.mxu1 %v17671_v10  ;;  %v1738_v9 = vld [vmem:[%s19514_s9 + $0x2c50] sm:$0xff]  ;;  %v1731_v25 = vld [vmem:[%s19514_s9 + $0x2c18] sm:$0xff] }
 0x38f   : > { %v1739_v10 = vld [vmem:[%s19514_s9 + $0x2c58] sm:$0xff]  ;;  %v17765_v14 = vcombine.high %v1730_v8, %v1738_v9  ;;  %v17764_v60 = vcombine.low %v1730_v8, %v1738_v9 }
 0x390   : > { %v17767_v15 = vcombine.high %v1731_v25, %v1739_v10  ;;  %v17766_v27 = vcombine.low %v1731_v25, %v1739_v10 }
 0x391   : > { %13614 = vmatpush1.bf16.msra.mxu0 %v17668_v18  ;;  %13942 = vmatpush1.bf16.msra.mxu1 %v17670_v19  ;;  %v1746_v18 = vld [vmem:[%s19514_s9 + $0x2c90] sm:$0xff] }
 0x392   : > { %13615 = vmatprep.subr.bf16.mxu0 %v17685_v21  ;;  %13943 = vmatprep.subr.bf16.mxu1 %v17687_v24  ;;  %v1754_v19 = vld [vmem:[%s19514_s9 + $0x2cd0] sm:$0xff]  ;;  %v1747_v21 = vld [vmem:[%s19514_s9 + $0x2c98] sm:$0xff] }
 0x393   : > { %v1755_v24 = vld [vmem:[%s19514_s9 + $0x2cd8] sm:$0xff]  ;;  %v17781_v29 = vcombine.high %v1746_v18, %v1754_v19  ;;  %v17780_v35 = vcombine.low %v1746_v18, %v1754_v19 }
 0x394   : > { %v17783_v30 = vcombine.high %v1747_v21, %v1755_v24  ;;  %v17782_v36 = vcombine.low %v1747_v21, %v1755_v24 }
 0x395   : > { %13616 = vmatpush1.bf16.msra.mxu0 %v17684_v50  ;;  %13944 = vmatpush1.bf16.msra.mxu1 %v17686_v16  ;;  %v1762_v50 = vld [vmem:[%s19514_s9 + $0x2d10] sm:$0xff] }
 0x396   : > { %13617 = vmatprep.subr.bf16.mxu0 %v17701_v33  ;;  %13945 = vmatprep.subr.bf16.mxu1 %v17703_v34  ;;  %v1770_v16 = vld [vmem:[%s19514_s9 + $0x2d50] sm:$0xff]  ;;  %v1763_v33 = vld [vmem:[%s19514_s9 + $0x2d18] sm:$0xff] }
 0x397   : > { %v1771_v34 = vld [vmem:[%s19514_s9 + $0x2d58] sm:$0xff]  ;;  %v17797_v38 = vcombine.high %v1762_v50, %v1770_v16  ;;  %v17796_v26 = vcombine.low %v1762_v50, %v1770_v16 }
 0x398   : > { %v17799_v39 = vcombine.high %v1763_v33, %v1771_v34  ;;  %v17798_v45 = vcombine.low %v1763_v33, %v1771_v34 }
 0x399   : > { %13618 = vmatpush1.bf16.msra.mxu0 %v17700_v41  ;;  %13946 = vmatpush1.bf16.msra.mxu1 %v17702_v42  ;;  %v1778_v41 = vld [vmem:[%s19514_s9 + $0x2d90] sm:$0xff] }
 0x39a   : > { %13619 = vmatprep.subr.bf16.mxu0 %v17717_v43  ;;  %13947 = vmatprep.subr.bf16.mxu1 %v17719_v44  ;;  %v1786_v42 = vld [vmem:[%s19514_s9 + $0x2dd0] sm:$0xff]  ;;  %v1779_v43 = vld [vmem:[%s19514_s9 + $0x2d98] sm:$0xff] }
 0x39b   : > { %v1787_v44 = vld [vmem:[%s19514_s9 + $0x2dd8] sm:$0xff]  ;;  %v17813_v48 = vcombine.high %v1778_v41, %v1786_v42  ;;  %v17812_v20 = vcombine.low %v1778_v41, %v1786_v42 }
 0x39c   : > { %v17815_v49 = vcombine.high %v1779_v43, %v1787_v44  ;;  %v17814_v57 = vcombine.low %v1779_v43, %v1787_v44 }
 0x39d   : > { %13620 = vmatpush1.bf16.msra.mxu0 %v17716_v51  ;;  %13948 = vmatpush1.bf16.msra.mxu1 %v17718_v52  ;;  %v1794_v51 = vld [vmem:[%s19514_s9 + $0x2e10] sm:$0xff] }
 0x39e   : > { %13621 = vmatprep.subr.bf16.mxu0 %v17733_v53  ;;  %13949 = vmatprep.subr.bf16.mxu1 %v17735_v55  ;;  %v1802_v52 = vld [vmem:[%s19514_s9 + $0x2e50] sm:$0xff]  ;;  %v1795_v53 = vld [vmem:[%s19514_s9 + $0x2e18] sm:$0xff] }
 0x39f   : > { %v1803_v55 = vld [vmem:[%s19514_s9 + $0x2e58] sm:$0xff]  ;;  %v17829_v61 = vcombine.high %v1794_v51, %v1802_v52  ;;  %v17828_v8 = vcombine.low %v1794_v51, %v1802_v52 }
 0x3a0   : > { %v17831_v63 = vcombine.high %v1795_v53, %v1803_v55  ;;  %v17830_v9 = vcombine.low %v1795_v53, %v1803_v55 }
 0x3a1   : > { %13622 = vmatpush1.bf16.msra.mxu0 %v17732_v0  ;;  %13950 = vmatpush1.bf16.msra.mxu1 %v17734_v1  ;;  %v1810_v0 = vld [vmem:[%s19514_s9 + $0x2e90] sm:$0xff] }
 0x3a2   : > { %13623 = vmatprep.subr.bf16.mxu0 %v17749_v5  ;;  %13951 = vmatprep.subr.bf16.mxu1 %v17751_v6  ;;  %v1818_v1 = vld [vmem:[%s19514_s9 + $0x2ed0] sm:$0xff]  ;;  %v1811_v5 = vld [vmem:[%s19514_s9 + $0x2e98] sm:$0xff] }
 0x3a3   : > { %v1819_v6 = vld [vmem:[%s19514_s9 + $0x2ed8] sm:$0xff]  ;;  %v17845_v25 = vcombine.high %v1810_v0, %v1818_v1  ;;  %v17844_v18 = vcombine.low %v1810_v0, %v1818_v1 }
 0x3a4   : > { %v17847_v10 = vcombine.high %v1811_v5, %v1819_v6  ;;  %v17846_v19 = vcombine.low %v1811_v5, %v1819_v6 }
 0x3a5   : > { %13624 = vmatpush1.bf16.msra.mxu0 %v17748_v11  ;;  %13952 = vmatpush1.bf16.msra.mxu1 %v17750_v12  ;;  %v1826_v11 = vld [vmem:[%s19514_s9 + $0x2f10] sm:$0xff] }
 0x3a6   : > { %13625 = vmatprep.subr.bf16.mxu0 %v17765_v14  ;;  %13953 = vmatprep.subr.bf16.mxu1 %v17767_v15  ;;  %v1834_v12 = vld [vmem:[%s19514_s9 + $0x2f50] sm:$0xff]  ;;  %v1827_v14 = vld [vmem:[%s19514_s9 + $0x2f18] sm:$0xff] }
 0x3a7   : > { %v1835_v15 = vld [vmem:[%s19514_s9 + $0x2f58] sm:$0xff]  ;;  %v17861_v21 = vcombine.high %v1826_v11, %v1834_v12  ;;  %v17860_v50 = vcombine.low %v1826_v11, %v1834_v12 }
 0x3a8   : > { %v17863_v24 = vcombine.high %v1827_v14, %v1835_v15  ;;  %v17862_v16 = vcombine.low %v1827_v14, %v1835_v15 }
 0x3a9   : > { %13626 = vmatpush1.bf16.msra.mxu0 %v17764_v60  ;;  %13954 = vmatpush1.bf16.msra.mxu1 %v17766_v27  ;;  %v1842_v60 = vld [vmem:[%s19514_s9 + $0x2f90] sm:$0xff] }
 0x3aa   : > { %13627 = vmatprep.subr.bf16.mxu0 %v17781_v29  ;;  %13955 = vmatprep.subr.bf16.mxu1 %v17783_v30  ;;  %v1850_v27 = vld [vmem:[%s19514_s9 + $0x2fd0] sm:$0xff]  ;;  %v1843_v29 = vld [vmem:[%s19514_s9 + $0x2f98] sm:$0xff] }
 0x3ab   : > { %v1851_v30 = vld [vmem:[%s19514_s9 + $0x2fd8] sm:$0xff]  ;;  %v17877_v33 = vcombine.high %v1842_v60, %v1850_v27  ;;  %v17876_v41 = vcombine.low %v1842_v60, %v1850_v27 }
 0x3ac   : > { %v17879_v34 = vcombine.high %v1843_v29, %v1851_v30  ;;  %v17878_v42 = vcombine.low %v1843_v29, %v1851_v30 }
 0x3ad   : > { %13628 = vmatpush1.bf16.msra.mxu0 %v17780_v35  ;;  %13956 = vmatpush1.bf16.msra.mxu1 %v17782_v36  ;;  %v1858_v35 = vld [vmem:[%s19514_s9 + $0x3010] sm:$0xff] }
 0x3ae   : > { %13629 = vmatprep.subr.bf16.mxu0 %v17797_v38  ;;  %13957 = vmatprep.subr.bf16.mxu1 %v17799_v39  ;;  %v1866_v36 = vld [vmem:[%s19514_s9 + $0x3050] sm:$0xff]  ;;  %v1859_v38 = vld [vmem:[%s19514_s9 + $0x3018] sm:$0xff] }
 0x3af   : > { %v1867_v39 = vld [vmem:[%s19514_s9 + $0x3058] sm:$0xff]  ;;  %v17893_v43 = vcombine.high %v1858_v35, %v1866_v36  ;;  %v17892_v51 = vcombine.low %v1858_v35, %v1866_v36 }
 0x3b0   : > { %v17895_v44 = vcombine.high %v1859_v38, %v1867_v39  ;;  %v17894_v52 = vcombine.low %v1859_v38, %v1867_v39 }
 0x3b1   : > { %13630 = vmatpush1.bf16.msra.mxu0 %v17796_v26  ;;  %13958 = vmatpush1.bf16.msra.mxu1 %v17798_v45  ;;  %v1874_v26 = vld [vmem:[%s19514_s9 + $0x3090] sm:$0xff] }
 0x3b2   : > { %13631 = vmatprep.subr.bf16.mxu0 %v17813_v48  ;;  %13959 = vmatprep.subr.bf16.mxu1 %v17815_v49  ;;  %v1882_v45 = vld [vmem:[%s19514_s9 + $0x30d0] sm:$0xff]  ;;  %v1875_v48 = vld [vmem:[%s19514_s9 + $0x3098] sm:$0xff] }
 0x3b3   : > { %v1883_v49 = vld [vmem:[%s19514_s9 + $0x30d8] sm:$0xff]  ;;  %v17909_v53 = vcombine.high %v1874_v26, %v1882_v45  ;;  %v17908_v0 = vcombine.low %v1874_v26, %v1882_v45 }
 0x3b4   : > { %v17911_v55 = vcombine.high %v1875_v48, %v1883_v49  ;;  %v17910_v1 = vcombine.low %v1875_v48, %v1883_v49 }
 0x3b5   : > { %13632 = vmatpush1.bf16.msra.mxu0 %v17812_v20  ;;  %13960 = vmatpush1.bf16.msra.mxu1 %v17814_v57  ;;  %v1890_v20 = vld [vmem:[%s19514_s9 + $0x3110] sm:$0xff] }
 0x3b6   : > { %13633 = vmatprep.subr.bf16.mxu0 %v17829_v61  ;;  %13961 = vmatprep.subr.bf16.mxu1 %v17831_v63  ;;  %v1898_v57 = vld [vmem:[%s19514_s9 + $0x3150] sm:$0xff]  ;;  %v1891_v61 = vld [vmem:[%s19514_s9 + $0x3118] sm:$0xff] }
 0x3b7   : > { %v1899_v63 = vld [vmem:[%s19514_s9 + $0x3158] sm:$0xff]  ;;  %v17925_v5 = vcombine.high %v1890_v20, %v1898_v57  ;;  %v17924_v11 = vcombine.low %v1890_v20, %v1898_v57 }
 0x3b8   : > { %v17927_v6 = vcombine.high %v1891_v61, %v1899_v63  ;;  %v17926_v12 = vcombine.low %v1891_v61, %v1899_v63 }
 0x3b9   : > { %13634 = vmatpush1.bf16.msra.mxu0 %v17828_v8  ;;  %13962 = vmatpush1.bf16.msra.mxu1 %v17830_v9  ;;  %v1906_v8 = vld [vmem:[%s19514_s9 + $0x3190] sm:$0xff] }
 0x3ba   : > { %13635 = vmatprep.subr.bf16.mxu0 %v17845_v25  ;;  %13963 = vmatprep.subr.bf16.mxu1 %v17847_v10  ;;  %v1914_v9 = vld [vmem:[%s19514_s9 + $0x31d0] sm:$0xff]  ;;  %v1907_v25 = vld [vmem:[%s19514_s9 + $0x3198] sm:$0xff] }
 0x3bb   : > { %v1915_v10 = vld [vmem:[%s19514_s9 + $0x31d8] sm:$0xff]  ;;  %v17941_v14 = vcombine.high %v1906_v8, %v1914_v9  ;;  %v17940_v60 = vcombine.low %v1906_v8, %v1914_v9 }
 0x3bc   : > { %v17943_v15 = vcombine.high %v1907_v25, %v1915_v10  ;;  %v17942_v27 = vcombine.low %v1907_v25, %v1915_v10 }
 0x3bd   : > { %13636 = vmatpush1.bf16.msra.mxu0 %v17844_v18  ;;  %13964 = vmatpush1.bf16.msra.mxu1 %v17846_v19  ;;  %v1922_v18 = vld [vmem:[%s19514_s9 + $0x3210] sm:$0xff] }
 0x3be   : > { %13637 = vmatprep.subr.bf16.mxu0 %v17861_v21  ;;  %13965 = vmatprep.subr.bf16.mxu1 %v17863_v24  ;;  %v1930_v19 = vld [vmem:[%s19514_s9 + $0x3250] sm:$0xff]  ;;  %v1923_v21 = vld [vmem:[%s19514_s9 + $0x3218] sm:$0xff] }
 0x3bf   : > { %v1931_v24 = vld [vmem:[%s19514_s9 + $0x3258] sm:$0xff]  ;;  %v17957_v29 = vcombine.high %v1922_v18, %v1930_v19  ;;  %v17956_v35 = vcombine.low %v1922_v18, %v1930_v19 }
 0x3c0   : > { %v17959_v30 = vcombine.high %v1923_v21, %v1931_v24  ;;  %v17958_v36 = vcombine.low %v1923_v21, %v1931_v24 }
 0x3c1   : > { %13638 = vmatpush1.bf16.msra.mxu0 %v17860_v50  ;;  %13966 = vmatpush1.bf16.msra.mxu1 %v17862_v16  ;;  %v1938_v50 = vld [vmem:[%s19514_s9 + $0x3290] sm:$0xff] }
 0x3c2   : > { %13639 = vmatprep.subr.bf16.mxu0 %v17877_v33  ;;  %13967 = vmatprep.subr.bf16.mxu1 %v17879_v34  ;;  %v1946_v16 = vld [vmem:[%s19514_s9 + $0x32d0] sm:$0xff]  ;;  %v1939_v33 = vld [vmem:[%s19514_s9 + $0x3298] sm:$0xff] }
 0x3c3   : > { %v1947_v34 = vld [vmem:[%s19514_s9 + $0x32d8] sm:$0xff]  ;;  %v17973_v38 = vcombine.high %v1938_v50, %v1946_v16  ;;  %v17972_v26 = vcombine.low %v1938_v50, %v1946_v16 }
 0x3c4   : > { %v17975_v39 = vcombine.high %v1939_v33, %v1947_v34  ;;  %v17974_v45 = vcombine.low %v1939_v33, %v1947_v34 }
 0x3c5   : > { %13640 = vmatpush1.bf16.msra.mxu0 %v17876_v41  ;;  %13968 = vmatpush1.bf16.msra.mxu1 %v17878_v42  ;;  %v1954_v41 = vld [vmem:[%s19514_s9 + $0x3310] sm:$0xff] }
 0x3c6   : > { %13650 = vmatprep.subr.bf16.mxu0 %v17893_v43  ;;  %13978 = vmatprep.subr.bf16.mxu1 %v17895_v44  ;;  %v1962_v42 = vld [vmem:[%s19514_s9 + $0x3350] sm:$0xff]  ;;  %v1955_v43 = vld [vmem:[%s19514_s9 + $0x3318] sm:$0xff] }
 0x3c7   : > { %v1963_v44 = vld [vmem:[%s19514_s9 + $0x3358] sm:$0xff]  ;;  %v17989_v48 = vcombine.high %v1954_v41, %v1962_v42  ;;  %v17988_v20 = vcombine.low %v1954_v41, %v1962_v42 }
 0x3c8   : > { %13642 = vmatmul.mubr.bf16.vlgmr.msra.gmra.mrb[4].mxu0 %v20028_v47  ;;  %13970 = vmatmul.mubr.bf16.vlgmr.msra.gmra.mrb[4].mxu1 %v20028_v47  ;;  %v17991_v49 = vcombine.high %v1955_v43, %v1963_v44  ;;  %v17990_v57 = vcombine.low %v1955_v43, %v1963_v44 }
 0x3c9   : > { %13651 = vmatpush1.bf16.msra.mxu0 %v17892_v51  ;;  %13979 = vmatpush1.bf16.msra.mxu1 %v17894_v52  ;;  %v1970_v51 = vld [vmem:[%s19514_s9 + $0x3390] sm:$0xff] }
 0x3ca   : > { %13652 = vmatprep.subr.bf16.mxu0 %v17909_v53  ;;  %13980 = vmatprep.subr.bf16.mxu1 %v17911_v55  ;;  %v1978_v52 = vld [vmem:[%s19514_s9 + $0x33d0] sm:$0xff]  ;;  %v1971_v53 = vld [vmem:[%s19514_s9 + $0x3398] sm:$0xff] }
 0x3cb   : > { %13682 = vmatprep.mubr.bf16.mxu0 %v20041_v59  ;;  %14010 = vmatprep.mubr.bf16.mxu1 %v20041_v59  ;;  %v1979_v55 = vld [vmem:[%s19514_s9 + $0x33d8] sm:$0xff]  ;;  %v18005_v61 = vcombine.high %v1970_v51, %v1978_v52  ;;  %v18004_v8 = vcombine.low %v1970_v51, %v1978_v52 }
 0x3cc   : > { %v18007_v63 = vcombine.high %v1971_v53, %v1979_v55  ;;  %v18006_v9 = vcombine.low %v1971_v53, %v1979_v55 }
 0x3cd   : > { %13653 = vmatpush1.bf16.msra.mxu0 %v17908_v0  ;;  %13981 = vmatpush1.bf16.msra.mxu1 %v17910_v1  ;;  %v1986_v0 = vld [vmem:[%s19514_s9 + $0x3410] sm:$0xff] }
 0x3ce   : > { %13654 = vmatprep.subr.bf16.mxu0 %v17925_v5  ;;  %13982 = vmatprep.subr.bf16.mxu1 %v17927_v6  ;;  %v1994_v1 = vld [vmem:[%s19514_s9 + $0x3450] sm:$0xff]  ;;  %v1987_v5 = vld [vmem:[%s19514_s9 + $0x3418] sm:$0xff] }
 0x3cf   : > { %v1995_v6 = vld [vmem:[%s19514_s9 + $0x3458] sm:$0xff]  ;;  %v18021_v25 = vcombine.high %v1986_v0, %v1994_v1  ;;  %v18020_v18 = vcombine.low %v1986_v0, %v1994_v1 }
 0x3d0   : > { %v18023_v10 = vcombine.high %v1987_v5, %v1995_v6  ;;  %v18022_v19 = vcombine.low %v1987_v5, %v1995_v6 }
 0x3d1   : > { %13655 = vmatpush1.bf16.msra.mxu0 %v17924_v11  ;;  %13983 = vmatpush1.bf16.msra.mxu1 %v17926_v12  ;;  %v2002_v11 = vld [vmem:[%s19514_s9 + $0x3490] sm:$0xff] }
 0x3d2   : > { %13656 = vmatprep.subr.bf16.mxu0 %v17941_v14  ;;  %13984 = vmatprep.subr.bf16.mxu1 %v17943_v15  ;;  %v2010_v12 = vld [vmem:[%s19514_s9 + $0x34d0] sm:$0xff]  ;;  %v2003_v14 = vld [vmem:[%s19514_s9 + $0x3498] sm:$0xff] }
 0x3d3   : > { %v2011_v15 = vld [vmem:[%s19514_s9 + $0x34d8] sm:$0xff]  ;;  %v18037_v21 = vcombine.high %v2002_v11, %v2010_v12  ;;  %v18036_v50 = vcombine.low %v2002_v11, %v2010_v12 }
 0x3d4   : > { %v18039_v24 = vcombine.high %v2003_v14, %v2011_v15  ;;  %v18038_v16 = vcombine.low %v2003_v14, %v2011_v15 }
 0x3d5   : > { %13657 = vmatpush1.bf16.msra.mxu0 %v17940_v60  ;;  %13985 = vmatpush1.bf16.msra.mxu1 %v17942_v27  ;;  %v2018_v60 = vld [vmem:[%s19514_s9 + $0x3510] sm:$0xff] }
 0x3d6   : > { %13658 = vmatprep.subr.bf16.mxu0 %v17957_v29  ;;  %13986 = vmatprep.subr.bf16.mxu1 %v17959_v30  ;;  %v2026_v27 = vld [vmem:[%s19514_s9 + $0x3550] sm:$0xff]  ;;  %v2019_v29 = vld [vmem:[%s19514_s9 + $0x3518] sm:$0xff] }
 0x3d7   : > { %v2027_v30 = vld [vmem:[%s19514_s9 + $0x3558] sm:$0xff]  ;;  %v18053_v33 = vcombine.high %v2018_v60, %v2026_v27  ;;  %v18052_v41 = vcombine.low %v2018_v60, %v2026_v27 }
 0x3d8   : > { %v18055_v34 = vcombine.high %v2019_v29, %v2027_v30  ;;  %v18054_v42 = vcombine.low %v2019_v29, %v2027_v30 }
 0x3d9   : > { %13659 = vmatpush1.bf16.msra.mxu0 %v17956_v35  ;;  %13987 = vmatpush1.bf16.msra.mxu1 %v17958_v36  ;;  %v2034_v35 = vld [vmem:[%s19514_s9 + $0x3590] sm:$0xff] }
 0x3da   : > { %13660 = vmatprep.subr.bf16.mxu0 %v17973_v38  ;;  %13988 = vmatprep.subr.bf16.mxu1 %v17975_v39  ;;  %v2042_v36 = vld [vmem:[%s19514_s9 + $0x35d0] sm:$0xff]  ;;  %v2035_v38 = vld [vmem:[%s19514_s9 + $0x3598] sm:$0xff] }
 0x3db   : > { %v2043_v39 = vld [vmem:[%s19514_s9 + $0x35d8] sm:$0xff]  ;;  %v18069_v43 = vcombine.high %v2034_v35, %v2042_v36  ;;  %v18068_v51 = vcombine.low %v2034_v35, %v2042_v36 }
 0x3dc   : > { %v18071_v44 = vcombine.high %v2035_v38, %v2043_v39  ;;  %v18070_v52 = vcombine.low %v2035_v38, %v2043_v39 }
 0x3dd   : > { %13661 = vmatpush1.bf16.msra.mxu0 %v17972_v26  ;;  %13989 = vmatpush1.bf16.msra.mxu1 %v17974_v45  ;;  %v2050_v26 = vld [vmem:[%s19514_s9 + $0x3610] sm:$0xff] }
 0x3de   : > { %13662 = vmatprep.subr.bf16.mxu0 %v17989_v48  ;;  %13990 = vmatprep.subr.bf16.mxu1 %v17991_v49  ;;  %v2058_v45 = vld [vmem:[%s19514_s9 + $0x3650] sm:$0xff]  ;;  %v2051_v48 = vld [vmem:[%s19514_s9 + $0x3618] sm:$0xff] }
 0x3df   : > { %v2059_v49 = vld [vmem:[%s19514_s9 + $0x3658] sm:$0xff]  ;;  %v18085_v53 = vcombine.high %v2050_v26, %v2058_v45  ;;  %v18084_v0 = vcombine.low %v2050_v26, %v2058_v45 }
 0x3e0   : > { %v18087_v55 = vcombine.high %v2051_v48, %v2059_v49  ;;  %v18086_v1 = vcombine.low %v2051_v48, %v2059_v49 }
 0x3e1   : > { %13663 = vmatpush1.bf16.msra.mxu0 %v17988_v20  ;;  %13991 = vmatpush1.bf16.msra.mxu1 %v17990_v57  ;;  %v2066_v20 = vld [vmem:[%s19514_s9 + $0x3690] sm:$0xff] }
 0x3e2   : > { %13664 = vmatprep.subr.bf16.mxu0 %v18005_v61  ;;  %13992 = vmatprep.subr.bf16.mxu1 %v18007_v63  ;;  %v2074_v57 = vld [vmem:[%s19514_s9 + $0x36d0] sm:$0xff]  ;;  %v2067_v61 = vld [vmem:[%s19514_s9 + $0x3698] sm:$0xff] }
 0x3e3   : > { %v2075_v63 = vld [vmem:[%s19514_s9 + $0x36d8] sm:$0xff]  ;;  %v18101_v5 = vcombine.high %v2066_v20, %v2074_v57  ;;  %v18100_v11 = vcombine.low %v2066_v20, %v2074_v57 }
 0x3e4   : > { %v18103_v6 = vcombine.high %v2067_v61, %v2075_v63  ;;  %v18102_v12 = vcombine.low %v2067_v61, %v2075_v63 }
 0x3e5   : > { %13665 = vmatpush1.bf16.msra.mxu0 %v18004_v8  ;;  %13993 = vmatpush1.bf16.msra.mxu1 %v18006_v9  ;;  %v2082_v8 = vld [vmem:[%s19514_s9 + $0x3710] sm:$0xff] }
 0x3e6   : > { %13666 = vmatprep.subr.bf16.mxu0 %v18021_v25  ;;  %13994 = vmatprep.subr.bf16.mxu1 %v18023_v10  ;;  %v2090_v9 = vld [vmem:[%s19514_s9 + $0x3750] sm:$0xff]  ;;  %v2083_v25 = vld [vmem:[%s19514_s9 + $0x3718] sm:$0xff] }
 0x3e7   : > { %v2091_v10 = vld [vmem:[%s19514_s9 + $0x3758] sm:$0xff]  ;;  %v18117_v14 = vcombine.high %v2082_v8, %v2090_v9  ;;  %v18116_v60 = vcombine.low %v2082_v8, %v2090_v9 }
 0x3e8   : > { %v18119_v15 = vcombine.high %v2083_v25, %v2091_v10  ;;  %v18118_v27 = vcombine.low %v2083_v25, %v2091_v10 }
 0x3e9   : > { %13667 = vmatpush1.bf16.msra.mxu0 %v18020_v18  ;;  %13995 = vmatpush1.bf16.msra.mxu1 %v18022_v19  ;;  %v2098_v18 = vld [vmem:[%s19514_s9 + $0x3790] sm:$0xff] }
 0x3ea   : > { %13668 = vmatprep.subr.bf16.mxu0 %v18037_v21  ;;  %13996 = vmatprep.subr.bf16.mxu1 %v18039_v24  ;;  %v2106_v19 = vld [vmem:[%s19514_s9 + $0x37d0] sm:$0xff]  ;;  %v2099_v21 = vld [vmem:[%s19514_s9 + $0x3798] sm:$0xff] }
 0x3eb   : > { %v2107_v24 = vld [vmem:[%s19514_s9 + $0x37d8] sm:$0xff]  ;;  %v18133_v29 = vcombine.high %v2098_v18, %v2106_v19  ;;  %v18132_v35 = vcombine.low %v2098_v18, %v2106_v19 }
 0x3ec   : > { %v18135_v30 = vcombine.high %v2099_v21, %v2107_v24  ;;  %v18134_v36 = vcombine.low %v2099_v21, %v2107_v24 }
 0x3ed   : > { %13669 = vmatpush1.bf16.msra.mxu0 %v18036_v50  ;;  %13997 = vmatpush1.bf16.msra.mxu1 %v18038_v16  ;;  %v2114_v50 = vld [vmem:[%s19514_s9 + $0x3810] sm:$0xff] }
 0x3ee   : > { %13670 = vmatprep.subr.bf16.mxu0 %v18053_v33  ;;  %13998 = vmatprep.subr.bf16.mxu1 %v18055_v34  ;;  %v2122_v16 = vld [vmem:[%s19514_s9 + $0x3850] sm:$0xff]  ;;  %v2115_v33 = vld [vmem:[%s19514_s9 + $0x3818] sm:$0xff] }
 0x3ef   : > { %v2123_v34 = vld [vmem:[%s19514_s9 + $0x3858] sm:$0xff]  ;;  %v18149_v38 = vcombine.high %v2114_v50, %v2122_v16  ;;  %v18148_v26 = vcombine.low %v2114_v50, %v2122_v16 }
 0x3f0   : > { %v18151_v39 = vcombine.high %v2115_v33, %v2123_v34  ;;  %v18150_v45 = vcombine.low %v2115_v33, %v2123_v34 }
 0x3f1   : > { %13671 = vmatpush1.bf16.msra.mxu0 %v18052_v41  ;;  %13999 = vmatpush1.bf16.msra.mxu1 %v18054_v42  ;;  %v2130_v41 = vld [vmem:[%s19514_s9 + $0x3890] sm:$0xff] }
 0x3f2   : > { %13672 = vmatprep.subr.bf16.mxu0 %v18069_v43  ;;  %14000 = vmatprep.subr.bf16.mxu1 %v18071_v44  ;;  %v2138_v42 = vld [vmem:[%s19514_s9 + $0x38d0] sm:$0xff]  ;;  %v2131_v43 = vld [vmem:[%s19514_s9 + $0x3898] sm:$0xff] }
 0x3f3   : > { %v2139_v44 = vld [vmem:[%s19514_s9 + $0x38d8] sm:$0xff]  ;;  %v18165_v48 = vcombine.high %v2130_v41, %v2138_v42  ;;  %v18164_v20 = vcombine.low %v2130_v41, %v2138_v42 }
 0x3f4   : > { %v18167_v49 = vcombine.high %v2131_v43, %v2139_v44  ;;  %v18166_v57 = vcombine.low %v2131_v43, %v2139_v44 }
 0x3f5   : > { %13673 = vmatpush1.bf16.msra.mxu0 %v18068_v51  ;;  %14001 = vmatpush1.bf16.msra.mxu1 %v18070_v52  ;;  %v2146_v51 = vld [vmem:[%s19514_s9 + $0x3910] sm:$0xff] }
 0x3f6   : > { %13674 = vmatprep.subr.bf16.mxu0 %v18085_v53  ;;  %14002 = vmatprep.subr.bf16.mxu1 %v18087_v55  ;;  %v2154_v52 = vld [vmem:[%s19514_s9 + $0x3950] sm:$0xff]  ;;  %v2147_v53 = vld [vmem:[%s19514_s9 + $0x3918] sm:$0xff] }
 0x3f7   : > { %v2155_v55 = vld [vmem:[%s19514_s9 + $0x3958] sm:$0xff]  ;;  %v18181_v61 = vcombine.high %v2146_v51, %v2154_v52  ;;  %v18180_v8 = vcombine.low %v2146_v51, %v2154_v52 }
 0x3f8   : > { %v18183_v63 = vcombine.high %v2147_v53, %v2155_v55  ;;  %v18182_v9 = vcombine.low %v2147_v53, %v2155_v55 }
 0x3f9   : > { %13675 = vmatpush1.bf16.msra.mxu0 %v18084_v0  ;;  %14003 = vmatpush1.bf16.msra.mxu1 %v18086_v1  ;;  %v2162_v0 = vld [vmem:[%s19514_s9 + $0x3990] sm:$0xff] }
 0x3fa   : > { %13676 = vmatprep.subr.bf16.mxu0 %v18101_v5  ;;  %14004 = vmatprep.subr.bf16.mxu1 %v18103_v6  ;;  %v2170_v1 = vld [vmem:[%s19514_s9 + $0x39d0] sm:$0xff]  ;;  %v2163_v5 = vld [vmem:[%s19514_s9 + $0x3998] sm:$0xff] }
 0x3fb   : > { %v2171_v6 = vld [vmem:[%s19514_s9 + $0x39d8] sm:$0xff]  ;;  %v18197_v25 = vcombine.high %v2162_v0, %v2170_v1  ;;  %v18196_v18 = vcombine.low %v2162_v0, %v2170_v1 }
 0x3fc   : > { %v18199_v10 = vcombine.high %v2163_v5, %v2171_v6  ;;  %v18198_v19 = vcombine.low %v2163_v5, %v2171_v6 }
 0x3fd   : > { %13677 = vmatpush1.bf16.msra.mxu0 %v18100_v11  ;;  %14005 = vmatpush1.bf16.msra.mxu1 %v18102_v12  ;;  %v2178_v11 = vld [vmem:[%s19514_s9 + $0x3a10] sm:$0xff] }
 0x3fe   : > { %13678 = vmatprep.subr.bf16.mxu0 %v18117_v14  ;;  %14006 = vmatprep.subr.bf16.mxu1 %v18119_v15  ;;  %v2186_v12 = vld [vmem:[%s19514_s9 + $0x3a50] sm:$0xff]  ;;  %v2179_v14 = vld [vmem:[%s19514_s9 + $0x3a18] sm:$0xff] }
 0x3ff   : > { %v2187_v15 = vld [vmem:[%s19514_s9 + $0x3a58] sm:$0xff]  ;;  %v18213_v21 = vcombine.high %v2178_v11, %v2186_v12  ;;  %v18212_v50 = vcombine.low %v2178_v11, %v2186_v12 }
 0x400   : > { %v18215_v24 = vcombine.high %v2179_v14, %v2187_v15  ;;  %v18214_v16 = vcombine.low %v2179_v14, %v2187_v15 }
 0x401   : > { %13679 = vmatpush1.bf16.msra.mxu0 %v18116_v60  ;;  %14007 = vmatpush1.bf16.msra.mxu1 %v18118_v27  ;;  %v2194_v60 = vld [vmem:[%s19514_s9 + $0x3a90] sm:$0xff] }
 0x402   : > { %13680 = vmatprep.subr.bf16.mxu0 %v18133_v29  ;;  %14008 = vmatprep.subr.bf16.mxu1 %v18135_v30  ;;  %v2202_v27 = vld [vmem:[%s19514_s9 + $0x3ad0] sm:$0xff]  ;;  %v2195_v29 = vld [vmem:[%s19514_s9 + $0x3a98] sm:$0xff] }
 0x403   : > { %v2203_v30 = vld [vmem:[%s19514_s9 + $0x3ad8] sm:$0xff]  ;;  %v18229_v33 = vcombine.high %v2194_v60, %v2202_v27  ;;  %v18228_v41 = vcombine.low %v2194_v60, %v2202_v27 }
 0x404   : > { %v18231_v34 = vcombine.high %v2195_v29, %v2203_v30  ;;  %v18230_v42 = vcombine.low %v2195_v29, %v2203_v30 }
 0x405   : > { %13681 = vmatpush1.bf16.msra.mxu0 %v18132_v35  ;;  %14009 = vmatpush1.bf16.msra.mxu1 %v18134_v36  ;;  %v2210_v35 = vld [vmem:[%s19514_s9 + $0x3b10] sm:$0xff] }
 0x406   : > { %13691 = vmatprep.subr.bf16.mxu0 %v18149_v38  ;;  %14019 = vmatprep.subr.bf16.mxu1 %v18151_v39  ;;  %v2218_v36 = vld [vmem:[%s19514_s9 + $0x3b50] sm:$0xff]  ;;  %v2211_v38 = vld [vmem:[%s19514_s9 + $0x3b18] sm:$0xff] }
 0x407   : > { %v2219_v39 = vld [vmem:[%s19514_s9 + $0x3b58] sm:$0xff]  ;;  %v18245_v43 = vcombine.high %v2210_v35, %v2218_v36  ;;  %v18244_v51 = vcombine.low %v2210_v35, %v2218_v36 }
 0x408   : > { %13683 = vmatmul.mubr.bf16.vlgmr.msra.gmra.mrb[4].mxu0 %v20109_v54  ;;  %14011 = vmatmul.mubr.bf16.vlgmr.msra.gmra.mrb[4].mxu1 %v20109_v54  ;;  %v18247_v44 = vcombine.high %v2211_v38, %v2219_v39  ;;  %v18246_v52 = vcombine.low %v2211_v38, %v2219_v39 }
 0x409   : > { %13692 = vmatpush1.bf16.msra.mxu0 %v18148_v26  ;;  %14020 = vmatpush1.bf16.msra.mxu1 %v18150_v45  ;;  %v2226_v26 = vld [vmem:[%s19514_s9 + $0x3b90] sm:$0xff] }
 0x40a   : > { %13693 = vmatprep.subr.bf16.mxu0 %v18165_v48  ;;  %14021 = vmatprep.subr.bf16.mxu1 %v18167_v49  ;;  %v2234_v45 = vld [vmem:[%s19514_s9 + $0x3bd0] sm:$0xff]  ;;  %v2227_v48 = vld [vmem:[%s19514_s9 + $0x3b98] sm:$0xff] }
 0x40b   : > { %13723 = vmatprep.mubr.bf16.mxu0 %v20122_v31  ;;  %14051 = vmatprep.mubr.bf16.mxu1 %v20122_v31  ;;  %v2235_v49 = vld [vmem:[%s19514_s9 + $0x3bd8] sm:$0xff]  ;;  %v18261_v53 = vcombine.high %v2226_v26, %v2234_v45  ;;  %v18260_v0 = vcombine.low %v2226_v26, %v2234_v45 }
 0x40c   : > { %v18263_v55 = vcombine.high %v2227_v48, %v2235_v49  ;;  %v18262_v1 = vcombine.low %v2227_v48, %v2235_v49 }
 0x40d   : > { %13694 = vmatpush1.bf16.msra.mxu0 %v18164_v20  ;;  %14022 = vmatpush1.bf16.msra.mxu1 %v18166_v57  ;;  %v2242_v20 = vld [vmem:[%s19514_s9 + $0x3c10] sm:$0xff] }
 0x40e   : > { %13695 = vmatprep.subr.bf16.mxu0 %v18181_v61  ;;  %14023 = vmatprep.subr.bf16.mxu1 %v18183_v63  ;;  %v2250_v57 = vld [vmem:[%s19514_s9 + $0x3c50] sm:$0xff]  ;;  %v2243_v61 = vld [vmem:[%s19514_s9 + $0x3c18] sm:$0xff] }
 0x40f   : > { %v2251_v63 = vld [vmem:[%s19514_s9 + $0x3c58] sm:$0xff]  ;;  %v18277_v5 = vcombine.high %v2242_v20, %v2250_v57  ;;  %v18276_v11 = vcombine.low %v2242_v20, %v2250_v57 }
 0x410   : > { %v18279_v6 = vcombine.high %v2243_v61, %v2251_v63  ;;  %v18278_v12 = vcombine.low %v2243_v61, %v2251_v63 }
 0x411   : > { %13696 = vmatpush1.bf16.msra.mxu0 %v18180_v8  ;;  %14024 = vmatpush1.bf16.msra.mxu1 %v18182_v9  ;;  %v2258_v8 = vld [vmem:[%s19514_s9 + $0x3c90] sm:$0xff] }
 0x412   : > { %13697 = vmatprep.subr.bf16.mxu0 %v18197_v25  ;;  %14025 = vmatprep.subr.bf16.mxu1 %v18199_v10  ;;  %v2266_v9 = vld [vmem:[%s19514_s9 + $0x3cd0] sm:$0xff]  ;;  %v2259_v25 = vld [vmem:[%s19514_s9 + $0x3c98] sm:$0xff] }
 0x413   : > { %v2267_v10 = vld [vmem:[%s19514_s9 + $0x3cd8] sm:$0xff]  ;;  %v18293_v14 = vcombine.high %v2258_v8, %v2266_v9  ;;  %v18292_v60 = vcombine.low %v2258_v8, %v2266_v9 }
 0x414   : > { %v18295_v15 = vcombine.high %v2259_v25, %v2267_v10  ;;  %v18294_v27 = vcombine.low %v2259_v25, %v2267_v10 }
 0x415   : > { %13698 = vmatpush1.bf16.msra.mxu0 %v18196_v18  ;;  %14026 = vmatpush1.bf16.msra.mxu1 %v18198_v19  ;;  %v2274_v18 = vld [vmem:[%s19514_s9 + $0x3d10] sm:$0xff] }
 0x416   : > { %13699 = vmatprep.subr.bf16.mxu0 %v18213_v21  ;;  %14027 = vmatprep.subr.bf16.mxu1 %v18215_v24  ;;  %v2282_v19 = vld [vmem:[%s19514_s9 + $0x3d50] sm:$0xff]  ;;  %v2275_v21 = vld [vmem:[%s19514_s9 + $0x3d18] sm:$0xff] }
 0x417   : > { %v2283_v24 = vld [vmem:[%s19514_s9 + $0x3d58] sm:$0xff]  ;;  %v18309_v29 = vcombine.high %v2274_v18, %v2282_v19  ;;  %v18308_v35 = vcombine.low %v2274_v18, %v2282_v19 }
 0x418   : > { %v18311_v30 = vcombine.high %v2275_v21, %v2283_v24  ;;  %v18310_v36 = vcombine.low %v2275_v21, %v2283_v24 }
 0x419   : > { %13700 = vmatpush1.bf16.msra.mxu0 %v18212_v50  ;;  %14028 = vmatpush1.bf16.msra.mxu1 %v18214_v16  ;;  %v2290_v50 = vld [vmem:[%s19514_s9 + $0x3d90] sm:$0xff] }
 0x41a   : > { %13701 = vmatprep.subr.bf16.mxu0 %v18229_v33  ;;  %14029 = vmatprep.subr.bf16.mxu1 %v18231_v34  ;;  %v2298_v16 = vld [vmem:[%s19514_s9 + $0x3dd0] sm:$0xff]  ;;  %v2291_v33 = vld [vmem:[%s19514_s9 + $0x3d98] sm:$0xff] }
 0x41b   : > { %v2299_v34 = vld [vmem:[%s19514_s9 + $0x3dd8] sm:$0xff]  ;;  %v18325_v38 = vcombine.high %v2290_v50, %v2298_v16  ;;  %v18324_v26 = vcombine.low %v2290_v50, %v2298_v16 }
 0x41c   : > { %v18327_v39 = vcombine.high %v2291_v33, %v2299_v34  ;;  %v18326_v45 = vcombine.low %v2291_v33, %v2299_v34 }
 0x41d   : > { %13702 = vmatpush1.bf16.msra.mxu0 %v18228_v41  ;;  %14030 = vmatpush1.bf16.msra.mxu1 %v18230_v42  ;;  %v2306_v41 = vld [vmem:[%s19514_s9 + $0x3e10] sm:$0xff] }
 0x41e   : > { %13703 = vmatprep.subr.bf16.mxu0 %v18245_v43  ;;  %14031 = vmatprep.subr.bf16.mxu1 %v18247_v44  ;;  %v2314_v42 = vld [vmem:[%s19514_s9 + $0x3e50] sm:$0xff]  ;;  %v2307_v43 = vld [vmem:[%s19514_s9 + $0x3e18] sm:$0xff] }
 0x41f   : > { %v2315_v44 = vld [vmem:[%s19514_s9 + $0x3e58] sm:$0xff]  ;;  %v18341_v48 = vcombine.high %v2306_v41, %v2314_v42  ;;  %v18340_v20 = vcombine.low %v2306_v41, %v2314_v42 }
 0x420   : > { %v18343_v49 = vcombine.high %v2307_v43, %v2315_v44  ;;  %v18342_v57 = vcombine.low %v2307_v43, %v2315_v44 }
 0x421   : > { %13704 = vmatpush1.bf16.msra.mxu0 %v18244_v51  ;;  %14032 = vmatpush1.bf16.msra.mxu1 %v18246_v52  ;;  %v2322_v51 = vld [vmem:[%s19514_s9 + $0x3e90] sm:$0xff] }
 0x422   : > { %13705 = vmatprep.subr.bf16.mxu0 %v18261_v53  ;;  %14033 = vmatprep.subr.bf16.mxu1 %v18263_v55  ;;  %v2330_v52 = vld [vmem:[%s19514_s9 + $0x3ed0] sm:$0xff]  ;;  %v2323_v53 = vld [vmem:[%s19514_s9 + $0x3e98] sm:$0xff] }
 0x423   : > { %v2331_v55 = vld [vmem:[%s19514_s9 + $0x3ed8] sm:$0xff]  ;;  %v18357_v61 = vcombine.high %v2322_v51, %v2330_v52  ;;  %v18356_v8 = vcombine.low %v2322_v51, %v2330_v52 }
 0x424   : > { %v18359_v63 = vcombine.high %v2323_v53, %v2331_v55  ;;  %v18358_v9 = vcombine.low %v2323_v53, %v2331_v55 }
 0x425   : > { %13706 = vmatpush1.bf16.msra.mxu0 %v18260_v0  ;;  %14034 = vmatpush1.bf16.msra.mxu1 %v18262_v1  ;;  %v2338_v0 = vld [vmem:[%s19514_s9 + $0x3f10] sm:$0xff] }
 0x426   : > { %13707 = vmatprep.subr.bf16.mxu0 %v18277_v5  ;;  %14035 = vmatprep.subr.bf16.mxu1 %v18279_v6  ;;  %v2346_v1 = vld [vmem:[%s19514_s9 + $0x3f50] sm:$0xff]  ;;  %v2339_v5 = vld [vmem:[%s19514_s9 + $0x3f18] sm:$0xff] }
 0x427   : > { %v2347_v6 = vld [vmem:[%s19514_s9 + $0x3f58] sm:$0xff]  ;;  %v18373_v25 = vcombine.high %v2338_v0, %v2346_v1  ;;  %v18372_v18 = vcombine.low %v2338_v0, %v2346_v1 }
 0x428   : > { %v18375_v10 = vcombine.high %v2339_v5, %v2347_v6  ;;  %v18374_v19 = vcombine.low %v2339_v5, %v2347_v6 }
 0x429   : > { %13708 = vmatpush1.bf16.msra.mxu0 %v18276_v11  ;;  %14036 = vmatpush1.bf16.msra.mxu1 %v18278_v12  ;;  %v2354_v11 = vld [vmem:[%s19514_s9 + $0x3f90] sm:$0xff] }
 0x42a   : > { %13709 = vmatprep.subr.bf16.mxu0 %v18293_v14  ;;  %14037 = vmatprep.subr.bf16.mxu1 %v18295_v15  ;;  %v2362_v12 = vld [vmem:[%s19514_s9 + $0x3fd0] sm:$0xff]  ;;  %v2355_v14 = vld [vmem:[%s19514_s9 + $0x3f98] sm:$0xff] }
 0x42b   : > { %v2363_v15 = vld [vmem:[%s19514_s9 + $0x3fd8] sm:$0xff]  ;;  %v18389_v21 = vcombine.high %v2354_v11, %v2362_v12  ;;  %v18388_v50 = vcombine.low %v2354_v11, %v2362_v12 }
 0x42c   : > { %v18391_v24 = vcombine.high %v2355_v14, %v2363_v15  ;;  %v18390_v16 = vcombine.low %v2355_v14, %v2363_v15 }
 0x42d   : > { %13710 = vmatpush1.bf16.msra.mxu0 %v18292_v60  ;;  %14038 = vmatpush1.bf16.msra.mxu1 %v18294_v27  ;;  %v324_v60 = vld [vmem:[%s19514_s9 + $0x20] sm:$0xff] }
 0x42e   : > { %13711 = vmatprep.subr.bf16.mxu0 %v18309_v29  ;;  %14039 = vmatprep.subr.bf16.mxu1 %v18311_v30  ;;  %v332_v27 = vld [vmem:[%s19514_s9 + $0x60] sm:$0xff]  ;;  %v325_v29 = vld [vmem:[%s19514_s9 + $0x28] sm:$0xff] }
 0x42f   : > { %v333_v30 = vld [vmem:[%s19514_s9 + $0x68] sm:$0xff]  ;;  %v16361_v33 = vcombine.high %v324_v60, %v332_v27  ;;  %v16360_v41 = vcombine.low %v324_v60, %v332_v27 }
 0x430   : > { %v16363_v34 = vcombine.high %v325_v29, %v333_v30  ;;  %v16362_v42 = vcombine.low %v325_v29, %v333_v30 }
 0x431   : > { %13712 = vmatpush1.bf16.msra.mxu0 %v18308_v35  ;;  %14040 = vmatpush1.bf16.msra.mxu1 %v18310_v36  ;;  %v340_v35 = vld [vmem:[%s19514_s9 + $0xa0] sm:$0xff] }
 0x432   : > { %13713 = vmatprep.subr.bf16.mxu0 %v18325_v38  ;;  %14041 = vmatprep.subr.bf16.mxu1 %v18327_v39  ;;  %v348_v36 = vld [vmem:[%s19514_s9 + $0xe0] sm:$0xff]  ;;  %v341_v38 = vld [vmem:[%s19514_s9 + $0xa8] sm:$0xff] }
 0x433   : > { %v349_v39 = vld [vmem:[%s19514_s9 + $0xe8] sm:$0xff]  ;;  %v16377_v43 = vcombine.high %v340_v35, %v348_v36  ;;  %v16376_v51 = vcombine.low %v340_v35, %v348_v36 }
 0x434   : > { %v16379_v44 = vcombine.high %v341_v38, %v349_v39  ;;  %v16378_v52 = vcombine.low %v341_v38, %v349_v39 }
 0x435   : > { %13714 = vmatpush1.bf16.msra.mxu0 %v18324_v26  ;;  %14042 = vmatpush1.bf16.msra.mxu1 %v18326_v45  ;;  %v356_v26 = vld [vmem:[%s19514_s9 + $0x120] sm:$0xff] }
 0x436   : > { %13715 = vmatprep.subr.bf16.mxu0 %v18341_v48  ;;  %14043 = vmatprep.subr.bf16.mxu1 %v18343_v49  ;;  %v364_v45 = vld [vmem:[%s19514_s9 + $0x160] sm:$0xff]  ;;  %v357_v48 = vld [vmem:[%s19514_s9 + $0x128] sm:$0xff] }
 0x437   : > { %v365_v49 = vld [vmem:[%s19514_s9 + $0x168] sm:$0xff]  ;;  %v16393_v53 = vcombine.high %v356_v26, %v364_v45  ;;  %v16392_v0 = vcombine.low %v356_v26, %v364_v45 }
 0x438   : > { %v16395_v55 = vcombine.high %v357_v48, %v365_v49  ;;  %v16394_v1 = vcombine.low %v357_v48, %v365_v49 }
 0x439   : > { %13716 = vmatpush1.bf16.msra.mxu0 %v18340_v20  ;;  %14044 = vmatpush1.bf16.msra.mxu1 %v18342_v57  ;;  %v372_v20 = vld [vmem:[%s19514_s9 + $0x1a0] sm:$0xff] }
 0x43a   : > { %13717 = vmatprep.subr.bf16.mxu0 %v18357_v61  ;;  %14045 = vmatprep.subr.bf16.mxu1 %v18359_v63  ;;  %v380_v57 = vld [vmem:[%s19514_s9 + $0x1e0] sm:$0xff]  ;;  %v373_v61 = vld [vmem:[%s19514_s9 + $0x1a8] sm:$0xff] }
 0x43b   : > { %v381_v63 = vld [vmem:[%s19514_s9 + $0x1e8] sm:$0xff]  ;;  %v16409_v5 = vcombine.high %v372_v20, %v380_v57  ;;  %v16408_v11 = vcombine.low %v372_v20, %v380_v57 }
 0x43c   : > { %v16411_v6 = vcombine.high %v373_v61, %v381_v63  ;;  %v16410_v12 = vcombine.low %v373_v61, %v381_v63 }
 0x43d   : > { %13718 = vmatpush1.bf16.msra.mxu0 %v18356_v8  ;;  %14046 = vmatpush1.bf16.msra.mxu1 %v18358_v9  ;;  %v388_v8 = vld [vmem:[%s19514_s9 + $0x220] sm:$0xff] }
 0x43e   : > { %13719 = vmatprep.subr.bf16.mxu0 %v18373_v25  ;;  %14047 = vmatprep.subr.bf16.mxu1 %v18375_v10  ;;  %v396_v9 = vld [vmem:[%s19514_s9 + $0x260] sm:$0xff]  ;;  %v389_v25 = vld [vmem:[%s19514_s9 + $0x228] sm:$0xff] }
 0x43f   : > { %v397_v10 = vld [vmem:[%s19514_s9 + $0x268] sm:$0xff]  ;;  %v16425_v14 = vcombine.high %v388_v8, %v396_v9  ;;  %v16424_v60 = vcombine.low %v388_v8, %v396_v9 }
 0x440   : > { %v16427_v15 = vcombine.high %v389_v25, %v397_v10  ;;  %v16426_v27 = vcombine.low %v389_v25, %v397_v10 }
 0x441   : > { %13720 = vmatpush1.bf16.msra.mxu0 %v18372_v18  ;;  %14048 = vmatpush1.bf16.msra.mxu1 %v18374_v19  ;;  %v404_v18 = vld [vmem:[%s19514_s9 + $0x2a0] sm:$0xff] }
 0x442   : > { %13721 = vmatprep.subr.bf16.mxu0 %v18389_v21  ;;  %14049 = vmatprep.subr.bf16.mxu1 %v18391_v24  ;;  %v412_v19 = vld [vmem:[%s19514_s9 + $0x2e0] sm:$0xff]  ;;  %v405_v21 = vld [vmem:[%s19514_s9 + $0x2a8] sm:$0xff] }
 0x443   : > { %v413_v24 = vld [vmem:[%s19514_s9 + $0x2e8] sm:$0xff]  ;;  %v16441_v29 = vcombine.high %v404_v18, %v412_v19  ;;  %v16440_v35 = vcombine.low %v404_v18, %v412_v19 }
 0x444   : > { %v16443_v30 = vcombine.high %v405_v21, %v413_v24  ;;  %v16442_v36 = vcombine.low %v405_v21, %v413_v24 }
 0x445   : > { %13722 = vmatpush1.bf16.msra.mxu0 %v18388_v50  ;;  %14050 = vmatpush1.bf16.msra.mxu1 %v18390_v16  ;;  %v420_v50 = vld [vmem:[%s19514_s9 + $0x320] sm:$0xff] }
 0x446   : > { %14060 = vmatprep.subr.bf16.mxu0 %v16361_v33  ;;  %14388 = vmatprep.subr.bf16.mxu1 %v16363_v34  ;;  %v428_v16 = vld [vmem:[%s19514_s9 + $0x360] sm:$0xff]  ;;  %v421_v33 = vld [vmem:[%s19514_s9 + $0x328] sm:$0xff] }
 0x447   : > { %v429_v34 = vld [vmem:[%s19514_s9 + $0x368] sm:$0xff]  ;;  %v16457_v38 = vcombine.high %v420_v50, %v428_v16  ;;  %v16456_v26 = vcombine.low %v420_v50, %v428_v16 }
 0x448   : > { %13724 = vmatmul.mubr.bf16.vlgmr.msra.gmra.mrb[4].mxu0 %v20190_v40  ;;  %14052 = vmatmul.mubr.bf16.vlgmr.msra.gmra.mrb[4].mxu1 %v20190_v40  ;;  %v16459_v39 = vcombine.high %v421_v33, %v429_v34  ;;  %v16458_v45 = vcombine.low %v421_v33, %v429_v34 }
 0x449   : > { %14061 = vmatpush1.bf16.msra.mxu0 %v16360_v41  ;;  %14389 = vmatpush1.bf16.msra.mxu1 %v16362_v42  ;;  %v436_v41 = vld [vmem:[%s19514_s9 + $0x3a0] sm:$0xff] }
 0x44a   : > { %14062 = vmatprep.subr.bf16.mxu0 %v16377_v43  ;;  %14390 = vmatprep.subr.bf16.mxu1 %v16379_v44  ;;  %v444_v42 = vld [vmem:[%s19514_s9 + $0x3e0] sm:$0xff]  ;;  %v437_v43 = vld [vmem:[%s19514_s9 + $0x3a8] sm:$0xff] }
 0x44b   : > { %14092 = vmatprep.mubr.bf16.mxu0 %v19577_v58  ;;  %14420 = vmatprep.mubr.bf16.mxu1 %v19577_v58  ;;  %v445_v44 = vld [vmem:[%s19514_s9 + $0x3e8] sm:$0xff]  ;;  %v16473_v48 = vcombine.high %v436_v41, %v444_v42  ;;  %v16472_v20 = vcombine.low %v436_v41, %v444_v42 }
 0x44c   : > { %v16475_v49 = vcombine.high %v437_v43, %v445_v44  ;;  %v16474_v57 = vcombine.low %v437_v43, %v445_v44 }
 0x44d   : > { %14063 = vmatpush1.bf16.msra.mxu0 %v16376_v51  ;;  %14391 = vmatpush1.bf16.msra.mxu1 %v16378_v52  ;;  %v452_v51 = vld [vmem:[%s19514_s9 + $0x420] sm:$0xff] }
 0x44e   : > { %14064 = vmatprep.subr.bf16.mxu0 %v16393_v53  ;;  %14392 = vmatprep.subr.bf16.mxu1 %v16395_v55  ;;  %v460_v52 = vld [vmem:[%s19514_s9 + $0x460] sm:$0xff]  ;;  %v453_v53 = vld [vmem:[%s19514_s9 + $0x428] sm:$0xff] }
 0x44f   : > { %v461_v55 = vld [vmem:[%s19514_s9 + $0x468] sm:$0xff]  ;;  %v16489_v61 = vcombine.high %v452_v51, %v460_v52  ;;  %v16488_v8 = vcombine.low %v452_v51, %v460_v52 }
 0x450   : > { %v16491_v63 = vcombine.high %v453_v53, %v461_v55  ;;  %v16490_v9 = vcombine.low %v453_v53, %v461_v55 }
 0x451   : > { %14065 = vmatpush1.bf16.msra.mxu0 %v16392_v0  ;;  %14393 = vmatpush1.bf16.msra.mxu1 %v16394_v1  ;;  %v468_v0 = vld [vmem:[%s19514_s9 + $0x4a0] sm:$0xff] }
 0x452   : > { %14066 = vmatprep.subr.bf16.mxu0 %v16409_v5  ;;  %14394 = vmatprep.subr.bf16.mxu1 %v16411_v6  ;;  %v476_v1 = vld [vmem:[%s19514_s9 + $0x4e0] sm:$0xff]  ;;  %v469_v5 = vld [vmem:[%s19514_s9 + $0x4a8] sm:$0xff] }
 0x453   : > { %v477_v6 = vld [vmem:[%s19514_s9 + $0x4e8] sm:$0xff]  ;;  %v16505_v25 = vcombine.high %v468_v0, %v476_v1  ;;  %v16504_v18 = vcombine.low %v468_v0, %v476_v1 }
 0x454   : > { %v16507_v10 = vcombine.high %v469_v5, %v477_v6  ;;  %v16506_v19 = vcombine.low %v469_v5, %v477_v6 }
 0x455   : > { %14067 = vmatpush1.bf16.msra.mxu0 %v16408_v11  ;;  %14395 = vmatpush1.bf16.msra.mxu1 %v16410_v12  ;;  %v484_v11 = vld [vmem:[%s19514_s9 + $0x520] sm:$0xff] }
 0x456   : > { %14068 = vmatprep.subr.bf16.mxu0 %v16425_v14  ;;  %14396 = vmatprep.subr.bf16.mxu1 %v16427_v15  ;;  %v492_v12 = vld [vmem:[%s19514_s9 + $0x560] sm:$0xff]  ;;  %v485_v14 = vld [vmem:[%s19514_s9 + $0x528] sm:$0xff] }
 0x457   : > { %v493_v15 = vld [vmem:[%s19514_s9 + $0x568] sm:$0xff]  ;;  %v16521_v21 = vcombine.high %v484_v11, %v492_v12  ;;  %v16520_v50 = vcombine.low %v484_v11, %v492_v12 }
 0x458   : > { %v16523_v24 = vcombine.high %v485_v14, %v493_v15  ;;  %v16522_v16 = vcombine.low %v485_v14, %v493_v15 }
 0x459   : > { %14069 = vmatpush1.bf16.msra.mxu0 %v16424_v60  ;;  %14397 = vmatpush1.bf16.msra.mxu1 %v16426_v27  ;;  %v500_v60 = vld [vmem:[%s19514_s9 + $0x5a0] sm:$0xff] }
 0x45a   : > { %14070 = vmatprep.subr.bf16.mxu0 %v16441_v29  ;;  %14398 = vmatprep.subr.bf16.mxu1 %v16443_v30  ;;  %v508_v27 = vld [vmem:[%s19514_s9 + $0x5e0] sm:$0xff]  ;;  %v501_v29 = vld [vmem:[%s19514_s9 + $0x5a8] sm:$0xff] }
 0x45b   : > { %v509_v30 = vld [vmem:[%s19514_s9 + $0x5e8] sm:$0xff]  ;;  %v16537_v33 = vcombine.high %v500_v60, %v508_v27  ;;  %v16536_v41 = vcombine.low %v500_v60, %v508_v27 }
 0x45c   : > { %v16539_v34 = vcombine.high %v501_v29, %v509_v30  ;;  %v16538_v42 = vcombine.low %v501_v29, %v509_v30 }
 0x45d   : > { %14071 = vmatpush1.bf16.msra.mxu0 %v16440_v35  ;;  %14399 = vmatpush1.bf16.msra.mxu1 %v16442_v36  ;;  %v516_v35 = vld [vmem:[%s19514_s9 + $0x620] sm:$0xff] }
 0x45e   : > { %14072 = vmatprep.subr.bf16.mxu0 %v16457_v38  ;;  %14400 = vmatprep.subr.bf16.mxu1 %v16459_v39  ;;  %v524_v36 = vld [vmem:[%s19514_s9 + $0x660] sm:$0xff]  ;;  %v517_v38 = vld [vmem:[%s19514_s9 + $0x628] sm:$0xff] }
 0x45f   : > { %v525_v39 = vld [vmem:[%s19514_s9 + $0x668] sm:$0xff]  ;;  %v16553_v43 = vcombine.high %v516_v35, %v524_v36  ;;  %v16552_v51 = vcombine.low %v516_v35, %v524_v36 }
 0x460   : > { %v16555_v44 = vcombine.high %v517_v38, %v525_v39  ;;  %v16554_v52 = vcombine.low %v517_v38, %v525_v39 }
 0x461   : > { %14073 = vmatpush1.bf16.msra.mxu0 %v16456_v26  ;;  %14401 = vmatpush1.bf16.msra.mxu1 %v16458_v45  ;;  %v532_v26 = vld [vmem:[%s19514_s9 + $0x6a0] sm:$0xff] }
 0x462   : > { %14074 = vmatprep.subr.bf16.mxu0 %v16473_v48  ;;  %14402 = vmatprep.subr.bf16.mxu1 %v16475_v49  ;;  %v540_v45 = vld [vmem:[%s19514_s9 + $0x6e0] sm:$0xff]  ;;  %v533_v48 = vld [vmem:[%s19514_s9 + $0x6a8] sm:$0xff] }
 0x463   : > { %v541_v49 = vld [vmem:[%s19514_s9 + $0x6e8] sm:$0xff]  ;;  %v16569_v53 = vcombine.high %v532_v26, %v540_v45  ;;  %v16568_v0 = vcombine.low %v532_v26, %v540_v45 }
 0x464   : > { %v16571_v55 = vcombine.high %v533_v48, %v541_v49  ;;  %v16570_v1 = vcombine.low %v533_v48, %v541_v49 }
 0x465   : > { %14075 = vmatpush1.bf16.msra.mxu0 %v16472_v20  ;;  %14403 = vmatpush1.bf16.msra.mxu1 %v16474_v57  ;;  %v548_v20 = vld [vmem:[%s19514_s9 + $0x720] sm:$0xff] }
 0x466   : > { %14076 = vmatprep.subr.bf16.mxu0 %v16489_v61  ;;  %14404 = vmatprep.subr.bf16.mxu1 %v16491_v63  ;;  %v556_v57 = vld [vmem:[%s19514_s9 + $0x760] sm:$0xff]  ;;  %v549_v61 = vld [vmem:[%s19514_s9 + $0x728] sm:$0xff] }
 0x467   : > { %v557_v63 = vld [vmem:[%s19514_s9 + $0x768] sm:$0xff]  ;;  %v16585_v5 = vcombine.high %v548_v20, %v556_v57  ;;  %v16584_v11 = vcombine.low %v548_v20, %v556_v57 }
 0x468   : > { %v16587_v6 = vcombine.high %v549_v61, %v557_v63  ;;  %v16586_v12 = vcombine.low %v549_v61, %v557_v63 }
 0x469   : > { %14077 = vmatpush1.bf16.msra.mxu0 %v16488_v8  ;;  %14405 = vmatpush1.bf16.msra.mxu1 %v16490_v9  ;;  %v564_v8 = vld [vmem:[%s19514_s9 + $0x7a0] sm:$0xff] }
 0x46a   : > { %14078 = vmatprep.subr.bf16.mxu0 %v16505_v25  ;;  %14406 = vmatprep.subr.bf16.mxu1 %v16507_v10  ;;  %v572_v9 = vld [vmem:[%s19514_s9 + $0x7e0] sm:$0xff]  ;;  %v565_v25 = vld [vmem:[%s19514_s9 + $0x7a8] sm:$0xff] }
 0x46b   : > { %v573_v10 = vld [vmem:[%s19514_s9 + $0x7e8] sm:$0xff]  ;;  %v16601_v14 = vcombine.high %v564_v8, %v572_v9  ;;  %v16600_v60 = vcombine.low %v564_v8, %v572_v9 }
 0x46c   : > { %v16603_v15 = vcombine.high %v565_v25, %v573_v10  ;;  %v16602_v27 = vcombine.low %v565_v25, %v573_v10 }
 0x46d   : > { %14079 = vmatpush1.bf16.msra.mxu0 %v16504_v18  ;;  %14407 = vmatpush1.bf16.msra.mxu1 %v16506_v19  ;;  %v580_v18 = vld [vmem:[%s19514_s9 + $0x820] sm:$0xff] }
 0x46e   : > { %14080 = vmatprep.subr.bf16.mxu0 %v16521_v21  ;;  %14408 = vmatprep.subr.bf16.mxu1 %v16523_v24  ;;  %v588_v19 = vld [vmem:[%s19514_s9 + $0x860] sm:$0xff]  ;;  %v581_v21 = vld [vmem:[%s19514_s9 + $0x828] sm:$0xff] }
 0x46f   : > { %v589_v24 = vld [vmem:[%s19514_s9 + $0x868] sm:$0xff]  ;;  %v16617_v29 = vcombine.high %v580_v18, %v588_v19  ;;  %v16616_v35 = vcombine.low %v580_v18, %v588_v19 }
 0x470   : > { %v16619_v30 = vcombine.high %v581_v21, %v589_v24  ;;  %v16618_v36 = vcombine.low %v581_v21, %v589_v24 }
 0x471   : > { %14081 = vmatpush1.bf16.msra.mxu0 %v16520_v50  ;;  %14409 = vmatpush1.bf16.msra.mxu1 %v16522_v16  ;;  %v596_v50 = vld [vmem:[%s19514_s9 + $0x8a0] sm:$0xff] }
 0x472   : > { %14082 = vmatprep.subr.bf16.mxu0 %v16537_v33  ;;  %14410 = vmatprep.subr.bf16.mxu1 %v16539_v34  ;;  %v604_v16 = vld [vmem:[%s19514_s9 + $0x8e0] sm:$0xff]  ;;  %v597_v33 = vld [vmem:[%s19514_s9 + $0x8a8] sm:$0xff] }
 0x473   : > { %v605_v34 = vld [vmem:[%s19514_s9 + $0x8e8] sm:$0xff]  ;;  %v16633_v38 = vcombine.high %v596_v50, %v604_v16  ;;  %v16632_v26 = vcombine.low %v596_v50, %v604_v16 }
 0x474   : > { %v16635_v39 = vcombine.high %v597_v33, %v605_v34  ;;  %v16634_v45 = vcombine.low %v597_v33, %v605_v34 }
 0x475   : > { %14083 = vmatpush1.bf16.msra.mxu0 %v16536_v41  ;;  %14411 = vmatpush1.bf16.msra.mxu1 %v16538_v42  ;;  %v612_v41 = vld [vmem:[%s19514_s9 + $0x920] sm:$0xff] }
 0x476   : > { %14084 = vmatprep.subr.bf16.mxu0 %v16553_v43  ;;  %14412 = vmatprep.subr.bf16.mxu1 %v16555_v44  ;;  %v620_v42 = vld [vmem:[%s19514_s9 + $0x960] sm:$0xff]  ;;  %v613_v43 = vld [vmem:[%s19514_s9 + $0x928] sm:$0xff] }
 0x477   : > { %v621_v44 = vld [vmem:[%s19514_s9 + $0x968] sm:$0xff]  ;;  %v16649_v48 = vcombine.high %v612_v41, %v620_v42  ;;  %v16648_v20 = vcombine.low %v612_v41, %v620_v42 }
 0x478   : > { %v16651_v49 = vcombine.high %v613_v43, %v621_v44  ;;  %v16650_v57 = vcombine.low %v613_v43, %v621_v44 }
 0x479   : > { %14085 = vmatpush1.bf16.msra.mxu0 %v16552_v51  ;;  %14413 = vmatpush1.bf16.msra.mxu1 %v16554_v52  ;;  %v628_v51 = vld [vmem:[%s19514_s9 + $0x9a0] sm:$0xff] }
 0x47a   : > { %14086 = vmatprep.subr.bf16.mxu0 %v16569_v53  ;;  %14414 = vmatprep.subr.bf16.mxu1 %v16571_v55  ;;  %v636_v52 = vld [vmem:[%s19514_s9 + $0x9e0] sm:$0xff]  ;;  %v629_v53 = vld [vmem:[%s19514_s9 + $0x9a8] sm:$0xff] }
 0x47b   : > { %v637_v55 = vld [vmem:[%s19514_s9 + $0x9e8] sm:$0xff]  ;;  %v16665_v61 = vcombine.high %v628_v51, %v636_v52  ;;  %v16664_v8 = vcombine.low %v628_v51, %v636_v52 }
 0x47c   : > { %v16667_v63 = vcombine.high %v629_v53, %v637_v55  ;;  %v16666_v9 = vcombine.low %v629_v53, %v637_v55 }
 0x47d   : > { %14087 = vmatpush1.bf16.msra.mxu0 %v16568_v0  ;;  %14415 = vmatpush1.bf16.msra.mxu1 %v16570_v1  ;;  %v644_v0 = vld [vmem:[%s19514_s9 + $0xa20] sm:$0xff] }
 0x47e   : > { %14088 = vmatprep.subr.bf16.mxu0 %v16585_v5  ;;  %14416 = vmatprep.subr.bf16.mxu1 %v16587_v6  ;;  %v652_v1 = vld [vmem:[%s19514_s9 + $0xa60] sm:$0xff]  ;;  %v645_v5 = vld [vmem:[%s19514_s9 + $0xa28] sm:$0xff] }
 0x47f   : > { %v653_v6 = vld [vmem:[%s19514_s9 + $0xa68] sm:$0xff]  ;;  %v16681_v25 = vcombine.high %v644_v0, %v652_v1  ;;  %v16680_v18 = vcombine.low %v644_v0, %v652_v1 }
 0x480   : > { %v16683_v10 = vcombine.high %v645_v5, %v653_v6  ;;  %v16682_v19 = vcombine.low %v645_v5, %v653_v6 }
 0x481   : > { %14089 = vmatpush1.bf16.msra.mxu0 %v16584_v11  ;;  %14417 = vmatpush1.bf16.msra.mxu1 %v16586_v12  ;;  %v660_v11 = vld [vmem:[%s19514_s9 + $0xaa0] sm:$0xff] }
 0x482   : > { %14090 = vmatprep.subr.bf16.mxu0 %v16601_v14  ;;  %14418 = vmatprep.subr.bf16.mxu1 %v16603_v15  ;;  %v668_v12 = vld [vmem:[%s19514_s9 + $0xae0] sm:$0xff]  ;;  %v661_v14 = vld [vmem:[%s19514_s9 + $0xaa8] sm:$0xff] }
 0x483   : > { %v669_v15 = vld [vmem:[%s19514_s9 + $0xae8] sm:$0xff]  ;;  %v16697_v21 = vcombine.high %v660_v11, %v668_v12  ;;  %v16696_v50 = vcombine.low %v660_v11, %v668_v12 }
 0x484   : > { %v16699_v24 = vcombine.high %v661_v14, %v669_v15  ;;  %v16698_v16 = vcombine.low %v661_v14, %v669_v15 }
 0x485   : > { %14091 = vmatpush1.bf16.msra.mxu0 %v16600_v60  ;;  %14419 = vmatpush1.bf16.msra.mxu1 %v16602_v27  ;;  %v676_v60 = vld [vmem:[%s19514_s9 + $0xb20] sm:$0xff] }
 0x486   : > { %14101 = vmatprep.subr.bf16.mxu0 %v16617_v29  ;;  %14429 = vmatprep.subr.bf16.mxu1 %v16619_v30  ;;  %v684_v27 = vld [vmem:[%s19514_s9 + $0xb60] sm:$0xff]  ;;  %v677_v29 = vld [vmem:[%s19514_s9 + $0xb28] sm:$0xff] }
 0x487   : > { %v685_v30 = vld [vmem:[%s19514_s9 + $0xb68] sm:$0xff]  ;;  %v16713_v33 = vcombine.high %v676_v60, %v684_v27  ;;  %v16712_v41 = vcombine.low %v676_v60, %v684_v27 }
 0x488   : > { %14093 = vmatmul.mubr.bf16.vlgmr.msra.gmra.mrb[8].mxu0 %v19623_v13  ;;  %14421 = vmatmul.mubr.bf16.vlgmr.msra.gmra.mrb[8].mxu1 %v19623_v13  ;;  %v16715_v34 = vcombine.high %v677_v29, %v685_v30  ;;  %v16714_v42 = vcombine.low %v677_v29, %v685_v30 }
 0x489   : > { %14102 = vmatpush1.bf16.msra.mxu0 %v16616_v35  ;;  %14430 = vmatpush1.bf16.msra.mxu1 %v16618_v36  ;;  %v692_v35 = vld [vmem:[%s19514_s9 + $0xba0] sm:$0xff] }
 0x48a   : > { %14103 = vmatprep.subr.bf16.mxu0 %v16633_v38  ;;  %14431 = vmatprep.subr.bf16.mxu1 %v16635_v39  ;;  %v700_v36 = vld [vmem:[%s19514_s9 + $0xbe0] sm:$0xff]  ;;  %v693_v38 = vld [vmem:[%s19514_s9 + $0xba8] sm:$0xff] }
 0x48b   : > { %14133 = vmatprep.mubr.bf16.mxu0 %v19636_v22  ;;  %14461 = vmatprep.mubr.bf16.mxu1 %v19636_v22  ;;  %v701_v39 = vld [vmem:[%s19514_s9 + $0xbe8] sm:$0xff]  ;;  %v16729_v43 = vcombine.high %v692_v35, %v700_v36  ;;  %v16728_v51 = vcombine.low %v692_v35, %v700_v36 }
 0x48c   : > { %v16731_v44 = vcombine.high %v693_v38, %v701_v39  ;;  %v16730_v52 = vcombine.low %v693_v38, %v701_v39 }
 0x48d   : > { %14104 = vmatpush1.bf16.msra.mxu0 %v16632_v26  ;;  %14432 = vmatpush1.bf16.msra.mxu1 %v16634_v45  ;;  %v708_v26 = vld [vmem:[%s19514_s9 + $0xc20] sm:$0xff] }
 0x48e   : > { %14105 = vmatprep.subr.bf16.mxu0 %v16649_v48  ;;  %14433 = vmatprep.subr.bf16.mxu1 %v16651_v49  ;;  %v716_v45 = vld [vmem:[%s19514_s9 + $0xc60] sm:$0xff]  ;;  %v709_v48 = vld [vmem:[%s19514_s9 + $0xc28] sm:$0xff] }
 0x48f   : > { %v717_v49 = vld [vmem:[%s19514_s9 + $0xc68] sm:$0xff]  ;;  %v16745_v53 = vcombine.high %v708_v26, %v716_v45  ;;  %v16744_v0 = vcombine.low %v708_v26, %v716_v45 }
 0x490   : > { %v16747_v55 = vcombine.high %v709_v48, %v717_v49  ;;  %v16746_v1 = vcombine.low %v709_v48, %v717_v49 }
 0x491   : > { %14106 = vmatpush1.bf16.msra.mxu0 %v16648_v20  ;;  %14434 = vmatpush1.bf16.msra.mxu1 %v16650_v57  ;;  %v724_v20 = vld [vmem:[%s19514_s9 + $0xca0] sm:$0xff] }
 0x492   : > { %14107 = vmatprep.subr.bf16.mxu0 %v16665_v61  ;;  %14435 = vmatprep.subr.bf16.mxu1 %v16667_v63  ;;  %v732_v57 = vld [vmem:[%s19514_s9 + $0xce0] sm:$0xff]  ;;  %v725_v61 = vld [vmem:[%s19514_s9 + $0xca8] sm:$0xff] }
 0x493   : > { %v733_v63 = vld [vmem:[%s19514_s9 + $0xce8] sm:$0xff]  ;;  %v16761_v5 = vcombine.high %v724_v20, %v732_v57  ;;  %v16760_v11 = vcombine.low %v724_v20, %v732_v57 }
 0x494   : > { %v16763_v6 = vcombine.high %v725_v61, %v733_v63  ;;  %v16762_v12 = vcombine.low %v725_v61, %v733_v63 }
 0x495   : > { %14108 = vmatpush1.bf16.msra.mxu0 %v16664_v8  ;;  %14436 = vmatpush1.bf16.msra.mxu1 %v16666_v9  ;;  %v740_v8 = vld [vmem:[%s19514_s9 + $0xd20] sm:$0xff] }
 0x496   : > { %14109 = vmatprep.subr.bf16.mxu0 %v16681_v25  ;;  %14437 = vmatprep.subr.bf16.mxu1 %v16683_v10  ;;  %v748_v9 = vld [vmem:[%s19514_s9 + $0xd60] sm:$0xff]  ;;  %v741_v25 = vld [vmem:[%s19514_s9 + $0xd28] sm:$0xff] }
 0x497   : > { %v749_v10 = vld [vmem:[%s19514_s9 + $0xd68] sm:$0xff]  ;;  %v16777_v14 = vcombine.high %v740_v8, %v748_v9  ;;  %v16776_v60 = vcombine.low %v740_v8, %v748_v9 }
 0x498   : > { %v16779_v15 = vcombine.high %v741_v25, %v749_v10  ;;  %v16778_v27 = vcombine.low %v741_v25, %v749_v10 }
 0x499   : > { %14110 = vmatpush1.bf16.msra.mxu0 %v16680_v18  ;;  %14438 = vmatpush1.bf16.msra.mxu1 %v16682_v19  ;;  %v756_v18 = vld [vmem:[%s19514_s9 + $0xda0] sm:$0xff] }
 0x49a   : > { %14111 = vmatprep.subr.bf16.mxu0 %v16697_v21  ;;  %14439 = vmatprep.subr.bf16.mxu1 %v16699_v24  ;;  %v764_v19 = vld [vmem:[%s19514_s9 + $0xde0] sm:$0xff]  ;;  %v757_v21 = vld [vmem:[%s19514_s9 + $0xda8] sm:$0xff] }
 0x49b   : > { %v765_v24 = vld [vmem:[%s19514_s9 + $0xde8] sm:$0xff]  ;;  %v16793_v29 = vcombine.high %v756_v18, %v764_v19  ;;  %v16792_v35 = vcombine.low %v756_v18, %v764_v19 }
 0x49c   : > { %v16795_v30 = vcombine.high %v757_v21, %v765_v24  ;;  %v16794_v36 = vcombine.low %v757_v21, %v765_v24 }
 0x49d   : > { %14112 = vmatpush1.bf16.msra.mxu0 %v16696_v50  ;;  %14440 = vmatpush1.bf16.msra.mxu1 %v16698_v16  ;;  %v772_v50 = vld [vmem:[%s19514_s9 + $0xe20] sm:$0xff] }
 0x49e   : > { %14113 = vmatprep.subr.bf16.mxu0 %v16713_v33  ;;  %14441 = vmatprep.subr.bf16.mxu1 %v16715_v34  ;;  %v780_v16 = vld [vmem:[%s19514_s9 + $0xe60] sm:$0xff]  ;;  %v773_v33 = vld [vmem:[%s19514_s9 + $0xe28] sm:$0xff] }
 0x49f   : > { %v781_v34 = vld [vmem:[%s19514_s9 + $0xe68] sm:$0xff]  ;;  %v16809_v38 = vcombine.high %v772_v50, %v780_v16  ;;  %v16808_v26 = vcombine.low %v772_v50, %v780_v16 }
 0x4a0   : > { %v16811_v39 = vcombine.high %v773_v33, %v781_v34  ;;  %v16810_v45 = vcombine.low %v773_v33, %v781_v34 }
 0x4a1   : > { %14114 = vmatpush1.bf16.msra.mxu0 %v16712_v41  ;;  %14442 = vmatpush1.bf16.msra.mxu1 %v16714_v42  ;;  %v788_v41 = vld [vmem:[%s19514_s9 + $0xea0] sm:$0xff] }
 0x4a2   : > { %14115 = vmatprep.subr.bf16.mxu0 %v16729_v43  ;;  %14443 = vmatprep.subr.bf16.mxu1 %v16731_v44  ;;  %v796_v42 = vld [vmem:[%s19514_s9 + $0xee0] sm:$0xff]  ;;  %v789_v43 = vld [vmem:[%s19514_s9 + $0xea8] sm:$0xff] }
 0x4a3   : > { %v797_v44 = vld [vmem:[%s19514_s9 + $0xee8] sm:$0xff]  ;;  %v16825_v48 = vcombine.high %v788_v41, %v796_v42  ;;  %v16824_v20 = vcombine.low %v788_v41, %v796_v42 }
 0x4a4   : > { %v16827_v49 = vcombine.high %v789_v43, %v797_v44  ;;  %v16826_v57 = vcombine.low %v789_v43, %v797_v44 }
 0x4a5   : > { %14116 = vmatpush1.bf16.msra.mxu0 %v16728_v51  ;;  %14444 = vmatpush1.bf16.msra.mxu1 %v16730_v52  ;;  %v804_v51 = vld [vmem:[%s19514_s9 + $0xf20] sm:$0xff] }
 0x4a6   : > { %14117 = vmatprep.subr.bf16.mxu0 %v16745_v53  ;;  %14445 = vmatprep.subr.bf16.mxu1 %v16747_v55  ;;  %v812_v52 = vld [vmem:[%s19514_s9 + $0xf60] sm:$0xff]  ;;  %v805_v53 = vld [vmem:[%s19514_s9 + $0xf28] sm:$0xff] }
 0x4a7   : > { %v813_v55 = vld [vmem:[%s19514_s9 + $0xf68] sm:$0xff]  ;;  %v16841_v61 = vcombine.high %v804_v51, %v812_v52  ;;  %v16840_v8 = vcombine.low %v804_v51, %v812_v52 }
 0x4a8   : > { %v16843_v63 = vcombine.high %v805_v53, %v813_v55  ;;  %v16842_v9 = vcombine.low %v805_v53, %v813_v55 }
 0x4a9   : > { %14118 = vmatpush1.bf16.msra.mxu0 %v16744_v0  ;;  %14446 = vmatpush1.bf16.msra.mxu1 %v16746_v1  ;;  %v820_v0 = vld [vmem:[%s19514_s9 + $0xfa0] sm:$0xff] }
 0x4aa   : > { %14119 = vmatprep.subr.bf16.mxu0 %v16761_v5  ;;  %14447 = vmatprep.subr.bf16.mxu1 %v16763_v6  ;;  %v828_v1 = vld [vmem:[%s19514_s9 + $0xfe0] sm:$0xff]  ;;  %v821_v5 = vld [vmem:[%s19514_s9 + $0xfa8] sm:$0xff] }
 0x4ab   : > { %v829_v6 = vld [vmem:[%s19514_s9 + $0xfe8] sm:$0xff]  ;;  %v16857_v25 = vcombine.high %v820_v0, %v828_v1  ;;  %v16856_v18 = vcombine.low %v820_v0, %v828_v1 }
 0x4ac   : > { %v16859_v10 = vcombine.high %v821_v5, %v829_v6  ;;  %v16858_v19 = vcombine.low %v821_v5, %v829_v6 }
 0x4ad   : > { %14120 = vmatpush1.bf16.msra.mxu0 %v16760_v11  ;;  %14448 = vmatpush1.bf16.msra.mxu1 %v16762_v12  ;;  %v836_v11 = vld [vmem:[%s19514_s9 + $0x1020] sm:$0xff] }
 0x4ae   : > { %14121 = vmatprep.subr.bf16.mxu0 %v16777_v14  ;;  %14449 = vmatprep.subr.bf16.mxu1 %v16779_v15  ;;  %v844_v12 = vld [vmem:[%s19514_s9 + $0x1060] sm:$0xff]  ;;  %v837_v14 = vld [vmem:[%s19514_s9 + $0x1028] sm:$0xff] }
 0x4af   : > { %v845_v15 = vld [vmem:[%s19514_s9 + $0x1068] sm:$0xff]  ;;  %v16873_v21 = vcombine.high %v836_v11, %v844_v12  ;;  %v16872_v50 = vcombine.low %v836_v11, %v844_v12 }
 0x4b0   : > { %v16875_v24 = vcombine.high %v837_v14, %v845_v15  ;;  %v16874_v16 = vcombine.low %v837_v14, %v845_v15 }
 0x4b1   : > { %14122 = vmatpush1.bf16.msra.mxu0 %v16776_v60  ;;  %14450 = vmatpush1.bf16.msra.mxu1 %v16778_v27  ;;  %v852_v60 = vld [vmem:[%s19514_s9 + $0x10a0] sm:$0xff] }
 0x4b2   : > { %14123 = vmatprep.subr.bf16.mxu0 %v16793_v29  ;;  %14451 = vmatprep.subr.bf16.mxu1 %v16795_v30  ;;  %v860_v27 = vld [vmem:[%s19514_s9 + $0x10e0] sm:$0xff]  ;;  %v853_v29 = vld [vmem:[%s19514_s9 + $0x10a8] sm:$0xff] }
 0x4b3   : > { %v861_v30 = vld [vmem:[%s19514_s9 + $0x10e8] sm:$0xff]  ;;  %v16889_v33 = vcombine.high %v852_v60, %v860_v27  ;;  %v16888_v41 = vcombine.low %v852_v60, %v860_v27 }
 0x4b4   : > { %v16891_v34 = vcombine.high %v853_v29, %v861_v30  ;;  %v16890_v42 = vcombine.low %v853_v29, %v861_v30 }
 0x4b5   : > { %14124 = vmatpush1.bf16.msra.mxu0 %v16792_v35  ;;  %14452 = vmatpush1.bf16.msra.mxu1 %v16794_v36  ;;  %v868_v35 = vld [vmem:[%s19514_s9 + $0x1120] sm:$0xff] }
 0x4b6   : > { %14125 = vmatprep.subr.bf16.mxu0 %v16809_v38  ;;  %14453 = vmatprep.subr.bf16.mxu1 %v16811_v39  ;;  %v876_v36 = vld [vmem:[%s19514_s9 + $0x1160] sm:$0xff]  ;;  %v869_v38 = vld [vmem:[%s19514_s9 + $0x1128] sm:$0xff] }
 0x4b7   : > { %v877_v39 = vld [vmem:[%s19514_s9 + $0x1168] sm:$0xff]  ;;  %v16905_v43 = vcombine.high %v868_v35, %v876_v36  ;;  %v16904_v51 = vcombine.low %v868_v35, %v876_v36 }
 0x4b8   : > { %v16907_v44 = vcombine.high %v869_v38, %v877_v39  ;;  %v16906_v52 = vcombine.low %v869_v38, %v877_v39 }
 0x4b9   : > { %14126 = vmatpush1.bf16.msra.mxu0 %v16808_v26  ;;  %14454 = vmatpush1.bf16.msra.mxu1 %v16810_v45  ;;  %v884_v26 = vld [vmem:[%s19514_s9 + $0x11a0] sm:$0xff] }
 0x4ba   : > { %14127 = vmatprep.subr.bf16.mxu0 %v16825_v48  ;;  %14455 = vmatprep.subr.bf16.mxu1 %v16827_v49  ;;  %v892_v45 = vld [vmem:[%s19514_s9 + $0x11e0] sm:$0xff]  ;;  %v885_v48 = vld [vmem:[%s19514_s9 + $0x11a8] sm:$0xff] }
 0x4bb   : > { %v893_v49 = vld [vmem:[%s19514_s9 + $0x11e8] sm:$0xff]  ;;  %v16921_v53 = vcombine.high %v884_v26, %v892_v45  ;;  %v16920_v0 = vcombine.low %v884_v26, %v892_v45 }
 0x4bc   : > { %v16923_v55 = vcombine.high %v885_v48, %v893_v49  ;;  %v16922_v1 = vcombine.low %v885_v48, %v893_v49 }
 0x4bd   : > { %14128 = vmatpush1.bf16.msra.mxu0 %v16824_v20  ;;  %14456 = vmatpush1.bf16.msra.mxu1 %v16826_v57  ;;  %v900_v20 = vld [vmem:[%s19514_s9 + $0x1220] sm:$0xff] }
 0x4be   : > { %14129 = vmatprep.subr.bf16.mxu0 %v16841_v61  ;;  %14457 = vmatprep.subr.bf16.mxu1 %v16843_v63  ;;  %v908_v57 = vld [vmem:[%s19514_s9 + $0x1260] sm:$0xff]  ;;  %v901_v61 = vld [vmem:[%s19514_s9 + $0x1228] sm:$0xff] }
 0x4bf   : > { %v909_v63 = vld [vmem:[%s19514_s9 + $0x1268] sm:$0xff]  ;;  %v16937_v5 = vcombine.high %v900_v20, %v908_v57  ;;  %v16936_v11 = vcombine.low %v900_v20, %v908_v57 }
 0x4c0   : > { %v16939_v6 = vcombine.high %v901_v61, %v909_v63  ;;  %v16938_v12 = vcombine.low %v901_v61, %v909_v63 }
 0x4c1   : > { %14130 = vmatpush1.bf16.msra.mxu0 %v16840_v8  ;;  %14458 = vmatpush1.bf16.msra.mxu1 %v16842_v9  ;;  %v916_v8 = vld [vmem:[%s19514_s9 + $0x12a0] sm:$0xff] }
 0x4c2   : > { %14131 = vmatprep.subr.bf16.mxu0 %v16857_v25  ;;  %14459 = vmatprep.subr.bf16.mxu1 %v16859_v10  ;;  %v924_v9 = vld [vmem:[%s19514_s9 + $0x12e0] sm:$0xff]  ;;  %v917_v25 = vld [vmem:[%s19514_s9 + $0x12a8] sm:$0xff] }
 0x4c3   : > { %v925_v10 = vld [vmem:[%s19514_s9 + $0x12e8] sm:$0xff]  ;;  %v16953_v14 = vcombine.high %v916_v8, %v924_v9  ;;  %v16952_v60 = vcombine.low %v916_v8, %v924_v9 }
 0x4c4   : > { %v16955_v15 = vcombine.high %v917_v25, %v925_v10  ;;  %v16954_v27 = vcombine.low %v917_v25, %v925_v10 }
 0x4c5   : > { %14132 = vmatpush1.bf16.msra.mxu0 %v16856_v18  ;;  %14460 = vmatpush1.bf16.msra.mxu1 %v16858_v19  ;;  %v932_v18 = vld [vmem:[%s19514_s9 + $0x1320] sm:$0xff] }
 0x4c6   : > { %14142 = vmatprep.subr.bf16.mxu0 %v16873_v21  ;;  %14470 = vmatprep.subr.bf16.mxu1 %v16875_v24  ;;  %v940_v19 = vld [vmem:[%s19514_s9 + $0x1360] sm:$0xff]  ;;  %v933_v21 = vld [vmem:[%s19514_s9 + $0x1328] sm:$0xff] }
 0x4c7   : > { %v941_v24 = vld [vmem:[%s19514_s9 + $0x1368] sm:$0xff]  ;;  %v16969_v29 = vcombine.high %v932_v18, %v940_v19  ;;  %v16968_v35 = vcombine.low %v932_v18, %v940_v19 }
 0x4c8   : > { %14134 = vmatmul.mubr.bf16.vlgmr.msra.gmra.mrb[8].mxu0 %v19704_v23  ;;  %14462 = vmatmul.mubr.bf16.vlgmr.msra.gmra.mrb[8].mxu1 %v19704_v23  ;;  %v16971_v30 = vcombine.high %v933_v21, %v941_v24  ;;  %v16970_v36 = vcombine.low %v933_v21, %v941_v24 }
 0x4c9   : > { %14143 = vmatpush1.bf16.msra.mxu0 %v16872_v50  ;;  %14471 = vmatpush1.bf16.msra.mxu1 %v16874_v16  ;;  %v948_v50 = vld [vmem:[%s19514_s9 + $0x13a0] sm:$0xff] }
 0x4ca   : > { %14144 = vmatprep.subr.bf16.mxu0 %v16889_v33  ;;  %14472 = vmatprep.subr.bf16.mxu1 %v16891_v34  ;;  %v956_v16 = vld [vmem:[%s19514_s9 + $0x13e0] sm:$0xff]  ;;  %v949_v33 = vld [vmem:[%s19514_s9 + $0x13a8] sm:$0xff] }
 0x4cb   : > { %14174 = vmatprep.mubr.bf16.mxu0 %v19717_v32  ;;  %14502 = vmatprep.mubr.bf16.mxu1 %v19717_v32  ;;  %v957_v34 = vld [vmem:[%s19514_s9 + $0x13e8] sm:$0xff]  ;;  %v16985_v38 = vcombine.high %v948_v50, %v956_v16  ;;  %v16984_v26 = vcombine.low %v948_v50, %v956_v16 }
 0x4cc   : > { %v16987_v39 = vcombine.high %v949_v33, %v957_v34  ;;  %v16986_v45 = vcombine.low %v949_v33, %v957_v34 }
 0x4cd   : > { %14145 = vmatpush1.bf16.msra.mxu0 %v16888_v41  ;;  %14473 = vmatpush1.bf16.msra.mxu1 %v16890_v42  ;;  %v964_v41 = vld [vmem:[%s19514_s9 + $0x1420] sm:$0xff] }
 0x4ce   : > { %14146 = vmatprep.subr.bf16.mxu0 %v16905_v43  ;;  %14474 = vmatprep.subr.bf16.mxu1 %v16907_v44  ;;  %v972_v42 = vld [vmem:[%s19514_s9 + $0x1460] sm:$0xff]  ;;  %v965_v43 = vld [vmem:[%s19514_s9 + $0x1428] sm:$0xff] }
 0x4cf   : > { %v973_v44 = vld [vmem:[%s19514_s9 + $0x1468] sm:$0xff]  ;;  %v17001_v48 = vcombine.high %v964_v41, %v972_v42  ;;  %v17000_v20 = vcombine.low %v964_v41, %v972_v42 }
 0x4d0   : > { %v17003_v49 = vcombine.high %v965_v43, %v973_v44  ;;  %v17002_v57 = vcombine.low %v965_v43, %v973_v44 }
 0x4d1   : > { %14147 = vmatpush1.bf16.msra.mxu0 %v16904_v51  ;;  %14475 = vmatpush1.bf16.msra.mxu1 %v16906_v52  ;;  %v980_v51 = vld [vmem:[%s19514_s9 + $0x14a0] sm:$0xff] }
 0x4d2   : > { %14148 = vmatprep.subr.bf16.mxu0 %v16921_v53  ;;  %14476 = vmatprep.subr.bf16.mxu1 %v16923_v55  ;;  %v988_v52 = vld [vmem:[%s19514_s9 + $0x14e0] sm:$0xff]  ;;  %v981_v53 = vld [vmem:[%s19514_s9 + $0x14a8] sm:$0xff] }
 0x4d3   : > { %v989_v55 = vld [vmem:[%s19514_s9 + $0x14e8] sm:$0xff]  ;;  %v17017_v61 = vcombine.high %v980_v51, %v988_v52  ;;  %v17016_v8 = vcombine.low %v980_v51, %v988_v52 }
 0x4d4   : > { %v17019_v63 = vcombine.high %v981_v53, %v989_v55  ;;  %v17018_v9 = vcombine.low %v981_v53, %v989_v55 }
 0x4d5   : > { %14149 = vmatpush1.bf16.msra.mxu0 %v16920_v0  ;;  %14477 = vmatpush1.bf16.msra.mxu1 %v16922_v1  ;;  %v996_v0 = vld [vmem:[%s19514_s9 + $0x1520] sm:$0xff] }
 0x4d6   : > { %14150 = vmatprep.subr.bf16.mxu0 %v16937_v5  ;;  %14478 = vmatprep.subr.bf16.mxu1 %v16939_v6  ;;  %v1004_v1 = vld [vmem:[%s19514_s9 + $0x1560] sm:$0xff]  ;;  %v997_v5 = vld [vmem:[%s19514_s9 + $0x1528] sm:$0xff] }
 0x4d7   : > { %v1005_v6 = vld [vmem:[%s19514_s9 + $0x1568] sm:$0xff]  ;;  %v17033_v25 = vcombine.high %v996_v0, %v1004_v1  ;;  %v17032_v18 = vcombine.low %v996_v0, %v1004_v1 }
 0x4d8   : > { %v17035_v10 = vcombine.high %v997_v5, %v1005_v6  ;;  %v17034_v19 = vcombine.low %v997_v5, %v1005_v6 }
 0x4d9   : > { %14151 = vmatpush1.bf16.msra.mxu0 %v16936_v11  ;;  %14479 = vmatpush1.bf16.msra.mxu1 %v16938_v12  ;;  %v1012_v11 = vld [vmem:[%s19514_s9 + $0x15a0] sm:$0xff] }
 0x4da   : > { %14152 = vmatprep.subr.bf16.mxu0 %v16953_v14  ;;  %14480 = vmatprep.subr.bf16.mxu1 %v16955_v15  ;;  %v1020_v12 = vld [vmem:[%s19514_s9 + $0x15e0] sm:$0xff]  ;;  %v1013_v14 = vld [vmem:[%s19514_s9 + $0x15a8] sm:$0xff] }
 0x4db   : > { %v1021_v15 = vld [vmem:[%s19514_s9 + $0x15e8] sm:$0xff]  ;;  %v17049_v21 = vcombine.high %v1012_v11, %v1020_v12  ;;  %v17048_v50 = vcombine.low %v1012_v11, %v1020_v12 }
 0x4dc   : > { %v17051_v24 = vcombine.high %v1013_v14, %v1021_v15  ;;  %v17050_v16 = vcombine.low %v1013_v14, %v1021_v15 }
 0x4dd   : > { %14153 = vmatpush1.bf16.msra.mxu0 %v16952_v60  ;;  %14481 = vmatpush1.bf16.msra.mxu1 %v16954_v27  ;;  %v1028_v60 = vld [vmem:[%s19514_s9 + $0x1620] sm:$0xff] }
 0x4de   : > { %14154 = vmatprep.subr.bf16.mxu0 %v16969_v29  ;;  %14482 = vmatprep.subr.bf16.mxu1 %v16971_v30  ;;  %v1036_v27 = vld [vmem:[%s19514_s9 + $0x1660] sm:$0xff]  ;;  %v1029_v29 = vld [vmem:[%s19514_s9 + $0x1628] sm:$0xff] }
 0x4df   : > { %v1037_v30 = vld [vmem:[%s19514_s9 + $0x1668] sm:$0xff]  ;;  %v17065_v33 = vcombine.high %v1028_v60, %v1036_v27  ;;  %v17064_v41 = vcombine.low %v1028_v60, %v1036_v27 }
 0x4e0   : > { %v17067_v34 = vcombine.high %v1029_v29, %v1037_v30  ;;  %v17066_v42 = vcombine.low %v1029_v29, %v1037_v30 }
 0x4e1   : > { %14155 = vmatpush1.bf16.msra.mxu0 %v16968_v35  ;;  %14483 = vmatpush1.bf16.msra.mxu1 %v16970_v36  ;;  %v1044_v35 = vld [vmem:[%s19514_s9 + $0x16a0] sm:$0xff] }
 0x4e2   : > { %14156 = vmatprep.subr.bf16.mxu0 %v16985_v38  ;;  %14484 = vmatprep.subr.bf16.mxu1 %v16987_v39  ;;  %v1052_v36 = vld [vmem:[%s19514_s9 + $0x16e0] sm:$0xff]  ;;  %v1045_v38 = vld [vmem:[%s19514_s9 + $0x16a8] sm:$0xff] }
 0x4e3   : > { %v1053_v39 = vld [vmem:[%s19514_s9 + $0x16e8] sm:$0xff]  ;;  %v17081_v43 = vcombine.high %v1044_v35, %v1052_v36  ;;  %v17080_v51 = vcombine.low %v1044_v35, %v1052_v36 }
 0x4e4   : > { %v17083_v44 = vcombine.high %v1045_v38, %v1053_v39  ;;  %v17082_v52 = vcombine.low %v1045_v38, %v1053_v39 }
 0x4e5   : > { %14157 = vmatpush1.bf16.msra.mxu0 %v16984_v26  ;;  %14485 = vmatpush1.bf16.msra.mxu1 %v16986_v45  ;;  %v1060_v26 = vld [vmem:[%s19514_s9 + $0x1720] sm:$0xff] }
 0x4e6   : > { %14158 = vmatprep.subr.bf16.mxu0 %v17001_v48  ;;  %14486 = vmatprep.subr.bf16.mxu1 %v17003_v49  ;;  %v1068_v45 = vld [vmem:[%s19514_s9 + $0x1760] sm:$0xff]  ;;  %v1061_v48 = vld [vmem:[%s19514_s9 + $0x1728] sm:$0xff] }
 0x4e7   : > { %v1069_v49 = vld [vmem:[%s19514_s9 + $0x1768] sm:$0xff]  ;;  %v17097_v53 = vcombine.high %v1060_v26, %v1068_v45  ;;  %v17096_v0 = vcombine.low %v1060_v26, %v1068_v45 }
 0x4e8   : > { %v17099_v55 = vcombine.high %v1061_v48, %v1069_v49  ;;  %v17098_v1 = vcombine.low %v1061_v48, %v1069_v49 }
 0x4e9   : > { %14159 = vmatpush1.bf16.msra.mxu0 %v17000_v20  ;;  %14487 = vmatpush1.bf16.msra.mxu1 %v17002_v57  ;;  %v1076_v20 = vld [vmem:[%s19514_s9 + $0x17a0] sm:$0xff] }
 0x4ea   : > { %14160 = vmatprep.subr.bf16.mxu0 %v17017_v61  ;;  %14488 = vmatprep.subr.bf16.mxu1 %v17019_v63  ;;  %v1084_v57 = vld [vmem:[%s19514_s9 + $0x17e0] sm:$0xff]  ;;  %v1077_v61 = vld [vmem:[%s19514_s9 + $0x17a8] sm:$0xff] }
 0x4eb   : > { %v1085_v63 = vld [vmem:[%s19514_s9 + $0x17e8] sm:$0xff]  ;;  %v17113_v5 = vcombine.high %v1076_v20, %v1084_v57  ;;  %v17112_v11 = vcombine.low %v1076_v20, %v1084_v57 }
 0x4ec   : > { %v17115_v6 = vcombine.high %v1077_v61, %v1085_v63  ;;  %v17114_v12 = vcombine.low %v1077_v61, %v1085_v63 }
 0x4ed   : > { %14161 = vmatpush1.bf16.msra.mxu0 %v17016_v8  ;;  %14489 = vmatpush1.bf16.msra.mxu1 %v17018_v9  ;;  %v1092_v8 = vld [vmem:[%s19514_s9 + $0x1820] sm:$0xff] }
 0x4ee   : > { %14162 = vmatprep.subr.bf16.mxu0 %v17033_v25  ;;  %14490 = vmatprep.subr.bf16.mxu1 %v17035_v10  ;;  %v1100_v9 = vld [vmem:[%s19514_s9 + $0x1860] sm:$0xff]  ;;  %v1093_v25 = vld [vmem:[%s19514_s9 + $0x1828] sm:$0xff] }
 0x4ef   : > { %v1101_v10 = vld [vmem:[%s19514_s9 + $0x1868] sm:$0xff]  ;;  %v17129_v14 = vcombine.high %v1092_v8, %v1100_v9  ;;  %v17128_v60 = vcombine.low %v1092_v8, %v1100_v9 }
 0x4f0   : > { %v17131_v15 = vcombine.high %v1093_v25, %v1101_v10  ;;  %v17130_v27 = vcombine.low %v1093_v25, %v1101_v10 }
 0x4f1   : > { %14163 = vmatpush1.bf16.msra.mxu0 %v17032_v18  ;;  %14491 = vmatpush1.bf16.msra.mxu1 %v17034_v19  ;;  %v1108_v18 = vld [vmem:[%s19514_s9 + $0x18a0] sm:$0xff] }
 0x4f2   : > { %14164 = vmatprep.subr.bf16.mxu0 %v17049_v21  ;;  %14492 = vmatprep.subr.bf16.mxu1 %v17051_v24  ;;  %v1116_v19 = vld [vmem:[%s19514_s9 + $0x18e0] sm:$0xff]  ;;  %v1109_v21 = vld [vmem:[%s19514_s9 + $0x18a8] sm:$0xff] }
 0x4f3   : > { %v1117_v24 = vld [vmem:[%s19514_s9 + $0x18e8] sm:$0xff]  ;;  %v17145_v29 = vcombine.high %v1108_v18, %v1116_v19  ;;  %v17144_v35 = vcombine.low %v1108_v18, %v1116_v19 }
 0x4f4   : > { %v17147_v30 = vcombine.high %v1109_v21, %v1117_v24  ;;  %v17146_v36 = vcombine.low %v1109_v21, %v1117_v24 }
 0x4f5   : > { %14165 = vmatpush1.bf16.msra.mxu0 %v17048_v50  ;;  %14493 = vmatpush1.bf16.msra.mxu1 %v17050_v16  ;;  %v1124_v50 = vld [vmem:[%s19514_s9 + $0x1920] sm:$0xff] }
 0x4f6   : > { %14166 = vmatprep.subr.bf16.mxu0 %v17065_v33  ;;  %14494 = vmatprep.subr.bf16.mxu1 %v17067_v34  ;;  %v1132_v16 = vld [vmem:[%s19514_s9 + $0x1960] sm:$0xff]  ;;  %v1125_v33 = vld [vmem:[%s19514_s9 + $0x1928] sm:$0xff] }
 0x4f7   : > { %v1133_v34 = vld [vmem:[%s19514_s9 + $0x1968] sm:$0xff]  ;;  %v17161_v38 = vcombine.high %v1124_v50, %v1132_v16  ;;  %v17160_v26 = vcombine.low %v1124_v50, %v1132_v16 }
 0x4f8   : > { %v17163_v39 = vcombine.high %v1125_v33, %v1133_v34  ;;  %v17162_v45 = vcombine.low %v1125_v33, %v1133_v34  ;;  %v1205_v16 = vld [vmem:[%s19514_s9 + $0x1ba8] sm:$0xff] }
 0x4f9   : > { %14167 = vmatpush1.bf16.msra.mxu0 %v17064_v41  ;;  %14495 = vmatpush1.bf16.msra.mxu1 %v17066_v42  ;;  %v1140_v41 = vld [vmem:[%s19514_s9 + $0x19a0] sm:$0xff]  ;;  %v1213_v33 = vld [vmem:[%s19514_s9 + $0x1be8] sm:$0xff] }
 0x4fa   : > { %14168 = vmatprep.subr.bf16.mxu0 %v17081_v43  ;;  %14496 = vmatprep.subr.bf16.mxu1 %v17083_v44  ;;  %v1148_v42 = vld [vmem:[%s19514_s9 + $0x19e0] sm:$0xff]  ;;  %v1141_v43 = vld [vmem:[%s19514_s9 + $0x19a8] sm:$0xff] }
 0x4fb   : > { %v1149_v44 = vld [vmem:[%s19514_s9 + $0x19e8] sm:$0xff]  ;;  %v17177_v48 = vcombine.high %v1140_v41, %v1148_v42  ;;  %v17176_v20 = vcombine.low %v1140_v41, %v1148_v42 }
 0x4fc   : > { %v17179_v49 = vcombine.high %v1141_v43, %v1149_v44  ;;  %v17178_v57 = vcombine.low %v1141_v43, %v1149_v44  ;;  %v17243_v44 = vcombine.high %v1205_v16, %v1213_v33 }
 0x4fd   : > { %14169 = vmatpush1.bf16.msra.mxu0 %v17080_v51  ;;  %14497 = vmatpush1.bf16.msra.mxu1 %v17082_v52  ;;  %v1156_v51 = vld [vmem:[%s19514_s9 + $0x1a20] sm:$0xff] }
 0x4fe   : > { %14170 = vmatprep.subr.bf16.mxu0 %v17097_v53  ;;  %14498 = vmatprep.subr.bf16.mxu1 %v17099_v55  ;;  %v1164_v52 = vld [vmem:[%s19514_s9 + $0x1a60] sm:$0xff]  ;;  %v1157_v53 = vld [vmem:[%s19514_s9 + $0x1a28] sm:$0xff] }
 0x4ff   : > { %v1165_v55 = vld [vmem:[%s19514_s9 + $0x1a68] sm:$0xff]  ;;  %v17193_v61 = vcombine.high %v1156_v51, %v1164_v52  ;;  %v17192_v8 = vcombine.low %v1156_v51, %v1164_v52  ;;  %v17242_v52 = vcombine.low %v1205_v16, %v1213_v33 }
 0x500   : > { %v17195_v63 = vcombine.high %v1157_v53, %v1165_v55  ;;  %v17194_v9 = vcombine.low %v1157_v53, %v1165_v55 }
 0x501   : > { %14171 = vmatpush1.bf16.msra.mxu0 %v17096_v0  ;;  %14499 = vmatpush1.bf16.msra.mxu1 %v17098_v1  ;;  %v1172_v0 = vld [vmem:[%s19514_s9 + $0x1aa0] sm:$0xff] }
 0x502   : > { %14172 = vmatprep.subr.bf16.mxu0 %v17113_v5  ;;  %14500 = vmatprep.subr.bf16.mxu1 %v17115_v6  ;;  %v1180_v1 = vld [vmem:[%s19514_s9 + $0x1ae0] sm:$0xff]  ;;  %v1173_v5 = vld [vmem:[%s19514_s9 + $0x1aa8] sm:$0xff] }
 0x503   : > { %v1181_v6 = vld [vmem:[%s19514_s9 + $0x1ae8] sm:$0xff]  ;;  %v17209_v25 = vcombine.high %v1172_v0, %v1180_v1  ;;  %v17208_v18 = vcombine.low %v1172_v0, %v1180_v1 }
 0x504   : > { %v17211_v10 = vcombine.high %v1173_v5, %v1181_v6  ;;  %v17210_v19 = vcombine.low %v1173_v5, %v1181_v6 }
 0x505   : > { %14173 = vmatpush1.bf16.msra.mxu0 %v17112_v11  ;;  %14501 = vmatpush1.bf16.msra.mxu1 %v17114_v12  ;;  %v1188_v11 = vld [vmem:[%s19514_s9 + $0x1b20] sm:$0xff] }
 0x506   : > { %14183 = vmatprep.subr.bf16.mxu0 %v17129_v14  ;;  %14511 = vmatprep.subr.bf16.mxu1 %v17131_v15  ;;  %v1196_v12 = vld [vmem:[%s19514_s9 + $0x1b60] sm:$0xff]  ;;  %v1189_v14 = vld [vmem:[%s19514_s9 + $0x1b28] sm:$0xff] }
 0x507   : > { %v1197_v15 = vld [vmem:[%s19514_s9 + $0x1b68] sm:$0xff]  ;;  %v17225_v21 = vcombine.high %v1188_v11, %v1196_v12 }
 0x508   : > { %14175 = vmatmul.mubr.bf16.vlgmr.msra.gmra.mrb[8].mxu0 %v19785_v37  ;;  %14503 = vmatmul.mubr.bf16.vlgmr.msra.gmra.mrb[8].mxu1 %v19785_v37  ;;  %v17226_v41 = vcombine.low %v1189_v14, %v1197_v15 }
 0x509   : > { %14184 = vmatpush1.bf16.msra.mxu0 %v17128_v60  ;;  %14512 = vmatpush1.bf16.msra.mxu1 %v17130_v27  ;;  %v17227_v60 = vcombine.high %v1189_v14, %v1197_v15  ;;  %v1204_v27 = vld [vmem:[%s19514_s9 + $0x1ba0] sm:$0xff] }
 0x50a   : > { %14185 = vmatprep.subr.bf16.mxu0 %v17145_v29  ;;  %14513 = vmatprep.subr.bf16.mxu1 %v17147_v30  ;;  %v1212_v29 = vld [vmem:[%s19514_s9 + $0x1be0] sm:$0xff] }
 0x50b   : > { %14215 = vmatprep.mubr.bf16.mxu0 %v19798_v46  ;;  %14543 = vmatprep.mubr.bf16.mxu1 %v19798_v46  ;;  %v17241_v42 = vcombine.high %v1204_v27, %v1212_v29  ;;  %v17240_v51 = vcombine.low %v1204_v27, %v1212_v29 }
 0x50d   : > { %14186 = vmatpush1.bf16.msra.mxu0 %v17144_v35  ;;  %14514 = vmatpush1.bf16.msra.mxu1 %v17146_v36  ;;  %v17224_v36 = vcombine.low %v1188_v11, %v1196_v12 }
 0x50e   : > { %14187 = vmatprep.subr.bf16.mxu0 %v17161_v38  ;;  %14515 = vmatprep.subr.bf16.mxu1 %v17163_v39 }
 0x511   : > { %14188 = vmatpush1.bf16.msra.mxu0 %v17160_v26  ;;  %14516 = vmatpush1.bf16.msra.mxu1 %v17162_v45  ;;  %v1220_v26 = vld [vmem:[%s19514_s9 + $0x1c20] sm:$0xff] }
 0x512   : > { %14189 = vmatprep.subr.bf16.mxu0 %v17177_v48  ;;  %14517 = vmatprep.subr.bf16.mxu1 %v17179_v49  ;;  %v1228_v45 = vld [vmem:[%s19514_s9 + $0x1c60] sm:$0xff]  ;;  %v1221_v48 = vld [vmem:[%s19514_s9 + $0x1c28] sm:$0xff] }
 0x513   : > { %v1229_v49 = vld [vmem:[%s19514_s9 + $0x1c68] sm:$0xff]  ;;  %v17257_v53 = vcombine.high %v1220_v26, %v1228_v45  ;;  %v17256_v0 = vcombine.low %v1220_v26, %v1228_v45  ;;  %v1300_v26 = vld [vmem:[%s19514_s9 + $0x1ea0] sm:$0xff] }
 0x514   : > { %v17259_v55 = vcombine.high %v1221_v48, %v1229_v49  ;;  %v17258_v1 = vcombine.low %v1221_v48, %v1229_v49  ;;  %v1308_v45 = vld [vmem:[%s19514_s9 + $0x1ee0] sm:$0xff]  ;;  %v1301_v48 = vld [vmem:[%s19514_s9 + $0x1ea8] sm:$0xff] }
 0x515   : > { %14190 = vmatpush1.bf16.msra.mxu0 %v17176_v20  ;;  %14518 = vmatpush1.bf16.msra.mxu1 %v17178_v57  ;;  %v1236_v20 = vld [vmem:[%s19514_s9 + $0x1ca0] sm:$0xff]  ;;  %v1309_v49 = vld [vmem:[%s19514_s9 + $0x1ee8] sm:$0xff] }
 0x516   : > { %14191 = vmatprep.subr.bf16.mxu0 %v17193_v61  ;;  %14519 = vmatprep.subr.bf16.mxu1 %v17195_v63  ;;  %v1244_v57 = vld [vmem:[%s19514_s9 + $0x1ce0] sm:$0xff]  ;;  %v1237_v61 = vld [vmem:[%s19514_s9 + $0x1ca8] sm:$0xff] }
 0x517   : > { %v1245_v63 = vld [vmem:[%s19514_s9 + $0x1ce8] sm:$0xff]  ;;  %v17273_v5 = vcombine.high %v1236_v20, %v1244_v57  ;;  %v17272_v11 = vcombine.low %v1236_v20, %v1244_v57  ;;  %v1316_v20 = vld [vmem:[%s19514_s9 + $0x1f20] sm:$0xff] }
 0x518   : > { %v17275_v6 = vcombine.high %v1237_v61, %v1245_v63  ;;  %v17274_v12 = vcombine.low %v1237_v61, %v1245_v63  ;;  %v1324_v57 = vld [vmem:[%s19514_s9 + $0x1f60] sm:$0xff]  ;;  %v1317_v61 = vld [vmem:[%s19514_s9 + $0x1f28] sm:$0xff] }
 0x519   : > { %14192 = vmatpush1.bf16.msra.mxu0 %v17192_v8  ;;  %14520 = vmatpush1.bf16.msra.mxu1 %v17194_v9  ;;  %v1252_v8 = vld [vmem:[%s19514_s9 + $0x1d20] sm:$0xff]  ;;  %v1325_v63 = vld [vmem:[%s19514_s9 + $0x1f68] sm:$0xff] }
 0x51a   : > { %14193 = vmatprep.subr.bf16.mxu0 %v17209_v25  ;;  %14521 = vmatprep.subr.bf16.mxu1 %v17211_v10  ;;  %v1260_v9 = vld [vmem:[%s19514_s9 + $0x1d60] sm:$0xff]  ;;  %v1253_v25 = vld [vmem:[%s19514_s9 + $0x1d28] sm:$0xff] }
 0x51b   : > { %v20974_v24 = vpop.f32.mrb[4].mxu0  ;;  %v20978_v30 = vpop.f32.mrb[4].mxu1  ;;  %v1261_v10 = vld [vmem:[%s19514_s9 + $0x1d68] sm:$0xff]  ;;  %v17289_v14 = vcombine.high %v1252_v8, %v1260_v9  ;;  %v17288_v27 = vcombine.low %v1252_v8, %v1260_v9  ;;  %v1332_v8 = vld [vmem:[%s19514_s9 + $0x1fa0] sm:$0xff] }
 0x51c   : > { %v20980_v50 = vpop.f32.mrb[5].mxu0  ;;  %v20984_v34 = vpop.f32.mrb[5].mxu1  ;;  %v17291_v15 = vcombine.high %v1253_v25, %v1261_v10  ;;  %v17290_v29 = vcombine.low %v1253_v25, %v1261_v10  ;;  %v1340_v9 = vld [vmem:[%s19514_s9 + $0x1fe0] sm:$0xff]  ;;  %v1333_v25 = vld [vmem:[%s19514_s9 + $0x1fa8] sm:$0xff] }
 0x51d   : > { %v13729_v35 = vpop.f32.mrb[6].mxu0  ;;  %14194 = vmatpush1.bf16.msra.mxu0 %v17208_v18  ;;  %v14057_v38 = vpop.f32.mrb[6].mxu1  ;;  %14522 = vmatpush1.bf16.msra.mxu1 %v17210_v19  ;;  %v1268_v18 = vld [vmem:[%s19514_s9 + $0x1da0] sm:$0xff]  ;;  %v1341_v10 = vld [vmem:[%s19514_s9 + $0x1fe8] sm:$0xff] }
 0x51e   : > { %v13730_v39 = vpop.f32.mrb[7].mxu0  ;;  %14195 = vmatprep.subr.bf16.mxu0 %v17225_v21  ;;  %v14058_v43 = vpop.f32.mrb[7].mxu1  ;;  %14523 = vmatprep.subr.bf16.mxu1 %v17227_v60  ;;  %v1276_v19 = vld [vmem:[%s19514_s9 + $0x1de0] sm:$0xff]  ;;  %v1269_v21 = vld [vmem:[%s19514_s9 + $0x1da8] sm:$0xff] }
 0x51f   : > { %v1277_v60 = vld [vmem:[%s19514_s9 + $0x1de8] sm:$0xff]  ;;  %v17305_v16 = vcombine.high %v1268_v18, %v1276_v19  ;;  %v1284_v35 = vld [vmem:[%s19514_s9 + $0x1e20] sm:$0xff] }
 0x520   : > { %v17307_v33 = vcombine.high %v1269_v21, %v1277_v60  ;;  %v1285_v38 = vld [vmem:[%s19514_s9 + $0x1e28] sm:$0xff] }
 0x521   : > { %14196 = vmatpush1.bf16.msra.mxu0 %v17224_v36  ;;  %14524 = vmatpush1.bf16.msra.mxu1 %v17226_v41  ;;  %v1292_v36 = vld [vmem:[%s19514_s9 + $0x1e60] sm:$0xff]  ;;  %v1293_v39 = vld [vmem:[%s19514_s9 + $0x1e68] sm:$0xff]  ;;  %v17304_v41 = vcombine.low %v1268_v18, %v1276_v19 }
 0x522   : > { %14197 = vmatprep.subr.bf16.mxu0 %v17241_v42  ;;  %14525 = vmatprep.subr.bf16.mxu1 %v17243_v44  ;;  %v17306_v42 = vcombine.low %v1269_v21, %v1277_v60  ;;  %v17321_v43 = vcombine.high %v1284_v35, %v1292_v36  ;;  %v17323_v44 = vcombine.high %v1285_v38, %v1293_v39  ;;  %v1348_v18 = vld [vmem:[%s19514_s9 + $0x2020] sm:$0xff]  ;;  %v1349_v21 = vld [vmem:[%s19514_s9 + $0x2028] sm:$0xff] }
 0x523   : > { %v1356_v19 = vld [vmem:[%s19514_s9 + $0x2060] sm:$0xff]  ;;  %v1357_v60 = vld [vmem:[%s19514_s9 + $0x2068] sm:$0xff] }
 0x525   : > { %14198 = vmatpush1.bf16.msra.mxu0 %v17240_v51  ;;  %14526 = vmatpush1.bf16.msra.mxu1 %v17242_v52  ;;  %v17320_v51 = vcombine.low %v1284_v35, %v1292_v36  ;;  %v17322_v52 = vcombine.low %v1285_v38, %v1293_v39  ;;  %v1364_v35 = vld [vmem:[%s19514_s9 + $0x20a0] sm:$0xff]  ;;  %v1365_v38 = vld [vmem:[%s19514_s9 + $0x20a8] sm:$0xff] }
 0x526   : > { %14199 = vmatprep.subr.bf16.mxu0 %v17257_v53  ;;  %14527 = vmatprep.subr.bf16.mxu1 %v17259_v55  ;;  %v17337_v53 = vcombine.high %v1300_v26, %v1308_v45  ;;  %v17339_v55 = vcombine.high %v1301_v48, %v1309_v49  ;;  %v1372_v36 = vld [vmem:[%s19514_s9 + $0x20e0] sm:$0xff]  ;;  %v1373_v39 = vld [vmem:[%s19514_s9 + $0x20e8] sm:$0xff] }
 0x529   : > { %14200 = vmatpush1.bf16.msra.mxu0 %v17256_v0  ;;  %14528 = vmatpush1.bf16.msra.mxu1 %v17258_v1  ;;  %v17336_v0 = vcombine.low %v1300_v26, %v1308_v45  ;;  %v17338_v1 = vcombine.low %v1301_v48, %v1309_v49  ;;  %v1380_v26 = vld [vmem:[%s19514_s9 + $0x2120] sm:$0xff]  ;;  %v1381_v48 = vld [vmem:[%s19514_s9 + $0x2128] sm:$0xff] }
 0x52a   : > { %14201 = vmatprep.subr.bf16.mxu0 %v17273_v5  ;;  %14529 = vmatprep.subr.bf16.mxu1 %v17275_v6  ;;  %v17353_v5 = vcombine.high %v1316_v20, %v1324_v57  ;;  %v17355_v6 = vcombine.high %v1317_v61, %v1325_v63  ;;  %v1388_v45 = vld [vmem:[%s19514_s9 + $0x2160] sm:$0xff]  ;;  %v1389_v49 = vld [vmem:[%s19514_s9 + $0x2168] sm:$0xff] }
 0x52d   : > { %14202 = vmatpush1.bf16.msra.mxu0 %v17272_v11  ;;  %14530 = vmatpush1.bf16.msra.mxu1 %v17274_v12  ;;  %v17352_v11 = vcombine.low %v1316_v20, %v1324_v57  ;;  %v17354_v12 = vcombine.low %v1317_v61, %v1325_v63  ;;  %v1396_v20 = vld [vmem:[%s19514_s9 + $0x21a0] sm:$0xff]  ;;  %v1397_v61 = vld [vmem:[%s19514_s9 + $0x21a8] sm:$0xff] }
 0x52e   : > { %14203 = vmatprep.subr.bf16.mxu0 %v17289_v14  ;;  %14531 = vmatprep.subr.bf16.mxu1 %v17291_v15  ;;  %v17369_v14 = vcombine.high %v1332_v8, %v1340_v9  ;;  %v17371_v15 = vcombine.high %v1333_v25, %v1341_v10  ;;  %v1404_v57 = vld [vmem:[%s19514_s9 + $0x21e0] sm:$0xff]  ;;  %v1405_v63 = vld [vmem:[%s19514_s9 + $0x21e8] sm:$0xff] }
 0x531   : > { %14204 = vmatpush1.bf16.msra.mxu0 %v17288_v27  ;;  %14532 = vmatpush1.bf16.msra.mxu1 %v17290_v29  ;;  %v17368_v27 = vcombine.low %v1332_v8, %v1340_v9  ;;  %v17370_v29 = vcombine.low %v1333_v25, %v1341_v10  ;;  %v1412_v8 = vld [vmem:[%s19514_s9 + $0x2220] sm:$0xff]  ;;  %v1413_v25 = vld [vmem:[%s19514_s9 + $0x2228] sm:$0xff] }
 0x532   : > { %14205 = vmatprep.subr.bf16.mxu0 %v17305_v16  ;;  %14533 = vmatprep.subr.bf16.mxu1 %v17307_v33  ;;  %v17385_v16 = vcombine.high %v1348_v18, %v1356_v19  ;;  %v17387_v33 = vcombine.high %v1349_v21, %v1357_v60  ;;  %v1420_v9 = vld [vmem:[%s19514_s9 + $0x2260] sm:$0xff]  ;;  %v1421_v10 = vld [vmem:[%s19514_s9 + $0x2268] sm:$0xff] }
 0x535   : > { %14206 = vmatpush1.bf16.msra.mxu0 %v17304_v41  ;;  %14534 = vmatpush1.bf16.msra.mxu1 %v17306_v42  ;;  %v17384_v41 = vcombine.low %v1348_v18, %v1356_v19  ;;  %v17386_v42 = vcombine.low %v1349_v21, %v1357_v60  ;;  %v1428_v18 = vld [vmem:[%s19514_s9 + $0x22a0] sm:$0xff]  ;;  %v1429_v21 = vld [vmem:[%s19514_s9 + $0x22a8] sm:$0xff] }
 0x536   : > { %14207 = vmatprep.subr.bf16.mxu0 %v17321_v43  ;;  %14535 = vmatprep.subr.bf16.mxu1 %v17323_v44  ;;  %v17401_v43 = vcombine.high %v1364_v35, %v1372_v36  ;;  %v17403_v44 = vcombine.high %v1365_v38, %v1373_v39  ;;  %v1436_v19 = vld [vmem:[%s19514_s9 + $0x22e0] sm:$0xff]  ;;  %v1437_v60 = vld [vmem:[%s19514_s9 + $0x22e8] sm:$0xff] }
 0x539   : > { %14208 = vmatpush1.bf16.msra.mxu0 %v17320_v51  ;;  %14536 = vmatpush1.bf16.msra.mxu1 %v17322_v52  ;;  %v17400_v51 = vcombine.low %v1364_v35, %v1372_v36  ;;  %v17402_v52 = vcombine.low %v1365_v38, %v1373_v39  ;;  %v1444_v35 = vld [vmem:[%s19514_s9 + $0x2320] sm:$0xff]  ;;  %v1445_v38 = vld [vmem:[%s19514_s9 + $0x2328] sm:$0xff] }
 0x53a   : > { %14209 = vmatprep.subr.bf16.mxu0 %v17337_v53  ;;  %14537 = vmatprep.subr.bf16.mxu1 %v17339_v55  ;;  %v17417_v53 = vcombine.high %v1380_v26, %v1388_v45  ;;  %v17419_v55 = vcombine.high %v1381_v48, %v1389_v49  ;;  %v1452_v36 = vld [vmem:[%s19514_s9 + $0x2360] sm:$0xff]  ;;  %v1453_v39 = vld [vmem:[%s19514_s9 + $0x2368] sm:$0xff] }
 0x53d   : > { %14210 = vmatpush1.bf16.msra.mxu0 %v17336_v0  ;;  %14538 = vmatpush1.bf16.msra.mxu1 %v17338_v1  ;;  %v17416_v0 = vcombine.low %v1380_v26, %v1388_v45  ;;  %v17418_v1 = vcombine.low %v1381_v48, %v1389_v49  ;;  %v1460_v26 = vld [vmem:[%s19514_s9 + $0x23a0] sm:$0xff]  ;;  %v1461_v48 = vld [vmem:[%s19514_s9 + $0x23a8] sm:$0xff] }
 0x53e   : > { %14211 = vmatprep.subr.bf16.mxu0 %v17353_v5  ;;  %14539 = vmatprep.subr.bf16.mxu1 %v17355_v6  ;;  %v17433_v5 = vcombine.high %v1396_v20, %v1404_v57  ;;  %v17435_v6 = vcombine.high %v1397_v61, %v1405_v63  ;;  %v1468_v45 = vld [vmem:[%s19514_s9 + $0x23e0] sm:$0xff]  ;;  %v1469_v49 = vld [vmem:[%s19514_s9 + $0x23e8] sm:$0xff] }
 0x541   : > { %14212 = vmatpush1.bf16.msra.mxu0 %v17352_v11  ;;  %14540 = vmatpush1.bf16.msra.mxu1 %v17354_v12  ;;  %v17432_v11 = vcombine.low %v1396_v20, %v1404_v57  ;;  %v17434_v12 = vcombine.low %v1397_v61, %v1405_v63  ;;  %v1476_v20 = vld [vmem:[%s19514_s9 + $0x2420] sm:$0xff]  ;;  %v1477_v61 = vld [vmem:[%s19514_s9 + $0x2428] sm:$0xff] }
 0x542   : > { %14213 = vmatprep.subr.bf16.mxu0 %v17369_v14  ;;  %14541 = vmatprep.subr.bf16.mxu1 %v17371_v15  ;;  %v17449_v14 = vcombine.high %v1412_v8, %v1420_v9  ;;  %v17451_v15 = vcombine.high %v1413_v25, %v1421_v10  ;;  %v1484_v57 = vld [vmem:[%s19514_s9 + $0x2460] sm:$0xff]  ;;  %v1485_v63 = vld [vmem:[%s19514_s9 + $0x2468] sm:$0xff] }
 0x545   : > { %14214 = vmatpush1.bf16.msra.mxu0 %v17368_v27  ;;  %14542 = vmatpush1.bf16.msra.mxu1 %v17370_v29  ;;  %v17448_v27 = vcombine.low %v1412_v8, %v1420_v9  ;;  %v17450_v29 = vcombine.low %v1413_v25, %v1421_v10  ;;  %v1492_v8 = vld [vmem:[%s19514_s9 + $0x24a0] sm:$0xff]  ;;  %v1493_v25 = vld [vmem:[%s19514_s9 + $0x24a8] sm:$0xff] }
 0x546   : > { %14224 = vmatprep.subr.bf16.mxu0 %v17385_v16  ;;  %14552 = vmatprep.subr.bf16.mxu1 %v17387_v33  ;;  %v17465_v16 = vcombine.high %v1428_v18, %v1436_v19  ;;  %v17467_v33 = vcombine.high %v1429_v21, %v1437_v60  ;;  %v1500_v9 = vld [vmem:[%s19514_s9 + $0x24e0] sm:$0xff]  ;;  %v1501_v10 = vld [vmem:[%s19514_s9 + $0x24e8] sm:$0xff] }
 0x548   : > { %14216 = vmatmul.mubr.bf16.vlgmr.msra.gmra.mrb[8].mxu0 %v19866_v56  ;;  %14544 = vmatmul.mubr.bf16.vlgmr.msra.gmra.mrb[8].mxu1 %v19866_v56 }
 0x549   : > { %14225 = vmatpush1.bf16.msra.mxu0 %v17384_v41  ;;  %14553 = vmatpush1.bf16.msra.mxu1 %v17386_v42  ;;  %v17464_v41 = vcombine.low %v1428_v18, %v1436_v19  ;;  %v17466_v42 = vcombine.low %v1429_v21, %v1437_v60  ;;  %v1508_v18 = vld [vmem:[%s19514_s9 + $0x2520] sm:$0xff]  ;;  %v1509_v21 = vld [vmem:[%s19514_s9 + $0x2528] sm:$0xff] }
 0x54a   : > { %14226 = vmatprep.subr.bf16.mxu0 %v17401_v43  ;;  %14554 = vmatprep.subr.bf16.mxu1 %v17403_v44  ;;  %v17481_v43 = vcombine.high %v1444_v35, %v1452_v36  ;;  %v17483_v44 = vcombine.high %v1445_v38, %v1453_v39  ;;  %v1516_v19 = vld [vmem:[%s19514_s9 + $0x2560] sm:$0xff]  ;;  %v1517_v60 = vld [vmem:[%s19514_s9 + $0x2568] sm:$0xff] }
 0x54b   : > { %14256 = vmatprep.mubr.bf16.mxu0 %v19879_v2  ;;  %14584 = vmatprep.mubr.bf16.mxu1 %v19879_v2 }
 0x54d   : > { %14227 = vmatpush1.bf16.msra.mxu0 %v17400_v51  ;;  %14555 = vmatpush1.bf16.msra.mxu1 %v17402_v52  ;;  %v17480_v51 = vcombine.low %v1444_v35, %v1452_v36  ;;  %v17482_v52 = vcombine.low %v1445_v38, %v1453_v39  ;;  %v1524_v35 = vld [vmem:[%s19514_s9 + $0x25a0] sm:$0xff]  ;;  %v1525_v38 = vld [vmem:[%s19514_s9 + $0x25a8] sm:$0xff] }
 0x54e   : > { %14228 = vmatprep.subr.bf16.mxu0 %v17417_v53  ;;  %14556 = vmatprep.subr.bf16.mxu1 %v17419_v55  ;;  %v17497_v53 = vcombine.high %v1460_v26, %v1468_v45  ;;  %v17499_v55 = vcombine.high %v1461_v48, %v1469_v49  ;;  %v1532_v36 = vld [vmem:[%s19514_s9 + $0x25e0] sm:$0xff]  ;;  %v1533_v39 = vld [vmem:[%s19514_s9 + $0x25e8] sm:$0xff] }
 0x551   : > { %14229 = vmatpush1.bf16.msra.mxu0 %v17416_v0  ;;  %14557 = vmatpush1.bf16.msra.mxu1 %v17418_v1  ;;  %v17496_v0 = vcombine.low %v1460_v26, %v1468_v45  ;;  %v17498_v1 = vcombine.low %v1461_v48, %v1469_v49  ;;  %v1540_v26 = vld [vmem:[%s19514_s9 + $0x2620] sm:$0xff]  ;;  %v1541_v48 = vld [vmem:[%s19514_s9 + $0x2628] sm:$0xff] }
 0x552   : > { %14230 = vmatprep.subr.bf16.mxu0 %v17433_v5  ;;  %14558 = vmatprep.subr.bf16.mxu1 %v17435_v6  ;;  %v17513_v5 = vcombine.high %v1476_v20, %v1484_v57  ;;  %v17515_v6 = vcombine.high %v1477_v61, %v1485_v63  ;;  %v1548_v45 = vld [vmem:[%s19514_s9 + $0x2660] sm:$0xff]  ;;  %v1549_v49 = vld [vmem:[%s19514_s9 + $0x2668] sm:$0xff] }
 0x555   : > { %14231 = vmatpush1.bf16.msra.mxu0 %v17432_v11  ;;  %14559 = vmatpush1.bf16.msra.mxu1 %v17434_v12  ;;  %v17512_v11 = vcombine.low %v1476_v20, %v1484_v57  ;;  %v17514_v12 = vcombine.low %v1477_v61, %v1485_v63  ;;  %v1556_v20 = vld [vmem:[%s19514_s9 + $0x26a0] sm:$0xff]  ;;  %v1557_v61 = vld [vmem:[%s19514_s9 + $0x26a8] sm:$0xff] }
 0x556   : > { %14232 = vmatprep.subr.bf16.mxu0 %v17449_v14  ;;  %14560 = vmatprep.subr.bf16.mxu1 %v17451_v15  ;;  %v17529_v14 = vcombine.high %v1492_v8, %v1500_v9  ;;  %v17531_v15 = vcombine.high %v1493_v25, %v1501_v10  ;;  %v1564_v57 = vld [vmem:[%s19514_s9 + $0x26e0] sm:$0xff]  ;;  %v1565_v63 = vld [vmem:[%s19514_s9 + $0x26e8] sm:$0xff] }
 0x559   : > { %14233 = vmatpush1.bf16.msra.mxu0 %v17448_v27  ;;  %14561 = vmatpush1.bf16.msra.mxu1 %v17450_v29  ;;  %v17528_v27 = vcombine.low %v1492_v8, %v1500_v9  ;;  %v17530_v29 = vcombine.low %v1493_v25, %v1501_v10  ;;  %v1572_v8 = vld [vmem:[%s19514_s9 + $0x2720] sm:$0xff]  ;;  %v1573_v25 = vld [vmem:[%s19514_s9 + $0x2728] sm:$0xff] }
 0x55a   : > { %14234 = vmatprep.subr.bf16.mxu0 %v17465_v16  ;;  %14562 = vmatprep.subr.bf16.mxu1 %v17467_v33  ;;  %v17545_v16 = vcombine.high %v1508_v18, %v1516_v19  ;;  %v17547_v33 = vcombine.high %v1509_v21, %v1517_v60  ;;  %v1580_v9 = vld [vmem:[%s19514_s9 + $0x2760] sm:$0xff]  ;;  %v1581_v10 = vld [vmem:[%s19514_s9 + $0x2768] sm:$0xff] }
 0x55d   : > { %14235 = vmatpush1.bf16.msra.mxu0 %v17464_v41  ;;  %14563 = vmatpush1.bf16.msra.mxu1 %v17466_v42  ;;  %v17544_v41 = vcombine.low %v1508_v18, %v1516_v19  ;;  %v17546_v42 = vcombine.low %v1509_v21, %v1517_v60  ;;  %v1588_v18 = vld [vmem:[%s19514_s9 + $0x27a0] sm:$0xff]  ;;  %v1589_v21 = vld [vmem:[%s19514_s9 + $0x27a8] sm:$0xff] }
 0x55e   : > { %14236 = vmatprep.subr.bf16.mxu0 %v17481_v43  ;;  %14564 = vmatprep.subr.bf16.mxu1 %v17483_v44  ;;  %v17561_v43 = vcombine.high %v1524_v35, %v1532_v36  ;;  %v17563_v44 = vcombine.high %v1525_v38, %v1533_v39  ;;  %v1596_v19 = vld [vmem:[%s19514_s9 + $0x27e0] sm:$0xff]  ;;  %v1597_v60 = vld [vmem:[%s19514_s9 + $0x27e8] sm:$0xff] }
 0x561   : > { %14237 = vmatpush1.bf16.msra.mxu0 %v17480_v51  ;;  %14565 = vmatpush1.bf16.msra.mxu1 %v17482_v52  ;;  %v17560_v51 = vcombine.low %v1524_v35, %v1532_v36  ;;  %v17562_v52 = vcombine.low %v1525_v38, %v1533_v39  ;;  %v1604_v35 = vld [vmem:[%s19514_s9 + $0x2820] sm:$0xff]  ;;  %v1605_v38 = vld [vmem:[%s19514_s9 + $0x2828] sm:$0xff] }
 0x562   : > { %14238 = vmatprep.subr.bf16.mxu0 %v17497_v53  ;;  %14566 = vmatprep.subr.bf16.mxu1 %v17499_v55  ;;  %v17577_v53 = vcombine.high %v1540_v26, %v1548_v45  ;;  %v17579_v55 = vcombine.high %v1541_v48, %v1549_v49  ;;  %v1612_v36 = vld [vmem:[%s19514_s9 + $0x2860] sm:$0xff]  ;;  %v1613_v39 = vld [vmem:[%s19514_s9 + $0x2868] sm:$0xff] }
 0x565   : > { %14239 = vmatpush1.bf16.msra.mxu0 %v17496_v0  ;;  %14567 = vmatpush1.bf16.msra.mxu1 %v17498_v1  ;;  %v17576_v0 = vcombine.low %v1540_v26, %v1548_v45  ;;  %v17578_v1 = vcombine.low %v1541_v48, %v1549_v49  ;;  %v1620_v26 = vld [vmem:[%s19514_s9 + $0x28a0] sm:$0xff]  ;;  %v1621_v48 = vld [vmem:[%s19514_s9 + $0x28a8] sm:$0xff] }
 0x566   : > { %14240 = vmatprep.subr.bf16.mxu0 %v17513_v5  ;;  %14568 = vmatprep.subr.bf16.mxu1 %v17515_v6  ;;  %v17593_v5 = vcombine.high %v1556_v20, %v1564_v57  ;;  %v17595_v6 = vcombine.high %v1557_v61, %v1565_v63  ;;  %v1628_v45 = vld [vmem:[%s19514_s9 + $0x28e0] sm:$0xff]  ;;  %v1629_v49 = vld [vmem:[%s19514_s9 + $0x28e8] sm:$0xff] }
 0x569   : > { %14241 = vmatpush1.bf16.msra.mxu0 %v17512_v11  ;;  %14569 = vmatpush1.bf16.msra.mxu1 %v17514_v12  ;;  %v17592_v11 = vcombine.low %v1556_v20, %v1564_v57  ;;  %v17594_v12 = vcombine.low %v1557_v61, %v1565_v63  ;;  %v1636_v20 = vld [vmem:[%s19514_s9 + $0x2920] sm:$0xff]  ;;  %v1637_v61 = vld [vmem:[%s19514_s9 + $0x2928] sm:$0xff] }
 0x56a   : > { %14242 = vmatprep.subr.bf16.mxu0 %v17529_v14  ;;  %14570 = vmatprep.subr.bf16.mxu1 %v17531_v15  ;;  %v17609_v14 = vcombine.high %v1572_v8, %v1580_v9  ;;  %v17611_v15 = vcombine.high %v1573_v25, %v1581_v10  ;;  %v1644_v57 = vld [vmem:[%s19514_s9 + $0x2960] sm:$0xff]  ;;  %v1645_v63 = vld [vmem:[%s19514_s9 + $0x2968] sm:$0xff] }
 0x56d   : > { %14243 = vmatpush1.bf16.msra.mxu0 %v17528_v27  ;;  %14571 = vmatpush1.bf16.msra.mxu1 %v17530_v29  ;;  %v17608_v27 = vcombine.low %v1572_v8, %v1580_v9  ;;  %v17610_v29 = vcombine.low %v1573_v25, %v1581_v10  ;;  %v1652_v8 = vld [vmem:[%s19514_s9 + $0x29a0] sm:$0xff]  ;;  %v1653_v25 = vld [vmem:[%s19514_s9 + $0x29a8] sm:$0xff] }
 0x56e   : > { %14244 = vmatprep.subr.bf16.mxu0 %v17545_v16  ;;  %14572 = vmatprep.subr.bf16.mxu1 %v17547_v33  ;;  %v17625_v16 = vcombine.high %v1588_v18, %v1596_v19  ;;  %v17627_v33 = vcombine.high %v1589_v21, %v1597_v60  ;;  %v1660_v9 = vld [vmem:[%s19514_s9 + $0x29e0] sm:$0xff]  ;;  %v1661_v10 = vld [vmem:[%s19514_s9 + $0x29e8] sm:$0xff] }
 0x571   : > { %14245 = vmatpush1.bf16.msra.mxu0 %v17544_v41  ;;  %14573 = vmatpush1.bf16.msra.mxu1 %v17546_v42  ;;  %v17624_v41 = vcombine.low %v1588_v18, %v1596_v19  ;;  %v17626_v42 = vcombine.low %v1589_v21, %v1597_v60  ;;  %v1668_v18 = vld [vmem:[%s19514_s9 + $0x2a20] sm:$0xff]  ;;  %v1669_v21 = vld [vmem:[%s19514_s9 + $0x2a28] sm:$0xff] }
 0x572   : > { %14246 = vmatprep.subr.bf16.mxu0 %v17561_v43  ;;  %14574 = vmatprep.subr.bf16.mxu1 %v17563_v44  ;;  %v17641_v43 = vcombine.high %v1604_v35, %v1612_v36  ;;  %v17643_v44 = vcombine.high %v1605_v38, %v1613_v39  ;;  %v1676_v19 = vld [vmem:[%s19514_s9 + $0x2a60] sm:$0xff]  ;;  %v1677_v60 = vld [vmem:[%s19514_s9 + $0x2a68] sm:$0xff] }
 0x575   : > { %14247 = vmatpush1.bf16.msra.mxu0 %v17560_v51  ;;  %14575 = vmatpush1.bf16.msra.mxu1 %v17562_v52  ;;  %v17640_v51 = vcombine.low %v1604_v35, %v1612_v36  ;;  %v17642_v52 = vcombine.low %v1605_v38, %v1613_v39  ;;  %v1684_v35 = vld [vmem:[%s19514_s9 + $0x2aa0] sm:$0xff]  ;;  %v1685_v38 = vld [vmem:[%s19514_s9 + $0x2aa8] sm:$0xff] }
 0x576   : > { %14248 = vmatprep.subr.bf16.mxu0 %v17577_v53  ;;  %14576 = vmatprep.subr.bf16.mxu1 %v17579_v55  ;;  %v17657_v53 = vcombine.high %v1620_v26, %v1628_v45  ;;  %v17659_v55 = vcombine.high %v1621_v48, %v1629_v49  ;;  %v1692_v36 = vld [vmem:[%s19514_s9 + $0x2ae0] sm:$0xff]  ;;  %v1693_v39 = vld [vmem:[%s19514_s9 + $0x2ae8] sm:$0xff] }
 0x579   : > { %14249 = vmatpush1.bf16.msra.mxu0 %v17576_v0  ;;  %14577 = vmatpush1.bf16.msra.mxu1 %v17578_v1  ;;  %v17656_v0 = vcombine.low %v1620_v26, %v1628_v45  ;;  %v17658_v1 = vcombine.low %v1621_v48, %v1629_v49  ;;  %v1700_v26 = vld [vmem:[%s19514_s9 + $0x2b20] sm:$0xff]  ;;  %v1701_v48 = vld [vmem:[%s19514_s9 + $0x2b28] sm:$0xff] }
 0x57a   : > { %14250 = vmatprep.subr.bf16.mxu0 %v17593_v5  ;;  %14578 = vmatprep.subr.bf16.mxu1 %v17595_v6  ;;  %v17673_v5 = vcombine.high %v1636_v20, %v1644_v57  ;;  %v17675_v6 = vcombine.high %v1637_v61, %v1645_v63  ;;  %v1708_v45 = vld [vmem:[%s19514_s9 + $0x2b60] sm:$0xff]  ;;  %v1709_v49 = vld [vmem:[%s19514_s9 + $0x2b68] sm:$0xff] }
 0x57d   : > { %14251 = vmatpush1.bf16.msra.mxu0 %v17592_v11  ;;  %14579 = vmatpush1.bf16.msra.mxu1 %v17594_v12  ;;  %v17672_v11 = vcombine.low %v1636_v20, %v1644_v57  ;;  %v17674_v12 = vcombine.low %v1637_v61, %v1645_v63  ;;  %v1716_v20 = vld [vmem:[%s19514_s9 + $0x2ba0] sm:$0xff]  ;;  %v1717_v61 = vld [vmem:[%s19514_s9 + $0x2ba8] sm:$0xff] }
 0x57e   : > { %14252 = vmatprep.subr.bf16.mxu0 %v17609_v14  ;;  %14580 = vmatprep.subr.bf16.mxu1 %v17611_v15  ;;  %v17689_v14 = vcombine.high %v1652_v8, %v1660_v9  ;;  %v17691_v15 = vcombine.high %v1653_v25, %v1661_v10  ;;  %v1724_v57 = vld [vmem:[%s19514_s9 + $0x2be0] sm:$0xff]  ;;  %v1725_v63 = vld [vmem:[%s19514_s9 + $0x2be8] sm:$0xff] }
 0x581   : > { %14253 = vmatpush1.bf16.msra.mxu0 %v17608_v27  ;;  %14581 = vmatpush1.bf16.msra.mxu1 %v17610_v29  ;;  %v17688_v27 = vcombine.low %v1652_v8, %v1660_v9  ;;  %v17690_v29 = vcombine.low %v1653_v25, %v1661_v10  ;;  %v1732_v8 = vld [vmem:[%s19514_s9 + $0x2c20] sm:$0xff]  ;;  %v1733_v25 = vld [vmem:[%s19514_s9 + $0x2c28] sm:$0xff] }
 0x582   : > { %14254 = vmatprep.subr.bf16.mxu0 %v17625_v16  ;;  %14582 = vmatprep.subr.bf16.mxu1 %v17627_v33  ;;  %v17705_v16 = vcombine.high %v1668_v18, %v1676_v19  ;;  %v17707_v33 = vcombine.high %v1669_v21, %v1677_v60  ;;  %v1740_v9 = vld [vmem:[%s19514_s9 + $0x2c60] sm:$0xff]  ;;  %v1741_v10 = vld [vmem:[%s19514_s9 + $0x2c68] sm:$0xff] }
 0x585   : > { %14255 = vmatpush1.bf16.msra.mxu0 %v17624_v41  ;;  %14583 = vmatpush1.bf16.msra.mxu1 %v17626_v42  ;;  %v17704_v41 = vcombine.low %v1668_v18, %v1676_v19  ;;  %v17706_v42 = vcombine.low %v1669_v21, %v1677_v60  ;;  %v1748_v18 = vld [vmem:[%s19514_s9 + $0x2ca0] sm:$0xff]  ;;  %v1749_v21 = vld [vmem:[%s19514_s9 + $0x2ca8] sm:$0xff] }
 0x586   : > { %14265 = vmatprep.subr.bf16.mxu0 %v17641_v43  ;;  %14593 = vmatprep.subr.bf16.mxu1 %v17643_v44  ;;  %v17721_v43 = vcombine.high %v1684_v35, %v1692_v36  ;;  %v17723_v44 = vcombine.high %v1685_v38, %v1693_v39  ;;  %v1756_v19 = vld [vmem:[%s19514_s9 + $0x2ce0] sm:$0xff]  ;;  %v1757_v60 = vld [vmem:[%s19514_s9 + $0x2ce8] sm:$0xff] }
 0x588   : > { %14257 = vmatmul.mubr.bf16.vlgmr.msra.gmra.mrb[8].mxu0 %v19947_v17  ;;  %14585 = vmatmul.mubr.bf16.vlgmr.msra.gmra.mrb[8].mxu1 %v19947_v17 }
 0x589   : > { %14266 = vmatpush1.bf16.msra.mxu0 %v17640_v51  ;;  %14594 = vmatpush1.bf16.msra.mxu1 %v17642_v52  ;;  %v17720_v51 = vcombine.low %v1684_v35, %v1692_v36  ;;  %v17722_v52 = vcombine.low %v1685_v38, %v1693_v39  ;;  %v1764_v35 = vld [vmem:[%s19514_s9 + $0x2d20] sm:$0xff]  ;;  %v1765_v38 = vld [vmem:[%s19514_s9 + $0x2d28] sm:$0xff] }
 0x58a   : > { %14267 = vmatprep.subr.bf16.mxu0 %v17657_v53  ;;  %14595 = vmatprep.subr.bf16.mxu1 %v17659_v55  ;;  %v17737_v53 = vcombine.high %v1700_v26, %v1708_v45  ;;  %v17739_v55 = vcombine.high %v1701_v48, %v1709_v49  ;;  %v1772_v36 = vld [vmem:[%s19514_s9 + $0x2d60] sm:$0xff]  ;;  %v1773_v39 = vld [vmem:[%s19514_s9 + $0x2d68] sm:$0xff] }
 0x58b   : > { %14297 = vmatprep.mubr.bf16.mxu0 %v19960_v28  ;;  %14625 = vmatprep.mubr.bf16.mxu1 %v19960_v28 }
 0x58d   : > { %14268 = vmatpush1.bf16.msra.mxu0 %v17656_v0  ;;  %14596 = vmatpush1.bf16.msra.mxu1 %v17658_v1  ;;  %v17736_v0 = vcombine.low %v1700_v26, %v1708_v45  ;;  %v17738_v1 = vcombine.low %v1701_v48, %v1709_v49  ;;  %v1780_v26 = vld [vmem:[%s19514_s9 + $0x2da0] sm:$0xff]  ;;  %v1781_v48 = vld [vmem:[%s19514_s9 + $0x2da8] sm:$0xff] }
 0x58e   : > { %14269 = vmatprep.subr.bf16.mxu0 %v17673_v5  ;;  %14597 = vmatprep.subr.bf16.mxu1 %v17675_v6  ;;  %v17753_v5 = vcombine.high %v1716_v20, %v1724_v57  ;;  %v17755_v6 = vcombine.high %v1717_v61, %v1725_v63  ;;  %v1788_v45 = vld [vmem:[%s19514_s9 + $0x2de0] sm:$0xff]  ;;  %v1789_v49 = vld [vmem:[%s19514_s9 + $0x2de8] sm:$0xff] }
 0x591   : > { %14270 = vmatpush1.bf16.msra.mxu0 %v17672_v11  ;;  %14598 = vmatpush1.bf16.msra.mxu1 %v17674_v12  ;;  %v17752_v11 = vcombine.low %v1716_v20, %v1724_v57  ;;  %v17754_v12 = vcombine.low %v1717_v61, %v1725_v63  ;;  %v1796_v20 = vld [vmem:[%s19514_s9 + $0x2e20] sm:$0xff]  ;;  %v1797_v61 = vld [vmem:[%s19514_s9 + $0x2e28] sm:$0xff] }
 0x592   : > { %14271 = vmatprep.subr.bf16.mxu0 %v17689_v14  ;;  %14599 = vmatprep.subr.bf16.mxu1 %v17691_v15  ;;  %v17769_v14 = vcombine.high %v1732_v8, %v1740_v9  ;;  %v17771_v15 = vcombine.high %v1733_v25, %v1741_v10  ;;  %v1804_v57 = vld [vmem:[%s19514_s9 + $0x2e60] sm:$0xff]  ;;  %v1805_v63 = vld [vmem:[%s19514_s9 + $0x2e68] sm:$0xff] }
 0x595   : > { %14272 = vmatpush1.bf16.msra.mxu0 %v17688_v27  ;;  %14600 = vmatpush1.bf16.msra.mxu1 %v17690_v29  ;;  %v17768_v27 = vcombine.low %v1732_v8, %v1740_v9  ;;  %v17770_v29 = vcombine.low %v1733_v25, %v1741_v10  ;;  %v1812_v8 = vld [vmem:[%s19514_s9 + $0x2ea0] sm:$0xff]  ;;  %v1813_v25 = vld [vmem:[%s19514_s9 + $0x2ea8] sm:$0xff] }
 0x596   : > { %14273 = vmatprep.subr.bf16.mxu0 %v17705_v16  ;;  %14601 = vmatprep.subr.bf16.mxu1 %v17707_v33  ;;  %v17785_v16 = vcombine.high %v1748_v18, %v1756_v19  ;;  %v17787_v33 = vcombine.high %v1749_v21, %v1757_v60  ;;  %v1820_v9 = vld [vmem:[%s19514_s9 + $0x2ee0] sm:$0xff]  ;;  %v1821_v10 = vld [vmem:[%s19514_s9 + $0x2ee8] sm:$0xff] }
 0x599   : > { %14274 = vmatpush1.bf16.msra.mxu0 %v17704_v41  ;;  %14602 = vmatpush1.bf16.msra.mxu1 %v17706_v42  ;;  %v17784_v41 = vcombine.low %v1748_v18, %v1756_v19  ;;  %v17786_v42 = vcombine.low %v1749_v21, %v1757_v60  ;;  %v1828_v18 = vld [vmem:[%s19514_s9 + $0x2f20] sm:$0xff]  ;;  %v1829_v21 = vld [vmem:[%s19514_s9 + $0x2f28] sm:$0xff] }
 0x59a   : > { %14275 = vmatprep.subr.bf16.mxu0 %v17721_v43  ;;  %14603 = vmatprep.subr.bf16.mxu1 %v17723_v44  ;;  %v17801_v43 = vcombine.high %v1764_v35, %v1772_v36  ;;  %v17803_v44 = vcombine.high %v1765_v38, %v1773_v39  ;;  %v1836_v19 = vld [vmem:[%s19514_s9 + $0x2f60] sm:$0xff]  ;;  %v1837_v60 = vld [vmem:[%s19514_s9 + $0x2f68] sm:$0xff] }
 0x59d   : > { %14276 = vmatpush1.bf16.msra.mxu0 %v17720_v51  ;;  %14604 = vmatpush1.bf16.msra.mxu1 %v17722_v52  ;;  %v17800_v51 = vcombine.low %v1764_v35, %v1772_v36  ;;  %v17802_v52 = vcombine.low %v1765_v38, %v1773_v39  ;;  %v1844_v35 = vld [vmem:[%s19514_s9 + $0x2fa0] sm:$0xff]  ;;  %v1845_v38 = vld [vmem:[%s19514_s9 + $0x2fa8] sm:$0xff] }
 0x59e   : > { %14277 = vmatprep.subr.bf16.mxu0 %v17737_v53  ;;  %14605 = vmatprep.subr.bf16.mxu1 %v17739_v55  ;;  %v17817_v53 = vcombine.high %v1780_v26, %v1788_v45  ;;  %v17819_v55 = vcombine.high %v1781_v48, %v1789_v49  ;;  %v1852_v36 = vld [vmem:[%s19514_s9 + $0x2fe0] sm:$0xff]  ;;  %v1853_v39 = vld [vmem:[%s19514_s9 + $0x2fe8] sm:$0xff] }
 0x5a1   : > { %14278 = vmatpush1.bf16.msra.mxu0 %v17736_v0  ;;  %14606 = vmatpush1.bf16.msra.mxu1 %v17738_v1  ;;  %v17816_v0 = vcombine.low %v1780_v26, %v1788_v45  ;;  %v17818_v1 = vcombine.low %v1781_v48, %v1789_v49  ;;  %v1860_v26 = vld [vmem:[%s19514_s9 + $0x3020] sm:$0xff]  ;;  %v1861_v48 = vld [vmem:[%s19514_s9 + $0x3028] sm:$0xff] }
 0x5a2   : > { %14279 = vmatprep.subr.bf16.mxu0 %v17753_v5  ;;  %14607 = vmatprep.subr.bf16.mxu1 %v17755_v6  ;;  %v17833_v5 = vcombine.high %v1796_v20, %v1804_v57  ;;  %v17835_v6 = vcombine.high %v1797_v61, %v1805_v63  ;;  %v1868_v45 = vld [vmem:[%s19514_s9 + $0x3060] sm:$0xff]  ;;  %v1869_v49 = vld [vmem:[%s19514_s9 + $0x3068] sm:$0xff] }
 0x5a5   : > { %14280 = vmatpush1.bf16.msra.mxu0 %v17752_v11  ;;  %14608 = vmatpush1.bf16.msra.mxu1 %v17754_v12  ;;  %v17832_v11 = vcombine.low %v1796_v20, %v1804_v57  ;;  %v17834_v12 = vcombine.low %v1797_v61, %v1805_v63  ;;  %v1876_v20 = vld [vmem:[%s19514_s9 + $0x30a0] sm:$0xff]  ;;  %v1877_v61 = vld [vmem:[%s19514_s9 + $0x30a8] sm:$0xff] }
 0x5a6   : > { %14281 = vmatprep.subr.bf16.mxu0 %v17769_v14  ;;  %14609 = vmatprep.subr.bf16.mxu1 %v17771_v15  ;;  %v17849_v14 = vcombine.high %v1812_v8, %v1820_v9  ;;  %v17851_v15 = vcombine.high %v1813_v25, %v1821_v10  ;;  %v1884_v57 = vld [vmem:[%s19514_s9 + $0x30e0] sm:$0xff]  ;;  %v1885_v63 = vld [vmem:[%s19514_s9 + $0x30e8] sm:$0xff] }
 0x5a9   : > { %14282 = vmatpush1.bf16.msra.mxu0 %v17768_v27  ;;  %14610 = vmatpush1.bf16.msra.mxu1 %v17770_v29  ;;  %v17848_v27 = vcombine.low %v1812_v8, %v1820_v9  ;;  %v17850_v29 = vcombine.low %v1813_v25, %v1821_v10  ;;  %v1892_v8 = vld [vmem:[%s19514_s9 + $0x3120] sm:$0xff]  ;;  %v1893_v25 = vld [vmem:[%s19514_s9 + $0x3128] sm:$0xff] }
 0x5aa   : > { %14283 = vmatprep.subr.bf16.mxu0 %v17785_v16  ;;  %14611 = vmatprep.subr.bf16.mxu1 %v17787_v33  ;;  %v17865_v16 = vcombine.high %v1828_v18, %v1836_v19  ;;  %v17867_v33 = vcombine.high %v1829_v21, %v1837_v60  ;;  %v1900_v9 = vld [vmem:[%s19514_s9 + $0x3160] sm:$0xff]  ;;  %v1901_v10 = vld [vmem:[%s19514_s9 + $0x3168] sm:$0xff] }
 0x5ad   : > { %14284 = vmatpush1.bf16.msra.mxu0 %v17784_v41  ;;  %14612 = vmatpush1.bf16.msra.mxu1 %v17786_v42  ;;  %v17864_v41 = vcombine.low %v1828_v18, %v1836_v19  ;;  %v17866_v42 = vcombine.low %v1829_v21, %v1837_v60  ;;  %v1908_v18 = vld [vmem:[%s19514_s9 + $0x31a0] sm:$0xff]  ;;  %v1909_v21 = vld [vmem:[%s19514_s9 + $0x31a8] sm:$0xff] }
 0x5ae   : > { %14285 = vmatprep.subr.bf16.mxu0 %v17801_v43  ;;  %14613 = vmatprep.subr.bf16.mxu1 %v17803_v44  ;;  %v17881_v43 = vcombine.high %v1844_v35, %v1852_v36  ;;  %v17883_v44 = vcombine.high %v1845_v38, %v1853_v39  ;;  %v1916_v19 = vld [vmem:[%s19514_s9 + $0x31e0] sm:$0xff]  ;;  %v1917_v60 = vld [vmem:[%s19514_s9 + $0x31e8] sm:$0xff] }
 0x5b1   : > { %14286 = vmatpush1.bf16.msra.mxu0 %v17800_v51  ;;  %14614 = vmatpush1.bf16.msra.mxu1 %v17802_v52  ;;  %v17880_v51 = vcombine.low %v1844_v35, %v1852_v36  ;;  %v17882_v52 = vcombine.low %v1845_v38, %v1853_v39  ;;  %v1924_v35 = vld [vmem:[%s19514_s9 + $0x3220] sm:$0xff]  ;;  %v1925_v38 = vld [vmem:[%s19514_s9 + $0x3228] sm:$0xff] }
 0x5b2   : > { %14287 = vmatprep.subr.bf16.mxu0 %v17817_v53  ;;  %14615 = vmatprep.subr.bf16.mxu1 %v17819_v55  ;;  %v17897_v53 = vcombine.high %v1860_v26, %v1868_v45  ;;  %v17899_v55 = vcombine.high %v1861_v48, %v1869_v49  ;;  %v1932_v36 = vld [vmem:[%s19514_s9 + $0x3260] sm:$0xff]  ;;  %v1933_v39 = vld [vmem:[%s19514_s9 + $0x3268] sm:$0xff] }
 0x5b5   : > { %14288 = vmatpush1.bf16.msra.mxu0 %v17816_v0  ;;  %14616 = vmatpush1.bf16.msra.mxu1 %v17818_v1  ;;  %v17896_v0 = vcombine.low %v1860_v26, %v1868_v45  ;;  %v17898_v1 = vcombine.low %v1861_v48, %v1869_v49  ;;  %v1940_v26 = vld [vmem:[%s19514_s9 + $0x32a0] sm:$0xff]  ;;  %v1941_v48 = vld [vmem:[%s19514_s9 + $0x32a8] sm:$0xff] }
 0x5b6   : > { %14289 = vmatprep.subr.bf16.mxu0 %v17833_v5  ;;  %14617 = vmatprep.subr.bf16.mxu1 %v17835_v6  ;;  %v17913_v5 = vcombine.high %v1876_v20, %v1884_v57  ;;  %v17915_v6 = vcombine.high %v1877_v61, %v1885_v63  ;;  %v1948_v45 = vld [vmem:[%s19514_s9 + $0x32e0] sm:$0xff]  ;;  %v1949_v49 = vld [vmem:[%s19514_s9 + $0x32e8] sm:$0xff] }
 0x5b9   : > { %14290 = vmatpush1.bf16.msra.mxu0 %v17832_v11  ;;  %14618 = vmatpush1.bf16.msra.mxu1 %v17834_v12  ;;  %v17912_v11 = vcombine.low %v1876_v20, %v1884_v57  ;;  %v17914_v12 = vcombine.low %v1877_v61, %v1885_v63  ;;  %v1956_v20 = vld [vmem:[%s19514_s9 + $0x3320] sm:$0xff]  ;;  %v1957_v61 = vld [vmem:[%s19514_s9 + $0x3328] sm:$0xff] }
 0x5ba   : > { %14291 = vmatprep.subr.bf16.mxu0 %v17849_v14  ;;  %14619 = vmatprep.subr.bf16.mxu1 %v17851_v15  ;;  %v17929_v14 = vcombine.high %v1892_v8, %v1900_v9  ;;  %v17931_v15 = vcombine.high %v1893_v25, %v1901_v10  ;;  %v1964_v57 = vld [vmem:[%s19514_s9 + $0x3360] sm:$0xff]  ;;  %v1965_v63 = vld [vmem:[%s19514_s9 + $0x3368] sm:$0xff] }
 0x5bd   : > { %14292 = vmatpush1.bf16.msra.mxu0 %v17848_v27  ;;  %14620 = vmatpush1.bf16.msra.mxu1 %v17850_v29  ;;  %v17928_v27 = vcombine.low %v1892_v8, %v1900_v9  ;;  %v17930_v29 = vcombine.low %v1893_v25, %v1901_v10  ;;  %v1972_v8 = vld [vmem:[%s19514_s9 + $0x33a0] sm:$0xff]  ;;  %v1973_v25 = vld [vmem:[%s19514_s9 + $0x33a8] sm:$0xff] }
 0x5be   : > { %14293 = vmatprep.subr.bf16.mxu0 %v17865_v16  ;;  %14621 = vmatprep.subr.bf16.mxu1 %v17867_v33  ;;  %v17945_v16 = vcombine.high %v1908_v18, %v1916_v19  ;;  %v17947_v33 = vcombine.high %v1909_v21, %v1917_v60  ;;  %v1980_v9 = vld [vmem:[%s19514_s9 + $0x33e0] sm:$0xff]  ;;  %v1981_v10 = vld [vmem:[%s19514_s9 + $0x33e8] sm:$0xff] }
 0x5c1   : > { %14294 = vmatpush1.bf16.msra.mxu0 %v17864_v41  ;;  %14622 = vmatpush1.bf16.msra.mxu1 %v17866_v42  ;;  %v17944_v41 = vcombine.low %v1908_v18, %v1916_v19  ;;  %v17946_v42 = vcombine.low %v1909_v21, %v1917_v60  ;;  %v1988_v18 = vld [vmem:[%s19514_s9 + $0x3420] sm:$0xff]  ;;  %v1989_v21 = vld [vmem:[%s19514_s9 + $0x3428] sm:$0xff] }
 0x5c2   : > { %14295 = vmatprep.subr.bf16.mxu0 %v17881_v43  ;;  %14623 = vmatprep.subr.bf16.mxu1 %v17883_v44  ;;  %v17961_v43 = vcombine.high %v1924_v35, %v1932_v36  ;;  %v17963_v44 = vcombine.high %v1925_v38, %v1933_v39  ;;  %v1996_v19 = vld [vmem:[%s19514_s9 + $0x3460] sm:$0xff]  ;;  %v1997_v60 = vld [vmem:[%s19514_s9 + $0x3468] sm:$0xff] }
 0x5c5   : > { %14296 = vmatpush1.bf16.msra.mxu0 %v17880_v51  ;;  %14624 = vmatpush1.bf16.msra.mxu1 %v17882_v52  ;;  %v17960_v51 = vcombine.low %v1924_v35, %v1932_v36  ;;  %v17962_v52 = vcombine.low %v1925_v38, %v1933_v39  ;;  %v2004_v35 = vld [vmem:[%s19514_s9 + $0x34a0] sm:$0xff]  ;;  %v2005_v38 = vld [vmem:[%s19514_s9 + $0x34a8] sm:$0xff] }
 0x5c6   : > { %14306 = vmatprep.subr.bf16.mxu0 %v17897_v53  ;;  %14634 = vmatprep.subr.bf16.mxu1 %v17899_v55  ;;  %v17977_v53 = vcombine.high %v1940_v26, %v1948_v45  ;;  %v17979_v55 = vcombine.high %v1941_v48, %v1949_v49  ;;  %v2012_v36 = vld [vmem:[%s19514_s9 + $0x34e0] sm:$0xff]  ;;  %v2013_v39 = vld [vmem:[%s19514_s9 + $0x34e8] sm:$0xff] }
 0x5c8   : > { %14298 = vmatmul.mubr.bf16.vlgmr.msra.gmra.mrb[8].mxu0 %v20028_v47  ;;  %14626 = vmatmul.mubr.bf16.vlgmr.msra.gmra.mrb[8].mxu1 %v20028_v47 }
 0x5c9   : > { %14307 = vmatpush1.bf16.msra.mxu0 %v17896_v0  ;;  %14635 = vmatpush1.bf16.msra.mxu1 %v17898_v1  ;;  %v17976_v0 = vcombine.low %v1940_v26, %v1948_v45  ;;  %v17978_v1 = vcombine.low %v1941_v48, %v1949_v49  ;;  %v2020_v26 = vld [vmem:[%s19514_s9 + $0x3520] sm:$0xff]  ;;  %v2021_v48 = vld [vmem:[%s19514_s9 + $0x3528] sm:$0xff] }
 0x5ca   : > { %14308 = vmatprep.subr.bf16.mxu0 %v17913_v5  ;;  %14636 = vmatprep.subr.bf16.mxu1 %v17915_v6  ;;  %v17993_v5 = vcombine.high %v1956_v20, %v1964_v57  ;;  %v17995_v6 = vcombine.high %v1957_v61, %v1965_v63  ;;  %v2028_v45 = vld [vmem:[%s19514_s9 + $0x3560] sm:$0xff]  ;;  %v2029_v49 = vld [vmem:[%s19514_s9 + $0x3568] sm:$0xff] }
 0x5cb   : > { %14338 = vmatprep.mubr.bf16.mxu0 %v20041_v59  ;;  %14666 = vmatprep.mubr.bf16.mxu1 %v20041_v59 }
 0x5cd   : > { %14309 = vmatpush1.bf16.msra.mxu0 %v17912_v11  ;;  %14637 = vmatpush1.bf16.msra.mxu1 %v17914_v12  ;;  %v17992_v11 = vcombine.low %v1956_v20, %v1964_v57  ;;  %v17994_v12 = vcombine.low %v1957_v61, %v1965_v63  ;;  %v2036_v20 = vld [vmem:[%s19514_s9 + $0x35a0] sm:$0xff]  ;;  %v2037_v61 = vld [vmem:[%s19514_s9 + $0x35a8] sm:$0xff] }
 0x5ce   : > { %14310 = vmatprep.subr.bf16.mxu0 %v17929_v14  ;;  %14638 = vmatprep.subr.bf16.mxu1 %v17931_v15  ;;  %v18009_v14 = vcombine.high %v1972_v8, %v1980_v9  ;;  %v18011_v15 = vcombine.high %v1973_v25, %v1981_v10  ;;  %v2044_v57 = vld [vmem:[%s19514_s9 + $0x35e0] sm:$0xff]  ;;  %v2045_v63 = vld [vmem:[%s19514_s9 + $0x35e8] sm:$0xff] }
 0x5d1   : > { %14311 = vmatpush1.bf16.msra.mxu0 %v17928_v27  ;;  %14639 = vmatpush1.bf16.msra.mxu1 %v17930_v29  ;;  %v18008_v27 = vcombine.low %v1972_v8, %v1980_v9  ;;  %v18010_v29 = vcombine.low %v1973_v25, %v1981_v10  ;;  %v2052_v8 = vld [vmem:[%s19514_s9 + $0x3620] sm:$0xff]  ;;  %v2053_v25 = vld [vmem:[%s19514_s9 + $0x3628] sm:$0xff] }
 0x5d2   : > { %14312 = vmatprep.subr.bf16.mxu0 %v17945_v16  ;;  %14640 = vmatprep.subr.bf16.mxu1 %v17947_v33  ;;  %v18025_v16 = vcombine.high %v1988_v18, %v1996_v19  ;;  %v18027_v33 = vcombine.high %v1989_v21, %v1997_v60  ;;  %v2060_v9 = vld [vmem:[%s19514_s9 + $0x3660] sm:$0xff]  ;;  %v2061_v10 = vld [vmem:[%s19514_s9 + $0x3668] sm:$0xff] }
 0x5d5   : > { %14313 = vmatpush1.bf16.msra.mxu0 %v17944_v41  ;;  %14641 = vmatpush1.bf16.msra.mxu1 %v17946_v42  ;;  %v18024_v41 = vcombine.low %v1988_v18, %v1996_v19  ;;  %v18026_v42 = vcombine.low %v1989_v21, %v1997_v60  ;;  %v2068_v18 = vld [vmem:[%s19514_s9 + $0x36a0] sm:$0xff]  ;;  %v2069_v21 = vld [vmem:[%s19514_s9 + $0x36a8] sm:$0xff] }
 0x5d6   : > { %14314 = vmatprep.subr.bf16.mxu0 %v17961_v43  ;;  %14642 = vmatprep.subr.bf16.mxu1 %v17963_v44  ;;  %v18041_v43 = vcombine.high %v2004_v35, %v2012_v36  ;;  %v18043_v44 = vcombine.high %v2005_v38, %v2013_v39  ;;  %v2076_v19 = vld [vmem:[%s19514_s9 + $0x36e0] sm:$0xff]  ;;  %v2077_v60 = vld [vmem:[%s19514_s9 + $0x36e8] sm:$0xff] }
 0x5d9   : > { %14315 = vmatpush1.bf16.msra.mxu0 %v17960_v51  ;;  %14643 = vmatpush1.bf16.msra.mxu1 %v17962_v52  ;;  %v18040_v51 = vcombine.low %v2004_v35, %v2012_v36  ;;  %v18042_v52 = vcombine.low %v2005_v38, %v2013_v39  ;;  %v2084_v35 = vld [vmem:[%s19514_s9 + $0x3720] sm:$0xff]  ;;  %v2085_v38 = vld [vmem:[%s19514_s9 + $0x3728] sm:$0xff] }
 0x5da   : > { %14316 = vmatprep.subr.bf16.mxu0 %v17977_v53  ;;  %14644 = vmatprep.subr.bf16.mxu1 %v17979_v55  ;;  %v18057_v53 = vcombine.high %v2020_v26, %v2028_v45  ;;  %v18059_v55 = vcombine.high %v2021_v48, %v2029_v49  ;;  %v2092_v36 = vld [vmem:[%s19514_s9 + $0x3760] sm:$0xff]  ;;  %v2093_v39 = vld [vmem:[%s19514_s9 + $0x3768] sm:$0xff] }
 0x5dd   : > { %14317 = vmatpush1.bf16.msra.mxu0 %v17976_v0  ;;  %14645 = vmatpush1.bf16.msra.mxu1 %v17978_v1  ;;  %v18056_v0 = vcombine.low %v2020_v26, %v2028_v45  ;;  %v18058_v1 = vcombine.low %v2021_v48, %v2029_v49  ;;  %v2100_v26 = vld [vmem:[%s19514_s9 + $0x37a0] sm:$0xff]  ;;  %v2101_v48 = vld [vmem:[%s19514_s9 + $0x37a8] sm:$0xff] }
 0x5de   : > { %14318 = vmatprep.subr.bf16.mxu0 %v17993_v5  ;;  %14646 = vmatprep.subr.bf16.mxu1 %v17995_v6  ;;  %v18073_v5 = vcombine.high %v2036_v20, %v2044_v57  ;;  %v18075_v6 = vcombine.high %v2037_v61, %v2045_v63  ;;  %v2108_v45 = vld [vmem:[%s19514_s9 + $0x37e0] sm:$0xff]  ;;  %v2109_v49 = vld [vmem:[%s19514_s9 + $0x37e8] sm:$0xff] }
 0x5e1   : > { %14319 = vmatpush1.bf16.msra.mxu0 %v17992_v11  ;;  %14647 = vmatpush1.bf16.msra.mxu1 %v17994_v12  ;;  %v18072_v11 = vcombine.low %v2036_v20, %v2044_v57  ;;  %v18074_v12 = vcombine.low %v2037_v61, %v2045_v63  ;;  %v2116_v20 = vld [vmem:[%s19514_s9 + $0x3820] sm:$0xff]  ;;  %v2117_v61 = vld [vmem:[%s19514_s9 + $0x3828] sm:$0xff] }
 0x5e2   : > { %14320 = vmatprep.subr.bf16.mxu0 %v18009_v14  ;;  %14648 = vmatprep.subr.bf16.mxu1 %v18011_v15  ;;  %v18089_v14 = vcombine.high %v2052_v8, %v2060_v9  ;;  %v18091_v15 = vcombine.high %v2053_v25, %v2061_v10  ;;  %v2124_v57 = vld [vmem:[%s19514_s9 + $0x3860] sm:$0xff]  ;;  %v2125_v63 = vld [vmem:[%s19514_s9 + $0x3868] sm:$0xff] }
 0x5e5   : > { %14321 = vmatpush1.bf16.msra.mxu0 %v18008_v27  ;;  %14649 = vmatpush1.bf16.msra.mxu1 %v18010_v29  ;;  %v18088_v27 = vcombine.low %v2052_v8, %v2060_v9  ;;  %v18090_v29 = vcombine.low %v2053_v25, %v2061_v10  ;;  %v2132_v8 = vld [vmem:[%s19514_s9 + $0x38a0] sm:$0xff]  ;;  %v2133_v25 = vld [vmem:[%s19514_s9 + $0x38a8] sm:$0xff] }
 0x5e6   : > { %14322 = vmatprep.subr.bf16.mxu0 %v18025_v16  ;;  %14650 = vmatprep.subr.bf16.mxu1 %v18027_v33  ;;  %v18105_v16 = vcombine.high %v2068_v18, %v2076_v19  ;;  %v18107_v33 = vcombine.high %v2069_v21, %v2077_v60  ;;  %v2140_v9 = vld [vmem:[%s19514_s9 + $0x38e0] sm:$0xff]  ;;  %v2141_v10 = vld [vmem:[%s19514_s9 + $0x38e8] sm:$0xff] }
 0x5e9   : > { %14323 = vmatpush1.bf16.msra.mxu0 %v18024_v41  ;;  %14651 = vmatpush1.bf16.msra.mxu1 %v18026_v42  ;;  %v18104_v41 = vcombine.low %v2068_v18, %v2076_v19  ;;  %v18106_v42 = vcombine.low %v2069_v21, %v2077_v60  ;;  %v2148_v18 = vld [vmem:[%s19514_s9 + $0x3920] sm:$0xff]  ;;  %v2149_v21 = vld [vmem:[%s19514_s9 + $0x3928] sm:$0xff] }
 0x5ea   : > { %14324 = vmatprep.subr.bf16.mxu0 %v18041_v43  ;;  %14652 = vmatprep.subr.bf16.mxu1 %v18043_v44  ;;  %v18121_v43 = vcombine.high %v2084_v35, %v2092_v36  ;;  %v18123_v44 = vcombine.high %v2085_v38, %v2093_v39  ;;  %v2156_v19 = vld [vmem:[%s19514_s9 + $0x3960] sm:$0xff]  ;;  %v2157_v60 = vld [vmem:[%s19514_s9 + $0x3968] sm:$0xff] }
 0x5ed   : > { %14325 = vmatpush1.bf16.msra.mxu0 %v18040_v51  ;;  %14653 = vmatpush1.bf16.msra.mxu1 %v18042_v52  ;;  %v18120_v51 = vcombine.low %v2084_v35, %v2092_v36  ;;  %v18122_v52 = vcombine.low %v2085_v38, %v2093_v39  ;;  %v2164_v35 = vld [vmem:[%s19514_s9 + $0x39a0] sm:$0xff]  ;;  %v2165_v38 = vld [vmem:[%s19514_s9 + $0x39a8] sm:$0xff] }
 0x5ee   : > { %14326 = vmatprep.subr.bf16.mxu0 %v18057_v53  ;;  %14654 = vmatprep.subr.bf16.mxu1 %v18059_v55  ;;  %v18137_v53 = vcombine.high %v2100_v26, %v2108_v45  ;;  %v18139_v55 = vcombine.high %v2101_v48, %v2109_v49  ;;  %v2172_v36 = vld [vmem:[%s19514_s9 + $0x39e0] sm:$0xff]  ;;  %v2173_v39 = vld [vmem:[%s19514_s9 + $0x39e8] sm:$0xff] }
 0x5f1   : > { %14327 = vmatpush1.bf16.msra.mxu0 %v18056_v0  ;;  %14655 = vmatpush1.bf16.msra.mxu1 %v18058_v1  ;;  %v18136_v0 = vcombine.low %v2100_v26, %v2108_v45  ;;  %v18138_v1 = vcombine.low %v2101_v48, %v2109_v49  ;;  %v2180_v26 = vld [vmem:[%s19514_s9 + $0x3a20] sm:$0xff]  ;;  %v2181_v48 = vld [vmem:[%s19514_s9 + $0x3a28] sm:$0xff] }
 0x5f2   : > { %14328 = vmatprep.subr.bf16.mxu0 %v18073_v5  ;;  %14656 = vmatprep.subr.bf16.mxu1 %v18075_v6  ;;  %v18153_v5 = vcombine.high %v2116_v20, %v2124_v57  ;;  %v18155_v6 = vcombine.high %v2117_v61, %v2125_v63  ;;  %v2188_v45 = vld [vmem:[%s19514_s9 + $0x3a60] sm:$0xff]  ;;  %v2189_v49 = vld [vmem:[%s19514_s9 + $0x3a68] sm:$0xff] }
 0x5f5   : > { %14329 = vmatpush1.bf16.msra.mxu0 %v18072_v11  ;;  %14657 = vmatpush1.bf16.msra.mxu1 %v18074_v12  ;;  %v18152_v11 = vcombine.low %v2116_v20, %v2124_v57  ;;  %v18154_v12 = vcombine.low %v2117_v61, %v2125_v63  ;;  %v2196_v20 = vld [vmem:[%s19514_s9 + $0x3aa0] sm:$0xff]  ;;  %v2197_v61 = vld [vmem:[%s19514_s9 + $0x3aa8] sm:$0xff] }
 0x5f6   : > { %14330 = vmatprep.subr.bf16.mxu0 %v18089_v14  ;;  %14658 = vmatprep.subr.bf16.mxu1 %v18091_v15  ;;  %v18169_v14 = vcombine.high %v2132_v8, %v2140_v9  ;;  %v18171_v15 = vcombine.high %v2133_v25, %v2141_v10  ;;  %v2204_v57 = vld [vmem:[%s19514_s9 + $0x3ae0] sm:$0xff]  ;;  %v2205_v63 = vld [vmem:[%s19514_s9 + $0x3ae8] sm:$0xff] }
 0x5f9   : > { %14331 = vmatpush1.bf16.msra.mxu0 %v18088_v27  ;;  %14659 = vmatpush1.bf16.msra.mxu1 %v18090_v29  ;;  %v18168_v27 = vcombine.low %v2132_v8, %v2140_v9  ;;  %v18170_v29 = vcombine.low %v2133_v25, %v2141_v10  ;;  %v2212_v8 = vld [vmem:[%s19514_s9 + $0x3b20] sm:$0xff]  ;;  %v2213_v25 = vld [vmem:[%s19514_s9 + $0x3b28] sm:$0xff] }
 0x5fa   : > { %14332 = vmatprep.subr.bf16.mxu0 %v18105_v16  ;;  %14660 = vmatprep.subr.bf16.mxu1 %v18107_v33  ;;  %v18185_v16 = vcombine.high %v2148_v18, %v2156_v19  ;;  %v18187_v33 = vcombine.high %v2149_v21, %v2157_v60  ;;  %v2220_v9 = vld [vmem:[%s19514_s9 + $0x3b60] sm:$0xff]  ;;  %v2221_v10 = vld [vmem:[%s19514_s9 + $0x3b68] sm:$0xff] }
 0x5fd   : > { %14333 = vmatpush1.bf16.msra.mxu0 %v18104_v41  ;;  %14661 = vmatpush1.bf16.msra.mxu1 %v18106_v42  ;;  %v18184_v41 = vcombine.low %v2148_v18, %v2156_v19  ;;  %v18186_v42 = vcombine.low %v2149_v21, %v2157_v60  ;;  %v2228_v18 = vld [vmem:[%s19514_s9 + $0x3ba0] sm:$0xff]  ;;  %v2229_v21 = vld [vmem:[%s19514_s9 + $0x3ba8] sm:$0xff] }
 0x5fe   : > { %14334 = vmatprep.subr.bf16.mxu0 %v18121_v43  ;;  %14662 = vmatprep.subr.bf16.mxu1 %v18123_v44  ;;  %v18201_v43 = vcombine.high %v2164_v35, %v2172_v36  ;;  %v18203_v44 = vcombine.high %v2165_v38, %v2173_v39  ;;  %v2236_v19 = vld [vmem:[%s19514_s9 + $0x3be0] sm:$0xff]  ;;  %v2237_v60 = vld [vmem:[%s19514_s9 + $0x3be8] sm:$0xff] }
 0x601   : > { %14335 = vmatpush1.bf16.msra.mxu0 %v18120_v51  ;;  %14663 = vmatpush1.bf16.msra.mxu1 %v18122_v52  ;;  %v18200_v51 = vcombine.low %v2164_v35, %v2172_v36  ;;  %v18202_v52 = vcombine.low %v2165_v38, %v2173_v39  ;;  %v2244_v35 = vld [vmem:[%s19514_s9 + $0x3c20] sm:$0xff]  ;;  %v2245_v38 = vld [vmem:[%s19514_s9 + $0x3c28] sm:$0xff] }
 0x602   : > { %14336 = vmatprep.subr.bf16.mxu0 %v18137_v53  ;;  %14664 = vmatprep.subr.bf16.mxu1 %v18139_v55  ;;  %v18217_v53 = vcombine.high %v2180_v26, %v2188_v45  ;;  %v18219_v55 = vcombine.high %v2181_v48, %v2189_v49  ;;  %v2252_v36 = vld [vmem:[%s19514_s9 + $0x3c60] sm:$0xff]  ;;  %v2253_v39 = vld [vmem:[%s19514_s9 + $0x3c68] sm:$0xff] }
 0x605   : > { %14337 = vmatpush1.bf16.msra.mxu0 %v18136_v0  ;;  %14665 = vmatpush1.bf16.msra.mxu1 %v18138_v1  ;;  %v18216_v0 = vcombine.low %v2180_v26, %v2188_v45  ;;  %v18218_v1 = vcombine.low %v2181_v48, %v2189_v49  ;;  %v2260_v26 = vld [vmem:[%s19514_s9 + $0x3ca0] sm:$0xff]  ;;  %v2261_v48 = vld [vmem:[%s19514_s9 + $0x3ca8] sm:$0xff] }
 0x606   : > { %14347 = vmatprep.subr.bf16.mxu0 %v18153_v5  ;;  %14675 = vmatprep.subr.bf16.mxu1 %v18155_v6  ;;  %v18233_v5 = vcombine.high %v2196_v20, %v2204_v57  ;;  %v18235_v6 = vcombine.high %v2197_v61, %v2205_v63  ;;  %v2268_v45 = vld [vmem:[%s19514_s9 + $0x3ce0] sm:$0xff]  ;;  %v2269_v49 = vld [vmem:[%s19514_s9 + $0x3ce8] sm:$0xff] }
 0x608   : > { %14339 = vmatmul.mubr.bf16.vlgmr.msra.gmra.mrb[8].mxu0 %v20109_v54  ;;  %14667 = vmatmul.mubr.bf16.vlgmr.msra.gmra.mrb[8].mxu1 %v20109_v54 }
 0x609   : > { %14348 = vmatpush1.bf16.msra.mxu0 %v18152_v11  ;;  %14676 = vmatpush1.bf16.msra.mxu1 %v18154_v12  ;;  %v18232_v11 = vcombine.low %v2196_v20, %v2204_v57  ;;  %v18234_v12 = vcombine.low %v2197_v61, %v2205_v63  ;;  %v2276_v20 = vld [vmem:[%s19514_s9 + $0x3d20] sm:$0xff]  ;;  %v2277_v61 = vld [vmem:[%s19514_s9 + $0x3d28] sm:$0xff] }
 0x60a   : > { %14349 = vmatprep.subr.bf16.mxu0 %v18169_v14  ;;  %14677 = vmatprep.subr.bf16.mxu1 %v18171_v15  ;;  %v18249_v14 = vcombine.high %v2212_v8, %v2220_v9  ;;  %v18251_v15 = vcombine.high %v2213_v25, %v2221_v10  ;;  %v2284_v57 = vld [vmem:[%s19514_s9 + $0x3d60] sm:$0xff]  ;;  %v2285_v63 = vld [vmem:[%s19514_s9 + $0x3d68] sm:$0xff] }
 0x60b   : > { %14379 = vmatprep.mubr.bf16.mxu0 %v20122_v31  ;;  %14707 = vmatprep.mubr.bf16.mxu1 %v20122_v31 }
 0x60d   : > { %14350 = vmatpush1.bf16.msra.mxu0 %v18168_v27  ;;  %14678 = vmatpush1.bf16.msra.mxu1 %v18170_v29  ;;  %v18248_v27 = vcombine.low %v2212_v8, %v2220_v9  ;;  %v18250_v29 = vcombine.low %v2213_v25, %v2221_v10  ;;  %v2292_v8 = vld [vmem:[%s19514_s9 + $0x3da0] sm:$0xff]  ;;  %v2293_v25 = vld [vmem:[%s19514_s9 + $0x3da8] sm:$0xff] }
 0x60e   : > { %14351 = vmatprep.subr.bf16.mxu0 %v18185_v16  ;;  %14679 = vmatprep.subr.bf16.mxu1 %v18187_v33  ;;  %v18265_v16 = vcombine.high %v2228_v18, %v2236_v19  ;;  %v18267_v33 = vcombine.high %v2229_v21, %v2237_v60  ;;  %v2300_v9 = vld [vmem:[%s19514_s9 + $0x3de0] sm:$0xff]  ;;  %v2301_v10 = vld [vmem:[%s19514_s9 + $0x3de8] sm:$0xff] }
 0x611   : > { %14352 = vmatpush1.bf16.msra.mxu0 %v18184_v41  ;;  %14680 = vmatpush1.bf16.msra.mxu1 %v18186_v42  ;;  %v18264_v41 = vcombine.low %v2228_v18, %v2236_v19  ;;  %v18266_v42 = vcombine.low %v2229_v21, %v2237_v60  ;;  %v2308_v18 = vld [vmem:[%s19514_s9 + $0x3e20] sm:$0xff]  ;;  %v2309_v21 = vld [vmem:[%s19514_s9 + $0x3e28] sm:$0xff] }
 0x612   : > { %14353 = vmatprep.subr.bf16.mxu0 %v18201_v43  ;;  %14681 = vmatprep.subr.bf16.mxu1 %v18203_v44  ;;  %v18281_v43 = vcombine.high %v2244_v35, %v2252_v36  ;;  %v18283_v44 = vcombine.high %v2245_v38, %v2253_v39  ;;  %v2316_v19 = vld [vmem:[%s19514_s9 + $0x3e60] sm:$0xff]  ;;  %v2317_v60 = vld [vmem:[%s19514_s9 + $0x3e68] sm:$0xff] }
 0x615   : > { %14354 = vmatpush1.bf16.msra.mxu0 %v18200_v51  ;;  %14682 = vmatpush1.bf16.msra.mxu1 %v18202_v52  ;;  %v18280_v51 = vcombine.low %v2244_v35, %v2252_v36  ;;  %v18282_v52 = vcombine.low %v2245_v38, %v2253_v39  ;;  %v2324_v35 = vld [vmem:[%s19514_s9 + $0x3ea0] sm:$0xff]  ;;  %v2325_v38 = vld [vmem:[%s19514_s9 + $0x3ea8] sm:$0xff] }
 0x616   : > { %14355 = vmatprep.subr.bf16.mxu0 %v18217_v53  ;;  %14683 = vmatprep.subr.bf16.mxu1 %v18219_v55  ;;  %v18297_v53 = vcombine.high %v2260_v26, %v2268_v45  ;;  %v18299_v55 = vcombine.high %v2261_v48, %v2269_v49  ;;  %v2332_v36 = vld [vmem:[%s19514_s9 + $0x3ee0] sm:$0xff]  ;;  %v2333_v39 = vld [vmem:[%s19514_s9 + $0x3ee8] sm:$0xff] }
 0x619   : > { %14356 = vmatpush1.bf16.msra.mxu0 %v18216_v0  ;;  %14684 = vmatpush1.bf16.msra.mxu1 %v18218_v1  ;;  %v18296_v0 = vcombine.low %v2260_v26, %v2268_v45  ;;  %v18298_v1 = vcombine.low %v2261_v48, %v2269_v49  ;;  %v2340_v26 = vld [vmem:[%s19514_s9 + $0x3f20] sm:$0xff]  ;;  %v2341_v48 = vld [vmem:[%s19514_s9 + $0x3f28] sm:$0xff] }
 0x61a   : > { %14357 = vmatprep.subr.bf16.mxu0 %v18233_v5  ;;  %14685 = vmatprep.subr.bf16.mxu1 %v18235_v6  ;;  %v18313_v5 = vcombine.high %v2276_v20, %v2284_v57  ;;  %v18315_v6 = vcombine.high %v2277_v61, %v2285_v63  ;;  %v2348_v45 = vld [vmem:[%s19514_s9 + $0x3f60] sm:$0xff]  ;;  %v2349_v49 = vld [vmem:[%s19514_s9 + $0x3f68] sm:$0xff] }
 0x61d   : > { %14358 = vmatpush1.bf16.msra.mxu0 %v18232_v11  ;;  %14686 = vmatpush1.bf16.msra.mxu1 %v18234_v12  ;;  %v18312_v11 = vcombine.low %v2276_v20, %v2284_v57  ;;  %v18314_v12 = vcombine.low %v2277_v61, %v2285_v63  ;;  %v2356_v20 = vld [vmem:[%s19514_s9 + $0x3fa0] sm:$0xff]  ;;  %v2357_v61 = vld [vmem:[%s19514_s9 + $0x3fa8] sm:$0xff] }
 0x61e   : > { %14359 = vmatprep.subr.bf16.mxu0 %v18249_v14  ;;  %14687 = vmatprep.subr.bf16.mxu1 %v18251_v15  ;;  %v18329_v14 = vcombine.high %v2292_v8, %v2300_v9  ;;  %v18331_v15 = vcombine.high %v2293_v25, %v2301_v10  ;;  %v2364_v57 = vld [vmem:[%s19514_s9 + $0x3fe0] sm:$0xff]  ;;  %v2365_v63 = vld [vmem:[%s19514_s9 + $0x3fe8] sm:$0xff] }
 0x621   : > { %14360 = vmatpush1.bf16.msra.mxu0 %v18248_v27  ;;  %14688 = vmatpush1.bf16.msra.mxu1 %v18250_v29  ;;  %v18328_v27 = vcombine.low %v2292_v8, %v2300_v9  ;;  %v18330_v29 = vcombine.low %v2293_v25, %v2301_v10  ;;  %v326_v8 = vld [vmem:[%s19514_s9 + $0x30] sm:$0xff]  ;;  %v327_v25 = vld [vmem:[%s19514_s9 + $0x38] sm:$0xff] }
 0x622   : > { %14361 = vmatprep.subr.bf16.mxu0 %v18265_v16  ;;  %14689 = vmatprep.subr.bf16.mxu1 %v18267_v33  ;;  %v18345_v16 = vcombine.high %v2308_v18, %v2316_v19  ;;  %v18347_v33 = vcombine.high %v2309_v21, %v2317_v60  ;;  %v334_v9 = vld [vmem:[%s19514_s9 + $0x70] sm:$0xff]  ;;  %v335_v10 = vld [vmem:[%s19514_s9 + $0x78] sm:$0xff] }
 0x625   : > { %14362 = vmatpush1.bf16.msra.mxu0 %v18264_v41  ;;  %14690 = vmatpush1.bf16.msra.mxu1 %v18266_v42  ;;  %v18344_v41 = vcombine.low %v2308_v18, %v2316_v19  ;;  %v18346_v42 = vcombine.low %v2309_v21, %v2317_v60  ;;  %v342_v18 = vld [vmem:[%s19514_s9 + $0xb0] sm:$0xff]  ;;  %v343_v21 = vld [vmem:[%s19514_s9 + $0xb8] sm:$0xff] }
 0x626   : > { %14363 = vmatprep.subr.bf16.mxu0 %v18281_v43  ;;  %14691 = vmatprep.subr.bf16.mxu1 %v18283_v44  ;;  %v18361_v43 = vcombine.high %v2324_v35, %v2332_v36  ;;  %v18363_v44 = vcombine.high %v2325_v38, %v2333_v39  ;;  %v350_v19 = vld [vmem:[%s19514_s9 + $0xf0] sm:$0xff]  ;;  %v351_v60 = vld [vmem:[%s19514_s9 + $0xf8] sm:$0xff] }
 0x629   : > { %14364 = vmatpush1.bf16.msra.mxu0 %v18280_v51  ;;  %14692 = vmatpush1.bf16.msra.mxu1 %v18282_v52  ;;  %v18360_v51 = vcombine.low %v2324_v35, %v2332_v36  ;;  %v18362_v52 = vcombine.low %v2325_v38, %v2333_v39  ;;  %v358_v35 = vld [vmem:[%s19514_s9 + $0x130] sm:$0xff]  ;;  %v359_v38 = vld [vmem:[%s19514_s9 + $0x138] sm:$0xff] }
 0x62a   : > { %14365 = vmatprep.subr.bf16.mxu0 %v18297_v53  ;;  %14693 = vmatprep.subr.bf16.mxu1 %v18299_v55  ;;  %v18377_v53 = vcombine.high %v2340_v26, %v2348_v45  ;;  %v18379_v55 = vcombine.high %v2341_v48, %v2349_v49  ;;  %v366_v36 = vld [vmem:[%s19514_s9 + $0x170] sm:$0xff]  ;;  %v367_v39 = vld [vmem:[%s19514_s9 + $0x178] sm:$0xff] }
 0x62d   : > { %14366 = vmatpush1.bf16.msra.mxu0 %v18296_v0  ;;  %14694 = vmatpush1.bf16.msra.mxu1 %v18298_v1  ;;  %v18376_v0 = vcombine.low %v2340_v26, %v2348_v45  ;;  %v18378_v1 = vcombine.low %v2341_v48, %v2349_v49  ;;  %v374_v26 = vld [vmem:[%s19514_s9 + $0x1b0] sm:$0xff]  ;;  %v375_v48 = vld [vmem:[%s19514_s9 + $0x1b8] sm:$0xff] }
 0x62e   : > { %14367 = vmatprep.subr.bf16.mxu0 %v18313_v5  ;;  %14695 = vmatprep.subr.bf16.mxu1 %v18315_v6  ;;  %v18393_v5 = vcombine.high %v2356_v20, %v2364_v57  ;;  %v18395_v6 = vcombine.high %v2357_v61, %v2365_v63  ;;  %v382_v45 = vld [vmem:[%s19514_s9 + $0x1f0] sm:$0xff]  ;;  %v383_v49 = vld [vmem:[%s19514_s9 + $0x1f8] sm:$0xff] }
 0x631   : > { %14368 = vmatpush1.bf16.msra.mxu0 %v18312_v11  ;;  %14696 = vmatpush1.bf16.msra.mxu1 %v18314_v12  ;;  %v18392_v11 = vcombine.low %v2356_v20, %v2364_v57  ;;  %v18394_v12 = vcombine.low %v2357_v61, %v2365_v63  ;;  %v390_v20 = vld [vmem:[%s19514_s9 + $0x230] sm:$0xff]  ;;  %v391_v61 = vld [vmem:[%s19514_s9 + $0x238] sm:$0xff] }
 0x632   : > { %14369 = vmatprep.subr.bf16.mxu0 %v18329_v14  ;;  %14697 = vmatprep.subr.bf16.mxu1 %v18331_v15  ;;  %v16365_v14 = vcombine.high %v326_v8, %v334_v9  ;;  %v16367_v15 = vcombine.high %v327_v25, %v335_v10  ;;  %v398_v57 = vld [vmem:[%s19514_s9 + $0x270] sm:$0xff]  ;;  %v399_v63 = vld [vmem:[%s19514_s9 + $0x278] sm:$0xff] }
 0x635   : > { %14370 = vmatpush1.bf16.msra.mxu0 %v18328_v27  ;;  %14698 = vmatpush1.bf16.msra.mxu1 %v18330_v29  ;;  %v16364_v27 = vcombine.low %v326_v8, %v334_v9  ;;  %v16366_v29 = vcombine.low %v327_v25, %v335_v10  ;;  %v414_v8 = vld [vmem:[%s19514_s9 + $0x2f0] sm:$0xff]  ;;  %v407_v9 = vld [vmem:[%s19514_s9 + $0x2b8] sm:$0xff]  ;;  %v16428_v10 = vcombine.low %v390_v20, %v398_v57 }
 0x636   : > { %14371 = vmatprep.subr.bf16.mxu0 %v18345_v16  ;;  %14699 = vmatprep.subr.bf16.mxu1 %v18347_v33  ;;  %v16381_v16 = vcombine.high %v342_v18, %v350_v19  ;;  %v16383_v33 = vcombine.high %v343_v21, %v351_v60  ;;  %v415_v25 = vld [vmem:[%s19514_s9 + $0x2f8] sm:$0xff] }
 0x639   : > { %14372 = vmatpush1.bf16.msra.mxu0 %v18344_v41  ;;  %14700 = vmatpush1.bf16.msra.mxu1 %v18346_v42  ;;  %v16380_v41 = vcombine.low %v342_v18, %v350_v19  ;;  %v16382_v42 = vcombine.low %v343_v21, %v351_v60  ;;  %v430_v18 = vld [vmem:[%s19514_s9 + $0x370] sm:$0xff]  ;;  %v423_v19 = vld [vmem:[%s19514_s9 + $0x338] sm:$0xff] }
 0x63a   : > { %14373 = vmatprep.subr.bf16.mxu0 %v18361_v43  ;;  %14701 = vmatprep.subr.bf16.mxu1 %v18363_v44  ;;  %v16397_v43 = vcombine.high %v358_v35, %v366_v36  ;;  %v16399_v44 = vcombine.high %v359_v38, %v367_v39  ;;  %v431_v21 = vld [vmem:[%s19514_s9 + $0x378] sm:$0xff] }
 0x63d   : > { %14374 = vmatpush1.bf16.msra.mxu0 %v18360_v51  ;;  %14702 = vmatpush1.bf16.msra.mxu1 %v18362_v52  ;;  %v16396_v51 = vcombine.low %v358_v35, %v366_v36  ;;  %v16398_v52 = vcombine.low %v359_v38, %v367_v39  ;;  %v446_v35 = vld [vmem:[%s19514_s9 + $0x3f0] sm:$0xff]  ;;  %v439_v36 = vld [vmem:[%s19514_s9 + $0x3b8] sm:$0xff] }
 0x63e   : > { %14375 = vmatprep.subr.bf16.mxu0 %v18377_v53  ;;  %14703 = vmatprep.subr.bf16.mxu1 %v18379_v55  ;;  %v16413_v53 = vcombine.high %v374_v26, %v382_v45  ;;  %v16415_v55 = vcombine.high %v375_v48, %v383_v49  ;;  %v447_v38 = vld [vmem:[%s19514_s9 + $0x3f8] sm:$0xff] }
 0x641   : > { %14376 = vmatpush1.bf16.msra.mxu0 %v18376_v0  ;;  %14704 = vmatpush1.bf16.msra.mxu1 %v18378_v1  ;;  %v16412_v0 = vcombine.low %v374_v26, %v382_v45  ;;  %v16429_v1 = vcombine.high %v390_v20, %v398_v57  ;;  %v462_v26 = vld [vmem:[%s19514_s9 + $0x470] sm:$0xff]  ;;  %v455_v45 = vld [vmem:[%s19514_s9 + $0x438] sm:$0xff] }
 0x642   : > { %14377 = vmatprep.subr.bf16.mxu0 %v18393_v5  ;;  %14705 = vmatprep.subr.bf16.mxu1 %v18395_v6  ;;  %v16431_v5 = vcombine.high %v391_v61, %v399_v63  ;;  %v406_v6 = vld [vmem:[%s19514_s9 + $0x2b0] sm:$0xff]  ;;  %v471_v57 = vld [vmem:[%s19514_s9 + $0x4b8] sm:$0xff] }
 0x643   : > { %v16444_v60 = vcombine.low %v406_v6, %v414_v8  ;;  %v478_v20 = vld [vmem:[%s19514_s9 + $0x4f0] sm:$0xff] }
 0x645   : > { %14378 = vmatpush1.bf16.msra.mxu0 %v18392_v11  ;;  %14706 = vmatpush1.bf16.msra.mxu1 %v18394_v12  ;;  %v16430_v11 = vcombine.low %v391_v61, %v399_v63  ;;  %v16445_v12 = vcombine.high %v406_v6, %v414_v8  ;;  %v479_v61 = vld [vmem:[%s19514_s9 + $0x4f8] sm:$0xff]  ;;  %v494_v6 = vld [vmem:[%s19514_s9 + $0x570] sm:$0xff] }
 0x646   : > { %14716 = vmatprep.subr.bf16.mxu0 %v16365_v14  ;;  %15044 = vmatprep.subr.bf16.mxu1 %v16367_v15  ;;  %v16447_v14 = vcombine.high %v407_v9, %v415_v25  ;;  %v422_v15 = vld [vmem:[%s19514_s9 + $0x330] sm:$0xff]  ;;  %v487_v8 = vld [vmem:[%s19514_s9 + $0x538] sm:$0xff] }
 0x647   : > { %v16460_v39 = vcombine.low %v422_v15, %v430_v18 }
 0x648   : > { %14380 = vmatmul.mubr.bf16.vlgmr.msra.gmra.mrb[8].mxu0 %v20190_v40  ;;  %14708 = vmatmul.mubr.bf16.vlgmr.msra.gmra.mrb[8].mxu1 %v20190_v40 }
 0x649   : > { %14717 = vmatpush1.bf16.msra.mxu0 %v16364_v27  ;;  %15045 = vmatpush1.bf16.msra.mxu1 %v16366_v29  ;;  %v16446_v27 = vcombine.low %v407_v9, %v415_v25  ;;  %v16461_v29 = vcombine.high %v422_v15, %v430_v18  ;;  %v495_v9 = vld [vmem:[%s19514_s9 + $0x578] sm:$0xff]  ;;  %v510_v15 = vld [vmem:[%s19514_s9 + $0x5f0] sm:$0xff] }
 0x64a   : > { %14718 = vmatprep.subr.bf16.mxu0 %v16381_v16  ;;  %15046 = vmatprep.subr.bf16.mxu1 %v16383_v33  ;;  %v16463_v16 = vcombine.high %v423_v19, %v431_v21  ;;  %v438_v33 = vld [vmem:[%s19514_s9 + $0x3b0] sm:$0xff]  ;;  %v503_v18 = vld [vmem:[%s19514_s9 + $0x5b8] sm:$0xff] }
 0x64b   : > { %14748 = vmatprep.mubr.bf16.mxu0 %v19577_v58  ;;  %15076 = vmatprep.mubr.bf16.mxu1 %v19577_v58  ;;  %v16414_v58 = vcombine.low %v375_v48, %v383_v49  ;;  %v463_v48 = vld [vmem:[%s19514_s9 + $0x478] sm:$0xff]  ;;  %v16476_v49 = vcombine.low %v438_v33, %v446_v35 }
 0x64d   : > { %14719 = vmatpush1.bf16.msra.mxu0 %v16380_v41  ;;  %15047 = vmatpush1.bf16.msra.mxu1 %v16382_v42  ;;  %v16462_v41 = vcombine.low %v423_v19, %v431_v21  ;;  %v16477_v42 = vcombine.high %v438_v33, %v446_v35  ;;  %v511_v19 = vld [vmem:[%s19514_s9 + $0x5f8] sm:$0xff]  ;;  %v526_v33 = vld [vmem:[%s19514_s9 + $0x670] sm:$0xff] }
 0x64e   : > { %14720 = vmatprep.subr.bf16.mxu0 %v16397_v43  ;;  %15048 = vmatprep.subr.bf16.mxu1 %v16399_v44  ;;  %v16479_v43 = vcombine.high %v439_v36, %v447_v38  ;;  %v454_v44 = vld [vmem:[%s19514_s9 + $0x430] sm:$0xff]  ;;  %v519_v35 = vld [vmem:[%s19514_s9 + $0x638] sm:$0xff] }
 0x64f   : > { %v16492_v63 = vcombine.low %v454_v44, %v462_v26 }
 0x651   : > { %14721 = vmatpush1.bf16.msra.mxu0 %v16396_v51  ;;  %15049 = vmatpush1.bf16.msra.mxu1 %v16398_v52  ;;  %v16478_v51 = vcombine.low %v439_v36, %v447_v38  ;;  %v16493_v52 = vcombine.high %v454_v44, %v462_v26  ;;  %v527_v36 = vld [vmem:[%s19514_s9 + $0x678] sm:$0xff]  ;;  %v542_v44 = vld [vmem:[%s19514_s9 + $0x6f0] sm:$0xff] }
 0x652   : > { %14722 = vmatprep.subr.bf16.mxu0 %v16413_v53  ;;  %15050 = vmatprep.subr.bf16.mxu1 %v16415_v55  ;;  %v16495_v53 = vcombine.high %v455_v45, %v463_v48  ;;  %v470_v55 = vld [vmem:[%s19514_s9 + $0x4b0] sm:$0xff]  ;;  %v535_v26 = vld [vmem:[%s19514_s9 + $0x6b8] sm:$0xff] }
 0x653   : > { %v16508_v25 = vcombine.low %v470_v55, %v478_v20 }
 0x655   : > { %14723 = vmatpush1.bf16.msra.mxu0 %v16412_v0  ;;  %15051 = vmatpush1.bf16.msra.mxu1 %v16414_v58  ;;  %v16494_v0 = vcombine.low %v455_v45, %v463_v48  ;;  %v16509_v58 = vcombine.high %v470_v55, %v478_v20  ;;  %v543_v45 = vld [vmem:[%s19514_s9 + $0x6f8] sm:$0xff]  ;;  %v558_v55 = vld [vmem:[%s19514_s9 + $0x770] sm:$0xff] }
 0x656   : > { %14724 = vmatprep.subr.bf16.mxu0 %v16429_v1  ;;  %15052 = vmatprep.subr.bf16.mxu1 %v16431_v5  ;;  %v16511_v1 = vcombine.high %v471_v57, %v479_v61  ;;  %v486_v5 = vld [vmem:[%s19514_s9 + $0x530] sm:$0xff]  ;;  %v551_v20 = vld [vmem:[%s19514_s9 + $0x738] sm:$0xff] }
 0x657   : > { %v16524_v21 = vcombine.low %v486_v5, %v494_v6 }
 0x659   : > { %14725 = vmatpush1.bf16.msra.mxu0 %v16428_v10  ;;  %15053 = vmatpush1.bf16.msra.mxu1 %v16430_v11  ;;  %v16510_v10 = vcombine.low %v471_v57, %v479_v61  ;;  %v16525_v11 = vcombine.high %v486_v5, %v494_v6  ;;  %v559_v57 = vld [vmem:[%s19514_s9 + $0x778] sm:$0xff]  ;;  %v574_v5 = vld [vmem:[%s19514_s9 + $0x7f0] sm:$0xff] }
 0x65a   : > { %14726 = vmatprep.subr.bf16.mxu0 %v16445_v12  ;;  %15054 = vmatprep.subr.bf16.mxu1 %v16447_v14  ;;  %v16527_v12 = vcombine.high %v487_v8, %v495_v9  ;;  %v502_v14 = vld [vmem:[%s19514_s9 + $0x5b0] sm:$0xff]  ;;  %v567_v6 = vld [vmem:[%s19514_s9 + $0x7b8] sm:$0xff] }
 0x65b   : > { %v16540_v38 = vcombine.low %v502_v14, %v510_v15 }
 0x65d   : > { %14727 = vmatpush1.bf16.msra.mxu0 %v16444_v60  ;;  %15055 = vmatpush1.bf16.msra.mxu1 %v16446_v27  ;;  %v16526_v60 = vcombine.low %v487_v8, %v495_v9  ;;  %v16541_v27 = vcombine.high %v502_v14, %v510_v15  ;;  %v575_v8 = vld [vmem:[%s19514_s9 + $0x7f8] sm:$0xff]  ;;  %v590_v14 = vld [vmem:[%s19514_s9 + $0x870] sm:$0xff] }
 0x65e   : > { %14728 = vmatprep.subr.bf16.mxu0 %v16461_v29  ;;  %15056 = vmatprep.subr.bf16.mxu1 %v16463_v16  ;;  %v16543_v29 = vcombine.high %v503_v18, %v511_v19  ;;  %v518_v16 = vld [vmem:[%s19514_s9 + $0x630] sm:$0xff]  ;;  %v583_v15 = vld [vmem:[%s19514_s9 + $0x838] sm:$0xff] }
 0x65f   : > { %v16556_v48 = vcombine.low %v518_v16, %v526_v33 }
 0x661   : > { %14729 = vmatpush1.bf16.msra.mxu0 %v16460_v39  ;;  %15057 = vmatpush1.bf16.msra.mxu1 %v16462_v41  ;;  %v16542_v39 = vcombine.low %v503_v18, %v511_v19  ;;  %v16557_v41 = vcombine.high %v518_v16, %v526_v33  ;;  %v591_v18 = vld [vmem:[%s19514_s9 + $0x878] sm:$0xff]  ;;  %v606_v16 = vld [vmem:[%s19514_s9 + $0x8f0] sm:$0xff] }
 0x662   : > { %14730 = vmatprep.subr.bf16.mxu0 %v16477_v42  ;;  %15058 = vmatprep.subr.bf16.mxu1 %v16479_v43  ;;  %v16559_v42 = vcombine.high %v519_v35, %v527_v36  ;;  %v534_v43 = vld [vmem:[%s19514_s9 + $0x6b0] sm:$0xff]  ;;  %v599_v33 = vld [vmem:[%s19514_s9 + $0x8b8] sm:$0xff] }
 0x663   : > { %v16572_v61 = vcombine.low %v534_v43, %v542_v44 }
 0x665   : > { %14731 = vmatpush1.bf16.msra.mxu0 %v16476_v49  ;;  %15059 = vmatpush1.bf16.msra.mxu1 %v16478_v51  ;;  %v16558_v49 = vcombine.low %v519_v35, %v527_v36  ;;  %v16573_v51 = vcombine.high %v534_v43, %v542_v44  ;;  %v607_v35 = vld [vmem:[%s19514_s9 + $0x8f8] sm:$0xff]  ;;  %v622_v43 = vld [vmem:[%s19514_s9 + $0x970] sm:$0xff] }
 0x666   : > { %14732 = vmatprep.subr.bf16.mxu0 %v16493_v52  ;;  %15060 = vmatprep.subr.bf16.mxu1 %v16495_v53  ;;  %v16575_v52 = vcombine.high %v535_v26, %v543_v45  ;;  %v550_v53 = vld [vmem:[%s19514_s9 + $0x730] sm:$0xff]  ;;  %v615_v44 = vld [vmem:[%s19514_s9 + $0x938] sm:$0xff] }
 0x667   : > { %v16588_v9 = vcombine.low %v550_v53, %v558_v55 }
 0x669   : > { %14733 = vmatpush1.bf16.msra.mxu0 %v16492_v63  ;;  %15061 = vmatpush1.bf16.msra.mxu1 %v16494_v0  ;;  %v16574_v63 = vcombine.low %v535_v26, %v543_v45  ;;  %v16589_v0 = vcombine.high %v550_v53, %v558_v55  ;;  %v623_v26 = vld [vmem:[%s19514_s9 + $0x978] sm:$0xff]  ;;  %v638_v53 = vld [vmem:[%s19514_s9 + $0x9f0] sm:$0xff] }
 0x66a   : > { %14734 = vmatprep.subr.bf16.mxu0 %v16509_v58  ;;  %15062 = vmatprep.subr.bf16.mxu1 %v16511_v1  ;;  %v16591_v58 = vcombine.high %v551_v20, %v559_v57  ;;  %v566_v1 = vld [vmem:[%s19514_s9 + $0x7b0] sm:$0xff]  ;;  %v631_v55 = vld [vmem:[%s19514_s9 + $0x9b8] sm:$0xff] }
 0x66b   : > { %v16604_v19 = vcombine.low %v566_v1, %v574_v5 }
 0x66d   : > { %14735 = vmatpush1.bf16.msra.mxu0 %v16508_v25  ;;  %15063 = vmatpush1.bf16.msra.mxu1 %v16510_v10  ;;  %v16590_v25 = vcombine.low %v551_v20, %v559_v57  ;;  %v16605_v10 = vcombine.high %v566_v1, %v574_v5  ;;  %v639_v20 = vld [vmem:[%s19514_s9 + $0x9f8] sm:$0xff]  ;;  %v16654_v57 = vcombine.low %v615_v44, %v623_v26 }
 0x66e   : > { %14736 = vmatprep.subr.bf16.mxu0 %v16525_v11  ;;  %15064 = vmatprep.subr.bf16.mxu1 %v16527_v12  ;;  %v16607_v11 = vcombine.high %v567_v6, %v575_v8  ;;  %v582_v12 = vld [vmem:[%s19514_s9 + $0x830] sm:$0xff]  ;;  %v647_v1 = vld [vmem:[%s19514_s9 + $0xa38] sm:$0xff] }
 0x66f   : > { %v16620_v36 = vcombine.low %v582_v12, %v590_v14  ;;  %v655_v5 = vld [vmem:[%s19514_s9 + $0xa78] sm:$0xff] }
 0x671   : > { %14737 = vmatpush1.bf16.msra.mxu0 %v16524_v21  ;;  %15065 = vmatpush1.bf16.msra.mxu1 %v16526_v60  ;;  %v16606_v21 = vcombine.low %v567_v6, %v575_v8  ;;  %v16621_v60 = vcombine.high %v582_v12, %v590_v14  ;;  %v671_v12 = vld [vmem:[%s19514_s9 + $0xaf8] sm:$0xff] }
 0x672   : > { %14738 = vmatprep.subr.bf16.mxu0 %v16541_v27  ;;  %15066 = vmatprep.subr.bf16.mxu1 %v16543_v29  ;;  %v16623_v27 = vcombine.high %v583_v15, %v591_v18  ;;  %v598_v29 = vld [vmem:[%s19514_s9 + $0x8b0] sm:$0xff] }
 0x673   : > { %v16636_v45 = vcombine.low %v598_v29, %v606_v16 }
 0x675   : > { %14739 = vmatpush1.bf16.msra.mxu0 %v16540_v38  ;;  %15067 = vmatpush1.bf16.msra.mxu1 %v16542_v39  ;;  %v16622_v38 = vcombine.low %v583_v15, %v591_v18  ;;  %v16637_v39 = vcombine.high %v598_v29, %v606_v16  ;;  %v16686_v15 = vcombine.low %v647_v1, %v655_v5  ;;  %v687_v29 = vld [vmem:[%s19514_s9 + $0xb78] sm:$0xff] }
 0x676   : > { %14740 = vmatprep.subr.bf16.mxu0 %v16557_v41  ;;  %15068 = vmatprep.subr.bf16.mxu1 %v16559_v42  ;;  %v16639_v41 = vcombine.high %v599_v33, %v607_v35  ;;  %v614_v42 = vld [vmem:[%s19514_s9 + $0x930] sm:$0xff] }
 0x679   : > { %14741 = vmatpush1.bf16.msra.mxu0 %v16556_v48  ;;  %15069 = vmatpush1.bf16.msra.mxu1 %v16558_v49  ;;  %v16638_v48 = vcombine.low %v599_v33, %v607_v35  ;;  %v16653_v49 = vcombine.high %v614_v42, %v622_v43 }
 0x67a   : > { %14742 = vmatprep.subr.bf16.mxu0 %v16573_v51  ;;  %15070 = vmatprep.subr.bf16.mxu1 %v16575_v52  ;;  %v16655_v51 = vcombine.high %v615_v44, %v623_v26  ;;  %v630_v52 = vld [vmem:[%s19514_s9 + $0x9b0] sm:$0xff] }
 0x67b   : > { %v16668_v6 = vcombine.low %v630_v52, %v638_v53 }
 0x67d   : > { %14743 = vmatpush1.bf16.msra.mxu0 %v16572_v61  ;;  %15071 = vmatpush1.bf16.msra.mxu1 %v16574_v63  ;;  %v16669_v61 = vcombine.high %v630_v52, %v638_v53  ;;  %v16671_v63 = vcombine.high %v631_v55, %v639_v20  ;;  %v719_v52 = vld [vmem:[%s19514_s9 + $0xc78] sm:$0xff] }
 0x67e   : > { %14744 = vmatprep.subr.bf16.mxu0 %v16589_v0  ;;  %15072 = vmatprep.subr.bf16.mxu1 %v16591_v58  ;;  %v646_v0 = vld [vmem:[%s19514_s9 + $0xa30] sm:$0xff] }
 0x67f   : > { %v654_v58 = vld [vmem:[%s19514_s9 + $0xa70] sm:$0xff] }
 0x680   : > { %v16685_v8 = vcombine.high %v646_v0, %v654_v58  ;;  %v16684_v14 = vcombine.low %v646_v0, %v654_v58  ;;  %v735_v0 = vld [vmem:[%s19514_s9 + $0xcf8] sm:$0xff] }
 0x681   : > { %14745 = vmatpush1.bf16.msra.mxu0 %v16588_v9  ;;  %15073 = vmatpush1.bf16.msra.mxu1 %v16590_v25  ;;  %v16687_v9 = vcombine.high %v647_v1, %v655_v5  ;;  %v662_v25 = vld [vmem:[%s19514_s9 + $0xab0] sm:$0xff] }
 0x682   : > { %14746 = vmatprep.subr.bf16.mxu0 %v16605_v10  ;;  %15074 = vmatprep.subr.bf16.mxu1 %v16607_v11  ;;  %v670_v10 = vld [vmem:[%s19514_s9 + $0xaf0] sm:$0xff]  ;;  %v663_v11 = vld [vmem:[%s19514_s9 + $0xab8] sm:$0xff] }
 0x683   : > { %v16701_v18 = vcombine.high %v662_v25, %v670_v10  ;;  %v16700_v16 = vcombine.low %v662_v25, %v670_v10  ;;  %v16702_v33 = vcombine.low %v663_v11, %v671_v12  ;;  %v751_v25 = vld [vmem:[%s19514_s9 + $0xd78] sm:$0xff] }
 0x685   : > { %14747 = vmatpush1.bf16.msra.mxu0 %v16604_v19  ;;  %15075 = vmatpush1.bf16.msra.mxu1 %v16606_v21  ;;  %v16703_v19 = vcombine.high %v663_v11, %v671_v12  ;;  %v678_v21 = vld [vmem:[%s19514_s9 + $0xb30] sm:$0xff] }
 0x686   : > { %14757 = vmatprep.subr.bf16.mxu0 %v16621_v60  ;;  %15085 = vmatprep.subr.bf16.mxu1 %v16623_v27  ;;  %v686_v60 = vld [vmem:[%s19514_s9 + $0xb70] sm:$0xff]  ;;  %v679_v27 = vld [vmem:[%s19514_s9 + $0xb38] sm:$0xff] }
 0x687   : > { %v16717_v35 = vcombine.high %v678_v21, %v686_v60  ;;  %v16718_v44 = vcombine.low %v679_v27, %v687_v29 }
 0x688   : > { %14749 = vmatmul.mubr.bf16.vlgmr.msra.gmra.mrb[12].mxu0 %v19623_v13  ;;  %15077 = vmatmul.mubr.bf16.vlgmr.msra.gmra.mrb[12].mxu1 %v19623_v13  ;;  %v16652_v13 = vcombine.low %v614_v42, %v622_v43  ;;  %v703_v42 = vld [vmem:[%s19514_s9 + $0xbf8] sm:$0xff]  ;;  %v16716_v43 = vcombine.low %v678_v21, %v686_v60 }
 0x689   : > { %14758 = vmatpush1.bf16.msra.mxu0 %v16620_v36  ;;  %15086 = vmatpush1.bf16.msra.mxu1 %v16622_v38  ;;  %v16719_v36 = vcombine.high %v679_v27, %v687_v29  ;;  %v694_v38 = vld [vmem:[%s19514_s9 + $0xbb0] sm:$0xff]  ;;  %v767_v21 = vld [vmem:[%s19514_s9 + $0xdf8] sm:$0xff] }
 0x68a   : > { %14759 = vmatprep.subr.bf16.mxu0 %v16637_v39  ;;  %15087 = vmatprep.subr.bf16.mxu1 %v16639_v41  ;;  %v702_v39 = vld [vmem:[%s19514_s9 + $0xbf0] sm:$0xff]  ;;  %v695_v41 = vld [vmem:[%s19514_s9 + $0xbb8] sm:$0xff] }
 0x68b   : > { %14789 = vmatprep.mubr.bf16.mxu0 %v19636_v22  ;;  %15117 = vmatprep.mubr.bf16.mxu1 %v19636_v22  ;;  %v16670_v22 = vcombine.low %v631_v55, %v639_v20  ;;  %v16733_v26 = vcombine.high %v694_v38, %v702_v39  ;;  %v16732_v53 = vcombine.low %v694_v38, %v702_v39  ;;  %v783_v38 = vld [vmem:[%s19514_s9 + $0xe78] sm:$0xff] }
 0x68c   : > { %v16734_v55 = vcombine.low %v695_v41, %v703_v42 }
 0x68d   : > { %14760 = vmatpush1.bf16.msra.mxu0 %v16636_v45  ;;  %15088 = vmatpush1.bf16.msra.mxu1 %v16638_v48  ;;  %v16735_v45 = vcombine.high %v695_v41, %v703_v42  ;;  %v710_v48 = vld [vmem:[%s19514_s9 + $0xc30] sm:$0xff] }
 0x68e   : > { %14761 = vmatprep.subr.bf16.mxu0 %v16653_v49  ;;  %15089 = vmatprep.subr.bf16.mxu1 %v16655_v51  ;;  %v718_v49 = vld [vmem:[%s19514_s9 + $0xc70] sm:$0xff]  ;;  %v711_v51 = vld [vmem:[%s19514_s9 + $0xc38] sm:$0xff] }
 0x68f   : > { %v16749_v20 = vcombine.high %v710_v48, %v718_v49  ;;  %v16748_v58 = vcombine.low %v710_v48, %v718_v49  ;;  %v16750_v1 = vcombine.low %v711_v51, %v719_v52  ;;  %v799_v48 = vld [vmem:[%s19514_s9 + $0xef8] sm:$0xff] }
 0x691   : > { %14762 = vmatpush1.bf16.msra.mxu0 %v16652_v13  ;;  %15090 = vmatpush1.bf16.msra.mxu1 %v16654_v57  ;;  %v16751_v13 = vcombine.high %v711_v51, %v719_v52  ;;  %v726_v57 = vld [vmem:[%s19514_s9 + $0xcb0] sm:$0xff] }
 0x692   : > { %14763 = vmatprep.subr.bf16.mxu0 %v16669_v61  ;;  %15091 = vmatprep.subr.bf16.mxu1 %v16671_v63  ;;  %v734_v61 = vld [vmem:[%s19514_s9 + $0xcf0] sm:$0xff]  ;;  %v727_v63 = vld [vmem:[%s19514_s9 + $0xcb8] sm:$0xff] }
 0x693   : > { %v16765_v5 = vcombine.high %v726_v57, %v734_v61  ;;  %v16764_v10 = vcombine.low %v726_v57, %v734_v61  ;;  %v16766_v11 = vcombine.low %v727_v63, %v735_v0  ;;  %v815_v57 = vld [vmem:[%s19514_s9 + $0xf78] sm:$0xff] }
 0x695   : > { %14764 = vmatpush1.bf16.msra.mxu0 %v16668_v6  ;;  %15092 = vmatpush1.bf16.msra.mxu1 %v16670_v22  ;;  %v16767_v6 = vcombine.high %v727_v63, %v735_v0  ;;  %v742_v22 = vld [vmem:[%s19514_s9 + $0xd30] sm:$0xff] }
 0x696   : > { %14765 = vmatprep.subr.bf16.mxu0 %v16685_v8  ;;  %15093 = vmatprep.subr.bf16.mxu1 %v16687_v9  ;;  %v750_v8 = vld [vmem:[%s19514_s9 + $0xd70] sm:$0xff]  ;;  %v743_v9 = vld [vmem:[%s19514_s9 + $0xd38] sm:$0xff] }
 0x697   : > { %v16781_v12 = vcombine.high %v742_v22, %v750_v8  ;;  %v16780_v60 = vcombine.low %v742_v22, %v750_v8  ;;  %v16782_v27 = vcombine.low %v743_v9, %v751_v25  ;;  %v831_v22 = vld [vmem:[%s19514_s9 + $0xff8] sm:$0xff] }
 0x699   : > { %14766 = vmatpush1.bf16.msra.mxu0 %v16684_v14  ;;  %15094 = vmatpush1.bf16.msra.mxu1 %v16686_v15  ;;  %v16783_v14 = vcombine.high %v743_v9, %v751_v25  ;;  %v758_v15 = vld [vmem:[%s19514_s9 + $0xdb0] sm:$0xff] }
 0x69a   : > { %14767 = vmatprep.subr.bf16.mxu0 %v16701_v18  ;;  %15095 = vmatprep.subr.bf16.mxu1 %v16703_v19  ;;  %v766_v18 = vld [vmem:[%s19514_s9 + $0xdf0] sm:$0xff]  ;;  %v759_v19 = vld [vmem:[%s19514_s9 + $0xdb8] sm:$0xff] }
 0x69b   : > { %v16797_v29 = vcombine.high %v758_v15, %v766_v18  ;;  %v16796_v39 = vcombine.low %v758_v15, %v766_v18  ;;  %v16798_v41 = vcombine.low %v759_v19, %v767_v21  ;;  %v847_v15 = vld [vmem:[%s19514_s9 + $0x1078] sm:$0xff] }
 0x69d   : > { %14768 = vmatpush1.bf16.msra.mxu0 %v16700_v16  ;;  %15096 = vmatpush1.bf16.msra.mxu1 %v16702_v33  ;;  %v16799_v16 = vcombine.high %v759_v19, %v767_v21  ;;  %v774_v33 = vld [vmem:[%s19514_s9 + $0xe30] sm:$0xff] }
 0x69e   : > { %14769 = vmatprep.subr.bf16.mxu0 %v16717_v35  ;;  %15097 = vmatprep.subr.bf16.mxu1 %v16719_v36  ;;  %v782_v35 = vld [vmem:[%s19514_s9 + $0xe70] sm:$0xff]  ;;  %v775_v36 = vld [vmem:[%s19514_s9 + $0xe38] sm:$0xff] }
 0x69f   : > { %v16813_v42 = vcombine.high %v774_v33, %v782_v35  ;;  %v16812_v49 = vcombine.low %v774_v33, %v782_v35  ;;  %v16814_v51 = vcombine.low %v775_v36, %v783_v38  ;;  %v863_v33 = vld [vmem:[%s19514_s9 + $0x10f8] sm:$0xff] }
 0x6a1   : > { %14770 = vmatpush1.bf16.msra.mxu0 %v16716_v43  ;;  %15098 = vmatpush1.bf16.msra.mxu1 %v16718_v44  ;;  %v16815_v43 = vcombine.high %v775_v36, %v783_v38  ;;  %v790_v44 = vld [vmem:[%s19514_s9 + $0xeb0] sm:$0xff] }
 0x6a2   : > { %14771 = vmatprep.subr.bf16.mxu0 %v16733_v26  ;;  %15099 = vmatprep.subr.bf16.mxu1 %v16735_v45  ;;  %v798_v26 = vld [vmem:[%s19514_s9 + $0xef0] sm:$0xff]  ;;  %v791_v45 = vld [vmem:[%s19514_s9 + $0xeb8] sm:$0xff] }
 0x6a3   : > { %v16829_v52 = vcombine.high %v790_v44, %v798_v26  ;;  %v16828_v61 = vcombine.low %v790_v44, %v798_v26  ;;  %v16830_v63 = vcombine.low %v791_v45, %v799_v48  ;;  %v879_v44 = vld [vmem:[%s19514_s9 + $0x1178] sm:$0xff] }
 0x6a5   : > { %14772 = vmatpush1.bf16.msra.mxu0 %v16732_v53  ;;  %15100 = vmatpush1.bf16.msra.mxu1 %v16734_v55  ;;  %v16831_v53 = vcombine.high %v791_v45, %v799_v48  ;;  %v806_v55 = vld [vmem:[%s19514_s9 + $0xf30] sm:$0xff] }
 0x6a6   : > { %14773 = vmatprep.subr.bf16.mxu0 %v16749_v20  ;;  %15101 = vmatprep.subr.bf16.mxu1 %v16751_v13  ;;  %v814_v20 = vld [vmem:[%s19514_s9 + $0xf70] sm:$0xff]  ;;  %v807_v13 = vld [vmem:[%s19514_s9 + $0xf38] sm:$0xff] }
 0x6a7   : > { %v16845_v0 = vcombine.high %v806_v55, %v814_v20  ;;  %v16844_v8 = vcombine.low %v806_v55, %v814_v20  ;;  %v16846_v9 = vcombine.low %v807_v13, %v815_v57  ;;  %v895_v55 = vld [vmem:[%s19514_s9 + $0x11f8] sm:$0xff] }
 0x6a9   : > { %14774 = vmatpush1.bf16.msra.mxu0 %v16748_v58  ;;  %15102 = vmatpush1.bf16.msra.mxu1 %v16750_v1  ;;  %v16847_v58 = vcombine.high %v807_v13, %v815_v57  ;;  %v822_v1 = vld [vmem:[%s19514_s9 + $0xfb0] sm:$0xff] }
 0x6aa   : > { %14775 = vmatprep.subr.bf16.mxu0 %v16765_v5  ;;  %15103 = vmatprep.subr.bf16.mxu1 %v16767_v6  ;;  %v830_v5 = vld [vmem:[%s19514_s9 + $0xff0] sm:$0xff]  ;;  %v823_v6 = vld [vmem:[%s19514_s9 + $0xfb8] sm:$0xff] }
 0x6ab   : > { %v16861_v25 = vcombine.high %v822_v1, %v830_v5  ;;  %v16860_v18 = vcombine.low %v822_v1, %v830_v5  ;;  %v16862_v19 = vcombine.low %v823_v6, %v831_v22 }
 0x6ad   : > { %14776 = vmatpush1.bf16.msra.mxu0 %v16764_v10  ;;  %15104 = vmatpush1.bf16.msra.mxu1 %v16766_v11  ;;  %v16863_v10 = vcombine.high %v823_v6, %v831_v22  ;;  %v838_v11 = vld [vmem:[%s19514_s9 + $0x1030] sm:$0xff] }
 0x6ae   : > { %14777 = vmatprep.subr.bf16.mxu0 %v16781_v12  ;;  %15105 = vmatprep.subr.bf16.mxu1 %v16783_v14  ;;  %v846_v12 = vld [vmem:[%s19514_s9 + $0x1070] sm:$0xff]  ;;  %v839_v14 = vld [vmem:[%s19514_s9 + $0x1038] sm:$0xff] }
 0x6af   : > { %v16877_v21 = vcombine.high %v838_v11, %v846_v12  ;;  %v16876_v35 = vcombine.low %v838_v11, %v846_v12  ;;  %v16878_v36 = vcombine.low %v839_v14, %v847_v15  ;;  %v918_v22 = vld [vmem:[%s19514_s9 + $0x12b0] sm:$0xff] }
 0x6b1   : > { %14778 = vmatpush1.bf16.msra.mxu0 %v16780_v60  ;;  %15106 = vmatpush1.bf16.msra.mxu1 %v16782_v27  ;;  %v16879_v60 = vcombine.high %v839_v14, %v847_v15  ;;  %v854_v27 = vld [vmem:[%s19514_s9 + $0x10b0] sm:$0xff] }
 0x6b2   : > { %14779 = vmatprep.subr.bf16.mxu0 %v16797_v29  ;;  %15107 = vmatprep.subr.bf16.mxu1 %v16799_v16  ;;  %v862_v29 = vld [vmem:[%s19514_s9 + $0x10f0] sm:$0xff]  ;;  %v855_v16 = vld [vmem:[%s19514_s9 + $0x10b8] sm:$0xff] }
 0x6b3   : > { %v16893_v38 = vcombine.high %v854_v27, %v862_v29  ;;  %v16892_v26 = vcombine.low %v854_v27, %v862_v29  ;;  %v16894_v45 = vcombine.low %v855_v16, %v863_v33  ;;  %v934_v15 = vld [vmem:[%s19514_s9 + $0x1330] sm:$0xff] }
 0x6b5   : > { %14780 = vmatpush1.bf16.msra.mxu0 %v16796_v39  ;;  %15108 = vmatpush1.bf16.msra.mxu1 %v16798_v41  ;;  %v16895_v39 = vcombine.high %v855_v16, %v863_v33  ;;  %v870_v41 = vld [vmem:[%s19514_s9 + $0x1130] sm:$0xff] }
 0x6b6   : > { %14781 = vmatprep.subr.bf16.mxu0 %v16813_v42  ;;  %15109 = vmatprep.subr.bf16.mxu1 %v16815_v43  ;;  %v878_v42 = vld [vmem:[%s19514_s9 + $0x1170] sm:$0xff]  ;;  %v871_v43 = vld [vmem:[%s19514_s9 + $0x1138] sm:$0xff] }
 0x6b7   : > { %v16909_v48 = vcombine.high %v870_v41, %v878_v42  ;;  %v16910_v20 = vcombine.low %v871_v43, %v879_v44  ;;  %v950_v33 = vld [vmem:[%s19514_s9 + $0x13b0] sm:$0xff] }
 0x6b9   : > { %14782 = vmatpush1.bf16.msra.mxu0 %v16812_v49  ;;  %15110 = vmatpush1.bf16.msra.mxu1 %v16814_v51  ;;  %v16911_v49 = vcombine.high %v871_v43, %v879_v44  ;;  %v886_v51 = vld [vmem:[%s19514_s9 + $0x11b0] sm:$0xff] }
 0x6ba   : > { %14783 = vmatprep.subr.bf16.mxu0 %v16829_v52  ;;  %15111 = vmatprep.subr.bf16.mxu1 %v16831_v53  ;;  %v894_v52 = vld [vmem:[%s19514_s9 + $0x11f0] sm:$0xff]  ;;  %v887_v53 = vld [vmem:[%s19514_s9 + $0x11b8] sm:$0xff] }
 0x6bb   : > { %v16925_v13 = vcombine.high %v886_v51, %v894_v52  ;;  %v16927_v57 = vcombine.high %v887_v53, %v895_v55  ;;  %v16924_v1 = vcombine.low %v886_v51, %v894_v52  ;;  %v966_v44 = vld [vmem:[%s19514_s9 + $0x1430] sm:$0xff] }
 0x6bd   : > { %14784 = vmatpush1.bf16.msra.mxu0 %v16828_v61  ;;  %15112 = vmatpush1.bf16.msra.mxu1 %v16830_v63  ;;  %v902_v61 = vld [vmem:[%s19514_s9 + $0x1230] sm:$0xff] }
 0x6be   : > { %14785 = vmatprep.subr.bf16.mxu0 %v16845_v0  ;;  %15113 = vmatprep.subr.bf16.mxu1 %v16847_v58  ;;  %v910_v63 = vld [vmem:[%s19514_s9 + $0x1270] sm:$0xff]  ;;  %v903_v0 = vld [vmem:[%s19514_s9 + $0x1238] sm:$0xff] }
 0x6bf   : > { %v911_v58 = vld [vmem:[%s19514_s9 + $0x1278] sm:$0xff]  ;;  %v16941_v5 = vcombine.high %v902_v61, %v910_v63 }
 0x6c0   : > { %v16943_v6 = vcombine.high %v903_v0, %v911_v58  ;;  %v16942_v11 = vcombine.low %v903_v0, %v911_v58  ;;  %v998_v58 = vld [vmem:[%s19514_s9 + $0x1530] sm:$0xff] }
 0x6c1   : > { %14786 = vmatpush1.bf16.msra.mxu0 %v16844_v8  ;;  %15114 = vmatpush1.bf16.msra.mxu1 %v16846_v9  ;;  %v926_v8 = vld [vmem:[%s19514_s9 + $0x12f0] sm:$0xff]  ;;  %v919_v9 = vld [vmem:[%s19514_s9 + $0x12b8] sm:$0xff] }
 0x6c2   : > { %14787 = vmatprep.subr.bf16.mxu0 %v16861_v25  ;;  %15115 = vmatprep.subr.bf16.mxu1 %v16863_v10  ;;  %v927_v25 = vld [vmem:[%s19514_s9 + $0x12f8] sm:$0xff]  ;;  %v16940_v10 = vcombine.low %v902_v61, %v910_v63  ;;  %v16957_v12 = vcombine.high %v918_v22, %v926_v8 }
 0x6c3   : > { %v16959_v14 = vcombine.high %v919_v9, %v927_v25  ;;  %v16958_v27 = vcombine.low %v919_v9, %v927_v25  ;;  %v1014_v25 = vld [vmem:[%s19514_s9 + $0x15b0] sm:$0xff] }
 0x6c5   : > { %14788 = vmatpush1.bf16.msra.mxu0 %v16860_v18  ;;  %15116 = vmatpush1.bf16.msra.mxu1 %v16862_v19  ;;  %v942_v18 = vld [vmem:[%s19514_s9 + $0x1370] sm:$0xff]  ;;  %v935_v19 = vld [vmem:[%s19514_s9 + $0x1338] sm:$0xff] }
 0x6c6   : > { %14798 = vmatprep.subr.bf16.mxu0 %v16877_v21  ;;  %15126 = vmatprep.subr.bf16.mxu1 %v16879_v60  ;;  %v943_v21 = vld [vmem:[%s19514_s9 + $0x1378] sm:$0xff]  ;;  %v16956_v60 = vcombine.low %v918_v22, %v926_v8  ;;  %v16973_v29 = vcombine.high %v934_v15, %v942_v18 }
 0x6c7   : > { %v16975_v16 = vcombine.high %v935_v19, %v943_v21 }
 0x6c8   : > { %14790 = vmatmul.mubr.bf16.vlgmr.msra.gmra.mrb[12].mxu0 %v19704_v23  ;;  %15118 = vmatmul.mubr.bf16.vlgmr.msra.gmra.mrb[12].mxu1 %v19704_v23  ;;  %v16908_v23 = vcombine.low %v870_v41, %v878_v42  ;;  %v16974_v41 = vcombine.low %v935_v19, %v943_v21  ;;  %v1030_v21 = vld [vmem:[%s19514_s9 + $0x1630] sm:$0xff] }
 0x6c9   : > { %14799 = vmatpush1.bf16.msra.mxu0 %v16876_v35  ;;  %15127 = vmatpush1.bf16.msra.mxu1 %v16878_v36  ;;  %v958_v35 = vld [vmem:[%s19514_s9 + $0x13f0] sm:$0xff]  ;;  %v951_v36 = vld [vmem:[%s19514_s9 + $0x13b8] sm:$0xff] }
 0x6ca   : > { %14800 = vmatprep.subr.bf16.mxu0 %v16893_v38  ;;  %15128 = vmatprep.subr.bf16.mxu1 %v16895_v39  ;;  %v959_v38 = vld [vmem:[%s19514_s9 + $0x13f8] sm:$0xff]  ;;  %v16972_v39 = vcombine.low %v934_v15, %v942_v18  ;;  %v16989_v42 = vcombine.high %v950_v33, %v958_v35 }
 0x6cb   : > { %14830 = vmatprep.mubr.bf16.mxu0 %v19717_v32  ;;  %15158 = vmatprep.mubr.bf16.mxu1 %v19717_v32  ;;  %v16926_v32 = vcombine.low %v887_v53, %v895_v55  ;;  %v16991_v43 = vcombine.high %v951_v36, %v959_v38  ;;  %v16990_v51 = vcombine.low %v951_v36, %v959_v38  ;;  %v982_v55 = vld [vmem:[%s19514_s9 + $0x14b0] sm:$0xff] }
 0x6cc   : > { %v1046_v38 = vld [vmem:[%s19514_s9 + $0x16b0] sm:$0xff] }
 0x6cd   : > { %14801 = vmatpush1.bf16.msra.mxu0 %v16892_v26  ;;  %15129 = vmatpush1.bf16.msra.mxu1 %v16894_v45  ;;  %v974_v26 = vld [vmem:[%s19514_s9 + $0x1470] sm:$0xff]  ;;  %v967_v45 = vld [vmem:[%s19514_s9 + $0x1438] sm:$0xff] }
 0x6ce   : > { %14802 = vmatprep.subr.bf16.mxu0 %v16909_v48  ;;  %15130 = vmatprep.subr.bf16.mxu1 %v16911_v49  ;;  %v975_v48 = vld [vmem:[%s19514_s9 + $0x1478] sm:$0xff]  ;;  %v16988_v49 = vcombine.low %v950_v33, %v958_v35  ;;  %v17005_v52 = vcombine.high %v966_v44, %v974_v26 }
 0x6cf   : > { %v17007_v53 = vcombine.high %v967_v45, %v975_v48  ;;  %v17006_v61 = vcombine.low %v967_v45, %v975_v48  ;;  %v1062_v48 = vld [vmem:[%s19514_s9 + $0x1730] sm:$0xff] }
 0x6d1   : > { %14803 = vmatpush1.bf16.msra.mxu0 %v16908_v23  ;;  %15131 = vmatpush1.bf16.msra.mxu1 %v16910_v20  ;;  %v990_v23 = vld [vmem:[%s19514_s9 + $0x14f0] sm:$0xff]  ;;  %v983_v20 = vld [vmem:[%s19514_s9 + $0x14b8] sm:$0xff] }
 0x6d2   : > { %14804 = vmatprep.subr.bf16.mxu0 %v16925_v13  ;;  %15132 = vmatprep.subr.bf16.mxu1 %v16927_v57  ;;  %v991_v13 = vld [vmem:[%s19514_s9 + $0x14f8] sm:$0xff]  ;;  %v17004_v57 = vcombine.low %v966_v44, %v974_v26  ;;  %v17021_v63 = vcombine.high %v982_v55, %v990_v23 }
 0x6d3   : > { %v17023_v0 = vcombine.high %v983_v20, %v991_v13  ;;  %v17022_v22 = vcombine.low %v983_v20, %v991_v13  ;;  %v1078_v13 = vld [vmem:[%s19514_s9 + $0x17b0] sm:$0xff] }
 0x6d5   : > { %14805 = vmatpush1.bf16.msra.mxu0 %v16924_v1  ;;  %15133 = vmatpush1.bf16.msra.mxu1 %v16926_v32  ;;  %v1006_v1 = vld [vmem:[%s19514_s9 + $0x1570] sm:$0xff]  ;;  %v999_v32 = vld [vmem:[%s19514_s9 + $0x1538] sm:$0xff] }
 0x6d6   : > { %14806 = vmatprep.subr.bf16.mxu0 %v16941_v5  ;;  %15134 = vmatprep.subr.bf16.mxu1 %v16943_v6  ;;  %v1007_v5 = vld [vmem:[%s19514_s9 + $0x1578] sm:$0xff]  ;;  %v17020_v6 = vcombine.low %v982_v55, %v990_v23  ;;  %v17037_v8 = vcombine.high %v998_v58, %v1006_v1 }
 0x6d7   : > { %v17039_v9 = vcombine.high %v999_v32, %v1007_v5  ;;  %v17038_v15 = vcombine.low %v999_v32, %v1007_v5  ;;  %v1094_v5 = vld [vmem:[%s19514_s9 + $0x1830] sm:$0xff] }
 0x6d9   : > { %14807 = vmatpush1.bf16.msra.mxu0 %v16940_v10  ;;  %15135 = vmatpush1.bf16.msra.mxu1 %v16942_v11  ;;  %v1022_v10 = vld [vmem:[%s19514_s9 + $0x15f0] sm:$0xff]  ;;  %v1015_v11 = vld [vmem:[%s19514_s9 + $0x15b8] sm:$0xff] }
 0x6da   : > { %14808 = vmatprep.subr.bf16.mxu0 %v16957_v12  ;;  %15136 = vmatprep.subr.bf16.mxu1 %v16959_v14  ;;  %v1023_v12 = vld [vmem:[%s19514_s9 + $0x15f8] sm:$0xff]  ;;  %v17036_v14 = vcombine.low %v998_v58, %v1006_v1  ;;  %v17053_v18 = vcombine.high %v1014_v25, %v1022_v10 }
 0x6db   : > { %v17055_v19 = vcombine.high %v1015_v11, %v1023_v12  ;;  %v17054_v33 = vcombine.low %v1015_v11, %v1023_v12  ;;  %v1110_v12 = vld [vmem:[%s19514_s9 + $0x18b0] sm:$0xff] }
 0x6dd   : > { %14809 = vmatpush1.bf16.msra.mxu0 %v16956_v60  ;;  %15137 = vmatpush1.bf16.msra.mxu1 %v16958_v27  ;;  %v1038_v60 = vld [vmem:[%s19514_s9 + $0x1670] sm:$0xff]  ;;  %v1031_v27 = vld [vmem:[%s19514_s9 + $0x1638] sm:$0xff] }
 0x6de   : > { %14810 = vmatprep.subr.bf16.mxu0 %v16973_v29  ;;  %15138 = vmatprep.subr.bf16.mxu1 %v16975_v16  ;;  %v1039_v29 = vld [vmem:[%s19514_s9 + $0x1678] sm:$0xff]  ;;  %v17052_v16 = vcombine.low %v1014_v25, %v1022_v10  ;;  %v17069_v35 = vcombine.high %v1030_v21, %v1038_v60 }
 0x6df   : > { %v17071_v36 = vcombine.high %v1031_v27, %v1039_v29  ;;  %v17070_v44 = vcombine.low %v1031_v27, %v1039_v29  ;;  %v1126_v29 = vld [vmem:[%s19514_s9 + $0x1930] sm:$0xff] }
 0x6e1   : > { %14811 = vmatpush1.bf16.msra.mxu0 %v16972_v39  ;;  %15139 = vmatpush1.bf16.msra.mxu1 %v16974_v41  ;;  %v1054_v39 = vld [vmem:[%s19514_s9 + $0x16f0] sm:$0xff]  ;;  %v1047_v41 = vld [vmem:[%s19514_s9 + $0x16b8] sm:$0xff] }
 0x6e2   : > { %14812 = vmatprep.subr.bf16.mxu0 %v16989_v42  ;;  %15140 = vmatprep.subr.bf16.mxu1 %v16991_v43  ;;  %v1055_v42 = vld [vmem:[%s19514_s9 + $0x16f8] sm:$0xff]  ;;  %v17068_v43 = vcombine.low %v1030_v21, %v1038_v60  ;;  %v17085_v26 = vcombine.high %v1046_v38, %v1054_v39 }
 0x6e3   : > { %v17087_v45 = vcombine.high %v1047_v41, %v1055_v42  ;;  %v17086_v55 = vcombine.low %v1047_v41, %v1055_v42  ;;  %v1142_v42 = vld [vmem:[%s19514_s9 + $0x19b0] sm:$0xff] }
 0x6e5   : > { %14813 = vmatpush1.bf16.msra.mxu0 %v16988_v49  ;;  %15141 = vmatpush1.bf16.msra.mxu1 %v16990_v51  ;;  %v1070_v49 = vld [vmem:[%s19514_s9 + $0x1770] sm:$0xff]  ;;  %v1063_v51 = vld [vmem:[%s19514_s9 + $0x1738] sm:$0xff] }
 0x6e6   : > { %14814 = vmatprep.subr.bf16.mxu0 %v17005_v52  ;;  %15142 = vmatprep.subr.bf16.mxu1 %v17007_v53  ;;  %v1071_v52 = vld [vmem:[%s19514_s9 + $0x1778] sm:$0xff]  ;;  %v17084_v53 = vcombine.low %v1046_v38, %v1054_v39  ;;  %v17101_v23 = vcombine.high %v1062_v48, %v1070_v49 }
 0x6e7   : > { %v17103_v20 = vcombine.high %v1063_v51, %v1071_v52  ;;  %v17102_v58 = vcombine.low %v1063_v51, %v1071_v52  ;;  %v1158_v52 = vld [vmem:[%s19514_s9 + $0x1a30] sm:$0xff] }
 0x6e9   : > { %14815 = vmatpush1.bf16.msra.mxu0 %v17004_v57  ;;  %15143 = vmatpush1.bf16.msra.mxu1 %v17006_v61  ;;  %v1086_v57 = vld [vmem:[%s19514_s9 + $0x17f0] sm:$0xff]  ;;  %v1079_v61 = vld [vmem:[%s19514_s9 + $0x17b8] sm:$0xff] }
 0x6ea   : > { %14816 = vmatprep.subr.bf16.mxu0 %v17021_v63  ;;  %15144 = vmatprep.subr.bf16.mxu1 %v17023_v0  ;;  %v1087_v63 = vld [vmem:[%s19514_s9 + $0x17f8] sm:$0xff]  ;;  %v17100_v0 = vcombine.low %v1062_v48, %v1070_v49  ;;  %v17117_v1 = vcombine.high %v1078_v13, %v1086_v57 }
 0x6eb   : > { %v17119_v32 = vcombine.high %v1079_v61, %v1087_v63  ;;  %v17118_v25 = vcombine.low %v1079_v61, %v1087_v63  ;;  %v1174_v63 = vld [vmem:[%s19514_s9 + $0x1ab0] sm:$0xff] }
 0x6ed   : > { %14817 = vmatpush1.bf16.msra.mxu0 %v17020_v6  ;;  %15145 = vmatpush1.bf16.msra.mxu1 %v17022_v22  ;;  %v1102_v6 = vld [vmem:[%s19514_s9 + $0x1870] sm:$0xff]  ;;  %v1095_v22 = vld [vmem:[%s19514_s9 + $0x1838] sm:$0xff] }
 0x6ee   : > { %14818 = vmatprep.subr.bf16.mxu0 %v17037_v8  ;;  %15146 = vmatprep.subr.bf16.mxu1 %v17039_v9  ;;  %v1103_v8 = vld [vmem:[%s19514_s9 + $0x1878] sm:$0xff]  ;;  %v17116_v9 = vcombine.low %v1078_v13, %v1086_v57  ;;  %v17133_v10 = vcombine.high %v1094_v5, %v1102_v6 }
 0x6ef   : > { %v17135_v11 = vcombine.high %v1095_v22, %v1103_v8  ;;  %v17134_v21 = vcombine.low %v1095_v22, %v1103_v8 }
 0x6f1   : > { %14819 = vmatpush1.bf16.msra.mxu0 %v17036_v14  ;;  %15147 = vmatpush1.bf16.msra.mxu1 %v17038_v15  ;;  %v1118_v14 = vld [vmem:[%s19514_s9 + $0x18f0] sm:$0xff]  ;;  %v1111_v15 = vld [vmem:[%s19514_s9 + $0x18b8] sm:$0xff] }
 0x6f2   : > { %14820 = vmatprep.subr.bf16.mxu0 %v17053_v18  ;;  %15148 = vmatprep.subr.bf16.mxu1 %v17055_v19  ;;  %v1119_v18 = vld [vmem:[%s19514_s9 + $0x18f8] sm:$0xff]  ;;  %v17132_v19 = vcombine.low %v1094_v5, %v1102_v6  ;;  %v17149_v60 = vcombine.high %v1110_v12, %v1118_v14  ;;  %v2369_v5 = vld [vmem:[%s19527_s12 + $0x8] sm:$0xff] }
 0x6f3   : > { %v17151_v27 = vcombine.high %v1111_v15, %v1119_v18  ;;  %v17150_v38 = vcombine.low %v1111_v15, %v1119_v18  ;;  %v1191_v18 = vld [vmem:[%s19514_s9 + $0x1b38] sm:$0xff] }
 0x6f5   : > { %14821 = vmatpush1.bf16.msra.mxu0 %v17052_v16  ;;  %15149 = vmatpush1.bf16.msra.mxu1 %v17054_v33  ;;  %v1134_v16 = vld [vmem:[%s19514_s9 + $0x1970] sm:$0xff]  ;;  %v1127_v33 = vld [vmem:[%s19514_s9 + $0x1938] sm:$0xff] }
 0x6f6   : > { %14822 = vmatprep.subr.bf16.mxu0 %v17069_v35  ;;  %15150 = vmatprep.subr.bf16.mxu1 %v17071_v36  ;;  %v1135_v35 = vld [vmem:[%s19514_s9 + $0x1978] sm:$0xff]  ;;  %v17148_v36 = vcombine.low %v1110_v12, %v1118_v14  ;;  %v17165_v39 = vcombine.high %v1126_v29, %v1134_v16  ;;  %v1198_v12 = vld [vmem:[%s19514_s9 + $0x1b70] sm:$0xff] }
 0x6f7   : > { %v17167_v41 = vcombine.high %v1127_v33, %v1135_v35  ;;  %v17166_v48 = vcombine.low %v1127_v33, %v1135_v35 }
 0x6f9   : > { %14823 = vmatpush1.bf16.msra.mxu0 %v17068_v43  ;;  %15151 = vmatpush1.bf16.msra.mxu1 %v17070_v44  ;;  %v1150_v43 = vld [vmem:[%s19514_s9 + $0x19f0] sm:$0xff]  ;;  %v1143_v44 = vld [vmem:[%s19514_s9 + $0x19b8] sm:$0xff] }
 0x6fa   : > { %14824 = vmatprep.subr.bf16.mxu0 %v17085_v26  ;;  %15152 = vmatprep.subr.bf16.mxu1 %v17087_v45  ;;  %v1151_v26 = vld [vmem:[%s19514_s9 + $0x19f8] sm:$0xff]  ;;  %v2372_v45 = vlaneseq  ;;  %v17181_v49 = vcombine.high %v1142_v42, %v1150_v43 }
 0x6fb   : > { %v17183_v51 = vcombine.high %v1143_v44, %v1151_v26  ;;  %v17182_v13 = vcombine.low %v1143_v44, %v1151_v26  ;;  %v1207_v44 = vld [vmem:[%s19514_s9 + $0x1bb8] sm:$0xff] }
 0x6fc   : > { %v1215_v26 = vld [vmem:[%s19514_s9 + $0x1bf8] sm:$0xff] }
 0x6fd   : > { %14825 = vmatpush1.bf16.msra.mxu0 %v17084_v53  ;;  %15153 = vmatpush1.bf16.msra.mxu1 %v17086_v55  ;;  %v1166_v53 = vld [vmem:[%s19514_s9 + $0x1a70] sm:$0xff]  ;;  %v1159_v55 = vld [vmem:[%s19514_s9 + $0x1a38] sm:$0xff] }
 0x6fe   : > { %14826 = vmatprep.subr.bf16.mxu0 %v17101_v23  ;;  %15154 = vmatprep.subr.bf16.mxu1 %v17103_v20  ;;  %v1167_v23 = vld [vmem:[%s19514_s9 + $0x1a78] sm:$0xff]  ;;  %v21518_v20 = vshrl.u32 %v2372_v45, 7  ;;  %v17197_v57 = vcombine.high %v1158_v52, %v1166_v53 }
 0x6ff   : > { %v17199_v61 = vcombine.high %v1159_v55, %v1167_v23  ;;  %v17198_v22 = vcombine.low %v1159_v55, %v1167_v23 }
 0x700   : > { %v2374_v6 = vsub.s32 0, %v21518_v20  ;;  %v2386_v14 = vsub.s32 3, %v21518_v20 }
 0x701   : > { %14827 = vmatpush1.bf16.msra.mxu0 %v17100_v0  ;;  %15155 = vmatpush1.bf16.msra.mxu1 %v17102_v58  ;;  %v1182_v0 = vld [vmem:[%s19514_s9 + $0x1af0] sm:$0xff]  ;;  %v1175_v58 = vld [vmem:[%s19514_s9 + $0x1ab8] sm:$0xff] }
 0x702   : > { %14828 = vmatprep.subr.bf16.mxu0 %v17117_v1  ;;  %15156 = vmatprep.subr.bf16.mxu1 %v17119_v32  ;;  %v1183_v1 = vld [vmem:[%s19514_s9 + $0x1af8] sm:$0xff]  ;;  %v17196_v32 = vcombine.low %v1158_v52, %v1166_v53  ;;  %v17213_v8 = vcombine.high %v1174_v63, %v1182_v0  ;;  %v2407_v15 = vrot.slane %v2369_v5, %v2374_v6 }
 0x705   : > { %14829 = vmatpush1.bf16.msra.mxu0 %v17116_v9  ;;  %15157 = vmatpush1.bf16.msra.mxu1 %v17118_v25  ;;  %v2382_v9 = vsub.s32 2, %v21518_v20  ;;  %v2378_v25 = vsub.s32 1, %v21518_v20 }
 0x706   : > { %14839 = vmatprep.subr.bf16.mxu0 %v17133_v10  ;;  %15167 = vmatprep.subr.bf16.mxu1 %v17135_v11  ;;  %v17215_v10 = vcombine.high %v1175_v58, %v1183_v1  ;;  %v1190_v11 = vld [vmem:[%s19514_s9 + $0x1b30] sm:$0xff] }
 0x707   : > { %v17229_v33 = vcombine.high %v1190_v11, %v1198_v12 }
 0x708   : > { %14831 = vmatmul.mubr.bf16.vlgmr.msra.gmra.mrb[12].mxu0 %v19785_v37  ;;  %15159 = vmatmul.mubr.bf16.vlgmr.msra.gmra.mrb[12].mxu1 %v19785_v37  ;;  %v17164_v37 = vcombine.low %v1126_v29, %v1134_v16  ;;  %v2419_v29 = vrot.slane %v2369_v5, %v2386_v14  ;;  %v17214_v16 = vcombine.low %v1175_v58, %v1183_v1  ;;  %v1231_v58 = vld [vmem:[%s19514_s9 + $0x1c78] sm:$0xff] }
 0x709   : > { %14840 = vmatpush1.bf16.msra.mxu0 %v17132_v19  ;;  %15168 = vmatpush1.bf16.msra.mxu1 %v17134_v21  ;;  %v1199_v19 = vld [vmem:[%s19514_s9 + $0x1b78] sm:$0xff]  ;;  %v2415_v21 = vrot.slane %v2369_v5, %v2382_v9 }
 0x70a   : > { %14841 = vmatprep.subr.bf16.mxu0 %v17149_v60  ;;  %15169 = vmatprep.subr.bf16.mxu1 %v17151_v27  ;;  %v2411_v60 = vrot.slane %v2369_v5, %v2378_v25  ;;  %v17212_v27 = vcombine.low %v1174_v63, %v1182_v0  ;;  %v17230_v23 = vcombine.low %v1191_v18, %v1199_v19  ;;  %v1230_v63 = vld [vmem:[%s19514_s9 + $0x1c70] sm:$0xff]  ;;  %v1223_v0 = vld [vmem:[%s19514_s9 + $0x1c38] sm:$0xff] }
 0x70b   : > { %14871 = vmatprep.mubr.bf16.mxu0 %v19798_v46  ;;  %15199 = vmatprep.mubr.bf16.mxu1 %v19798_v46  ;;  %v17180_v46 = vcombine.low %v1142_v42, %v1150_v43 }
 0x70d   : > { %14842 = vmatpush1.bf16.msra.mxu0 %v17148_v36  ;;  %15170 = vmatpush1.bf16.msra.mxu1 %v17150_v38  ;;  %v17231_v36 = vcombine.high %v1191_v18, %v1199_v19  ;;  %v1206_v38 = vld [vmem:[%s19514_s9 + $0x1bb0] sm:$0xff]  ;;  %v17262_v18 = vcombine.low %v1223_v0, %v1231_v58 }
 0x70e   : > { %14843 = vmatprep.subr.bf16.mxu0 %v17165_v39  ;;  %15171 = vmatprep.subr.bf16.mxu1 %v17167_v41  ;;  %v1214_v39 = vld [vmem:[%s19514_s9 + $0x1bf0] sm:$0xff] }
 0x70f   : > { %v17244_v1 = vcombine.low %v1206_v38, %v1214_v39 }
 0x711   : > { %14844 = vmatpush1.bf16.msra.mxu0 %v17164_v37  ;;  %15172 = vmatpush1.bf16.msra.mxu1 %v17166_v48 }
 0x712   : > { %14845 = vmatprep.subr.bf16.mxu0 %v17181_v49  ;;  %15173 = vmatprep.subr.bf16.mxu1 %v17183_v51  ;;  %v17228_v51 = vcombine.low %v1190_v11, %v1198_v12  ;;  %v1239_v11 = vld [vmem:[%s19514_s9 + $0x1cb8] sm:$0xff] }
 0x713   : > { %v1247_v12 = vld [vmem:[%s19514_s9 + $0x1cf8] sm:$0xff] }
 0x715   : > { %14846 = vmatpush1.bf16.msra.mxu0 %v17180_v46  ;;  %15174 = vmatpush1.bf16.msra.mxu1 %v17182_v13  ;;  %v17245_v46 = vcombine.high %v1206_v38, %v1214_v39  ;;  %v1270_v39 = vld [vmem:[%s19514_s9 + $0x1db0] sm:$0xff] }
 0x716   : > { %14847 = vmatprep.subr.bf16.mxu0 %v17197_v57  ;;  %15175 = vmatprep.subr.bf16.mxu1 %v17199_v61  ;;  %v17247_v57 = vcombine.high %v1207_v44, %v1215_v26  ;;  %v1222_v61 = vld [vmem:[%s19514_s9 + $0x1c30] sm:$0xff] }
 0x717   : > { %v17261_v5 = vcombine.high %v1222_v61, %v1230_v63 }
 0x719   : > { %14848 = vmatpush1.bf16.msra.mxu0 %v17196_v32  ;;  %15176 = vmatpush1.bf16.msra.mxu1 %v17198_v22  ;;  %v17246_v32 = vcombine.low %v1207_v44, %v1215_v26  ;;  %v17263_v22 = vcombine.high %v1223_v0, %v1231_v58  ;;  %v1279_v44 = vld [vmem:[%s19514_s9 + $0x1df8] sm:$0xff]  ;;  %v1302_v0 = vld [vmem:[%s19514_s9 + $0x1eb0] sm:$0xff] }
 0x71a   : > { %14849 = vmatprep.subr.bf16.mxu0 %v17213_v8  ;;  %15177 = vmatprep.subr.bf16.mxu1 %v17215_v10  ;;  %v1238_v8 = vld [vmem:[%s19514_s9 + $0x1cb0] sm:$0xff] }
 0x71b   : > { %v14381_v35 = vpop.f32.mrb[8].mxu0  ;;  %v14709_v42 = vpop.f32.mrb[8].mxu1  ;;  %v1246_v10 = vld [vmem:[%s19514_s9 + $0x1cf0] sm:$0xff] }
 0x71c   : > { %v21543_v41 = vadd.f32 %v14381_v35, %v2407_v15  ;;  %v14383_v43 = vpop.f32.mrb[9].mxu0  ;;  %v21547_v37 = vadd.f32 %v14709_v42, %v2415_v21  ;;  %v14711_v48 = vpop.f32.mrb[9].mxu1  ;;  %v17260_v15 = vcombine.low %v1222_v61, %v1230_v63  ;;  %v17277_v19 = vcombine.high %v1238_v8, %v1246_v10  ;;  %v1278_v42 = vld [vmem:[%s19514_s9 + $0x1df0] sm:$0xff] }
 0x71d   : > { %v21549_v45 = vadd.f32 %v14383_v43, %v2411_v60  ;;  %v14385_v49 = vpop.f32.mrb[10].mxu0  ;;  %14850 = vmatpush1.bf16.msra.mxu0 %v17212_v27  ;;  %v21551_v52 = vadd.f32 %v14711_v48, %v2419_v29  ;;  %v14713_v53 = vpop.f32.mrb[10].mxu1  ;;  %15178 = vmatpush1.bf16.msra.mxu1 %v17214_v16  ;;  %v17279_v21 = vcombine.high %v1239_v11, %v1247_v12  ;;  %v1254_v60 = vld [vmem:[%s19514_s9 + $0x1d30] sm:$0xff]  ;;  %v1255_v29 = vld [vmem:[%s19514_s9 + $0x1d38] sm:$0xff] }
 0x71e   : > { %v14386_v55 = vpop.f32.mrb[11].mxu0  ;;  %14851 = vmatprep.subr.bf16.mxu0 %v17229_v33  ;;  %v14714_v13 = vpop.f32.mrb[11].mxu1  ;;  %15179 = vmatprep.subr.bf16.mxu1 %v17231_v36  ;;  %v1262_v27 = vld [vmem:[%s19514_s9 + $0x1d70] sm:$0xff]  ;;  %v1263_v16 = vld [vmem:[%s19514_s9 + $0x1d78] sm:$0xff]  ;;  %v17276_v33 = vcombine.low %v1238_v8, %v1246_v10  ;;  %v17278_v35 = vcombine.low %v1239_v11, %v1247_v12  ;;  %v17309_v49 = vcombine.high %v1270_v39, %v1278_v42 }
 0x71f   : > { %v17293_v36 = vcombine.high %v1254_v60, %v1262_v27  ;;  %v17295_v38 = vcombine.high %v1255_v29, %v1263_v16  ;;  %v1271_v43 = vld [vmem:[%s19514_s9 + $0x1db8] sm:$0xff]  ;;  %v17292_v26 = vcombine.low %v1254_v60, %v1262_v27  ;;  %v17294_v48 = vcombine.low %v1255_v29, %v1263_v16  ;;  %v1286_v53 = vld [vmem:[%s19514_s9 + $0x1e30] sm:$0xff] }
 0x720   : > { %v1294_v55 = vld [vmem:[%s19514_s9 + $0x1e70] sm:$0xff]  ;;  %v17308_v13 = vcombine.low %v1270_v39, %v1278_v42 }
 0x721   : > { %14852 = vmatpush1.bf16.msra.mxu0 %v17228_v51  ;;  %15180 = vmatpush1.bf16.msra.mxu1 %v17230_v23  ;;  %v17311_v51 = vcombine.high %v1271_v43, %v1279_v44  ;;  %v1287_v23 = vld [vmem:[%s19514_s9 + $0x1e38] sm:$0xff]  ;;  %v17325_v61 = vcombine.high %v1286_v53, %v1294_v55  ;;  %v1310_v58 = vld [vmem:[%s19514_s9 + $0x1ef0] sm:$0xff] }
 0x722   : > { %14853 = vmatprep.subr.bf16.mxu0 %v17245_v46  ;;  %15181 = vmatprep.subr.bf16.mxu1 %v17247_v57  ;;  %v1295_v46 = vld [vmem:[%s19514_s9 + $0x1e78] sm:$0xff]  ;;  %v17310_v57 = vcombine.low %v1271_v43, %v1279_v44  ;;  %v17341_v8 = vcombine.high %v1302_v0, %v1310_v58  ;;  %v1318_v11 = vld [vmem:[%s19514_s9 + $0x1f30] sm:$0xff] }
 0x723   : > { %v17327_v63 = vcombine.high %v1287_v23, %v1295_v46  ;;  %v1326_v12 = vld [vmem:[%s19514_s9 + $0x1f70] sm:$0xff] }
 0x724   : > { %v17357_v60 = vcombine.high %v1318_v11, %v1326_v12  ;;  %v1334_v29 = vld [vmem:[%s19514_s9 + $0x1fb0] sm:$0xff] }
 0x725   : > { %14854 = vmatpush1.bf16.msra.mxu0 %v17244_v1  ;;  %15182 = vmatpush1.bf16.msra.mxu1 %v17246_v32  ;;  %v1303_v1 = vld [vmem:[%s19514_s9 + $0x1eb8] sm:$0xff]  ;;  %v1342_v16 = vld [vmem:[%s19514_s9 + $0x1ff0] sm:$0xff] }
 0x726   : > { %14855 = vmatprep.subr.bf16.mxu0 %v17261_v5  ;;  %15183 = vmatprep.subr.bf16.mxu1 %v17263_v22  ;;  %v1311_v32 = vld [vmem:[%s19514_s9 + $0x1ef8] sm:$0xff]  ;;  %v17324_v5 = vcombine.low %v1286_v53, %v1294_v55  ;;  %v17326_v22 = vcombine.low %v1287_v23, %v1295_v46  ;;  %v17373_v39 = vcombine.high %v1334_v29, %v1342_v16  ;;  %v1350_v43 = vld [vmem:[%s19514_s9 + $0x2030] sm:$0xff] }
 0x727   : > { %v17343_v10 = vcombine.high %v1303_v1, %v1311_v32  ;;  %v1358_v44 = vld [vmem:[%s19514_s9 + $0x2070] sm:$0xff] }
 0x728   : > { %v17389_v53 = vcombine.high %v1350_v43, %v1358_v44  ;;  %v1366_v23 = vld [vmem:[%s19514_s9 + $0x20b0] sm:$0xff] }
 0x729   : > { %14856 = vmatpush1.bf16.msra.mxu0 %v17260_v15  ;;  %15184 = vmatpush1.bf16.msra.mxu1 %v17262_v18  ;;  %v1319_v15 = vld [vmem:[%s19514_s9 + $0x1f38] sm:$0xff]  ;;  %v1374_v46 = vld [vmem:[%s19514_s9 + $0x20f0] sm:$0xff] }
 0x72a   : > { %14857 = vmatprep.subr.bf16.mxu0 %v17277_v19  ;;  %15185 = vmatprep.subr.bf16.mxu1 %v17279_v21  ;;  %v1327_v18 = vld [vmem:[%s19514_s9 + $0x1f78] sm:$0xff]  ;;  %v17340_v19 = vcombine.low %v1302_v0, %v1310_v58  ;;  %v17342_v21 = vcombine.low %v1303_v1, %v1311_v32  ;;  %v17405_v0 = vcombine.high %v1366_v23, %v1374_v46  ;;  %v1382_v1 = vld [vmem:[%s19514_s9 + $0x2130] sm:$0xff] }
 0x72b   : > { %v17359_v27 = vcombine.high %v1319_v15, %v1327_v18  ;;  %v1390_v32 = vld [vmem:[%s19514_s9 + $0x2170] sm:$0xff] }
 0x72d   : > { %14858 = vmatpush1.bf16.msra.mxu0 %v17276_v33  ;;  %15186 = vmatpush1.bf16.msra.mxu1 %v17278_v35  ;;  %v1335_v33 = vld [vmem:[%s19514_s9 + $0x1fb8] sm:$0xff] }
 0x72e   : > { %14859 = vmatprep.subr.bf16.mxu0 %v17293_v36  ;;  %15187 = vmatprep.subr.bf16.mxu1 %v17295_v38  ;;  %v1343_v35 = vld [vmem:[%s19514_s9 + $0x1ff8] sm:$0xff]  ;;  %v17356_v36 = vcombine.low %v1318_v11, %v1326_v12  ;;  %v17358_v38 = vcombine.low %v1319_v15, %v1327_v18  ;;  %v17421_v11 = vcombine.high %v1382_v1, %v1390_v32  ;;  %v1398_v15 = vld [vmem:[%s19514_s9 + $0x21b0] sm:$0xff] }
 0x72f   : > { %v17375_v42 = vcombine.high %v1335_v33, %v1343_v35  ;;  %v1406_v18 = vld [vmem:[%s19514_s9 + $0x21f0] sm:$0xff] }
 0x731   : > { %14860 = vmatpush1.bf16.msra.mxu0 %v17292_v26  ;;  %15188 = vmatpush1.bf16.msra.mxu1 %v17294_v48  ;;  %v1351_v26 = vld [vmem:[%s19514_s9 + $0x2038] sm:$0xff] }
 0x732   : > { %14861 = vmatprep.subr.bf16.mxu0 %v17309_v49  ;;  %15189 = vmatprep.subr.bf16.mxu1 %v17311_v51  ;;  %v1359_v48 = vld [vmem:[%s19514_s9 + $0x2078] sm:$0xff]  ;;  %v17372_v49 = vcombine.low %v1334_v29, %v1342_v16  ;;  %v17374_v51 = vcombine.low %v1335_v33, %v1343_v35  ;;  %v1414_v16 = vld [vmem:[%s19514_s9 + $0x2230] sm:$0xff] }
 0x733   : > { %v17391_v55 = vcombine.high %v1351_v26, %v1359_v48  ;;  %v1422_v33 = vld [vmem:[%s19514_s9 + $0x2270] sm:$0xff]  ;;  %v1415_v35 = vld [vmem:[%s19514_s9 + $0x2238] sm:$0xff] }
 0x735   : > { %14862 = vmatpush1.bf16.msra.mxu0 %v17308_v13  ;;  %15190 = vmatpush1.bf16.msra.mxu1 %v17310_v57  ;;  %v1367_v13 = vld [vmem:[%s19514_s9 + $0x20b8] sm:$0xff] }
 0x736   : > { %14863 = vmatprep.subr.bf16.mxu0 %v17325_v61  ;;  %15191 = vmatprep.subr.bf16.mxu1 %v17327_v63  ;;  %v1375_v57 = vld [vmem:[%s19514_s9 + $0x20f8] sm:$0xff]  ;;  %v17388_v61 = vcombine.low %v1350_v43, %v1358_v44  ;;  %v17390_v63 = vcombine.low %v1351_v26, %v1359_v48  ;;  %v1430_v43 = vld [vmem:[%s19514_s9 + $0x22b0] sm:$0xff] }
 0x737   : > { %v17407_v58 = vcombine.high %v1367_v13, %v1375_v57  ;;  %v1438_v44 = vld [vmem:[%s19514_s9 + $0x22f0] sm:$0xff]  ;;  %v1431_v26 = vld [vmem:[%s19514_s9 + $0x22b8] sm:$0xff] }
 0x738   : > { %v1439_v48 = vld [vmem:[%s19514_s9 + $0x22f8] sm:$0xff] }
 0x739   : > { %14864 = vmatpush1.bf16.msra.mxu0 %v17324_v5  ;;  %15192 = vmatpush1.bf16.msra.mxu1 %v17326_v22  ;;  %v1383_v5 = vld [vmem:[%s19514_s9 + $0x2138] sm:$0xff] }
 0x73a   : > { %14865 = vmatprep.subr.bf16.mxu0 %v17341_v8  ;;  %15193 = vmatprep.subr.bf16.mxu1 %v17343_v10  ;;  %v1391_v22 = vld [vmem:[%s19514_s9 + $0x2178] sm:$0xff]  ;;  %v17404_v8 = vcombine.low %v1366_v23, %v1374_v46  ;;  %v17406_v10 = vcombine.low %v1367_v13, %v1375_v57  ;;  %v1446_v23 = vld [vmem:[%s19514_s9 + $0x2330] sm:$0xff] }
 0x73b   : > { %v17423_v12 = vcombine.high %v1383_v5, %v1391_v22  ;;  %v1454_v46 = vld [vmem:[%s19514_s9 + $0x2370] sm:$0xff]  ;;  %v1447_v13 = vld [vmem:[%s19514_s9 + $0x2338] sm:$0xff] }
 0x73c   : > { %v1455_v57 = vld [vmem:[%s19514_s9 + $0x2378] sm:$0xff] }
 0x73d   : > { %14866 = vmatpush1.bf16.msra.mxu0 %v17340_v19  ;;  %15194 = vmatpush1.bf16.msra.mxu1 %v17342_v21  ;;  %v1399_v19 = vld [vmem:[%s19514_s9 + $0x21b8] sm:$0xff] }
 0x73e   : > { %14867 = vmatprep.subr.bf16.mxu0 %v17357_v60  ;;  %15195 = vmatprep.subr.bf16.mxu1 %v17359_v27  ;;  %v1407_v21 = vld [vmem:[%s19514_s9 + $0x21f8] sm:$0xff]  ;;  %v17422_v60 = vcombine.low %v1383_v5, %v1391_v22  ;;  %v17437_v27 = vcombine.high %v1398_v15, %v1406_v18 }
 0x73f   : > { %v17439_v29 = vcombine.high %v1399_v19, %v1407_v21  ;;  %v1463_v5 = vld [vmem:[%s19514_s9 + $0x23b8] sm:$0xff] }
 0x740   : > { %v1471_v22 = vld [vmem:[%s19514_s9 + $0x23f8] sm:$0xff] }
 0x741   : > { %14868 = vmatpush1.bf16.msra.mxu0 %v17356_v36  ;;  %15196 = vmatpush1.bf16.msra.mxu1 %v17358_v38  ;;  %v1423_v36 = vld [vmem:[%s19514_s9 + $0x2278] sm:$0xff]  ;;  %v17436_v38 = vcombine.low %v1398_v15, %v1406_v18  ;;  %v1478_v15 = vld [vmem:[%s19514_s9 + $0x2430] sm:$0xff] }
 0x742   : > { %14869 = vmatprep.subr.bf16.mxu0 %v17373_v39  ;;  %15197 = vmatprep.subr.bf16.mxu1 %v17375_v42  ;;  %v17453_v39 = vcombine.high %v1414_v16, %v1422_v33  ;;  %v17455_v42 = vcombine.high %v1415_v35, %v1423_v36  ;;  %v1486_v18 = vld [vmem:[%s19514_s9 + $0x2470] sm:$0xff] }
 0x745   : > { %14870 = vmatpush1.bf16.msra.mxu0 %v17372_v49  ;;  %15198 = vmatpush1.bf16.msra.mxu1 %v17374_v51  ;;  %v17452_v49 = vcombine.low %v1414_v16, %v1422_v33  ;;  %v17454_v51 = vcombine.low %v1415_v35, %v1423_v36  ;;  %v1494_v16 = vld [vmem:[%s19514_s9 + $0x24b0] sm:$0xff]  ;;  %v1495_v35 = vld [vmem:[%s19514_s9 + $0x24b8] sm:$0xff] }
 0x746   : > { %14880 = vmatprep.subr.bf16.mxu0 %v17389_v53  ;;  %15208 = vmatprep.subr.bf16.mxu1 %v17391_v55  ;;  %v17469_v53 = vcombine.high %v1430_v43, %v1438_v44  ;;  %v17471_v55 = vcombine.high %v1431_v26, %v1439_v48  ;;  %v1502_v33 = vld [vmem:[%s19514_s9 + $0x24f0] sm:$0xff]  ;;  %v1503_v36 = vld [vmem:[%s19514_s9 + $0x24f8] sm:$0xff] }
 0x748   : > { %14872 = vmatmul.mubr.bf16.vlgmr.msra.gmra.mrb[12].mxu0 %v19866_v56  ;;  %15200 = vmatmul.mubr.bf16.vlgmr.msra.gmra.mrb[12].mxu1 %v19866_v56  ;;  %v17420_v56 = vcombine.low %v1382_v1, %v1390_v32  ;;  %v1462_v1 = vld [vmem:[%s19514_s9 + $0x23b0] sm:$0xff] }
 0x749   : > { %14881 = vmatpush1.bf16.msra.mxu0 %v17388_v61  ;;  %15209 = vmatpush1.bf16.msra.mxu1 %v17390_v63  ;;  %v17468_v61 = vcombine.low %v1430_v43, %v1438_v44  ;;  %v17470_v63 = vcombine.low %v1431_v26, %v1439_v48  ;;  %v1470_v32 = vld [vmem:[%s19514_s9 + $0x23f0] sm:$0xff]  ;;  %v1511_v26 = vld [vmem:[%s19514_s9 + $0x2538] sm:$0xff] }
 0x74a   : > { %14882 = vmatprep.subr.bf16.mxu0 %v17405_v0  ;;  %15210 = vmatprep.subr.bf16.mxu1 %v17407_v58  ;;  %v17485_v0 = vcombine.high %v1446_v23, %v1454_v46  ;;  %v17487_v58 = vcombine.high %v1447_v13, %v1455_v57  ;;  %v1510_v43 = vld [vmem:[%s19514_s9 + $0x2530] sm:$0xff]  ;;  %v1519_v48 = vld [vmem:[%s19514_s9 + $0x2578] sm:$0xff] }
 0x74b   : > { %14912 = vmatprep.mubr.bf16.mxu0 %v19879_v2  ;;  %15240 = vmatprep.mubr.bf16.mxu1 %v19879_v2  ;;  %v17438_v2 = vcombine.low %v1399_v19, %v1407_v21  ;;  %v1479_v19 = vld [vmem:[%s19514_s9 + $0x2438] sm:$0xff]  ;;  %v1518_v44 = vld [vmem:[%s19514_s9 + $0x2570] sm:$0xff] }
 0x74c   : > { %v1487_v21 = vld [vmem:[%s19514_s9 + $0x2478] sm:$0xff] }
 0x74d   : > { %14883 = vmatpush1.bf16.msra.mxu0 %v17404_v8  ;;  %15211 = vmatpush1.bf16.msra.mxu1 %v17406_v10  ;;  %v17484_v8 = vcombine.low %v1446_v23, %v1454_v46  ;;  %v17486_v10 = vcombine.low %v1447_v13, %v1455_v57  ;;  %v1526_v23 = vld [vmem:[%s19514_s9 + $0x25b0] sm:$0xff]  ;;  %v1527_v13 = vld [vmem:[%s19514_s9 + $0x25b8] sm:$0xff] }
 0x74e   : > { %14884 = vmatprep.subr.bf16.mxu0 %v17421_v11  ;;  %15212 = vmatprep.subr.bf16.mxu1 %v17423_v12  ;;  %v17501_v11 = vcombine.high %v1462_v1, %v1470_v32  ;;  %v17503_v12 = vcombine.high %v1463_v5, %v1471_v22  ;;  %v1534_v46 = vld [vmem:[%s19514_s9 + $0x25f0] sm:$0xff]  ;;  %v1535_v57 = vld [vmem:[%s19514_s9 + $0x25f8] sm:$0xff] }
 0x751   : > { %14885 = vmatpush1.bf16.msra.mxu0 %v17420_v56  ;;  %15213 = vmatpush1.bf16.msra.mxu1 %v17422_v60  ;;  %v17500_v56 = vcombine.low %v1462_v1, %v1470_v32  ;;  %v17502_v60 = vcombine.low %v1463_v5, %v1471_v22  ;;  %v1542_v1 = vld [vmem:[%s19514_s9 + $0x2630] sm:$0xff]  ;;  %v1543_v5 = vld [vmem:[%s19514_s9 + $0x2638] sm:$0xff] }
 0x752   : > { %14886 = vmatprep.subr.bf16.mxu0 %v17437_v27  ;;  %15214 = vmatprep.subr.bf16.mxu1 %v17439_v29  ;;  %v17517_v27 = vcombine.high %v1478_v15, %v1486_v18  ;;  %v17519_v29 = vcombine.high %v1479_v19, %v1487_v21  ;;  %v1550_v32 = vld [vmem:[%s19514_s9 + $0x2670] sm:$0xff]  ;;  %v1551_v22 = vld [vmem:[%s19514_s9 + $0x2678] sm:$0xff] }
 0x755   : > { %14887 = vmatpush1.bf16.msra.mxu0 %v17436_v38  ;;  %15215 = vmatpush1.bf16.msra.mxu1 %v17438_v2  ;;  %v17516_v38 = vcombine.low %v1478_v15, %v1486_v18  ;;  %v17518_v2 = vcombine.low %v1479_v19, %v1487_v21  ;;  %v1558_v15 = vld [vmem:[%s19514_s9 + $0x26b0] sm:$0xff]  ;;  %v1559_v19 = vld [vmem:[%s19514_s9 + $0x26b8] sm:$0xff] }
 0x756   : > { %14888 = vmatprep.subr.bf16.mxu0 %v17453_v39  ;;  %15216 = vmatprep.subr.bf16.mxu1 %v17455_v42  ;;  %v17533_v39 = vcombine.high %v1494_v16, %v1502_v33  ;;  %v17535_v42 = vcombine.high %v1495_v35, %v1503_v36  ;;  %v1566_v18 = vld [vmem:[%s19514_s9 + $0x26f0] sm:$0xff]  ;;  %v1567_v21 = vld [vmem:[%s19514_s9 + $0x26f8] sm:$0xff] }
 0x759   : > { %14889 = vmatpush1.bf16.msra.mxu0 %v17452_v49  ;;  %15217 = vmatpush1.bf16.msra.mxu1 %v17454_v51  ;;  %v17532_v49 = vcombine.low %v1494_v16, %v1502_v33  ;;  %v17534_v51 = vcombine.low %v1495_v35, %v1503_v36  ;;  %v1574_v16 = vld [vmem:[%s19514_s9 + $0x2730] sm:$0xff]  ;;  %v1575_v35 = vld [vmem:[%s19514_s9 + $0x2738] sm:$0xff] }
 0x75a   : > { %14890 = vmatprep.subr.bf16.mxu0 %v17469_v53  ;;  %15218 = vmatprep.subr.bf16.mxu1 %v17471_v55  ;;  %v17549_v53 = vcombine.high %v1510_v43, %v1518_v44  ;;  %v17551_v55 = vcombine.high %v1511_v26, %v1519_v48  ;;  %v1582_v33 = vld [vmem:[%s19514_s9 + $0x2770] sm:$0xff]  ;;  %v1583_v36 = vld [vmem:[%s19514_s9 + $0x2778] sm:$0xff] }
 0x75d   : > { %14891 = vmatpush1.bf16.msra.mxu0 %v17468_v61  ;;  %15219 = vmatpush1.bf16.msra.mxu1 %v17470_v63  ;;  %v17548_v61 = vcombine.low %v1510_v43, %v1518_v44  ;;  %v17550_v63 = vcombine.low %v1511_v26, %v1519_v48  ;;  %v1590_v43 = vld [vmem:[%s19514_s9 + $0x27b0] sm:$0xff]  ;;  %v1591_v26 = vld [vmem:[%s19514_s9 + $0x27b8] sm:$0xff] }
 0x75e   : > { %14892 = vmatprep.subr.bf16.mxu0 %v17485_v0  ;;  %15220 = vmatprep.subr.bf16.mxu1 %v17487_v58  ;;  %v17565_v0 = vcombine.high %v1526_v23, %v1534_v46  ;;  %v17567_v58 = vcombine.high %v1527_v13, %v1535_v57  ;;  %v1598_v44 = vld [vmem:[%s19514_s9 + $0x27f0] sm:$0xff]  ;;  %v1599_v48 = vld [vmem:[%s19514_s9 + $0x27f8] sm:$0xff] }
 0x761   : > { %14893 = vmatpush1.bf16.msra.mxu0 %v17484_v8  ;;  %15221 = vmatpush1.bf16.msra.mxu1 %v17486_v10  ;;  %v17564_v8 = vcombine.low %v1526_v23, %v1534_v46  ;;  %v17566_v10 = vcombine.low %v1527_v13, %v1535_v57  ;;  %v1606_v23 = vld [vmem:[%s19514_s9 + $0x2830] sm:$0xff]  ;;  %v1607_v13 = vld [vmem:[%s19514_s9 + $0x2838] sm:$0xff] }
 0x762   : > { %14894 = vmatprep.subr.bf16.mxu0 %v17501_v11  ;;  %15222 = vmatprep.subr.bf16.mxu1 %v17503_v12  ;;  %v17581_v11 = vcombine.high %v1542_v1, %v1550_v32  ;;  %v17583_v12 = vcombine.high %v1543_v5, %v1551_v22  ;;  %v1614_v46 = vld [vmem:[%s19514_s9 + $0x2870] sm:$0xff]  ;;  %v1615_v57 = vld [vmem:[%s19514_s9 + $0x2878] sm:$0xff] }
 0x765   : > { %14895 = vmatpush1.bf16.msra.mxu0 %v17500_v56  ;;  %15223 = vmatpush1.bf16.msra.mxu1 %v17502_v60  ;;  %v17580_v56 = vcombine.low %v1542_v1, %v1550_v32  ;;  %v17582_v60 = vcombine.low %v1543_v5, %v1551_v22  ;;  %v1622_v1 = vld [vmem:[%s19514_s9 + $0x28b0] sm:$0xff]  ;;  %v1623_v5 = vld [vmem:[%s19514_s9 + $0x28b8] sm:$0xff] }
 0x766   : > { %14896 = vmatprep.subr.bf16.mxu0 %v17517_v27  ;;  %15224 = vmatprep.subr.bf16.mxu1 %v17519_v29  ;;  %v17597_v27 = vcombine.high %v1558_v15, %v1566_v18  ;;  %v17599_v29 = vcombine.high %v1559_v19, %v1567_v21  ;;  %v1630_v32 = vld [vmem:[%s19514_s9 + $0x28f0] sm:$0xff]  ;;  %v1631_v22 = vld [vmem:[%s19514_s9 + $0x28f8] sm:$0xff] }
 0x769   : > { %14897 = vmatpush1.bf16.msra.mxu0 %v17516_v38  ;;  %15225 = vmatpush1.bf16.msra.mxu1 %v17518_v2  ;;  %v17596_v38 = vcombine.low %v1558_v15, %v1566_v18  ;;  %v17598_v2 = vcombine.low %v1559_v19, %v1567_v21  ;;  %v1638_v15 = vld [vmem:[%s19514_s9 + $0x2930] sm:$0xff]  ;;  %v1639_v19 = vld [vmem:[%s19514_s9 + $0x2938] sm:$0xff] }
 0x76a   : > { %14898 = vmatprep.subr.bf16.mxu0 %v17533_v39  ;;  %15226 = vmatprep.subr.bf16.mxu1 %v17535_v42  ;;  %v17613_v39 = vcombine.high %v1574_v16, %v1582_v33  ;;  %v17615_v42 = vcombine.high %v1575_v35, %v1583_v36  ;;  %v1646_v18 = vld [vmem:[%s19514_s9 + $0x2970] sm:$0xff]  ;;  %v1647_v21 = vld [vmem:[%s19514_s9 + $0x2978] sm:$0xff] }
 0x76d   : > { %14899 = vmatpush1.bf16.msra.mxu0 %v17532_v49  ;;  %15227 = vmatpush1.bf16.msra.mxu1 %v17534_v51  ;;  %v17612_v49 = vcombine.low %v1574_v16, %v1582_v33  ;;  %v17614_v51 = vcombine.low %v1575_v35, %v1583_v36  ;;  %v1654_v16 = vld [vmem:[%s19514_s9 + $0x29b0] sm:$0xff]  ;;  %v1655_v35 = vld [vmem:[%s19514_s9 + $0x29b8] sm:$0xff] }
 0x76e   : > { %14900 = vmatprep.subr.bf16.mxu0 %v17549_v53  ;;  %15228 = vmatprep.subr.bf16.mxu1 %v17551_v55  ;;  %v17629_v53 = vcombine.high %v1590_v43, %v1598_v44  ;;  %v17631_v55 = vcombine.high %v1591_v26, %v1599_v48  ;;  %v1662_v33 = vld [vmem:[%s19514_s9 + $0x29f0] sm:$0xff]  ;;  %v1663_v36 = vld [vmem:[%s19514_s9 + $0x29f8] sm:$0xff] }
 0x771   : > { %14901 = vmatpush1.bf16.msra.mxu0 %v17548_v61  ;;  %15229 = vmatpush1.bf16.msra.mxu1 %v17550_v63  ;;  %v17628_v61 = vcombine.low %v1590_v43, %v1598_v44  ;;  %v17630_v63 = vcombine.low %v1591_v26, %v1599_v48  ;;  %v1678_v43 = vld [vmem:[%s19514_s9 + $0x2a70] sm:$0xff]  ;;  %v1671_v44 = vld [vmem:[%s19514_s9 + $0x2a38] sm:$0xff]  ;;  %v17692_v48 = vcombine.low %v1654_v16, %v1662_v33 }
 0x772   : > { %14902 = vmatprep.subr.bf16.mxu0 %v17565_v0  ;;  %15230 = vmatprep.subr.bf16.mxu1 %v17567_v58  ;;  %v17645_v0 = vcombine.high %v1606_v23, %v1614_v46  ;;  %v17647_v58 = vcombine.high %v1607_v13, %v1615_v57  ;;  %v1679_v26 = vld [vmem:[%s19514_s9 + $0x2a78] sm:$0xff] }
 0x775   : > { %14903 = vmatpush1.bf16.msra.mxu0 %v17564_v8  ;;  %15231 = vmatpush1.bf16.msra.mxu1 %v17566_v10  ;;  %v17644_v8 = vcombine.low %v1606_v23, %v1614_v46  ;;  %v17646_v10 = vcombine.low %v1607_v13, %v1615_v57  ;;  %v1687_v23 = vld [vmem:[%s19514_s9 + $0x2ab8] sm:$0xff]  ;;  %v17710_v57 = vcombine.low %v1671_v44, %v1679_v26 }
 0x776   : > { %14904 = vmatprep.subr.bf16.mxu0 %v17581_v11  ;;  %15232 = vmatprep.subr.bf16.mxu1 %v17583_v12  ;;  %v17661_v11 = vcombine.high %v1622_v1, %v1630_v32  ;;  %v17663_v12 = vcombine.high %v1623_v5, %v1631_v22  ;;  %v1695_v46 = vld [vmem:[%s19514_s9 + $0x2af8] sm:$0xff] }
 0x779   : > { %14905 = vmatpush1.bf16.msra.mxu0 %v17580_v56  ;;  %15233 = vmatpush1.bf16.msra.mxu1 %v17582_v60  ;;  %v17660_v56 = vcombine.low %v1622_v1, %v1630_v32  ;;  %v17662_v60 = vcombine.low %v1623_v5, %v1631_v22  ;;  %v1703_v1 = vld [vmem:[%s19514_s9 + $0x2b38] sm:$0xff]  ;;  %v17726_v22 = vcombine.low %v1687_v23, %v1695_v46 }
 0x77a   : > { %14906 = vmatprep.subr.bf16.mxu0 %v17597_v27  ;;  %15234 = vmatprep.subr.bf16.mxu1 %v17599_v29  ;;  %v17677_v27 = vcombine.high %v1638_v15, %v1646_v18  ;;  %v17679_v29 = vcombine.high %v1639_v19, %v1647_v21  ;;  %v1711_v32 = vld [vmem:[%s19514_s9 + $0x2b78] sm:$0xff] }
 0x77d   : > { %14907 = vmatpush1.bf16.msra.mxu0 %v17596_v38  ;;  %15235 = vmatpush1.bf16.msra.mxu1 %v17598_v2  ;;  %v17678_v38 = vcombine.low %v1639_v19, %v1647_v21  ;;  %v17693_v2 = vcombine.high %v1654_v16, %v1662_v33  ;;  %v17742_v21 = vcombine.low %v1703_v1, %v1711_v32  ;;  %v1735_v16 = vld [vmem:[%s19514_s9 + $0x2c38] sm:$0xff] }
 0x77e   : > { %14908 = vmatprep.subr.bf16.mxu0 %v17613_v39  ;;  %15236 = vmatprep.subr.bf16.mxu1 %v17615_v42  ;;  %v17695_v39 = vcombine.high %v1655_v35, %v1663_v36  ;;  %v1670_v42 = vld [vmem:[%s19514_s9 + $0x2a30] sm:$0xff]  ;;  %v1743_v33 = vld [vmem:[%s19514_s9 + $0x2c78] sm:$0xff] }
 0x77f   : > { %v17708_v13 = vcombine.low %v1670_v42, %v1678_v43 }
 0x781   : > { %14909 = vmatpush1.bf16.msra.mxu0 %v17612_v49  ;;  %15237 = vmatpush1.bf16.msra.mxu1 %v17614_v51  ;;  %v17709_v49 = vcombine.high %v1670_v42, %v1678_v43  ;;  %v17711_v51 = vcombine.high %v1671_v44, %v1679_v26  ;;  %v1751_v42 = vld [vmem:[%s19514_s9 + $0x2cb8] sm:$0xff]  ;;  %v17774_v26 = vcombine.low %v1735_v16, %v1743_v33 }
 0x782   : > { %14910 = vmatprep.subr.bf16.mxu0 %v17629_v53  ;;  %15238 = vmatprep.subr.bf16.mxu1 %v17631_v55  ;;  %v1686_v53 = vld [vmem:[%s19514_s9 + $0x2ab0] sm:$0xff]  ;;  %v1759_v43 = vld [vmem:[%s19514_s9 + $0x2cf8] sm:$0xff] }
 0x783   : > { %v1694_v55 = vld [vmem:[%s19514_s9 + $0x2af0] sm:$0xff] }
 0x784   : > { %v17724_v5 = vcombine.low %v1686_v53, %v1694_v55 }
 0x785   : > { %14911 = vmatpush1.bf16.msra.mxu0 %v17628_v61  ;;  %15239 = vmatpush1.bf16.msra.mxu1 %v17630_v63  ;;  %v17725_v61 = vcombine.high %v1686_v53, %v1694_v55  ;;  %v17727_v63 = vcombine.high %v1687_v23, %v1695_v46  ;;  %v1767_v53 = vld [vmem:[%s19514_s9 + $0x2d38] sm:$0xff]  ;;  %v17790_v46 = vcombine.low %v1751_v42, %v1759_v43 }
 0x786   : > { %14921 = vmatprep.subr.bf16.mxu0 %v17645_v0  ;;  %15249 = vmatprep.subr.bf16.mxu1 %v17647_v58  ;;  %v1702_v0 = vld [vmem:[%s19514_s9 + $0x2b30] sm:$0xff]  ;;  %v1775_v55 = vld [vmem:[%s19514_s9 + $0x2d78] sm:$0xff] }
 0x787   : > { %v1710_v58 = vld [vmem:[%s19514_s9 + $0x2b70] sm:$0xff] }
 0x788   : > { %14913 = vmatmul.mubr.bf16.vlgmr.msra.gmra.mrb[12].mxu0 %v19947_v17  ;;  %15241 = vmatmul.mubr.bf16.vlgmr.msra.gmra.mrb[12].mxu1 %v19947_v17  ;;  %v17676_v17 = vcombine.low %v1638_v15, %v1646_v18  ;;  %v1719_v15 = vld [vmem:[%s19514_s9 + $0x2bb8] sm:$0xff]  ;;  %v17740_v19 = vcombine.low %v1702_v0, %v1710_v58 }
 0x789   : > { %14922 = vmatpush1.bf16.msra.mxu0 %v17644_v8  ;;  %15250 = vmatpush1.bf16.msra.mxu1 %v17646_v10  ;;  %v17741_v8 = vcombine.high %v1702_v0, %v1710_v58  ;;  %v17743_v10 = vcombine.high %v1703_v1, %v1711_v32  ;;  %v1727_v18 = vld [vmem:[%s19514_s9 + $0x2bf8] sm:$0xff]  ;;  %v17806_v32 = vcombine.low %v1767_v53, %v1775_v55 }
 0x78a   : > { %14923 = vmatprep.subr.bf16.mxu0 %v17661_v11  ;;  %15251 = vmatprep.subr.bf16.mxu1 %v17663_v12  ;;  %v1718_v11 = vld [vmem:[%s19514_s9 + $0x2bb0] sm:$0xff]  ;;  %v1783_v0 = vld [vmem:[%s19514_s9 + $0x2db8] sm:$0xff] }
 0x78b   : > { %14953 = vmatprep.mubr.bf16.mxu0 %v19960_v28  ;;  %15281 = vmatprep.mubr.bf16.mxu1 %v19960_v28  ;;  %v17694_v28 = vcombine.low %v1655_v35, %v1663_v36  ;;  %v1726_v12 = vld [vmem:[%s19514_s9 + $0x2bf0] sm:$0xff]  ;;  %v17758_v36 = vcombine.low %v1719_v15, %v1727_v18  ;;  %v1791_v58 = vld [vmem:[%s19514_s9 + $0x2df8] sm:$0xff] }
 0x78c   : > { %v17756_v35 = vcombine.low %v1718_v11, %v1726_v12 }
 0x78d   : > { %14924 = vmatpush1.bf16.msra.mxu0 %v17660_v56  ;;  %15252 = vmatpush1.bf16.msra.mxu1 %v17662_v60  ;;  %v17757_v56 = vcombine.high %v1718_v11, %v1726_v12  ;;  %v17759_v60 = vcombine.high %v1719_v15, %v1727_v18  ;;  %v1799_v11 = vld [vmem:[%s19514_s9 + $0x2e38] sm:$0xff]  ;;  %v17822_v18 = vcombine.low %v1783_v0, %v1791_v58 }
 0x78e   : > { %14925 = vmatprep.subr.bf16.mxu0 %v17677_v27  ;;  %15253 = vmatprep.subr.bf16.mxu1 %v17679_v29  ;;  %v1734_v27 = vld [vmem:[%s19514_s9 + $0x2c30] sm:$0xff]  ;;  %v1807_v12 = vld [vmem:[%s19514_s9 + $0x2e78] sm:$0xff] }
 0x78f   : > { %v1742_v29 = vld [vmem:[%s19514_s9 + $0x2c70] sm:$0xff] }
 0x790   : > { %v17772_v44 = vcombine.low %v1734_v27, %v1742_v29 }
 0x791   : > { %14926 = vmatpush1.bf16.msra.mxu0 %v17676_v17  ;;  %15254 = vmatpush1.bf16.msra.mxu1 %v17678_v38  ;;  %v17773_v17 = vcombine.high %v1734_v27, %v1742_v29  ;;  %v17775_v38 = vcombine.high %v1735_v16, %v1743_v33  ;;  %v1815_v27 = vld [vmem:[%s19514_s9 + $0x2eb8] sm:$0xff]  ;;  %v17838_v33 = vcombine.low %v1799_v11, %v1807_v12 }
 0x792   : > { %14927 = vmatprep.subr.bf16.mxu0 %v17693_v2  ;;  %15255 = vmatprep.subr.bf16.mxu1 %v17695_v39  ;;  %v1750_v2 = vld [vmem:[%s19514_s9 + $0x2cb0] sm:$0xff]  ;;  %v1823_v29 = vld [vmem:[%s19514_s9 + $0x2ef8] sm:$0xff] }
 0x793   : > { %v1758_v39 = vld [vmem:[%s19514_s9 + $0x2cf0] sm:$0xff] }
 0x794   : > { %v17788_v23 = vcombine.low %v1750_v2, %v1758_v39 }
 0x795   : > { %14928 = vmatpush1.bf16.msra.mxu0 %v17692_v48  ;;  %15256 = vmatpush1.bf16.msra.mxu1 %v17694_v28  ;;  %v17789_v48 = vcombine.high %v1750_v2, %v1758_v39  ;;  %v17791_v28 = vcombine.high %v1751_v42, %v1759_v43  ;;  %v1831_v2 = vld [vmem:[%s19514_s9 + $0x2f38] sm:$0xff]  ;;  %v17854_v43 = vcombine.low %v1815_v27, %v1823_v29 }
 0x796   : > { %14929 = vmatprep.subr.bf16.mxu0 %v17709_v49  ;;  %15257 = vmatprep.subr.bf16.mxu1 %v17711_v51  ;;  %v1766_v49 = vld [vmem:[%s19514_s9 + $0x2d30] sm:$0xff]  ;;  %v1839_v39 = vld [vmem:[%s19514_s9 + $0x2f78] sm:$0xff] }
 0x797   : > { %v1774_v51 = vld [vmem:[%s19514_s9 + $0x2d70] sm:$0xff] }
 0x798   : > { %v17804_v1 = vcombine.low %v1766_v49, %v1774_v51 }
 0x799   : > { %14930 = vmatpush1.bf16.msra.mxu0 %v17708_v13  ;;  %15258 = vmatpush1.bf16.msra.mxu1 %v17710_v57  ;;  %v17805_v13 = vcombine.high %v1766_v49, %v1774_v51  ;;  %v17807_v57 = vcombine.high %v1767_v53, %v1775_v55  ;;  %v1847_v49 = vld [vmem:[%s19514_s9 + $0x2fb8] sm:$0xff]  ;;  %v17870_v55 = vcombine.low %v1831_v2, %v1839_v39 }
 0x79a   : > { %14931 = vmatprep.subr.bf16.mxu0 %v17725_v61  ;;  %15259 = vmatprep.subr.bf16.mxu1 %v17727_v63  ;;  %v1782_v61 = vld [vmem:[%s19514_s9 + $0x2db0] sm:$0xff]  ;;  %v1855_v51 = vld [vmem:[%s19514_s9 + $0x2ff8] sm:$0xff] }
 0x79b   : > { %v1790_v63 = vld [vmem:[%s19514_s9 + $0x2df0] sm:$0xff] }
 0x79c   : > { %v17820_v15 = vcombine.low %v1782_v61, %v1790_v63 }
 0x79d   : > { %14932 = vmatpush1.bf16.msra.mxu0 %v17724_v5  ;;  %15260 = vmatpush1.bf16.msra.mxu1 %v17726_v22  ;;  %v17821_v5 = vcombine.high %v1782_v61, %v1790_v63  ;;  %v17823_v22 = vcombine.high %v1783_v0, %v1791_v58  ;;  %v1863_v61 = vld [vmem:[%s19514_s9 + $0x3038] sm:$0xff]  ;;  %v17886_v58 = vcombine.low %v1847_v49, %v1855_v51 }
 0x79e   : > { %14933 = vmatprep.subr.bf16.mxu0 %v17741_v8  ;;  %15261 = vmatprep.subr.bf16.mxu1 %v17743_v10  ;;  %v1798_v8 = vld [vmem:[%s19514_s9 + $0x2e30] sm:$0xff]  ;;  %v1871_v63 = vld [vmem:[%s19514_s9 + $0x3078] sm:$0xff] }
 0x79f   : > { %v1806_v10 = vld [vmem:[%s19514_s9 + $0x2e70] sm:$0xff] }
 0x7a0   : > { %v17836_v16 = vcombine.low %v1798_v8, %v1806_v10 }
 0x7a1   : > { %14934 = vmatpush1.bf16.msra.mxu0 %v17740_v19  ;;  %15262 = vmatpush1.bf16.msra.mxu1 %v17742_v21  ;;  %v17837_v19 = vcombine.high %v1798_v8, %v1806_v10  ;;  %v17839_v21 = vcombine.high %v1799_v11, %v1807_v12  ;;  %v1879_v8 = vld [vmem:[%s19514_s9 + $0x30b8] sm:$0xff]  ;;  %v17902_v12 = vcombine.low %v1863_v61, %v1871_v63 }
 0x7a2   : > { %14935 = vmatprep.subr.bf16.mxu0 %v17757_v56  ;;  %15263 = vmatprep.subr.bf16.mxu1 %v17759_v60  ;;  %v1814_v56 = vld [vmem:[%s19514_s9 + $0x2eb0] sm:$0xff]  ;;  %v1887_v10 = vld [vmem:[%s19514_s9 + $0x30f8] sm:$0xff] }
 0x7a3   : > { %v1822_v60 = vld [vmem:[%s19514_s9 + $0x2ef0] sm:$0xff] }
 0x7a4   : > { %v17852_v42 = vcombine.low %v1814_v56, %v1822_v60 }
 0x7a5   : > { %14936 = vmatpush1.bf16.msra.mxu0 %v17756_v35  ;;  %15264 = vmatpush1.bf16.msra.mxu1 %v17758_v36  ;;  %v17853_v35 = vcombine.high %v1814_v56, %v1822_v60  ;;  %v17855_v36 = vcombine.high %v1815_v27, %v1823_v29  ;;  %v1895_v56 = vld [vmem:[%s19514_s9 + $0x3138] sm:$0xff]  ;;  %v17918_v29 = vcombine.low %v1879_v8, %v1887_v10 }
 0x7a6   : > { %14937 = vmatprep.subr.bf16.mxu0 %v17773_v17  ;;  %15265 = vmatprep.subr.bf16.mxu1 %v17775_v38  ;;  %v1830_v17 = vld [vmem:[%s19514_s9 + $0x2f30] sm:$0xff]  ;;  %v1903_v60 = vld [vmem:[%s19514_s9 + $0x3178] sm:$0xff] }
 0x7a7   : > { %v1838_v38 = vld [vmem:[%s19514_s9 + $0x2f70] sm:$0xff] }
 0x7a8   : > { %v17868_v53 = vcombine.low %v1830_v17, %v1838_v38 }
 0x7a9   : > { %14938 = vmatpush1.bf16.msra.mxu0 %v17772_v44  ;;  %15266 = vmatpush1.bf16.msra.mxu1 %v17774_v26  ;;  %v17869_v44 = vcombine.high %v1830_v17, %v1838_v38  ;;  %v17871_v26 = vcombine.high %v1831_v2, %v1839_v39  ;;  %v1911_v17 = vld [vmem:[%s19514_s9 + $0x31b8] sm:$0xff]  ;;  %v17934_v2 = vcombine.low %v1895_v56, %v1903_v60 }
 0x7aa   : > { %14939 = vmatprep.subr.bf16.mxu0 %v17789_v48  ;;  %15267 = vmatprep.subr.bf16.mxu1 %v17791_v28  ;;  %v1846_v48 = vld [vmem:[%s19514_s9 + $0x2fb0] sm:$0xff]  ;;  %v1919_v38 = vld [vmem:[%s19514_s9 + $0x31f8] sm:$0xff] }
 0x7ab   : > { %v1854_v28 = vld [vmem:[%s19514_s9 + $0x2ff0] sm:$0xff] }
 0x7ac   : > { %v17884_v0 = vcombine.low %v1846_v48, %v1854_v28 }
 0x7ad   : > { %14940 = vmatpush1.bf16.msra.mxu0 %v17788_v23  ;;  %15268 = vmatpush1.bf16.msra.mxu1 %v17790_v46  ;;  %v17885_v23 = vcombine.high %v1846_v48, %v1854_v28  ;;  %v17887_v46 = vcombine.high %v1847_v49, %v1855_v51  ;;  %v1935_v48 = vld [vmem:[%s19514_s9 + $0x3278] sm:$0xff] }
 0x7ae   : > { %14941 = vmatprep.subr.bf16.mxu0 %v17805_v13  ;;  %15269 = vmatprep.subr.bf16.mxu1 %v17807_v57  ;;  %v1862_v13 = vld [vmem:[%s19514_s9 + $0x3030] sm:$0xff] }
 0x7af   : > { %v1870_v57 = vld [vmem:[%s19514_s9 + $0x3070] sm:$0xff] }
 0x7b0   : > { %v17900_v11 = vcombine.low %v1862_v13, %v1870_v57 }
 0x7b1   : > { %14942 = vmatpush1.bf16.msra.mxu0 %v17804_v1  ;;  %15270 = vmatpush1.bf16.msra.mxu1 %v17806_v32  ;;  %v17901_v1 = vcombine.high %v1862_v13, %v1870_v57  ;;  %v17903_v32 = vcombine.high %v1863_v61, %v1871_v63 }
 0x7b2   : > { %14943 = vmatprep.subr.bf16.mxu0 %v17821_v5  ;;  %15271 = vmatprep.subr.bf16.mxu1 %v17823_v22  ;;  %v1878_v5 = vld [vmem:[%s19514_s9 + $0x30b0] sm:$0xff] }
 0x7b3   : > { %v1886_v22 = vld [vmem:[%s19514_s9 + $0x30f0] sm:$0xff] }
 0x7b4   : > { %v17916_v27 = vcombine.low %v1878_v5, %v1886_v22 }
 0x7b5   : > { %14944 = vmatpush1.bf16.msra.mxu0 %v17820_v15  ;;  %15272 = vmatpush1.bf16.msra.mxu1 %v17822_v18  ;;  %v17917_v15 = vcombine.high %v1878_v5, %v1886_v22  ;;  %v17919_v18 = vcombine.high %v1879_v8, %v1887_v10 }
 0x7b6   : > { %14945 = vmatprep.subr.bf16.mxu0 %v17837_v19  ;;  %15273 = vmatprep.subr.bf16.mxu1 %v17839_v21  ;;  %v1894_v19 = vld [vmem:[%s19514_s9 + $0x3130] sm:$0xff] }
 0x7b7   : > { %v1902_v21 = vld [vmem:[%s19514_s9 + $0x3170] sm:$0xff] }
 0x7b9   : > { %14946 = vmatpush1.bf16.msra.mxu0 %v17836_v16  ;;  %15274 = vmatpush1.bf16.msra.mxu1 %v17838_v33  ;;  %v17933_v16 = vcombine.high %v1894_v19, %v1902_v21  ;;  %v17935_v33 = vcombine.high %v1895_v56, %v1903_v60 }
 0x7ba   : > { %14947 = vmatprep.subr.bf16.mxu0 %v17853_v35  ;;  %15275 = vmatprep.subr.bf16.mxu1 %v17855_v36  ;;  %v1910_v35 = vld [vmem:[%s19514_s9 + $0x31b0] sm:$0xff] }
 0x7bb   : > { %v1918_v36 = vld [vmem:[%s19514_s9 + $0x31f0] sm:$0xff] }
 0x7bc   : > { %v17949_v39 = vcombine.high %v1910_v35, %v1918_v36  ;;  %v17948_v28 = vcombine.low %v1910_v35, %v1918_v36 }
 0x7bd   : > { %14948 = vmatpush1.bf16.msra.mxu0 %v17852_v42  ;;  %15276 = vmatpush1.bf16.msra.mxu1 %v17854_v43  ;;  %v17951_v42 = vcombine.high %v1911_v17, %v1919_v38  ;;  %v1926_v43 = vld [vmem:[%s19514_s9 + $0x3230] sm:$0xff] }
 0x7be   : > { %14949 = vmatprep.subr.bf16.mxu0 %v17869_v44  ;;  %15277 = vmatprep.subr.bf16.mxu1 %v17871_v26  ;;  %v1934_v44 = vld [vmem:[%s19514_s9 + $0x3270] sm:$0xff]  ;;  %v1927_v26 = vld [vmem:[%s19514_s9 + $0x3238] sm:$0xff] }
 0x7bf   : > { %v17965_v49 = vcombine.high %v1926_v43, %v1934_v44  ;;  %v17967_v51 = vcombine.high %v1927_v26, %v1935_v48  ;;  %v17964_v13 = vcombine.low %v1926_v43, %v1934_v44  ;;  %v17966_v57 = vcombine.low %v1927_v26, %v1935_v48 }
 0x7c1   : > { %14950 = vmatpush1.bf16.msra.mxu0 %v17868_v53  ;;  %15278 = vmatpush1.bf16.msra.mxu1 %v17870_v55  ;;  %v1942_v53 = vld [vmem:[%s19514_s9 + $0x32b0] sm:$0xff] }
 0x7c2   : > { %14951 = vmatprep.subr.bf16.mxu0 %v17885_v23  ;;  %15279 = vmatprep.subr.bf16.mxu1 %v17887_v46  ;;  %v1950_v55 = vld [vmem:[%s19514_s9 + $0x32f0] sm:$0xff]  ;;  %v1943_v23 = vld [vmem:[%s19514_s9 + $0x32b8] sm:$0xff] }
 0x7c3   : > { %v1951_v46 = vld [vmem:[%s19514_s9 + $0x32f8] sm:$0xff]  ;;  %v17981_v61 = vcombine.high %v1942_v53, %v1950_v55  ;;  %v17980_v5 = vcombine.low %v1942_v53, %v1950_v55 }
 0x7c4   : > { %v17983_v63 = vcombine.high %v1943_v23, %v1951_v46  ;;  %v17982_v22 = vcombine.low %v1943_v23, %v1951_v46 }
 0x7c5   : > { %14952 = vmatpush1.bf16.msra.mxu0 %v17884_v0  ;;  %15280 = vmatpush1.bf16.msra.mxu1 %v17886_v58  ;;  %v1958_v0 = vld [vmem:[%s19514_s9 + $0x3330] sm:$0xff] }
 0x7c6   : > { %14962 = vmatprep.subr.bf16.mxu0 %v17901_v1  ;;  %15290 = vmatprep.subr.bf16.mxu1 %v17903_v32  ;;  %v1966_v58 = vld [vmem:[%s19514_s9 + $0x3370] sm:$0xff]  ;;  %v1959_v1 = vld [vmem:[%s19514_s9 + $0x3338] sm:$0xff] }
 0x7c7   : > { %v1967_v32 = vld [vmem:[%s19514_s9 + $0x3378] sm:$0xff]  ;;  %v17997_v8 = vcombine.high %v1958_v0, %v1966_v58 }
 0x7c8   : > { %14954 = vmatmul.mubr.bf16.vlgmr.msra.gmra.mrb[12].mxu0 %v20028_v47  ;;  %15282 = vmatmul.mubr.bf16.vlgmr.msra.gmra.mrb[12].mxu1 %v20028_v47  ;;  %v17932_v47 = vcombine.low %v1894_v19, %v1902_v21  ;;  %v17999_v10 = vcombine.high %v1959_v1, %v1967_v32  ;;  %v17996_v19 = vcombine.low %v1958_v0, %v1966_v58 }
 0x7c9   : > { %14963 = vmatpush1.bf16.msra.mxu0 %v17900_v11  ;;  %15291 = vmatpush1.bf16.msra.mxu1 %v17902_v12  ;;  %v1974_v11 = vld [vmem:[%s19514_s9 + $0x33b0] sm:$0xff]  ;;  %v17998_v21 = vcombine.low %v1959_v1, %v1967_v32 }
 0x7ca   : > { %14964 = vmatprep.subr.bf16.mxu0 %v17917_v15  ;;  %15292 = vmatprep.subr.bf16.mxu1 %v17919_v18  ;;  %v1982_v12 = vld [vmem:[%s19514_s9 + $0x33f0] sm:$0xff]  ;;  %v1975_v15 = vld [vmem:[%s19514_s9 + $0x33b8] sm:$0xff] }
 0x7cb   : > { %14994 = vmatprep.mubr.bf16.mxu0 %v20041_v59  ;;  %15322 = vmatprep.mubr.bf16.mxu1 %v20041_v59  ;;  %v17950_v59 = vcombine.low %v1911_v17, %v1919_v38  ;;  %v1983_v18 = vld [vmem:[%s19514_s9 + $0x33f8] sm:$0xff]  ;;  %v18013_v56 = vcombine.high %v1974_v11, %v1982_v12  ;;  %v18012_v35 = vcombine.low %v1974_v11, %v1982_v12 }
 0x7cc   : > { %v18015_v60 = vcombine.high %v1975_v15, %v1983_v18  ;;  %v18014_v36 = vcombine.low %v1975_v15, %v1983_v18 }
 0x7cd   : > { %14965 = vmatpush1.bf16.msra.mxu0 %v17916_v27  ;;  %15293 = vmatpush1.bf16.msra.mxu1 %v17918_v29  ;;  %v1990_v27 = vld [vmem:[%s19514_s9 + $0x3430] sm:$0xff] }
 0x7ce   : > { %14966 = vmatprep.subr.bf16.mxu0 %v17933_v16  ;;  %15294 = vmatprep.subr.bf16.mxu1 %v17935_v33  ;;  %v1998_v29 = vld [vmem:[%s19514_s9 + $0x3470] sm:$0xff]  ;;  %v1991_v16 = vld [vmem:[%s19514_s9 + $0x3438] sm:$0xff] }
 0x7cf   : > { %v1999_v33 = vld [vmem:[%s19514_s9 + $0x3478] sm:$0xff]  ;;  %v18029_v17 = vcombine.high %v1990_v27, %v1998_v29  ;;  %v18028_v43 = vcombine.low %v1990_v27, %v1998_v29 }
 0x7d0   : > { %v18031_v38 = vcombine.high %v1991_v16, %v1999_v33  ;;  %v18030_v44 = vcombine.low %v1991_v16, %v1999_v33 }
 0x7d1   : > { %14967 = vmatpush1.bf16.msra.mxu0 %v17932_v47  ;;  %15295 = vmatpush1.bf16.msra.mxu1 %v17934_v2  ;;  %v2006_v47 = vld [vmem:[%s19514_s9 + $0x34b0] sm:$0xff] }
 0x7d2   : > { %14968 = vmatprep.subr.bf16.mxu0 %v17949_v39  ;;  %15296 = vmatprep.subr.bf16.mxu1 %v17951_v42  ;;  %v2014_v2 = vld [vmem:[%s19514_s9 + $0x34f0] sm:$0xff]  ;;  %v2007_v39 = vld [vmem:[%s19514_s9 + $0x34b8] sm:$0xff] }
 0x7d3   : > { %v2015_v42 = vld [vmem:[%s19514_s9 + $0x34f8] sm:$0xff]  ;;  %v18045_v26 = vcombine.high %v2006_v47, %v2014_v2  ;;  %v18044_v53 = vcombine.low %v2006_v47, %v2014_v2 }
 0x7d4   : > { %v18047_v48 = vcombine.high %v2007_v39, %v2015_v42  ;;  %v18046_v55 = vcombine.low %v2007_v39, %v2015_v42 }
 0x7d5   : > { %14969 = vmatpush1.bf16.msra.mxu0 %v17948_v28  ;;  %15297 = vmatpush1.bf16.msra.mxu1 %v17950_v59  ;;  %v2022_v28 = vld [vmem:[%s19514_s9 + $0x3530] sm:$0xff] }
 0x7d6   : > { %14970 = vmatprep.subr.bf16.mxu0 %v17965_v49  ;;  %15298 = vmatprep.subr.bf16.mxu1 %v17967_v51  ;;  %v2030_v59 = vld [vmem:[%s19514_s9 + $0x3570] sm:$0xff]  ;;  %v2023_v49 = vld [vmem:[%s19514_s9 + $0x3538] sm:$0xff] }
 0x7d7   : > { %v2031_v51 = vld [vmem:[%s19514_s9 + $0x3578] sm:$0xff]  ;;  %v18061_v23 = vcombine.high %v2022_v28, %v2030_v59  ;;  %v18060_v0 = vcombine.low %v2022_v28, %v2030_v59 }
 0x7d8   : > { %v18063_v46 = vcombine.high %v2023_v49, %v2031_v51  ;;  %v18062_v58 = vcombine.low %v2023_v49, %v2031_v51 }
 0x7d9   : > { %14971 = vmatpush1.bf16.msra.mxu0 %v17964_v13  ;;  %15299 = vmatpush1.bf16.msra.mxu1 %v17966_v57  ;;  %v2038_v13 = vld [vmem:[%s19514_s9 + $0x35b0] sm:$0xff] }
 0x7da   : > { %14972 = vmatprep.subr.bf16.mxu0 %v17981_v61  ;;  %15300 = vmatprep.subr.bf16.mxu1 %v17983_v63  ;;  %v2046_v57 = vld [vmem:[%s19514_s9 + $0x35f0] sm:$0xff]  ;;  %v2039_v61 = vld [vmem:[%s19514_s9 + $0x35b8] sm:$0xff] }
 0x7db   : > { %v2047_v63 = vld [vmem:[%s19514_s9 + $0x35f8] sm:$0xff]  ;;  %v18077_v1 = vcombine.high %v2038_v13, %v2046_v57  ;;  %v18076_v11 = vcombine.low %v2038_v13, %v2046_v57 }
 0x7dc   : > { %v18079_v32 = vcombine.high %v2039_v61, %v2047_v63  ;;  %v18078_v12 = vcombine.low %v2039_v61, %v2047_v63 }
 0x7dd   : > { %14973 = vmatpush1.bf16.msra.mxu0 %v17980_v5  ;;  %15301 = vmatpush1.bf16.msra.mxu1 %v17982_v22  ;;  %v2054_v5 = vld [vmem:[%s19514_s9 + $0x3630] sm:$0xff] }
 0x7de   : > { %14974 = vmatprep.subr.bf16.mxu0 %v17997_v8  ;;  %15302 = vmatprep.subr.bf16.mxu1 %v17999_v10  ;;  %v2062_v22 = vld [vmem:[%s19514_s9 + $0x3670] sm:$0xff]  ;;  %v2055_v8 = vld [vmem:[%s19514_s9 + $0x3638] sm:$0xff] }
 0x7df   : > { %v2063_v10 = vld [vmem:[%s19514_s9 + $0x3678] sm:$0xff]  ;;  %v18093_v15 = vcombine.high %v2054_v5, %v2062_v22  ;;  %v18092_v27 = vcombine.low %v2054_v5, %v2062_v22 }
 0x7e0   : > { %v18095_v18 = vcombine.high %v2055_v8, %v2063_v10  ;;  %v18094_v29 = vcombine.low %v2055_v8, %v2063_v10 }
 0x7e1   : > { %14975 = vmatpush1.bf16.msra.mxu0 %v17996_v19  ;;  %15303 = vmatpush1.bf16.msra.mxu1 %v17998_v21  ;;  %v2070_v19 = vld [vmem:[%s19514_s9 + $0x36b0] sm:$0xff] }
 0x7e2   : > { %14976 = vmatprep.subr.bf16.mxu0 %v18013_v56  ;;  %15304 = vmatprep.subr.bf16.mxu1 %v18015_v60  ;;  %v2078_v21 = vld [vmem:[%s19514_s9 + $0x36f0] sm:$0xff]  ;;  %v2071_v56 = vld [vmem:[%s19514_s9 + $0x36b8] sm:$0xff] }
 0x7e3   : > { %v2079_v60 = vld [vmem:[%s19514_s9 + $0x36f8] sm:$0xff]  ;;  %v18109_v16 = vcombine.high %v2070_v19, %v2078_v21  ;;  %v18108_v47 = vcombine.low %v2070_v19, %v2078_v21 }
 0x7e4   : > { %v18111_v33 = vcombine.high %v2071_v56, %v2079_v60  ;;  %v18110_v2 = vcombine.low %v2071_v56, %v2079_v60 }
 0x7e5   : > { %14977 = vmatpush1.bf16.msra.mxu0 %v18012_v35  ;;  %15305 = vmatpush1.bf16.msra.mxu1 %v18014_v36  ;;  %v2086_v35 = vld [vmem:[%s19514_s9 + $0x3730] sm:$0xff] }
 0x7e6   : > { %14978 = vmatprep.subr.bf16.mxu0 %v18029_v17  ;;  %15306 = vmatprep.subr.bf16.mxu1 %v18031_v38  ;;  %v2094_v36 = vld [vmem:[%s19514_s9 + $0x3770] sm:$0xff]  ;;  %v2087_v17 = vld [vmem:[%s19514_s9 + $0x3738] sm:$0xff] }
 0x7e7   : > { %v2095_v38 = vld [vmem:[%s19514_s9 + $0x3778] sm:$0xff]  ;;  %v18125_v39 = vcombine.high %v2086_v35, %v2094_v36  ;;  %v18124_v28 = vcombine.low %v2086_v35, %v2094_v36 }
 0x7e8   : > { %v18127_v42 = vcombine.high %v2087_v17, %v2095_v38  ;;  %v18126_v59 = vcombine.low %v2087_v17, %v2095_v38  ;;  %v2182_v38 = vld [vmem:[%s19514_s9 + $0x3a30] sm:$0xff] }
 0x7e9   : > { %14979 = vmatpush1.bf16.msra.mxu0 %v18028_v43  ;;  %15307 = vmatpush1.bf16.msra.mxu1 %v18030_v44  ;;  %v2102_v43 = vld [vmem:[%s19514_s9 + $0x37b0] sm:$0xff] }
 0x7ea   : > { %14980 = vmatprep.subr.bf16.mxu0 %v18045_v26  ;;  %15308 = vmatprep.subr.bf16.mxu1 %v18047_v48  ;;  %v2110_v44 = vld [vmem:[%s19514_s9 + $0x37f0] sm:$0xff]  ;;  %v2103_v26 = vld [vmem:[%s19514_s9 + $0x37b8] sm:$0xff] }
 0x7eb   : > { %v2111_v48 = vld [vmem:[%s19514_s9 + $0x37f8] sm:$0xff]  ;;  %v18141_v49 = vcombine.high %v2102_v43, %v2110_v44  ;;  %v18140_v13 = vcombine.low %v2102_v43, %v2110_v44 }
 0x7ec   : > { %v18143_v51 = vcombine.high %v2103_v26, %v2111_v48  ;;  %v18142_v57 = vcombine.low %v2103_v26, %v2111_v48  ;;  %v2198_v26 = vld [vmem:[%s19514_s9 + $0x3ab0] sm:$0xff] }
 0x7ed   : > { %14981 = vmatpush1.bf16.msra.mxu0 %v18044_v53  ;;  %15309 = vmatpush1.bf16.msra.mxu1 %v18046_v55  ;;  %v2118_v53 = vld [vmem:[%s19514_s9 + $0x3830] sm:$0xff] }
 0x7ee   : > { %14982 = vmatprep.subr.bf16.mxu0 %v18061_v23  ;;  %15310 = vmatprep.subr.bf16.mxu1 %v18063_v46  ;;  %v2126_v55 = vld [vmem:[%s19514_s9 + $0x3870] sm:$0xff]  ;;  %v2119_v23 = vld [vmem:[%s19514_s9 + $0x3838] sm:$0xff] }
 0x7ef   : > { %v2127_v46 = vld [vmem:[%s19514_s9 + $0x3878] sm:$0xff]  ;;  %v18157_v61 = vcombine.high %v2118_v53, %v2126_v55  ;;  %v18156_v5 = vcombine.low %v2118_v53, %v2126_v55  ;;  %v2206_v48 = vld [vmem:[%s19514_s9 + $0x3af0] sm:$0xff] }
 0x7f0   : > { %v18159_v63 = vcombine.high %v2119_v23, %v2127_v46  ;;  %v18158_v22 = vcombine.low %v2119_v23, %v2127_v46  ;;  %v18237_v53 = vcombine.high %v2198_v26, %v2206_v48  ;;  %v2214_v23 = vld [vmem:[%s19514_s9 + $0x3b30] sm:$0xff] }
 0x7f1   : > { %14983 = vmatpush1.bf16.msra.mxu0 %v18060_v0  ;;  %15311 = vmatpush1.bf16.msra.mxu1 %v18062_v58  ;;  %v2134_v0 = vld [vmem:[%s19514_s9 + $0x38b0] sm:$0xff] }
 0x7f2   : > { %14984 = vmatprep.subr.bf16.mxu0 %v18077_v1  ;;  %15312 = vmatprep.subr.bf16.mxu1 %v18079_v32  ;;  %v2142_v58 = vld [vmem:[%s19514_s9 + $0x38f0] sm:$0xff]  ;;  %v2135_v1 = vld [vmem:[%s19514_s9 + $0x38b8] sm:$0xff] }
 0x7f3   : > { %v2143_v32 = vld [vmem:[%s19514_s9 + $0x38f8] sm:$0xff]  ;;  %v18173_v8 = vcombine.high %v2134_v0, %v2142_v58  ;;  %v18172_v19 = vcombine.low %v2134_v0, %v2142_v58  ;;  %v2222_v46 = vld [vmem:[%s19514_s9 + $0x3b70] sm:$0xff] }
 0x7f4   : > { %v18175_v10 = vcombine.high %v2135_v1, %v2143_v32  ;;  %v18174_v21 = vcombine.low %v2135_v1, %v2143_v32  ;;  %v18253_v0 = vcombine.high %v2214_v23, %v2222_v46  ;;  %v2230_v1 = vld [vmem:[%s19514_s9 + $0x3bb0] sm:$0xff] }
 0x7f5   : > { %14985 = vmatpush1.bf16.msra.mxu0 %v18076_v11  ;;  %15313 = vmatpush1.bf16.msra.mxu1 %v18078_v12  ;;  %v2150_v11 = vld [vmem:[%s19514_s9 + $0x3930] sm:$0xff] }
 0x7f6   : > { %14986 = vmatprep.subr.bf16.mxu0 %v18093_v15  ;;  %15314 = vmatprep.subr.bf16.mxu1 %v18095_v18  ;;  %v2158_v12 = vld [vmem:[%s19514_s9 + $0x3970] sm:$0xff]  ;;  %v2151_v15 = vld [vmem:[%s19514_s9 + $0x3938] sm:$0xff] }
 0x7f7   : > { %v2159_v18 = vld [vmem:[%s19514_s9 + $0x3978] sm:$0xff]  ;;  %v18189_v56 = vcombine.high %v2150_v11, %v2158_v12  ;;  %v2238_v32 = vld [vmem:[%s19514_s9 + $0x3bf0] sm:$0xff] }
 0x7f8   : > { %v18191_v60 = vcombine.high %v2151_v15, %v2159_v18  ;;  %v18190_v35 = vcombine.low %v2151_v15, %v2159_v18  ;;  %v2246_v15 = vld [vmem:[%s19514_s9 + $0x3c30] sm:$0xff] }
 0x7f9   : > { %14987 = vmatpush1.bf16.msra.mxu0 %v18092_v27  ;;  %15315 = vmatpush1.bf16.msra.mxu1 %v18094_v29  ;;  %v2166_v27 = vld [vmem:[%s19514_s9 + $0x39b0] sm:$0xff] }
 0x7fa   : > { %14988 = vmatprep.subr.bf16.mxu0 %v18109_v16  ;;  %15316 = vmatprep.subr.bf16.mxu1 %v18111_v33  ;;  %v2174_v29 = vld [vmem:[%s19514_s9 + $0x39f0] sm:$0xff]  ;;  %v2167_v16 = vld [vmem:[%s19514_s9 + $0x39b8] sm:$0xff] }
 0x7fb   : > { %v2175_v33 = vld [vmem:[%s19514_s9 + $0x39f8] sm:$0xff]  ;;  %v18205_v36 = vcombine.high %v2166_v27, %v2174_v29  ;;  %v2254_v18 = vld [vmem:[%s19514_s9 + $0x3c70] sm:$0xff] }
 0x7fc   : > { %v18207_v17 = vcombine.high %v2167_v16, %v2175_v33 }
 0x7fd   : > { %14989 = vmatpush1.bf16.msra.mxu0 %v18108_v47  ;;  %15317 = vmatpush1.bf16.msra.mxu1 %v18110_v2  ;;  %v2190_v47 = vld [vmem:[%s19514_s9 + $0x3a70] sm:$0xff]  ;;  %v2183_v2 = vld [vmem:[%s19514_s9 + $0x3a38] sm:$0xff] }
 0x7fe   : > { %14990 = vmatprep.subr.bf16.mxu0 %v18125_v39  ;;  %15318 = vmatprep.subr.bf16.mxu1 %v18127_v42  ;;  %v2191_v39 = vld [vmem:[%s19514_s9 + $0x3a78] sm:$0xff]  ;;  %v18204_v42 = vcombine.low %v2166_v27, %v2174_v29  ;;  %v18221_v43 = vcombine.high %v2182_v38, %v2190_v47  ;;  %v18285_v27 = vcombine.high %v2246_v15, %v2254_v18 }
 0x7ff   : > { %v18223_v44 = vcombine.high %v2183_v2, %v2191_v39 }
 0x801   : > { %14991 = vmatpush1.bf16.msra.mxu0 %v18124_v28  ;;  %15319 = vmatpush1.bf16.msra.mxu1 %v18126_v59  ;;  %v2199_v28 = vld [vmem:[%s19514_s9 + $0x3ab8] sm:$0xff] }
 0x802   : > { %14992 = vmatprep.subr.bf16.mxu0 %v18141_v49  ;;  %15320 = vmatprep.subr.bf16.mxu1 %v18143_v51  ;;  %v2207_v59 = vld [vmem:[%s19514_s9 + $0x3af8] sm:$0xff]  ;;  %v18220_v49 = vcombine.low %v2182_v38, %v2190_v47  ;;  %v18222_v51 = vcombine.low %v2183_v2, %v2191_v39  ;;  %v2278_v2 = vld [vmem:[%s19514_s9 + $0x3d30] sm:$0xff] }
 0x803   : > { %v18239_v55 = vcombine.high %v2199_v28, %v2207_v59  ;;  %v2286_v39 = vld [vmem:[%s19514_s9 + $0x3d70] sm:$0xff] }
 0x805   : > { %14993 = vmatpush1.bf16.msra.mxu0 %v18140_v13  ;;  %15321 = vmatpush1.bf16.msra.mxu1 %v18142_v57  ;;  %v2215_v13 = vld [vmem:[%s19514_s9 + $0x3b38] sm:$0xff] }
 0x806   : > { %15003 = vmatprep.subr.bf16.mxu0 %v18157_v61  ;;  %15331 = vmatprep.subr.bf16.mxu1 %v18159_v63  ;;  %v2223_v57 = vld [vmem:[%s19514_s9 + $0x3b78] sm:$0xff]  ;;  %v18236_v61 = vcombine.low %v2198_v26, %v2206_v48  ;;  %v18238_v63 = vcombine.low %v2199_v28, %v2207_v59  ;;  %v18317_v26 = vcombine.high %v2278_v2, %v2286_v39  ;;  %v2294_v28 = vld [vmem:[%s19514_s9 + $0x3db0] sm:$0xff] }
 0x807   : > { %v18255_v58 = vcombine.high %v2215_v13, %v2223_v57  ;;  %v2302_v59 = vld [vmem:[%s19514_s9 + $0x3df0] sm:$0xff] }
 0x808   : > { %14995 = vmatmul.mubr.bf16.vlgmr.msra.gmra.mrb[12].mxu0 %v20109_v54  ;;  %15323 = vmatmul.mubr.bf16.vlgmr.msra.gmra.mrb[12].mxu1 %v20109_v54  ;;  %v18188_v54 = vcombine.low %v2150_v11, %v2158_v12  ;;  %v18269_v11 = vcombine.high %v2230_v1, %v2238_v32 }
 0x809   : > { %15004 = vmatpush1.bf16.msra.mxu0 %v18156_v5  ;;  %15332 = vmatpush1.bf16.msra.mxu1 %v18158_v22  ;;  %v2231_v5 = vld [vmem:[%s19514_s9 + $0x3bb8] sm:$0xff] }
 0x80a   : > { %15005 = vmatprep.subr.bf16.mxu0 %v18173_v8  ;;  %15333 = vmatprep.subr.bf16.mxu1 %v18175_v10  ;;  %v2239_v22 = vld [vmem:[%s19514_s9 + $0x3bf8] sm:$0xff]  ;;  %v18252_v8 = vcombine.low %v2214_v23, %v2222_v46  ;;  %v18254_v10 = vcombine.low %v2215_v13, %v2223_v57  ;;  %v18333_v23 = vcombine.high %v2294_v28, %v2302_v59  ;;  %v2310_v13 = vld [vmem:[%s19514_s9 + $0x3e30] sm:$0xff] }
 0x80b   : > { %15035 = vmatprep.mubr.bf16.mxu0 %v20122_v31  ;;  %15363 = vmatprep.mubr.bf16.mxu1 %v20122_v31  ;;  %v18206_v31 = vcombine.low %v2167_v16, %v2175_v33  ;;  %v18271_v12 = vcombine.high %v2231_v5, %v2239_v22  ;;  %v2262_v16 = vld [vmem:[%s19514_s9 + $0x3cb0] sm:$0xff] }
 0x80c   : > { %v2270_v33 = vld [vmem:[%s19514_s9 + $0x3cf0] sm:$0xff] }
 0x80d   : > { %15006 = vmatpush1.bf16.msra.mxu0 %v18172_v19  ;;  %15334 = vmatpush1.bf16.msra.mxu1 %v18174_v21  ;;  %v2247_v19 = vld [vmem:[%s19514_s9 + $0x3c38] sm:$0xff]  ;;  %v18301_v38 = vcombine.high %v2262_v16, %v2270_v33  ;;  %v2318_v57 = vld [vmem:[%s19514_s9 + $0x3e70] sm:$0xff] }
 0x80e   : > { %15007 = vmatprep.subr.bf16.mxu0 %v18189_v56  ;;  %15335 = vmatprep.subr.bf16.mxu1 %v18191_v60  ;;  %v2255_v21 = vld [vmem:[%s19514_s9 + $0x3c78] sm:$0xff]  ;;  %v18268_v56 = vcombine.low %v2230_v1, %v2238_v32  ;;  %v18270_v60 = vcombine.low %v2231_v5, %v2239_v22  ;;  %v18349_v1 = vcombine.high %v2310_v13, %v2318_v57  ;;  %v2326_v5 = vld [vmem:[%s19514_s9 + $0x3eb0] sm:$0xff] }
 0x80f   : > { %v18287_v29 = vcombine.high %v2247_v19, %v2255_v21  ;;  %v2334_v22 = vld [vmem:[%s19514_s9 + $0x3ef0] sm:$0xff] }
 0x811   : > { %15008 = vmatpush1.bf16.msra.mxu0 %v18188_v54  ;;  %15336 = vmatpush1.bf16.msra.mxu1 %v18190_v35  ;;  %v2263_v54 = vld [vmem:[%s19514_s9 + $0x3cb8] sm:$0xff] }
 0x812   : > { %15009 = vmatprep.subr.bf16.mxu0 %v18205_v36  ;;  %15337 = vmatprep.subr.bf16.mxu1 %v18207_v17  ;;  %v2271_v35 = vld [vmem:[%s19514_s9 + $0x3cf8] sm:$0xff]  ;;  %v18284_v36 = vcombine.low %v2246_v15, %v2254_v18  ;;  %v18286_v17 = vcombine.low %v2247_v19, %v2255_v21  ;;  %v18365_v15 = vcombine.high %v2326_v5, %v2334_v22  ;;  %v2342_v19 = vld [vmem:[%s19514_s9 + $0x3f30] sm:$0xff] }
 0x813   : > { %v18303_v47 = vcombine.high %v2263_v54, %v2271_v35  ;;  %v2350_v21 = vld [vmem:[%s19514_s9 + $0x3f70] sm:$0xff] }
 0x815   : > { %15010 = vmatpush1.bf16.msra.mxu0 %v18204_v42  ;;  %15338 = vmatpush1.bf16.msra.mxu1 %v18206_v31  ;;  %v2279_v42 = vld [vmem:[%s19514_s9 + $0x3d38] sm:$0xff] }
 0x816   : > { %15011 = vmatprep.subr.bf16.mxu0 %v18221_v43  ;;  %15339 = vmatprep.subr.bf16.mxu1 %v18223_v44  ;;  %v2287_v31 = vld [vmem:[%s19514_s9 + $0x3d78] sm:$0xff]  ;;  %v18300_v43 = vcombine.low %v2262_v16, %v2270_v33  ;;  %v18302_v44 = vcombine.low %v2263_v54, %v2271_v35  ;;  %v18381_v16 = vcombine.high %v2342_v19, %v2350_v21  ;;  %v2358_v54 = vld [vmem:[%s19514_s9 + $0x3fb0] sm:$0xff] }
 0x817   : > { %v18319_v48 = vcombine.high %v2279_v42, %v2287_v31  ;;  %v2366_v35 = vld [vmem:[%s19514_s9 + $0x3ff0] sm:$0xff] }
 0x819   : > { %15012 = vmatpush1.bf16.msra.mxu0 %v18220_v49  ;;  %15340 = vmatpush1.bf16.msra.mxu1 %v18222_v51  ;;  %v2295_v49 = vld [vmem:[%s19514_s9 + $0x3db8] sm:$0xff] }
 0x81a   : > { %15013 = vmatprep.subr.bf16.mxu0 %v18237_v53  ;;  %15341 = vmatprep.subr.bf16.mxu1 %v18239_v55  ;;  %v2303_v51 = vld [vmem:[%s19514_s9 + $0x3df8] sm:$0xff]  ;;  %v18316_v53 = vcombine.low %v2278_v2, %v2286_v39  ;;  %v18318_v55 = vcombine.low %v2279_v42, %v2287_v31  ;;  %v18397_v39 = vcombine.high %v2358_v54, %v2366_v35 }
 0x81b   : > { %v18335_v46 = vcombine.high %v2295_v49, %v2303_v51  ;;  %v15405_v31 = vld [vmem:[%s19537_s7 + $0x80] sm:$0xff] }
 0x81d   : > { %15014 = vmatpush1.bf16.msra.mxu0 %v18236_v61  ;;  %15342 = vmatpush1.bf16.msra.mxu1 %v18238_v63  ;;  %v2311_v61 = vld [vmem:[%s19514_s9 + $0x3e38] sm:$0xff] }
 0x81e   : > { %15015 = vmatprep.subr.bf16.mxu0 %v18253_v0  ;;  %15343 = vmatprep.subr.bf16.mxu1 %v18255_v58  ;;  %v2319_v63 = vld [vmem:[%s19514_s9 + $0x3e78] sm:$0xff]  ;;  %v18332_v0 = vcombine.low %v2294_v28, %v2302_v59  ;;  %v18334_v58 = vcombine.low %v2295_v49, %v2303_v51  ;;  %v18396_v59 = vcombine.low %v2358_v54, %v2366_v35  ;;  %v15426_v54 = vld [vmem:[%s19537_s7 + $0x128] sm:$0xff]  ;;  %v15411_v35 = vld [vmem:[%s19537_s7 + $0xb0] sm:$0xff] }
 0x81f   : > { %v18351_v32 = vcombine.high %v2311_v61, %v2319_v63 }
 0x821   : > { %15016 = vmatpush1.bf16.msra.mxu0 %v18252_v8  ;;  %15344 = vmatpush1.bf16.msra.mxu1 %v18254_v10  ;;  %v2327_v8 = vld [vmem:[%s19514_s9 + $0x3eb8] sm:$0xff] }
 0x822   : > { %15017 = vmatprep.subr.bf16.mxu0 %v18269_v11  ;;  %15345 = vmatprep.subr.bf16.mxu1 %v18271_v12  ;;  %v2335_v10 = vld [vmem:[%s19514_s9 + $0x3ef8] sm:$0xff]  ;;  %v18348_v11 = vcombine.low %v2310_v13, %v2318_v57  ;;  %v18350_v12 = vcombine.low %v2311_v61, %v2319_v63  ;;  %v15408_v57 = vld [vmem:[%s19537_s7 + $0x98] sm:$0xff] }
 0x823   : > { %v18367_v18 = vcombine.high %v2327_v8, %v2335_v10 }
 0x825   : > { %15018 = vmatpush1.bf16.msra.mxu0 %v18268_v56  ;;  %15346 = vmatpush1.bf16.msra.mxu1 %v18270_v60  ;;  %v2343_v56 = vld [vmem:[%s19514_s9 + $0x3f38] sm:$0xff] }
 0x826   : > { %15019 = vmatprep.subr.bf16.mxu0 %v18285_v27  ;;  %15347 = vmatprep.subr.bf16.mxu1 %v18287_v29  ;;  %v2351_v60 = vld [vmem:[%s19514_s9 + $0x3f78] sm:$0xff]  ;;  %v18364_v27 = vcombine.low %v2326_v5, %v2334_v22  ;;  %v18366_v29 = vcombine.low %v2327_v8, %v2335_v10  ;;  %v15392_v5 = vld [vmem:[%s19537_s7 + $0x18] sm:$0xff]  ;;  %v15423_v22 = vld [vmem:[%s19537_s7 + $0x110] sm:$0xff] }
 0x827   : > { %v18383_v33 = vcombine.high %v2343_v56, %v2351_v60  ;;  %v18382_v2 = vcombine.low %v2343_v56, %v2351_v60  ;;  %v15424_v8 = vld [vmem:[%s19537_s7 + $0x118] sm:$0xff]  ;;  %v15409_v10 = vld [vmem:[%s19537_s7 + $0xa0] sm:$0xff] }
 0x828   : > { %v18722_v56 = vpack.c.bf16 %v15424_v8, %v15423_v22  ;;  %v15400_v22 = vld [vmem:[%s19537_s7 + $0x58] sm:$0xff] }
 0x829   : > { %15020 = vmatpush1.bf16.msra.mxu0 %v18284_v36  ;;  %15348 = vmatpush1.bf16.msra.mxu1 %v18286_v17  ;;  %v2359_v36 = vld [vmem:[%s19514_s9 + $0x3fb8] sm:$0xff] }
 0x82a   : > { %15021 = vmatprep.subr.bf16.mxu0 %v18301_v38  ;;  %15349 = vmatprep.subr.bf16.mxu1 %v18303_v47  ;;  %v2367_v17 = vld [vmem:[%s19514_s9 + $0x3ff8] sm:$0xff]  ;;  %v18380_v47 = vcombine.low %v2342_v19, %v2350_v21 }
 0x82b   : > { %v21858_v38 = vld [vmem:[%s19527_s12] sm:$0xff]  ;;  %v18399_v42 = vcombine.high %v2359_v36, %v2367_v17  ;;  %v18398_v49 = vcombine.low %v2359_v36, %v2367_v17  ;;  %v15443_v36 = vld [vmem:[%s19537_s7 + $0x1b0] sm:$0xff]  ;;  %v15444_v17 = vld [vmem:[%s19537_s7 + $0x1b8] sm:$0xff] }
 0x82c   : > { %v2387_v28 = vrot.slane %v21858_v38, %v2386_v14  ;;  %v15407_v14 = vld [vmem:[%s19537_s7 + $0x90] sm:$0xff] }
 0x82d   : > { %15022 = vmatpush1.bf16.msra.mxu0 %v18300_v43  ;;  %15350 = vmatpush1.bf16.msra.mxu1 %v18302_v44  ;;  %v15406_v43 = vld [vmem:[%s19537_s7 + $0x88] sm:$0xff]  ;;  %v2379_v44 = vrot.slane %v21858_v38, %v2378_v25 }
 0x82e   : > { %15023 = vmatprep.subr.bf16.mxu0 %v18317_v26  ;;  %15351 = vmatprep.subr.bf16.mxu1 %v18319_v48  ;;  %v15437_v26 = vld [vmem:[%s19537_s7 + $0x180] sm:$0xff]  ;;  %v15438_v48 = vld [vmem:[%s19537_s7 + $0x188] sm:$0xff]  ;;  %v18684_v51 = vpack.c.bf16 %v15406_v43, %v15405_v31  ;;  %v18943_v61 = vadd.f32 %v20432_v7, %v2387_v28  ;;  %v15396_v31 = vld [vmem:[%s19537_s7 + $0x38] sm:$0xff] }
 0x82f   : > { %v18716_v25 = vpack.c.bf16 %v15438_v48, %v15437_v26  ;;  %v18941_v13 = vadd.f32 %v20428_v4, %v2379_v44  ;;  %v18688_v4 = vpack.c.bf16 %v15408_v57, %v15407_v14  ;;  %v15427_v43 = vld [vmem:[%s19537_s7 + $0x130] sm:$0xff]  ;;  %v18728_v44 = vpack.c.bf16 %v15444_v17, %v15443_v36  ;;  %v15428_v26 = vld [vmem:[%s19537_s7 + $0x138] sm:$0xff]  ;;  %v15413_v48 = vld [vmem:[%s19537_s7 + $0xc0] sm:$0xff] }
 0x830   : > { %v15375_v19 = vmax.f32 %v18943_v61, 0.0  ;;  %v15414_v28 = vld [vmem:[%s19537_s7 + $0xc8] sm:$0xff]  ;;  %v15415_v57 = vld [vmem:[%s19537_s7 + $0xd0] sm:$0xff]  ;;  %v15416_v61 = vld [vmem:[%s19537_s7 + $0xd8] sm:$0xff]  ;;  %v2402_v17 = vsub.s32 7, %v21518_v20 }
 0x831   : > { %15024 = vmatpush1.bf16.msra.mxu0 %v18316_v53  ;;  %15352 = vmatpush1.bf16.msra.mxu1 %v18318_v55  ;;  %v15389_v53 = vld [vmem:[%s19537_s7] sm:$0xff]  ;;  %v15390_v55 = vld [vmem:[%s19537_s7 + $0x8] sm:$0xff]  ;;  %v15373_v7 = vmax.f32 %v18941_v13, 0.0  ;;  %v15452_v36 = vld [vmem:[%s19537_s7 + $0x1f8] sm:$0xff] }
 0x832   : > { %15025 = vmatprep.subr.bf16.mxu0 %v18333_v23  ;;  %15353 = vmatprep.subr.bf16.mxu1 %v18335_v46  ;;  %v15421_v23 = vld [vmem:[%s19537_s7 + $0x100] sm:$0xff]  ;;  %v15422_v46 = vld [vmem:[%s19537_s7 + $0x108] sm:$0xff]  ;;  %v18686_v63 = vpack.c.bf16 %v15390_v55, %v15389_v53  ;;  %v18730_v53 = vpack.c.bf16 %v15428_v26, %v15427_v43  ;;  %v18700_v55 = vpack.c.bf16 %v15414_v28, %v15413_v48  ;;  %v15404_v43 = vld [vmem:[%s19537_s7 + $0x78] sm:$0xff] }
 0x833   : > { %v15430_v14 = vld [vmem:[%s19537_s7 + $0x148] sm:$0xff]  ;;  %v2383_v26 = vrot.slane %v21858_v38, %v2382_v9  ;;  %v15436_v28 = vld [vmem:[%s19537_s7 + $0x178] sm:$0xff] }
 0x835   : > { %15026 = vmatpush1.bf16.msra.mxu0 %v18332_v0  ;;  %15354 = vmatpush1.bf16.msra.mxu1 %v18334_v58  ;;  %v15439_v0 = vld [vmem:[%s19537_s7 + $0x190] sm:$0xff]  ;;  %v15440_v58 = vld [vmem:[%s19537_s7 + $0x198] sm:$0xff] }
 0x836   : > { %15027 = vmatprep.subr.bf16.mxu0 %v18349_v1  ;;  %15355 = vmatprep.subr.bf16.mxu1 %v18351_v32  ;;  %v18718_v1 = vpack.c.bf16 %v15422_v46, %v15421_v23  ;;  %v15391_v32 = vld [vmem:[%s19537_s7 + $0x10] sm:$0xff]  ;;  %v15398_v23 = vld [vmem:[%s19537_s7 + $0x48] sm:$0xff]  ;;  %v15429_v46 = vld [vmem:[%s19537_s7 + $0x140] sm:$0xff] }
 0x837   : > { %v18690_v21 = vpack.c.bf16 %v15392_v5, %v15391_v32  ;;  %v18704_v32 = vpack.c.bf16 %v15416_v61, %v15415_v57  ;;  %v15399_v5 = vld [vmem:[%s19537_s7 + $0x50] sm:$0xff]  ;;  %v18942_v57 = vadd.f32 %v20426_v3, %v2383_v26  ;;  %v15504_v3 = vld [vmem:[%s19537_s7 + $0x398] sm:$0xff] }
 0x839   : > { %15028 = vmatpush1.bf16.msra.mxu0 %v18348_v11  ;;  %15356 = vmatpush1.bf16.msra.mxu1 %v18350_v12  ;;  %v15410_v11 = vld [vmem:[%s19537_s7 + $0xa8] sm:$0xff]  ;;  %v18720_v12 = vpack.c.bf16 %v15440_v58, %v15439_v0  ;;  %v15448_v0 = vld [vmem:[%s19537_s7 + $0x1d8] sm:$0xff] }
 0x83a   : > { %15029 = vmatprep.subr.bf16.mxu0 %v18365_v15  ;;  %15357 = vmatprep.subr.bf16.mxu1 %v18367_v18  ;;  %v15441_v15 = vld [vmem:[%s19537_s7 + $0x1a0] sm:$0xff]  ;;  %v15442_v18 = vld [vmem:[%s19537_s7 + $0x1a8] sm:$0xff]  ;;  %v18692_v60 = vpack.c.bf16 %v15410_v11, %v15409_v10  ;;  %v15432_v10 = vld [vmem:[%s19537_s7 + $0x158] sm:$0xff] }
 0x83b   : > { %v15417_v11 = vld [vmem:[%s19537_s7 + $0xe0] sm:$0xff] }
 0x83d   : > { %15030 = vmatpush1.bf16.msra.mxu0 %v18364_v27  ;;  %15358 = vmatpush1.bf16.msra.mxu1 %v18366_v29  ;;  %v15393_v27 = vld [vmem:[%s19537_s7 + $0x20] sm:$0xff]  ;;  %v15394_v29 = vld [vmem:[%s19537_s7 + $0x28] sm:$0xff] }
 0x83e   : > { %15031 = vmatprep.subr.bf16.mxu0 %v18381_v16  ;;  %15359 = vmatprep.subr.bf16.mxu1 %v18383_v33  ;;  %v15425_v16 = vld [vmem:[%s19537_s7 + $0x120] sm:$0xff]  ;;  %v18724_v33 = vpack.c.bf16 %v15442_v18, %v15441_v15  ;;  %v15450_v15 = vld [vmem:[%s19537_s7 + $0x1e8] sm:$0xff]  ;;  %v18706_v18 = vpack.c.bf16 %v15400_v22, %v15399_v5  ;;  %v15503_v22 = vld [vmem:[%s19537_s7 + $0x390] sm:$0xff] }
 0x841   : > { %15032 = vmatpush1.bf16.msra.mxu0 %v18380_v47  ;;  %15360 = vmatpush1.bf16.msra.mxu1 %v18382_v2  ;;  %v18694_v47 = vpack.c.bf16 %v15394_v29, %v15393_v27  ;;  %v18726_v2 = vpack.c.bf16 %v15426_v54, %v15425_v16  ;;  %v15433_v27 = vld [vmem:[%s19537_s7 + $0x160] sm:$0xff]  ;;  %v15434_v16 = vld [vmem:[%s19537_s7 + $0x168] sm:$0xff]  ;;  %v15420_v54 = vld [vmem:[%s19537_s7 + $0xf8] sm:$0xff] }
 0x842   : > { %15033 = vmatprep.subr.bf16.mxu0 %v18397_v39  ;;  %15361 = vmatprep.subr.bf16.mxu1 %v18399_v42  ;;  %v15395_v42 = vld [vmem:[%s19537_s7 + $0x30] sm:$0xff] }
 0x845   : > { %15034 = vmatpush1.bf16.msra.mxu0 %v18396_v59  ;;  %15362 = vmatpush1.bf16.msra.mxu1 %v18398_v49  ;;  %v15445_v59 = vld [vmem:[%s19537_s7 + $0x1c0] sm:$0xff]  ;;  %v15446_v49 = vld [vmem:[%s19537_s7 + $0x1c8] sm:$0xff] }
 0x846   : > { %18685 = vmatprep.subr.bf16.mxu0 %v18684_v51  ;;  %18717 = vmatprep.subr.bf16.mxu1 %v18716_v25  ;;  %v18698_v51 = vpack.c.bf16 %v15396_v31, %v15395_v42  ;;  %v15397_v25 = vld [vmem:[%s19537_s7 + $0x40] sm:$0xff]  ;;  %v18732_v13 = vpack.c.bf16 %v15446_v49, %v15445_v59  ;;  %v15403_v31 = vld [vmem:[%s19537_s7 + $0x70] sm:$0xff]  ;;  %v15470_v49 = vld [vmem:[%s19537_s7 + $0x288] sm:$0xff] }
 0x847   : > { %v18702_v58 = vpack.c.bf16 %v15398_v23, %v15397_v25  ;;  %v15469_v59 = vld [vmem:[%s19537_s7 + $0x280] sm:$0xff]  ;;  %v18714_v9 = vpack.c.bf16 %v15404_v43, %v15403_v31  ;;  %v15507_v31 = vld [vmem:[%s19537_s7 + $0x3b0] sm:$0xff]  ;;  %v15508_v43 = vld [vmem:[%s19537_s7 + $0x3b8] sm:$0xff] }
 0x848   : > { %15036 = vmatmul.mubr.bf16.vlgmr.msra.gmra.mrb[12].mxu0 %v20190_v40  ;;  %15364 = vmatmul.mubr.bf16.vlgmr.msra.gmra.mrb[12].mxu1 %v20190_v40  ;;  %v15412_v40 = vld [vmem:[%s19537_s7 + $0xb8] sm:$0xff] }
 0x849   : > { %18687 = vmatpush3.bf16.msra.mxu0 %v18686_v63  ;;  %15709 = vmatprep.mubr.f32.mxu0 %v15373_v7  ;;  %v18696_v39 = vpack.c.bf16 %v15412_v40, %v15411_v35  ;;  %v15447_v63 = vld [vmem:[%s19537_s7 + $0x1d0] sm:$0xff]  ;;  %v15418_v7 = vld [vmem:[%s19537_s7 + $0xe8] sm:$0xff]  ;;  %v2394_v35 = vsub.s32 5, %v21518_v20 }
 0x84a   : > { %18719 = vmatpush3.bf16.msra.mxu1 %v18718_v1  ;;  %15779 = vmatprep.mubr.f32.mxu1 %v15375_v19  ;;  %v18734_v1 = vpack.c.bf16 %v15430_v14, %v15429_v46  ;;  %v18736_v8 = vpack.c.bf16 %v15448_v0, %v15447_v63  ;;  %v15451_v40 = vld [vmem:[%s19537_s7 + $0x1f0] sm:$0xff]  ;;  %v18748_v46 = vpack.c.bf16 %v15470_v49, %v15469_v59  ;;  %v15454_v14 = vld [vmem:[%s19537_s7 + $0x208] sm:$0xff]  ;;  %v15485_v63 = vld [vmem:[%s19537_s7 + $0x300] sm:$0xff] }
 0x84b   : > { %18689 = vmatprep.subr.bf16.mxu0 %v18688_v4  ;;  %18721 = vmatprep.subr.bf16.mxu1 %v18720_v12  ;;  %v15431_v4 = vld [vmem:[%s19537_s7 + $0x150] sm:$0xff]  ;;  %v15449_v12 = vld [vmem:[%s19537_s7 + $0x1e0] sm:$0xff]  ;;  %v18744_v48 = vpack.c.bf16 %v15452_v36, %v15451_v40  ;;  %v15486_v0 = vld [vmem:[%s19537_s7 + $0x308] sm:$0xff] }
 0x84c   : > { %v18738_v19 = vpack.c.bf16 %v15432_v10, %v15431_v4  ;;  %v18740_v29 = vpack.c.bf16 %v15450_v15, %v15449_v12  ;;  %v15455_v10 = vld [vmem:[%s19537_s7 + $0x210] sm:$0xff]  ;;  %v15488_v15 = vld [vmem:[%s19537_s7 + $0x318] sm:$0xff]  ;;  %v15458_v40 = vld [vmem:[%s19537_s7 + $0x228] sm:$0xff] }
 0x84d   : > { %18691 = vmatpush3.bf16.msra.mxu0 %v18690_v21  ;;  %v18708_v21 = vpack.c.bf16 %v15418_v7, %v15417_v11  ;;  %v15456_v11 = vld [vmem:[%s19537_s7 + $0x218] sm:$0xff]  ;;  %v15374_v7 = vmax.f32 %v18942_v57, 0.0  ;;  %v15489_v36 = vld [vmem:[%s19537_s7 + $0x320] sm:$0xff]  ;;  %v15491_v49 = vld [vmem:[%s19537_s7 + $0x330] sm:$0xff] }
 0x84e   : > { %18723 = vmatpush3.bf16.msra.mxu1 %v18722_v56  ;;  %18693 = vmatprep.subr.bf16.mxu0 %v18692_v60  ;;  %v15401_v56 = vld [vmem:[%s19537_s7 + $0x60] sm:$0xff]  ;;  %v15402_v60 = vld [vmem:[%s19537_s7 + $0x68] sm:$0xff]  ;;  %v15460_v59 = vld [vmem:[%s19537_s7 + $0x238] sm:$0xff] }
 0x84f   : > { %18725 = vmatprep.subr.bf16.mxu1 %v18724_v33  ;;  %v15419_v33 = vld [vmem:[%s19537_s7 + $0xf0] sm:$0xff]  ;;  %v15462_v57 = vld [vmem:[%s19537_s7 + $0x248] sm:$0xff] }
 0x850   : > { %v18712_v42 = vpack.c.bf16 %v15420_v54, %v15419_v33  ;;  %v15457_v54 = vld [vmem:[%s19537_s7 + $0x220] sm:$0xff] }
 0x851   : > { %18695 = vmatpush3.bf16.msra.mxu0 %v18694_v47  ;;  %v18710_v47 = vpack.c.bf16 %v15402_v60, %v15401_v56  ;;  %v15505_v56 = vld [vmem:[%s19537_s7 + $0x3a0] sm:$0xff]  ;;  %v15506_v60 = vld [vmem:[%s19537_s7 + $0x3a8] sm:$0xff] }
 0x852   : > { %18727 = vmatpush3.bf16.msra.mxu1 %v18726_v2  ;;  %18697 = vmatprep.subr.bf16.mxu0 %v18696_v39  ;;  %v2375_v2 = vrot.slane %v21858_v38, %v2374_v6  ;;  %v18742_v39 = vpack.c.bf16 %v15434_v16, %v15433_v27  ;;  %v2395_v6 = vrot.slane %v21858_v38, %v2394_v35 }
 0x853   : > { %18729 = vmatprep.subr.bf16.mxu1 %v18728_v44  ;;  %v15435_v44 = vld [vmem:[%s19537_s7 + $0x170] sm:$0xff] }
 0x854   : > { %v18940_v25 = vadd.f32 %v20422_v62, %v2375_v2  ;;  %v18746_v23 = vpack.c.bf16 %v15436_v28, %v15435_v44  ;;  %v15471_v62 = vld [vmem:[%s19537_s7 + $0x290] sm:$0xff]  ;;  %v15490_v2 = vld [vmem:[%s19537_s7 + $0x328] sm:$0xff]  ;;  %v18758_v44 = vpack.c.bf16 %v15458_v40, %v15457_v54 }
 0x855   : > { %18699 = vmatpush3.bf16.msra.mxu0 %v18698_v51  ;;  %v15501_v51 = vld [vmem:[%s19537_s7 + $0x380] sm:$0xff]  ;;  %v18790_v26 = vpack.c.bf16 %v15490_v2, %v15489_v36  ;;  %v15459_v28 = vld [vmem:[%s19537_s7 + $0x230] sm:$0xff]  ;;  %v15498_v54 = vld [vmem:[%s19537_s7 + $0x368] sm:$0xff] }
 0x856   : > { %18731 = vmatpush3.bf16.msra.mxu1 %v18730_v53  ;;  %18701 = vmatprep.subr.bf16.mxu0 %v18700_v55  ;;  %v15502_v53 = vld [vmem:[%s19537_s7 + $0x388] sm:$0xff]  ;;  %v2403_v55 = vrot.slane %v21858_v38, %v2402_v17  ;;  %v15372_v4 = vmax.f32 %v18940_v25, 0.0  ;;  %v15483_v40 = vld [vmem:[%s19537_s7 + $0x2f0] sm:$0xff]  ;;  %v15484_v36 = vld [vmem:[%s19537_s7 + $0x2f8] sm:$0xff] }
 0x857   : > { %18733 = vmatprep.subr.bf16.mxu1 %v18732_v13  ;;  %v15453_v13 = vld [vmem:[%s19537_s7 + $0x200] sm:$0xff]  ;;  %v18780_v61 = vpack.c.bf16 %v15502_v53, %v15501_v51  ;;  %v15492_v51 = vld [vmem:[%s19537_s7 + $0x338] sm:$0xff]  ;;  %v15510_v25 = vld [vmem:[%s19537_s7 + $0x3c8] sm:$0xff] }
 0x858   : > { %v18750_v5 = vpack.c.bf16 %v15454_v14, %v15453_v13  ;;  %v15477_v53 = vld [vmem:[%s19537_s7 + $0x2c0] sm:$0xff]  ;;  %v15516_v2 = vld [vmem:[%s19537_s7 + $0x3f8] sm:$0xff] }
 0x859   : > { %18703 = vmatpush3.bf16.msra.mxu0 %v18702_v58  ;;  %v18945_v58 = vadd.f32 %v20980_v50, %v2395_v6  ;;  %v15487_v50 = vld [vmem:[%s19537_s7 + $0x310] sm:$0xff]  ;;  %v18792_v6 = vpack.c.bf16 %v15508_v43, %v15507_v31  ;;  %v15461_v14 = vld [vmem:[%s19537_s7 + $0x240] sm:$0xff]  ;;  %v18776_v43 = vpack.c.bf16 %v15484_v36, %v15483_v40  ;;  %v15540_v40 = vld [vmem:[%s19537_s7 + $0x4b8] sm:$0xff] }
 0x85a   : > { %18735 = vmatpush3.bf16.msra.mxu1 %v18734_v1  ;;  %18705 = vmatprep.subr.bf16.mxu0 %v18704_v32  ;;  %v15472_v1 = vld [vmem:[%s19537_s7 + $0x298] sm:$0xff]  ;;  %v18947_v32 = vadd.f32 %v20984_v34, %v2403_v55  ;;  %v15473_v34 = vld [vmem:[%s19537_s7 + $0x2a0] sm:$0xff]  ;;  %v18786_v16 = vpack.c.bf16 %v15488_v15, %v15487_v50  ;;  %v15478_v55 = vld [vmem:[%s19537_s7 + $0x2c8] sm:$0xff] }
 0x85b   : > { %18737 = vmatprep.subr.bf16.mxu1 %v18736_v8  ;;  %v18782_v8 = vpack.c.bf16 %v15486_v0, %v15485_v63  ;;  %v18752_v12 = vpack.c.bf16 %v15472_v1, %v15471_v62  ;;  %v18764_v13 = vpack.c.bf16 %v15478_v55, %v15477_v53  ;;  %v15494_v0 = vld [vmem:[%s19537_s7 + $0x348] sm:$0xff]  ;;  %v15480_v62 = vld [vmem:[%s19537_s7 + $0x2d8] sm:$0xff]  ;;  %v15511_v1 = vld [vmem:[%s19537_s7 + $0x3d0] sm:$0xff] }
 0x85c   : > { %v15379_v27 = vmax.f32 %v18947_v32, 0.0  ;;  %v15512_v32 = vld [vmem:[%s19537_s7 + $0x3d8] sm:$0xff]  ;;  %v15513_v15 = vld [vmem:[%s19537_s7 + $0x3e0] sm:$0xff]  ;;  %v15566_v55 = vld [vmem:[%s19537_s7 + $0x588] sm:$0xff] }
 0x85d   : > { %18707 = vmatpush3.bf16.msra.mxu0 %v18706_v18  ;;  %v15474_v18 = vld [vmem:[%s19537_s7 + $0x2a8] sm:$0xff]  ;;  %v15496_v50 = vld [vmem:[%s19537_s7 + $0x358] sm:$0xff]  ;;  %v15565_v53 = vld [vmem:[%s19537_s7 + $0x580] sm:$0xff] }
 0x85e   : > { %18739 = vmatpush3.bf16.msra.mxu1 %v18738_v19  ;;  %18709 = vmatprep.subr.bf16.mxu0 %v18708_v21  ;;  %v15377_v19 = vmax.f32 %v18945_v58, 0.0  ;;  %v18784_v21 = vpack.c.bf16 %v15504_v3, %v15503_v22  ;;  %v18756_v33 = vpack.c.bf16 %v15474_v18, %v15473_v34  ;;  %v15479_v58 = vld [vmem:[%s19537_s7 + $0x2d0] sm:$0xff]  ;;  %v15514_v34 = vld [vmem:[%s19537_s7 + $0x3e8] sm:$0xff] }
 0x85f   : > { %18741 = vmatprep.subr.bf16.mxu1 %v18740_v29  ;;  %v18754_v29 = vpack.c.bf16 %v15456_v11, %v15455_v10  ;;  %v18768_v3 = vpack.c.bf16 %v15480_v62, %v15479_v58  ;;  %v15495_v10 = vld [vmem:[%s19537_s7 + $0x350] sm:$0xff]  ;;  %v18800_v11 = vpack.c.bf16 %v15512_v32, %v15511_v1  ;;  %v15568_v1 = vld [vmem:[%s19537_s7 + $0x598] sm:$0xff] }
 0x860   : > { %v15567_v62 = vld [vmem:[%s19537_s7 + $0x590] sm:$0xff] }
 0x861   : > { %18711 = vmatpush3.bf16.msra.mxu0 %v18710_v47  ;;  %v18788_v47 = vpack.c.bf16 %v15506_v60, %v15505_v56  ;;  %v15465_v60 = vld [vmem:[%s19537_s7 + $0x260] sm:$0xff]  ;;  %v15571_v36 = vld [vmem:[%s19537_s7 + $0x5b0] sm:$0xff] }
 0x862   : > { %18743 = vmatpush3.bf16.msra.mxu1 %v18742_v39  ;;  %18713 = vmatprep.subr.bf16.mxu0 %v18712_v42  ;;  %v15475_v39 = vld [vmem:[%s19537_s7 + $0x2b0] sm:$0xff]  ;;  %v15476_v42 = vld [vmem:[%s19537_s7 + $0x2b8] sm:$0xff] }
 0x863   : > { %18745 = vmatprep.subr.bf16.mxu1 %v18744_v48  ;;  %v18760_v48 = vpack.c.bf16 %v15476_v42, %v15475_v39 }
 0x865   : > { %18715 = vmatpush3.bf16.msra.mxu0 %v18714_v9  ;;  %v15509_v9 = vld [vmem:[%s19537_s7 + $0x3c0] sm:$0xff] }
 0x866   : > { %18747 = vmatpush3.bf16.msra.mxu1 %v18746_v23  ;;  %18749 = vmatprep.subr.bf16.mxu0 %v18748_v46  ;;  %v18762_v23 = vpack.c.bf16 %v15460_v59, %v15459_v28  ;;  %v18794_v46 = vpack.c.bf16 %v15492_v51, %v15491_v49  ;;  %v18796_v63 = vpack.c.bf16 %v15510_v25, %v15509_v9  ;;  %v15500_v49 = vld [vmem:[%s19537_s7 + $0x378] sm:$0xff]  ;;  %v15534_v51 = vld [vmem:[%s19537_s7 + $0x488] sm:$0xff] }
 0x867   : > { %18781 = vmatprep.subr.bf16.mxu1 %v18780_v61  ;;  %v15493_v61 = vld [vmem:[%s19537_s7 + $0x340] sm:$0xff] }
 0x868   : > { %15710 = vmatmul.mubr.f32.vlgmr.msra.gmra.mrb[16].mxu0 %v15372_v4  ;;  %v18798_v22 = vpack.c.bf16 %v15494_v0, %v15493_v61  ;;  %v15463_v4 = vld [vmem:[%s19537_s7 + $0x250] sm:$0xff]  ;;  %v15549_v61 = vld [vmem:[%s19537_s7 + $0x500] sm:$0xff] }
 0x869   : > { %15780 = vmatmul.mubr.f32.vlgmr.msra.gmra.mrb[16].mxu1 %v15374_v7  ;;  %18751 = vmatpush3.bf16.msra.mxu0 %v18750_v5  ;;  %v18766_v5 = vpack.c.bf16 %v15462_v57, %v15461_v14  ;;  %v15481_v7 = vld [vmem:[%s19537_s7 + $0x2e0] sm:$0xff]  ;;  %v18844_v57 = vpack.c.bf16 %v15566_v55, %v15565_v53  ;;  %v15535_v0 = vld [vmem:[%s19537_s7 + $0x490] sm:$0xff] }
 0x86a   : > { %15849 = vmatprep.mubr.f32.mxu0 %v15377_v19  ;;  %18783 = vmatpush3.bf16.msra.mxu1 %v18782_v8  ;;  %v15464_v8 = vld [vmem:[%s19537_s7 + $0x258] sm:$0xff]  ;;  %v2390_v19 = vsub.s32 4, %v21518_v20 }
 0x86b   : > { %15919 = vmatprep.mubr.f32.mxu1 %v15379_v27  ;;  %18753 = vmatprep.subr.bf16.mxu0 %v18752_v12  ;;  %v15482_v12 = vld [vmem:[%s19537_s7 + $0x2e8] sm:$0xff]  ;;  %v18770_v18 = vpack.c.bf16 %v15464_v8, %v15463_v4 }
 0x86c   : > { %18785 = vmatprep.subr.bf16.mxu1 %v18784_v21  ;;  %v18802_v21 = vpack.c.bf16 %v15496_v50, %v15495_v10  ;;  %v18772_v56 = vpack.c.bf16 %v15482_v12, %v15481_v7  ;;  %v15466_v27 = vld [vmem:[%s19537_s7 + $0x268] sm:$0xff]  ;;  %v2391_v42 = vrot.slane %v21858_v38, %v2390_v19  ;;  %v15552_v10 = vld [vmem:[%s19537_s7 + $0x518] sm:$0xff]  ;;  %v15381_v7 = vmax.f32 %v21549_v45, 0.0 }
 0x86d   : > { %18755 = vmatpush3.bf16.msra.mxu0 %v18754_v29  ;;  %v15497_v29 = vld [vmem:[%s19537_s7 + $0x360] sm:$0xff]  ;;  %v18774_v39 = vpack.c.bf16 %v15466_v27, %v15465_v60  ;;  %v15538_v50 = vld [vmem:[%s19537_s7 + $0x4a8] sm:$0xff]  ;;  %v18848_v12 = vpack.c.bf16 %v15568_v1, %v15567_v62  ;;  %v15528_v62 = vld [vmem:[%s19537_s7 + $0x458] sm:$0xff] }
 0x86e   : > { %18787 = vmatpush3.bf16.msra.mxu1 %v18786_v16  ;;  %18757 = vmatprep.subr.bf16.mxu0 %v18756_v33  ;;  %v2398_v16 = vsub.s32 6, %v21518_v20  ;;  %v18804_v33 = vpack.c.bf16 %v15514_v34, %v15513_v15  ;;  %v18806_v31 = vpack.c.bf16 %v15498_v54, %v15497_v29  ;;  %v18944_v25 = vadd.f32 %v20974_v24, %v2391_v42  ;;  %v15536_v24 = vld [vmem:[%s19537_s7 + $0x498] sm:$0xff]  ;;  %v15569_v15 = vld [vmem:[%s19537_s7 + $0x5a0] sm:$0xff]  ;;  %v15570_v34 = vld [vmem:[%s19537_s7 + $0x5a8] sm:$0xff] }
 0x86f   : > { %18789 = vmatprep.subr.bf16.mxu1 %v18788_v47  ;;  %v15515_v47 = vld [vmem:[%s19537_s7 + $0x3f0] sm:$0xff]  ;;  %v18816_v8 = vpack.c.bf16 %v15536_v24, %v15535_v0  ;;  %v15521_v27 = vld [vmem:[%s19537_s7 + $0x420] sm:$0xff]  ;;  %v15522_v45 = vld [vmem:[%s19537_s7 + $0x428] sm:$0xff] }
 0x870   : > { %v2399_v28 = vrot.slane %v21858_v38, %v2398_v16  ;;  %v18808_v59 = vpack.c.bf16 %v15516_v2, %v15515_v47  ;;  %v15376_v32 = vmax.f32 %v18944_v25, 0.0  ;;  %v15553_v29 = vld [vmem:[%s19537_s7 + $0x520] sm:$0xff]  ;;  %v15539_v54 = vld [vmem:[%s19537_s7 + $0x4b0] sm:$0xff]  ;;  %v15572_v47 = vld [vmem:[%s19537_s7 + $0x5b8] sm:$0xff]  ;;  %v18822_v2 = vpack.c.bf16 %v15522_v45, %v15521_v27 }
 0x871   : > { %18759 = vmatpush3.bf16.msra.mxu0 %v18758_v44  ;;  %v15467_v44 = vld [vmem:[%s19537_s7 + $0x270] sm:$0xff]  ;;  %v18824_v42 = vpack.c.bf16 %v15540_v40, %v15539_v54  ;;  %v15526_v25 = vld [vmem:[%s19537_s7 + $0x448] sm:$0xff] }
 0x872   : > { %18791 = vmatpush3.bf16.msra.mxu1 %v18790_v26  ;;  %18761 = vmatprep.subr.bf16.mxu0 %v18760_v48  ;;  %v15468_v26 = vld [vmem:[%s19537_s7 + $0x278] sm:$0xff]  ;;  %v15499_v48 = vld [vmem:[%s19537_s7 + $0x370] sm:$0xff]  ;;  %v18946_v14 = vadd.f32 %v20978_v30, %v2399_v28  ;;  %v15541_v28 = vld [vmem:[%s19537_s7 + $0x4c0] sm:$0xff] }
 0x873   : > { %18793 = vmatprep.subr.bf16.mxu1 %v18792_v6  ;;  %v15533_v6 = vld [vmem:[%s19537_s7 + $0x480] sm:$0xff]  ;;  %v18778_v9 = vpack.c.bf16 %v15468_v26, %v15467_v44  ;;  %v18810_v38 = vpack.c.bf16 %v15500_v49, %v15499_v48  ;;  %v15555_v44 = vld [vmem:[%s19537_s7 + $0x530] sm:$0xff]  ;;  %v18856_v26 = vpack.c.bf16 %v15572_v47, %v15571_v36  ;;  %v15556_v48 = vld [vmem:[%s19537_s7 + $0x538] sm:$0xff] }
 0x874   : > { %v15378_v4 = vmax.f32 %v18946_v14, 0.0  ;;  %v15573_v49 = vld [vmem:[%s19537_s7 + $0x5c0] sm:$0xff]  ;;  %v18858_v53 = vpack.c.bf16 %v15556_v48, %v15555_v44  ;;  %v15544_v14 = vld [vmem:[%s19537_s7 + $0x4d8] sm:$0xff]  ;;  %v15559_v1 = vld [vmem:[%s19537_s7 + $0x550] sm:$0xff] }
 0x875   : > { %18763 = vmatpush3.bf16.msra.mxu0 %v18762_v23  ;;  %v18812_v23 = vpack.c.bf16 %v15534_v51, %v15533_v6  ;;  %v15574_v6 = vld [vmem:[%s19537_s7 + $0x5c8] sm:$0xff]  ;;  %v15563_v54 = vld [vmem:[%s19537_s7 + $0x570] sm:$0xff]  ;;  %v15564_v36 = vld [vmem:[%s19537_s7 + $0x578] sm:$0xff] }
 0x876   : > { %18795 = vmatpush3.bf16.msra.mxu1 %v18794_v46  ;;  %18765 = vmatprep.subr.bf16.mxu0 %v18764_v13  ;;  %v15517_v46 = vld [vmem:[%s19537_s7 + $0x400] sm:$0xff]  ;;  %v15518_v13 = vld [vmem:[%s19537_s7 + $0x408] sm:$0xff] }
 0x877   : > { %18797 = vmatprep.subr.bf16.mxu1 %v18796_v63  ;;  %v15550_v63 = vld [vmem:[%s19537_s7 + $0x508] sm:$0xff]  ;;  %v18814_v58 = vpack.c.bf16 %v15518_v13, %v15517_v46  ;;  %v15543_v13 = vld [vmem:[%s19537_s7 + $0x4d0] sm:$0xff]  ;;  %v15597_v47 = vld [vmem:[%s19537_s7 + $0x680] sm:$0xff] }
 0x878   : > { %v18846_v30 = vpack.c.bf16 %v15550_v63, %v15549_v61  ;;  %v15558_v46 = vld [vmem:[%s19537_s7 + $0x548] sm:$0xff]  ;;  %v15576_v61 = vld [vmem:[%s19537_s7 + $0x5d8] sm:$0xff]  ;;  %v18832_v24 = vpack.c.bf16 %v15544_v14, %v15543_v13  ;;  %v15615_v14 = vld [vmem:[%s19537_s7 + $0x710] sm:$0xff] }
 0x879   : > { %18767 = vmatpush3.bf16.msra.mxu0 %v18766_v5  ;;  %v15519_v5 = vld [vmem:[%s19537_s7 + $0x410] sm:$0xff]  ;;  %v15582_v48 = vld [vmem:[%s19537_s7 + $0x608] sm:$0xff]  ;;  %v15584_v13 = vld [vmem:[%s19537_s7 + $0x618] sm:$0xff] }
 0x87a   : > { %18799 = vmatpush3.bf16.msra.mxu1 %v18798_v22  ;;  %18769 = vmatprep.subr.bf16.mxu0 %v18768_v3  ;;  %v15520_v22 = vld [vmem:[%s19537_s7 + $0x418] sm:$0xff]  ;;  %v15551_v3 = vld [vmem:[%s19537_s7 + $0x510] sm:$0xff] }
 0x87b   : > { %18801 = vmatprep.subr.bf16.mxu1 %v18800_v11  ;;  %v15537_v11 = vld [vmem:[%s19537_s7 + $0x4a0] sm:$0xff] }
 0x87c   : > { %v18820_v60 = vpack.c.bf16 %v15538_v50, %v15537_v11  ;;  %v15529_v50 = vld [vmem:[%s19537_s7 + $0x460] sm:$0xff] }
 0x87d   : > { %18771 = vmatpush3.bf16.msra.mxu0 %v18770_v18  ;;  %v15383_v18 = vmax.f32 %v21551_v52, 0.0  ;;  %v15554_v52 = vld [vmem:[%s19537_s7 + $0x528] sm:$0xff] }
 0x87e   : > { %18803 = vmatpush3.bf16.msra.mxu1 %v18802_v21  ;;  %18773 = vmatprep.subr.bf16.mxu0 %v18772_v56  ;;  %v18818_v21 = vpack.c.bf16 %v15520_v22, %v15519_v5  ;;  %v18850_v56 = vpack.c.bf16 %v15552_v10, %v15551_v3  ;;  %v15545_v5 = vld [vmem:[%s19537_s7 + $0x4e0] sm:$0xff]  ;;  %v15546_v22 = vld [vmem:[%s19537_s7 + $0x4e8] sm:$0xff] }
 0x87f   : > { %18805 = vmatprep.subr.bf16.mxu1 %v18804_v33  ;;  %v18852_v33 = vpack.c.bf16 %v15570_v34, %v15569_v15  ;;  %v15577_v3 = vld [vmem:[%s19537_s7 + $0x5e0] sm:$0xff]  ;;  %v18836_v11 = vpack.c.bf16 %v15546_v22, %v15545_v5  ;;  %v15562_v34 = vld [vmem:[%s19537_s7 + $0x568] sm:$0xff] }
 0x880   : > { %v15617_v5 = vld [vmem:[%s19537_s7 + $0x720] sm:$0xff] }
 0x881   : > { %18775 = vmatpush3.bf16.msra.mxu0 %v18774_v39  ;;  %v18854_v39 = vpack.c.bf16 %v15554_v52, %v15553_v29  ;;  %v15532_v52 = vld [vmem:[%s19537_s7 + $0x478] sm:$0xff] }
 0x882   : > { %18807 = vmatpush3.bf16.msra.mxu1 %v18806_v31  ;;  %18777 = vmatprep.subr.bf16.mxu0 %v18776_v43  ;;  %v15523_v31 = vld [vmem:[%s19537_s7 + $0x430] sm:$0xff]  ;;  %v15524_v43 = vld [vmem:[%s19537_s7 + $0x438] sm:$0xff] }
 0x883   : > { %18809 = vmatprep.subr.bf16.mxu1 %v18808_v59  ;;  %v15542_v59 = vld [vmem:[%s19537_s7 + $0x4c8] sm:$0xff]  ;;  %v18826_v51 = vpack.c.bf16 %v15524_v43, %v15523_v31  ;;  %v18874_v43 = vpack.c.bf16 %v15564_v36, %v15563_v54 }
 0x884   : > { %v18828_v55 = vpack.c.bf16 %v15542_v59, %v15541_v28  ;;  %v15613_v28 = vld [vmem:[%s19537_s7 + $0x700] sm:$0xff]  ;;  %v15590_v36 = vld [vmem:[%s19537_s7 + $0x648] sm:$0xff] }
 0x885   : > { %18779 = vmatpush3.bf16.msra.mxu0 %v18778_v9  ;;  %v15525_v9 = vld [vmem:[%s19537_s7 + $0x440] sm:$0xff] }
 0x886   : > { %18811 = vmatpush3.bf16.msra.mxu1 %v18810_v38  ;;  %18813 = vmatprep.subr.bf16.mxu0 %v18812_v23  ;;  %v15557_v38 = vld [vmem:[%s19537_s7 + $0x540] sm:$0xff]  ;;  %v18860_v23 = vpack.c.bf16 %v15574_v6, %v15573_v49  ;;  %v18830_v63 = vpack.c.bf16 %v15526_v25, %v15525_v9  ;;  %v15614_v49 = vld [vmem:[%s19537_s7 + $0x708] sm:$0xff]  ;;  %v15599_v6 = vld [vmem:[%s19537_s7 + $0x690] sm:$0xff]  ;;  %v15380_v25 = vmax.f32 %v21543_v41, 0.0 }
 0x887   : > { %18845 = vmatprep.subr.bf16.mxu1 %v18844_v57  ;;  %v15575_v57 = vld [vmem:[%s19537_s7 + $0x5d0] sm:$0xff]  ;;  %v18862_v0 = vpack.c.bf16 %v15558_v46, %v15557_v38  ;;  %v18910_v38 = vpack.c.bf16 %v15614_v49, %v15613_v28  ;;  %v15633_v41 = vld [vmem:[%s19537_s7 + $0x7a0] sm:$0xff]  ;;  %v15592_v49 = vld [vmem:[%s19537_s7 + $0x658] sm:$0xff] }
 0x888   : > { %15850 = vmatmul.mubr.f32.vlgmr.msra.gmra.mrb[18].mxu0 %v15376_v32  ;;  %v18864_v32 = vpack.c.bf16 %v15576_v61, %v15575_v57  ;;  %v15583_v46 = vld [vmem:[%s19537_s7 + $0x610] sm:$0xff]  ;;  %v15382_v57 = vmax.f32 %v21547_v37, 0.0 }
 0x889   : > { %15920 = vmatmul.mubr.f32.vlgmr.msra.gmra.mrb[18].mxu1 %v15378_v4  ;;  %18815 = vmatpush3.bf16.msra.mxu0 %v18814_v58  ;;  %v15527_v58 = vld [vmem:[%s19537_s7 + $0x450] sm:$0xff]  ;;  %v15578_v4 = vld [vmem:[%s19537_s7 + $0x5e8] sm:$0xff] }
 0x88a   : > { %15989 = vmatprep.mubr.f32.mxu0 %v15381_v7  ;;  %18847 = vmatpush3.bf16.msra.mxu1 %v18846_v30  ;;  %v15560_v30 = vld [vmem:[%s19537_s7 + $0x558] sm:$0xff]  ;;  %v15530_v7 = vld [vmem:[%s19537_s7 + $0x468] sm:$0xff]  ;;  %v18868_v15 = vpack.c.bf16 %v15578_v4, %v15577_v3  ;;  %v15603_v4 = vld [vmem:[%s19537_s7 + $0x6b0] sm:$0xff] }
 0x88b   : > { %16059 = vmatprep.mubr.f32.mxu1 %v15383_v18  ;;  %18817 = vmatprep.subr.bf16.mxu0 %v18816_v8  ;;  %v18834_v8 = vpack.c.bf16 %v15528_v62, %v15527_v58  ;;  %v18866_v10 = vpack.c.bf16 %v15560_v30, %v15559_v1  ;;  %v15547_v18 = vld [vmem:[%s19537_s7 + $0x4f0] sm:$0xff]  ;;  %v18838_v27 = vpack.c.bf16 %v15530_v7, %v15529_v50  ;;  %v15634_v58 = vld [vmem:[%s19537_s7 + $0x7a8] sm:$0xff] }
 0x88c   : > { %18849 = vmatprep.subr.bf16.mxu1 %v18848_v12  ;;  %v15561_v12 = vld [vmem:[%s19537_s7 + $0x560] sm:$0xff]  ;;  %v18882_v62 = vpack.c.bf16 %v15584_v13, %v15583_v46  ;;  %v15586_v30 = vld [vmem:[%s19537_s7 + $0x628] sm:$0xff]  ;;  %v18916_v22 = vpack.c.bf16 %v15634_v58, %v15633_v41  ;;  %v15612_v41 = vld [vmem:[%s19537_s7 + $0x6f8] sm:$0xff] }
 0x88d   : > { %18819 = vmatpush3.bf16.msra.mxu0 %v18818_v21  ;;  %v15548_v21 = vld [vmem:[%s19537_s7 + $0x4f8] sm:$0xff]  ;;  %v18870_v45 = vpack.c.bf16 %v15562_v34, %v15561_v12  ;;  %v15618_v3 = vld [vmem:[%s19537_s7 + $0x728] sm:$0xff]  ;;  %v15643_v58 = vld [vmem:[%s19537_s7 + $0x7f0] sm:$0xff] }
 0x88e   : > { %18851 = vmatpush3.bf16.msra.mxu1 %v18850_v56  ;;  %18821 = vmatprep.subr.bf16.mxu0 %v18820_v60  ;;  %v15579_v56 = vld [vmem:[%s19537_s7 + $0x5f0] sm:$0xff]  ;;  %v15580_v60 = vld [vmem:[%s19537_s7 + $0x5f8] sm:$0xff]  ;;  %v18840_v29 = vpack.c.bf16 %v15548_v21, %v15547_v18  ;;  %v18918_v7 = vpack.c.bf16 %v15618_v3, %v15617_v5 }
 0x88f   : > { %18853 = vmatprep.subr.bf16.mxu1 %v18852_v33  ;;  %v15531_v33 = vld [vmem:[%s19537_s7 + $0x470] sm:$0xff]  ;;  %v18872_v40 = vpack.c.bf16 %v15580_v60, %v15579_v56  ;;  %v15588_v34 = vld [vmem:[%s19537_s7 + $0x638] sm:$0xff]  ;;  %v15605_v60 = vld [vmem:[%s19537_s7 + $0x6c0] sm:$0xff] }
 0x890   : > { %v18842_v31 = vpack.c.bf16 %v15532_v52, %v15531_v33  ;;  %v15619_v18 = vld [vmem:[%s19537_s7 + $0x730] sm:$0xff]  ;;  %v15620_v56 = vld [vmem:[%s19537_s7 + $0x738] sm:$0xff] }
 0x891   : > { %18823 = vmatpush3.bf16.msra.mxu0 %v18822_v2  ;;  %v15598_v2 = vld [vmem:[%s19537_s7 + $0x688] sm:$0xff]  ;;  %v18922_v52 = vpack.c.bf16 %v15620_v56, %v15619_v18  ;;  %v15596_v5 = vld [vmem:[%s19537_s7 + $0x678] sm:$0xff]  ;;  %v15627_v3 = vld [vmem:[%s19537_s7 + $0x770] sm:$0xff] }
 0x892   : > { %18855 = vmatpush3.bf16.msra.mxu1 %v18854_v39  ;;  %18825 = vmatprep.subr.bf16.mxu0 %v18824_v42  ;;  %v15629_v39 = vld [vmem:[%s19537_s7 + $0x780] sm:$0xff]  ;;  %v15630_v42 = vld [vmem:[%s19537_s7 + $0x788] sm:$0xff]  ;;  %v18876_v44 = vpack.c.bf16 %v15598_v2, %v15597_v47 }
 0x893   : > { %18857 = vmatprep.subr.bf16.mxu1 %v18856_v26  ;;  %v15581_v26 = vld [vmem:[%s19537_s7 + $0x600] sm:$0xff]  ;;  %v18908_v59 = vpack.c.bf16 %v15630_v42, %v15629_v39  ;;  %v15622_v39 = vld [vmem:[%s19537_s7 + $0x748] sm:$0xff]  ;;  %v15607_v42 = vld [vmem:[%s19537_s7 + $0x6d0] sm:$0xff] }
 0x894   : > { %v18878_v9 = vpack.c.bf16 %v15582_v48, %v15581_v26  ;;  %v15621_v47 = vld [vmem:[%s19537_s7 + $0x740] sm:$0xff] }
 0x895   : > { %18827 = vmatpush3.bf16.msra.mxu0 %v18826_v51  ;;  %v15600_v51 = vld [vmem:[%s19537_s7 + $0x698] sm:$0xff]  ;;  %v18926_v48 = vpack.c.bf16 %v15622_v39, %v15621_v47 }
 0x896   : > { %18859 = vmatpush3.bf16.msra.mxu1 %v18858_v53  ;;  %18829 = vmatprep.subr.bf16.mxu0 %v18828_v55  ;;  %v15631_v53 = vld [vmem:[%s19537_s7 + $0x790] sm:$0xff]  ;;  %v15632_v55 = vld [vmem:[%s19537_s7 + $0x798] sm:$0xff] }
 0x897   : > { %18861 = vmatprep.subr.bf16.mxu1 %v18860_v23  ;;  %v18880_v23 = vpack.c.bf16 %v15600_v51, %v15599_v6  ;;  %v18912_v61 = vpack.c.bf16 %v15632_v55, %v15631_v53  ;;  %v15623_v6 = vld [vmem:[%s19537_s7 + $0x750] sm:$0xff]  ;;  %v15624_v53 = vld [vmem:[%s19537_s7 + $0x758] sm:$0xff]  ;;  %v15609_v55 = vld [vmem:[%s19537_s7 + $0x6e0] sm:$0xff] }
 0x898   : > { %v18930_v46 = vpack.c.bf16 %v15624_v53, %v15623_v6 }
 0x899   : > { %18831 = vmatpush3.bf16.msra.mxu0 %v18830_v63  ;;  %v15616_v63 = vld [vmem:[%s19537_s7 + $0x718] sm:$0xff] }
 0x89a   : > { %18863 = vmatpush3.bf16.msra.mxu1 %v18862_v0  ;;  %18833 = vmatprep.subr.bf16.mxu0 %v18832_v24  ;;  %v15601_v0 = vld [vmem:[%s19537_s7 + $0x6a0] sm:$0xff]  ;;  %v15602_v24 = vld [vmem:[%s19537_s7 + $0x6a8] sm:$0xff]  ;;  %v18914_v37 = vpack.c.bf16 %v15616_v63, %v15615_v14 }
 0x89b   : > { %18865 = vmatprep.subr.bf16.mxu1 %v18864_v32  ;;  %v18884_v1 = vpack.c.bf16 %v15602_v24, %v15601_v0  ;;  %v15585_v32 = vld [vmem:[%s19537_s7 + $0x620] sm:$0xff]  ;;  %v15626_v0 = vld [vmem:[%s19537_s7 + $0x768] sm:$0xff]  ;;  %v15611_v24 = vld [vmem:[%s19537_s7 + $0x6f0] sm:$0xff] }
 0x89c   : > { %v18886_v50 = vpack.c.bf16 %v15586_v30, %v15585_v32  ;;  %v15593_v14 = vld [vmem:[%s19537_s7 + $0x660] sm:$0xff]  ;;  %v18904_v32 = vpack.c.bf16 %v15612_v41, %v15611_v24  ;;  %v15595_v30 = vld [vmem:[%s19537_s7 + $0x670] sm:$0xff] }
 0x89d   : > { %18835 = vmatpush3.bf16.msra.mxu0 %v18834_v8  ;;  %v15604_v8 = vld [vmem:[%s19537_s7 + $0x6b8] sm:$0xff]  ;;  %v15388_v41 = vld [vmem:[#allocation2] sm:$0xff] }
 0x89e   : > { %18867 = vmatpush3.bf16.msra.mxu1 %v18866_v10  ;;  %18837 = vmatprep.subr.bf16.mxu0 %v18836_v11  ;;  %v15635_v10 = vld [vmem:[%s19537_s7 + $0x7b0] sm:$0xff]  ;;  %v15636_v11 = vld [vmem:[%s19537_s7 + $0x7b8] sm:$0xff]  ;;  %v18888_v12 = vpack.c.bf16 %v15604_v8, %v15603_v4  ;;  %v18906_v8 = vpack.c.bf16 %v15596_v5, %v15595_v30 }
 0x89f   : > { %18869 = vmatprep.subr.bf16.mxu1 %v18868_v15  ;;  %v15587_v15 = vld [vmem:[%s19537_s7 + $0x630] sm:$0xff]  ;;  %v18920_v21 = vpack.c.bf16 %v15636_v11, %v15635_v10  ;;  %v15628_v4 = vld [vmem:[%s19537_s7 + $0x778] sm:$0xff]  ;;  %v19271_v11 = vld [vmem:[%s19527_s12 + $0x8] sm:$0xff] }
 0x8a0   : > { %v18890_v33 = vpack.c.bf16 %v15588_v34, %v15587_v15  ;;  %v18938_v10 = vpack.c.bf16 %v15628_v4, %v15627_v3  ;;  %v2435_v15 = vrot.slane %v19271_v11, %v2402_v17 }
 0x8a1   : > { %18839 = vmatpush3.bf16.msra.mxu0 %v18838_v27  ;;  %v15606_v27 = vld [vmem:[%s19537_s7 + $0x6c8] sm:$0xff] }
 0x8a2   : > { %18871 = vmatpush3.bf16.msra.mxu1 %v18870_v45  ;;  %18841 = vmatprep.subr.bf16.mxu0 %v18840_v29  ;;  %v15637_v45 = vld [vmem:[%s19537_s7 + $0x7c0] sm:$0xff]  ;;  %v15638_v29 = vld [vmem:[%s19537_s7 + $0x7c8] sm:$0xff]  ;;  %v18892_v54 = vpack.c.bf16 %v15606_v27, %v15605_v60 }
 0x8a3   : > { %18873 = vmatprep.subr.bf16.mxu1 %v18872_v40  ;;  %v15589_v40 = vld [vmem:[%s19537_s7 + $0x640] sm:$0xff]  ;;  %v18924_v2 = vpack.c.bf16 %v15638_v29, %v15637_v45 }
 0x8a4   : > { %v18894_v26 = vpack.c.bf16 %v15590_v36, %v15589_v40 }
 0x8a5   : > { %18843 = vmatpush3.bf16.msra.mxu0 %v18842_v31  ;;  %v15608_v31 = vld [vmem:[%s19537_s7 + $0x6d8] sm:$0xff] }
 0x8a6   : > { %18875 = vmatpush3.bf16.msra.mxu1 %v18874_v43  ;;  %18877 = vmatprep.subr.bf16.mxu0 %v18876_v44  ;;  %v15639_v43 = vld [vmem:[%s19537_s7 + $0x7d0] sm:$0xff]  ;;  %v15640_v44 = vld [vmem:[%s19537_s7 + $0x7d8] sm:$0xff]  ;;  %v18896_v28 = vpack.c.bf16 %v15608_v31, %v15607_v42 }
 0x8a7   : > { %18909 = vmatprep.subr.bf16.mxu1 %v18908_v59  ;;  %v15591_v59 = vld [vmem:[%s19537_s7 + $0x650] sm:$0xff]  ;;  %v18928_v51 = vpack.c.bf16 %v15640_v44, %v15639_v43 }
 0x8a8   : > { %15990 = vmatmul.mubr.f32.vlgmr.msra.gmra.mrb[20].mxu0 %v15380_v25  ;;  %v15641_v25 = vld [vmem:[%s19537_s7 + $0x7e0] sm:$0xff] }
 0x8a9   : > { %16060 = vmatmul.mubr.f32.vlgmr.msra.gmra.mrb[20].mxu1 %v15382_v57  ;;  %18879 = vmatpush3.bf16.msra.mxu0 %v18878_v9  ;;  %v15610_v9 = vld [vmem:[%s19537_s7 + $0x6e8] sm:$0xff] }
 0x8aa   : > { %18911 = vmatpush3.bf16.msra.mxu1 %v18910_v38  ;;  %18881 = vmatprep.subr.bf16.mxu0 %v18880_v23  ;;  %v15642_v38 = vld [vmem:[%s19537_s7 + $0x7e8] sm:$0xff]  ;;  %v18898_v23 = vpack.c.bf16 %v15592_v49, %v15591_v59  ;;  %v18900_v13 = vpack.c.bf16 %v15610_v9, %v15609_v55 }
 0x8ab   : > { %18913 = vmatprep.subr.bf16.mxu1 %v18912_v61  ;;  %v15594_v57 = vld [vmem:[%s19537_s7 + $0x668] sm:$0xff]  ;;  %v15625_v61 = vld [vmem:[%s19537_s7 + $0x760] sm:$0xff]  ;;  %v18932_v63 = vpack.c.bf16 %v15642_v38, %v15641_v25 }
 0x8ad   : > { %18883 = vmatpush3.bf16.msra.mxu0 %v18882_v62  ;;  %v15644_v62 = vld [vmem:[%s19537_s7 + $0x7f8] sm:$0xff] }
 0x8ae   : > { %18915 = vmatpush3.bf16.msra.mxu1 %v18914_v37  ;;  %18885 = vmatprep.subr.bf16.mxu0 %v18884_v1  ;;  %v18902_v37 = vpack.c.bf16 %v15594_v57, %v15593_v14  ;;  %v18934_v1 = vpack.c.bf16 %v15626_v0, %v15625_v61 }
 0x8af   : > { %18917 = vmatprep.subr.bf16.mxu1 %v18916_v22  ;;  %v18936_v22 = vpack.c.bf16 %v15644_v62, %v15643_v58 }
 0x8b1   : > { %18887 = vmatpush3.bf16.msra.mxu0 %v18886_v50  ;;  %v2423_v50 = vrot.slane %v19271_v11, %v2390_v19 }
 0x8b2   : > { %18919 = vmatpush3.bf16.msra.mxu1 %v18918_v7  ;;  %18889 = vmatprep.subr.bf16.mxu0 %v18888_v12  ;;  %v2431_v7 = vrot.slane %v19271_v11, %v2398_v16  ;;  %v2427_v12 = vrot.slane %v19271_v11, %v2394_v35 }
 0x8b3   : > { %18921 = vmatprep.subr.bf16.mxu1 %v18920_v21 }
 0x8b5   : > { %18891 = vmatpush3.bf16.msra.mxu0 %v18890_v33 }
 0x8b6   : > { %18923 = vmatpush3.bf16.msra.mxu1 %v18922_v52  ;;  %18893 = vmatprep.subr.bf16.mxu0 %v18892_v54 }
 0x8b7   : > { %18925 = vmatprep.subr.bf16.mxu1 %v18924_v2 }
 0x8b9   : > { %18895 = vmatpush3.bf16.msra.mxu0 %v18894_v26 }
 0x8ba   : > { %18927 = vmatpush3.bf16.msra.mxu1 %v18926_v48  ;;  %18897 = vmatprep.subr.bf16.mxu0 %v18896_v28 }
 0x8bb   : > { %18929 = vmatprep.subr.bf16.mxu1 %v18928_v51 }
 0x8bd   : > { %18899 = vmatpush3.bf16.msra.mxu0 %v18898_v23 }
 0x8be   : > { %18931 = vmatpush3.bf16.msra.mxu1 %v18930_v46  ;;  %18901 = vmatprep.subr.bf16.mxu0 %v18900_v13 }
 0x8bf   : > { %18933 = vmatprep.subr.bf16.mxu1 %v18932_v63 }
 0x8c1   : > { %18903 = vmatpush3.bf16.msra.mxu0 %v18902_v37 }
 0x8c2   : > { %18935 = vmatpush3.bf16.msra.mxu1 %v18934_v1  ;;  %18905 = vmatprep.subr.bf16.mxu0 %v18904_v32 }
 0x8c3   : > { %18937 = vmatprep.subr.bf16.mxu1 %v18936_v22 }
 0x8c5   : > { %18907 = vmatpush3.bf16.msra.mxu0 %v18906_v8 }
 0x8c6   : > { %18939 = vmatpush3.bf16.msra.mxu1 %v18938_v10 }
 0x91b   : > { %v15037_v34 = vpop.f32.mrb[12].mxu0  ;;  %v15365_v21 = vpop.f32.mrb[12].mxu1 }
 0x91c   : > { %v18952_v18 = vadd.f32 %v15037_v34, %v2423_v50  ;;  %v15039_v56 = vpop.f32.mrb[13].mxu0  ;;  %v18954_v60 = vadd.f32 %v15365_v21, %v2431_v7  ;;  %v15367_v45 = vpop.f32.mrb[13].mxu1 }
 0x91d   : > { %v18953_v27 = vadd.f32 %v15039_v56, %v2427_v12  ;;  %v15041_v29 = vpop.f32.mrb[14].mxu0  ;;  %v18955_v33 = vadd.f32 %v15367_v45, %v2435_v15  ;;  %v15369_v52 = vpop.f32.mrb[14].mxu1 }
 0x91e   : > { %v15042_v19 = vpop.f32.mrb[15].mxu0  ;;  %v15370_v40 = vpop.f32.mrb[15].mxu1  ;;  %v15384_v16 = vmax.f32 %v18952_v18, 0.0  ;;  %v15386_v47 = vmax.f32 %v18954_v60, 0.0 }
 0x91f   : > { %v15385_v54 = vmax.f32 %v18953_v27, 0.0  ;;  %v15387_v36 = vmax.f32 %v18955_v33, 0.0 }
 0x921   : > { %16129 = vmatprep.mubr.f32.mxu0 %v15385_v54  ;;  %16199 = vmatprep.mubr.f32.mxu1 %v15387_v36 }
 0x922   : > { %16130 = vmatmul.mubr.f32.vlgmr.msra.gmra.mrb[22].mxu0 %v15384_v16  ;;  %16200 = vmatmul.mubr.f32.vlgmr.msra.gmra.mrb[22].mxu1 %v15386_v47 }
 0x93b   : > { %v18436_v20 = vpop.f32.mrb[16].mxu0 }
 0x93c   : > { %v18471_v35 = vpop.f32.mrb[16].mxu1  ;;  %v18437_v17 = vpop.f32.mrb[17].mxu0 }
 0x93d   : > { %v18438_v2 = vadd.f32 %v18437_v17, %v18436_v20  ;;  %v18472_v39 = vpop.f32.mrb[17].mxu1 }
 0x93e   : > { %v18473_v42 = vadd.f32 %v18472_v39, %v18471_v35 }
 0x940   : > { %v15782_v31 = vadd.f32 %v18473_v42, %v18438_v2 }
 0x95b   : > { %v18506_v43 = vpop.f32.mrb[18].mxu0 }
 0x95c   : > { %v18541_v44 = vpop.f32.mrb[18].mxu1  ;;  %v18507_v26 = vpop.f32.mrb[19].mxu0 }
 0x95d   : > { %v18508_v48 = vadd.f32 %v18507_v26, %v18506_v43  ;;  %v18542_v28 = vpop.f32.mrb[19].mxu1 }
 0x95e   : > { %v18543_v59 = vadd.f32 %v18542_v28, %v18541_v44 }
 0x95f   : > { %v15852_v49 = vadd.f32 %v18508_v48, %v15782_v31 }
 0x961   : > { %v15922_v6 = vadd.f32 %v18543_v59, %v15852_v49 }
 0x97b   : > { %v18576_v51 = vpop.f32.mrb[20].mxu0 }
 0x97c   : > { %v18611_v53 = vpop.f32.mrb[20].mxu1  ;;  %v18577_v55 = vpop.f32.mrb[21].mxu0 }
 0x97d   : > { %v18578_v9 = vadd.f32 %v18577_v55, %v18576_v51  ;;  %v18612_v25 = vpop.f32.mrb[21].mxu1 }
 0x97e   : > { %v18613_v38 = vadd.f32 %v18612_v25, %v18611_v53 }
 0x97f   : > { %v15992_v23 = vadd.f32 %v18578_v9, %v15922_v6 }
 0x981   : > { %v16062_v46 = vadd.f32 %v18613_v38, %v15992_v23 }
 0x9f5   : > { %v18646_v13 = vpop.f32.mrb[22].mxu0  ;;  %v18681_v14 = vpop.f32.mrb[22].mxu1 }
 0x9f6   : > { %v18647_v57 = vpop.f32.mrb[23].mxu0  ;;  %v18682_v63 = vpop.f32.mrb[23].mxu1 }
 0x9f7   : > { %v18648_v61 = vadd.f32 %v18647_v57, %v18646_v13  ;;  %v18683_v0 = vadd.f32 %v18682_v63, %v18681_v14 }
 0x9f9   : > { %v16132_v24 = vadd.f32 %v18648_v61, %v16062_v46  ;;  %16211 = sbr.rel (%p18400_p8) target bundleno = 2568 (0xa08), region = 48 }
 0x9fb   : > { %v16202_v58 = vadd.f32 %v18683_v0, %v16132_v24 }
 0x9fd   : > { %v16205_v62 = vadd.f32 %v16202_v58, %v15388_v41 }
 0x9ff   : > { %16207 = vst.msk [vmem:[#allocation2] sm:$0xff] %vm16206_vm1, %v16205_v62 }
 0xa06   : > { %v16212_v37 = vld [vmem:[#allocation2] sm:$0xff] }
 0xa07   : > { %16213 = vst.msk [vmem:[%s19532_s29] sm:$0xff] %vm16206_vm1, %v16212_v37 }
 0xa08 PF: > { %s17_s22 = sadd.s32 1, %s19368_s22   ;;  %s22202_s15 = smov %s19344_s16 }
 0xa09   : > { %p14_p9 = scmp.ge.s32.totalorder %s17_s22, 10   ;;  %s22203_s16 = smov %s19348_s17 }
 0xa0a   : > { %s22204_s17 = smov %s19466_s11  ;;  %s22205_s18 = smov %s19360_s20 }
 0xa0b   : > { %s22206_s19 = smov %s19364_s21  ;;  %s22207_s20 = smov %s22210_s24 }
 0xa0c   : > { %s22208_s21 = smov %s22214_s25  ;;  %16 = sbr.rel (!%p14_p9) target bundleno = 5 (0x5), region = 90 }
 0xa13   :  { %16233 = vsyncpa [#allocation4], 1 }
 0xa14   :  { %16235 = vsyncpa [#allocation4 + $0x1], 1 }

</bundles_post_ra>
